<compile_context>
chip_gen: v7x
topology: tpu7x:2x2x1
jax: 0.10.0
libtpu: 0.0.40
codegen_flags: <defaults>
</compile_context>

<pallas_src>
import jax
import jax.numpy as jnp
from jax.experimental import pallas as pl
from jax.experimental.pallas import tpu as pltpu

GLOBAL_FEATS = 1512 - 512  # = 1000, implied by mlp2 input channels


def sdf_global_decoder_kernel(
    x_ref, g_ref,
    w1a_ref, b1a_ref, w1b_ref, b1b_ref, w1c_ref, b1c_ref,
    w2ax_ref, w2ag_ref, b2a_ref, w2b_ref, b2b_ref,
    w3_ref, b3_ref,
    out_ref,
):
    f32 = jnp.float32
    bf16 = jnp.bfloat16

    x = x_ref[...]                                                   # (tm, 3)  f32
    w1a = w1a_ref[...]                                               # (3, 64)  f32

    # Layer 0 (3 -> 64): K=3 on the MXU costs a full 128/256-deep pass for ~40x
    # its real FLOPs, so do it as three VPU broadcast multiply-adds instead.
    h = (x[:, 0:1] * w1a[0:1, :]
         + x[:, 1:2] * w1a[1:2, :]
         + x[:, 2:3] * w1a[2:3, :]
         + b1a_ref[...])
    h = jnp.maximum(h, 0.0)

    # mlp1 rest: 64 -> 256 -> 512, bf16 on the MXU, f32 accumulation.
    h = jnp.maximum(
        jnp.dot(h.astype(bf16), w1b_ref[...], preferred_element_type=f32) + b1b_ref[...], 0.0)
    h = jnp.maximum(
        jnp.dot(h.astype(bf16), w1c_ref[...], preferred_element_type=f32) + b1c_ref[...], 0.0)

    # mlp2 layer 1 on concat([h, g]) along channels:
    #   concat(h, g) @ W  ==  h @ W[:512] + g @ W[512:]
    # (weight pre-split in the wrapper; avoids an in-kernel concat across the
    #  512/1000 lane boundary).  g arrives f32 from HBM and is cast to bf16
    #  here -> no materialized cast pass over HBM in the wrapper.
    g = g_ref[...].astype(bf16)                                      # (tm, 1000)
    h = (jnp.dot(h.astype(bf16), w2ax_ref[...], preferred_element_type=f32)
         + jnp.dot(g, w2ag_ref[...], preferred_element_type=f32)
         + b2a_ref[...])
    h = jnp.maximum(h, 0.0)

    # mlp2 layer 2: 512 -> 256, bf16, ReLU.
    h = jnp.maximum(
        jnp.dot(h.astype(bf16), w2b_ref[...], preferred_element_type=f32) + b2b_ref[...], 0.0)

    # mlp3: 256 -> out_pad (128 lanes, zero-padded past out_features), no activation.
    out = jnp.dot(h.astype(bf16), w3_ref[...], preferred_element_type=f32) + b3_ref[...]
    out_ref[...] = out.astype(out_ref.dtype)                         # bf16 writeback


def init_params(key, out_features):
    """Deterministic synthetic params. Weights stored as (in_ch, out_ch)."""
    dims = {
        "1a": (3, 64), "1b": (64, 256), "1c": (256, 512),
        "2a": (1512, 512), "2b": (512, 256),
        "3": (256, out_features),
    }
    params = {}
    for name, (cin, cout) in dims.items():
        key, kw, kb = jax.random.split(key, 3)
        bound = 1.0 / jnp.sqrt(cin)
        params["w" + name] = jax.random.uniform(kw, (cin, cout), jnp.float32, -bound, bound)
        params["b" + name] = jax.random.uniform(kb, (1, cout), jnp.float32, -bound, bound)
    return params


def sdf_global_decoder(query_points, global_features, params, *, tile_m=512):
    B, N, _ = query_points.shape
    G = global_features.shape[-1]
    M = B * N
    out_features = params["w3"].shape[1]
    out_pad = pl.cdiv(out_features, 128) * 128            # lane-dense output width

    f32, bf16 = jnp.float32, jnp.bfloat16

    # Arbitrary M handled with a cdiv grid and a ragged last tile: rows are
    # independent, OOB tail reads are garbage and OOB writes are dropped, and
    # the wrapper slices [:M].  No jnp.pad copy of the (M, 1000) tensor.
    tile_m = max(64, min(tile_m, pl.cdiv(M, 64) * 64))     # keep small-M cases sane
    grid_m = pl.cdiv(M, tile_m)

    # Contiguous reshapes only (no HBM copy).  g stays f32 in HBM.
    x = query_points.reshape(M, 3).astype(f32)
    g = global_features.reshape(M, G).astype(f32)

    # Split mlp2's first weight by input channel: rows [0:512] multiply the
    # mlp1 output, rows [512:1512] multiply the global features.
    w2ax = params["w2a"][:512].astype(bf16)
    w2ag = params["w2a"][512:].astype(bf16)

    # Zero-pad the final layer to 128 output lanes -> unmasked lane-dense stores.
    w3p = jnp.pad(params["w3"], ((0, 0), (0, out_pad - out_features))).astype(bf16)
    b3p = jnp.pad(params["b3"], ((0, 0), (0, out_pad - out_features))).astype(f32)

    weights = [
        params["w1a"].astype(f32), params["b1a"].astype(f32),   # VPU layer stays f32
        params["w1b"].astype(bf16), params["b1b"].astype(f32),
        params["w1c"].astype(bf16), params["b1c"].astype(f32),
        w2ax, w2ag, params["b2a"].astype(f32),
        params["w2b"].astype(bf16), params["b2b"].astype(f32),
        w3p, b3p,
    ]

    def full_spec(arr):
        # whole (small) parameter resident in VMEM for every grid step
        return pl.BlockSpec(arr.shape, lambda i: (0, 0))

    in_specs = [
        pl.BlockSpec((tile_m, 3), lambda i: (i, 0)),   # query points tile (f32)
        pl.BlockSpec((tile_m, G), lambda i: (i, 0)),   # global features tile (f32)
    ] + [full_spec(w) for w in weights]

    # Advisory cost estimate for the XLA scheduler around the custom call.
    flops = 2 * grid_m * tile_m * (
        3 * 64 + 64 * 256 + 256 * 512 + 512 * 512 + G * 512 + 512 * 256 + 256 * out_pad)
    weight_bytes = sum(int(w.size) * w.dtype.itemsize for w in weights)
    bytes_accessed = M * (3 * 4 + G * 4 + out_pad * 2) + weight_bytes
    cost = pl.CostEstimate(flops=flops, transcendentals=0, bytes_accessed=bytes_accessed)

    out = pl.pallas_call(
        sdf_global_decoder_kernel,
        out_shape=jax.ShapeDtypeStruct((M, out_pad), bf16),
        grid_spec=pltpu.PrefetchScalarGridSpec(
            num_scalar_prefetch=0,
            grid=(grid_m,),
            in_specs=in_specs,
            out_specs=pl.BlockSpec((tile_m, out_pad), lambda i: (i, 0)),
        ),
        compiler_params=pltpu.CompilerParams(
            dimension_semantics=("parallel",),        # megacore shards the row grid on v7x
            vmem_limit_bytes=48 * 1024 * 1024,        # > v5e 16 MiB default, < v7x 64 MiB physical
        ),
        cost_estimate=cost,
    )(x, g, *weights)

    return out[:M, :out_features].astype(f32).reshape(B, N, out_features)


def sdf_global_decoder_ref(query_points, global_features, params):
    """Pure-JAX f32 reference mirroring the PyTorch forward pass."""
    B, N, _ = query_points.shape
    x = query_points.reshape(B * N, 3)
    g = global_features.reshape(B * N, -1)
    relu = lambda t: jnp.maximum(t, 0.0)
    h = relu(x @ params["w1a"] + params["b1a"])
    h = relu(h @ params["w1b"] + params["b1b"])
    h = relu(h @ params["w1c"] + params["b1c"])
    h = jnp.concatenate([h, g], axis=-1)          # (B*N, 1512)
    h = relu(h @ params["w2a"] + params["b2a"])
    h = relu(h @ params["w2b"] + params["b2b"])
    h = h @ params["w3"] + params["b3"]
    return h.reshape(B, N, -1)


if __name__ == "__main__":
    # Multi-tile test: M = 2048 rows -> 4 grid steps at tile_m=512, so the
    # pipeline path and the v7x megacore split are both exercised.
    B, N, OUT = 2, 1024, 1
    key = jax.random.PRNGKey(0)
    kq, kg, kp = jax.random.split(key, 3)

    query_points = jax.random.normal(kq, (B, N, 3), jnp.float32)
    # NOTE: despite the docstring, the PyTorch code permutes global_features
    # with 3 dims, so it is per-point: (B, N, 1000) with 1512 - 512 = 1000.
    global_features = jax.random.normal(kg, (B, N, GLOBAL_FEATS), jnp.float32)
    params = init_params(kp, OUT)

    fn = jax.jit(sdf_global_decoder)
    out = jax.block_until_ready(fn(query_points, global_features, params))

    ref = sdf_global_decoder_ref(query_points, global_features, params)
    assert out.shape == (B, N, OUT), out.shape
    # bf16 matmul inputs (f32 accumulation) over the 1512-deep contraction plus
    # a bf16 output writeback => loosened tolerance vs. the pure-f32 reference.
    assert jnp.allclose(out, ref, atol=5e-2, rtol=5e-2), (
        float(jnp.max(jnp.abs(out - ref))))

    print("KERNEL_OK")
</pallas_src>

<mosaic_0001>
module attributes {stable_mosaic.version = 11 : i64} {
  func.func @sdf_global_decoder_kernel(%arg0: i32, %arg1: memref<512x3xf32, #tpu.memory_space<vmem>>, %arg2: memref<512x1000xf32, #tpu.memory_space<vmem>>, %arg3: memref<3x64xf32, #tpu.memory_space<vmem>>, %arg4: memref<1x64xf32, #tpu.memory_space<vmem>>, %arg5: memref<64x256xbf16, #tpu.memory_space<vmem>>, %arg6: memref<1x256xf32, #tpu.memory_space<vmem>>, %arg7: memref<256x512xbf16, #tpu.memory_space<vmem>>, %arg8: memref<1x512xf32, #tpu.memory_space<vmem>>, %arg9: memref<512x512xbf16, #tpu.memory_space<vmem>>, %arg10: memref<1000x512xbf16, #tpu.memory_space<vmem>>, %arg11: memref<1x512xf32, #tpu.memory_space<vmem>>, %arg12: memref<512x256xbf16, #tpu.memory_space<vmem>>, %arg13: memref<1x256xf32, #tpu.memory_space<vmem>>, %arg14: memref<256x128xbf16, #tpu.memory_space<vmem>>, %arg15: memref<1x128xf32, #tpu.memory_space<vmem>>, %arg16: memref<512x128xbf16, #tpu.memory_space<vmem>>) attributes {dimension_semantics = [#tpu.dimension_semantics<parallel>], iteration_bounds = array<i64: 4>, scalar_prefetch = 0 : i64, scratch_operands = 0 : i64, tpu.core_type = #tpu.core_type<tc>, window_params = [{transform_indices = @transform_0, window_bounds = array<i64: 512, 3>}, {transform_indices = @transform_1, window_bounds = array<i64: 512, 1000>}, {pipeline_mode = #tpu.pipeline_mode<synchronous>, transform_indices = @transform_2, window_bounds = array<i64: 3, 64>}, {pipeline_mode = #tpu.pipeline_mode<synchronous>, transform_indices = @transform_3, window_bounds = array<i64: 1, 64>}, {pipeline_mode = #tpu.pipeline_mode<synchronous>, transform_indices = @transform_4, window_bounds = array<i64: 64, 256>}, {pipeline_mode = #tpu.pipeline_mode<synchronous>, transform_indices = @transform_5, window_bounds = array<i64: 1, 256>}, {pipeline_mode = #tpu.pipeline_mode<synchronous>, transform_indices = @transform_6, window_bounds = array<i64: 256, 512>}, {pipeline_mode = #tpu.pipeline_mode<synchronous>, transform_indices = @transform_7, window_bounds = array<i64: 1, 512>}, {pipeline_mode = #tpu.pipeline_mode<synchronous>, transform_indices = @transform_8, window_bounds = array<i64: 512, 512>}, {pipeline_mode = #tpu.pipeline_mode<synchronous>, transform_indices = @transform_9, window_bounds = array<i64: 1000, 512>}, {pipeline_mode = #tpu.pipeline_mode<synchronous>, transform_indices = @transform_10, window_bounds = array<i64: 1, 512>}, {pipeline_mode = #tpu.pipeline_mode<synchronous>, transform_indices = @transform_11, window_bounds = array<i64: 512, 256>}, {pipeline_mode = #tpu.pipeline_mode<synchronous>, transform_indices = @transform_12, window_bounds = array<i64: 1, 256>}, {pipeline_mode = #tpu.pipeline_mode<synchronous>, transform_indices = @transform_13, window_bounds = array<i64: 256, 128>}, {pipeline_mode = #tpu.pipeline_mode<synchronous>, transform_indices = @transform_14, window_bounds = array<i64: 1, 128>}, {transform_indices = @transform_15, window_bounds = array<i64: 512, 128>}]} {
    %c0 = arith.constant 0 : index
    %c0_0 = arith.constant 0 : index
    %0 = vector.load %arg1[%c0, %c0_0] : memref<512x3xf32, #tpu.memory_space<vmem>>, vector<512x3xf32>
    %c0_1 = arith.constant 0 : index
    %c0_2 = arith.constant 0 : index
    %1 = vector.load %arg3[%c0_1, %c0_2] : memref<3x64xf32, #tpu.memory_space<vmem>>, vector<3x64xf32>
    %2 = vector.extract_strided_slice %0 {offsets = [0, 0], sizes = [512, 1], strides = [1, 1]} : vector<512x3xf32> to vector<512x1xf32>
    %3 = vector.extract_strided_slice %1 {offsets = [0, 0], sizes = [1, 64], strides = [1, 1]} : vector<3x64xf32> to vector<1x64xf32>
    %4 = vector.broadcast %2 : vector<512x1xf32> to vector<512x64xf32>
    %5 = vector.broadcast %3 : vector<1x64xf32> to vector<512x64xf32>
    %6 = arith.mulf %4, %5 : vector<512x64xf32>
    %7 = vector.extract_strided_slice %0 {offsets = [0, 1], sizes = [512, 1], strides = [1, 1]} : vector<512x3xf32> to vector<512x1xf32>
    %8 = vector.extract_strided_slice %1 {offsets = [1, 0], sizes = [1, 64], strides = [1, 1]} : vector<3x64xf32> to vector<1x64xf32>
    %9 = vector.broadcast %7 : vector<512x1xf32> to vector<512x64xf32>
    %10 = vector.broadcast %8 : vector<1x64xf32> to vector<512x64xf32>
    %11 = arith.mulf %9, %10 : vector<512x64xf32>
    %12 = arith.addf %6, %11 : vector<512x64xf32>
    %13 = vector.extract_strided_slice %0 {offsets = [0, 2], sizes = [512, 1], strides = [1, 1]} : vector<512x3xf32> to vector<512x1xf32>
    %14 = vector.extract_strided_slice %1 {offsets = [2, 0], sizes = [1, 64], strides = [1, 1]} : vector<3x64xf32> to vector<1x64xf32>
    %15 = vector.broadcast %13 : vector<512x1xf32> to vector<512x64xf32>
    %16 = vector.broadcast %14 : vector<1x64xf32> to vector<512x64xf32>
    %17 = arith.mulf %15, %16 : vector<512x64xf32>
    %18 = arith.addf %12, %17 : vector<512x64xf32>
    %c0_3 = arith.constant 0 : index
    %c0_4 = arith.constant 0 : index
    %19 = vector.load %arg4[%c0_3, %c0_4] : memref<1x64xf32, #tpu.memory_space<vmem>>, vector<1x64xf32>
    %20 = vector.broadcast %19 : vector<1x64xf32> to vector<512x64xf32>
    %21 = arith.addf %18, %20 : vector<512x64xf32>
    %cst = arith.constant 0.000000e+00 : f32
    %22 = vector.broadcast %cst : f32 to vector<512x64xf32>
    %23 = arith.maximumf %21, %22 : vector<512x64xf32>
    %24 = arith.truncf %23 : vector<512x64xf32> to vector<512x64xbf16>
    %c0_5 = arith.constant 0 : index
    %c0_6 = arith.constant 0 : index
    %25 = vector.load %arg5[%c0_5, %c0_6] : memref<64x256xbf16, #tpu.memory_space<vmem>>, vector<64x256xbf16>
    %cst_7 = arith.constant dense<0.000000e+00> : vector<512x256xf32>
    %26 = tpu.matmul %24, %25, %cst_7 {dimension_numbers = #tpu.dot_dimension_numbers<[1], [0], [0], [1], [0, 0, 1, 1], [], []>} : vector<512x64xbf16>, vector<64x256xbf16>, vector<512x256xf32> -> vector<512x256xf32>
    %c0_8 = arith.constant 0 : index
    %c0_9 = arith.constant 0 : index
    %27 = vector.load %arg6[%c0_8, %c0_9] : memref<1x256xf32, #tpu.memory_space<vmem>>, vector<1x256xf32>
    %28 = vector.broadcast %27 : vector<1x256xf32> to vector<512x256xf32>
    %29 = arith.addf %26, %28 : vector<512x256xf32>
    %cst_10 = arith.constant 0.000000e+00 : f32
    %30 = vector.broadcast %cst_10 : f32 to vector<512x256xf32>
    %31 = arith.maximumf %29, %30 : vector<512x256xf32>
    %32 = arith.truncf %31 : vector<512x256xf32> to vector<512x256xbf16>
    %c0_11 = arith.constant 0 : index
    %c0_12 = arith.constant 0 : index
    %33 = vector.load %arg7[%c0_11, %c0_12] : memref<256x512xbf16, #tpu.memory_space<vmem>>, vector<256x512xbf16>
    %cst_13 = arith.constant dense<0.000000e+00> : vector<512x512xf32>
    %34 = tpu.matmul %32, %33, %cst_13 {dimension_numbers = #tpu.dot_dimension_numbers<[1], [0], [0], [1], [0, 0, 1, 1], [], []>} : vector<512x256xbf16>, vector<256x512xbf16>, vector<512x512xf32> -> vector<512x512xf32>
    %c0_14 = arith.constant 0 : index
    %c0_15 = arith.constant 0 : index
    %35 = vector.load %arg8[%c0_14, %c0_15] : memref<1x512xf32, #tpu.memory_space<vmem>>, vector<1x512xf32>
    %36 = vector.broadcast %35 : vector<1x512xf32> to vector<512x512xf32>
    %37 = arith.addf %34, %36 : vector<512x512xf32>
    %cst_16 = arith.constant 0.000000e+00 : f32
    %38 = vector.broadcast %cst_16 : f32 to vector<512x512xf32>
    %39 = arith.maximumf %37, %38 : vector<512x512xf32>
    %c0_17 = arith.constant 0 : index
    %c0_18 = arith.constant 0 : index
    %40 = vector.load %arg2[%c0_17, %c0_18] : memref<512x1000xf32, #tpu.memory_space<vmem>>, vector<512x1000xf32>
    %41 = arith.truncf %40 : vector<512x1000xf32> to vector<512x1000xbf16>
    %42 = arith.truncf %39 : vector<512x512xf32> to vector<512x512xbf16>
    %c0_19 = arith.constant 0 : index
    %c0_20 = arith.constant 0 : index
    %43 = vector.load %arg9[%c0_19, %c0_20] : memref<512x512xbf16, #tpu.memory_space<vmem>>, vector<512x512xbf16>
    %cst_21 = arith.constant dense<0.000000e+00> : vector<512x512xf32>
    %44 = tpu.matmul %42, %43, %cst_21 {dimension_numbers = #tpu.dot_dimension_numbers<[1], [0], [0], [1], [0, 0, 1, 1], [], []>} : vector<512x512xbf16>, vector<512x512xbf16>, vector<512x512xf32> -> vector<512x512xf32>
    %c0_22 = arith.constant 0 : index
    %c0_23 = arith.constant 0 : index
    %45 = vector.load %arg10[%c0_22, %c0_23] : memref<1000x512xbf16, #tpu.memory_space<vmem>>, vector<1000x512xbf16>
    %cst_24 = arith.constant dense<0.000000e+00> : vector<512x512xf32>
    %46 = tpu.matmul %41, %45, %cst_24 {dimension_numbers = #tpu.dot_dimension_numbers<[1], [0], [0], [1], [0, 0, 1, 1], [], []>} : vector<512x1000xbf16>, vector<1000x512xbf16>, vector<512x512xf32> -> vector<512x512xf32>
    %47 = arith.addf %44, %46 : vector<512x512xf32>
    %c0_25 = arith.constant 0 : index
    %c0_26 = arith.constant 0 : index
    %48 = vector.load %arg11[%c0_25, %c0_26] : memref<1x512xf32, #tpu.memory_space<vmem>>, vector<1x512xf32>
    %49 = vector.broadcast %48 : vector<1x512xf32> to vector<512x512xf32>
    %50 = arith.addf %47, %49 : vector<512x512xf32>
    %cst_27 = arith.constant 0.000000e+00 : f32
    %51 = vector.broadcast %cst_27 : f32 to vector<512x512xf32>
    %52 = arith.maximumf %50, %51 : vector<512x512xf32>
    %53 = arith.truncf %52 : vector<512x512xf32> to vector<512x512xbf16>
    %c0_28 = arith.constant 0 : index
    %c0_29 = arith.constant 0 : index
    %54 = vector.load %arg12[%c0_28, %c0_29] : memref<512x256xbf16, #tpu.memory_space<vmem>>, vector<512x256xbf16>
    %cst_30 = arith.constant dense<0.000000e+00> : vector<512x256xf32>
    %55 = tpu.matmul %53, %54, %cst_30 {dimension_numbers = #tpu.dot_dimension_numbers<[1], [0], [0], [1], [0, 0, 1, 1], [], []>} : vector<512x512xbf16>, vector<512x256xbf16>, vector<512x256xf32> -> vector<512x256xf32>
    %c0_31 = arith.constant 0 : index
    %c0_32 = arith.constant 0 : index
    %56 = vector.load %arg13[%c0_31, %c0_32] : memref<1x256xf32, #tpu.memory_space<vmem>>, vector<1x256xf32>
    %57 = vector.broadcast %56 : vector<1x256xf32> to vector<512x256xf32>
    %58 = arith.addf %55, %57 : vector<512x256xf32>
    %cst_33 = arith.constant 0.000000e+00 : f32
    %59 = vector.broadcast %cst_33 : f32 to vector<512x256xf32>
    %60 = arith.maximumf %58, %59 : vector<512x256xf32>
    %61 = arith.truncf %60 : vector<512x256xf32> to vector<512x256xbf16>
    %c0_34 = arith.constant 0 : index
    %c0_35 = arith.constant 0 : index
    %62 = vector.load %arg14[%c0_34, %c0_35] : memref<256x128xbf16, #tpu.memory_space<vmem>>, vector<256x128xbf16>
    %cst_36 = arith.constant dense<0.000000e+00> : vector<512x128xf32>
    %63 = tpu.matmul %61, %62, %cst_36 {dimension_numbers = #tpu.dot_dimension_numbers<[1], [0], [0], [1], [0, 0, 1, 1], [], []>} : vector<512x256xbf16>, vector<256x128xbf16>, vector<512x128xf32> -> vector<512x128xf32>
    %c0_37 = arith.constant 0 : index
    %c0_38 = arith.constant 0 : index
    %64 = vector.load %arg15[%c0_37, %c0_38] : memref<1x128xf32, #tpu.memory_space<vmem>>, vector<1x128xf32>
    %65 = vector.broadcast %64 : vector<1x128xf32> to vector<512x128xf32>
    %66 = arith.addf %63, %65 : vector<512x128xf32>
    %67 = arith.truncf %66 : vector<512x128xf32> to vector<512x128xbf16>
    %c0_39 = arith.constant 0 : index
    %c0_40 = arith.constant 0 : index
    %68 = vector.load %arg16[%c0_39, %c0_40] : memref<512x128xbf16, #tpu.memory_space<vmem>>, vector<512x128xbf16>
    tpu.vector_store %arg16[%c0_39, %c0_40], %67 {strides = array<i32>} : memref<512x128xbf16, #tpu.memory_space<vmem>>, vector<512x128xbf16>,
    return
  }
  func.func @transform_0(%arg0: i32) -> (i32, i32) {
    %c0_i32 = arith.constant 0 : i32
    %c0_i32_0 = arith.constant 0 : i32
    return %arg0, %c0_i32 : i32, i32
  }
  func.func @transform_1(%arg0: i32) -> (i32, i32) {
    %c0_i32 = arith.constant 0 : i32
    %c0_i32_0 = arith.constant 0 : i32
    return %arg0, %c0_i32 : i32, i32
  }
  func.func @transform_2(%arg0: i32) -> (i32, i32) {
    %c0_i32 = arith.constant 0 : i32
    %c0_i32_0 = arith.constant 0 : i32
    %c0_i32_1 = arith.constant 0 : i32
    return %c0_i32, %c0_i32_0 : i32, i32
  }
  func.func @transform_3(%arg0: i32) -> (i32, i32) {
    %c0_i32 = arith.constant 0 : i32
    %c0_i32_0 = arith.constant 0 : i32
    %c0_i32_1 = arith.constant 0 : i32
    return %c0_i32, %c0_i32_0 : i32, i32
  }
  func.func @transform_4(%arg0: i32) -> (i32, i32) {
    %c0_i32 = arith.constant 0 : i32
    %c0_i32_0 = arith.constant 0 : i32
    %c0_i32_1 = arith.constant 0 : i32
    return %c0_i32, %c0_i32_0 : i32, i32
  }
  func.func @transform_5(%arg0: i32) -> (i32, i32) {
    %c0_i32 = arith.constant 0 : i32
    %c0_i32_0 = arith.constant 0 : i32
    %c0_i32_1 = arith.constant 0 : i32
    return %c0_i32, %c0_i32_0 : i32, i32
  }
  func.func @transform_6(%arg0: i32) -> (i32, i32) {
    %c0_i32 = arith.constant 0 : i32
    %c0_i32_0 = arith.constant 0 : i32
    %c0_i32_1 = arith.constant 0 : i32
    return %c0_i32, %c0_i32_0 : i32, i32
  }
  func.func @transform_7(%arg0: i32) -> (i32, i32) {
    %c0_i32 = arith.constant 0 : i32
    %c0_i32_0 = arith.constant 0 : i32
    %c0_i32_1 = arith.constant 0 : i32
    return %c0_i32, %c0_i32_0 : i32, i32
  }
  func.func @transform_8(%arg0: i32) -> (i32, i32) {
    %c0_i32 = arith.constant 0 : i32
    %c0_i32_0 = arith.constant 0 : i32
    %c0_i32_1 = arith.constant 0 : i32
    return %c0_i32, %c0_i32_0 : i32, i32
  }
  func.func @transform_9(%arg0: i32) -> (i32, i32) {
    %c0_i32 = arith.constant 0 : i32
    %c0_i32_0 = arith.constant 0 : i32
    %c0_i32_1 = arith.constant 0 : i32
    return %c0_i32, %c0_i32_0 : i32, i32
  }
  func.func @transform_10(%arg0: i32) -> (i32, i32) {
    %c0_i32 = arith.constant 0 : i32
    %c0_i32_0 = arith.constant 0 : i32
    %c0_i32_1 = arith.constant 0 : i32
    return %c0_i32, %c0_i32_0 : i32, i32
  }
  func.func @transform_11(%arg0: i32) -> (i32, i32) {
    %c0_i32 = arith.constant 0 : i32
    %c0_i32_0 = arith.constant 0 : i32
    %c0_i32_1 = arith.constant 0 : i32
    return %c0_i32, %c0_i32_0 : i32, i32
  }
  func.func @transform_12(%arg0: i32) -> (i32, i32) {
    %c0_i32 = arith.constant 0 : i32
    %c0_i32_0 = arith.constant 0 : i32
    %c0_i32_1 = arith.constant 0 : i32
    return %c0_i32, %c0_i32_0 : i32, i32
  }
  func.func @transform_13(%arg0: i32) -> (i32, i32) {
    %c0_i32 = arith.constant 0 : i32
    %c0_i32_0 = arith.constant 0 : i32
    %c0_i32_1 = arith.constant 0 : i32
    return %c0_i32, %c0_i32_0 : i32, i32
  }
  func.func @transform_14(%arg0: i32) -> (i32, i32) {
    %c0_i32 = arith.constant 0 : i32
    %c0_i32_0 = arith.constant 0 : i32
    %c0_i32_1 = arith.constant 0 : i32
    return %c0_i32, %c0_i32_0 : i32, i32
  }
  func.func @transform_15(%arg0: i32) -> (i32, i32) {
    %c0_i32 = arith.constant 0 : i32
    %c0_i32_0 = arith.constant 0 : i32
    return %arg0, %c0_i32 : i32, i32
  }
}

</mosaic_0001>

<bundles_post_ra>
// kernel: sdf_global_decoder.1
= control target key start
LH: loop header
LB: loop body
LE: loop exit
PB: predicated region body
PF: predicated region fallthrough
CT: control target
= control target key end

     0   :  { %s17778_s18 = smov 0   ;;  %s23553_s0 = inlined_call_operand.vmem [shape: f32[2048,3], index: 0, kind: input, shape index: {}]   ;;  %s23554_s1 = inlined_call_operand.vmem [shape: f32[2048,1000], index: 1, kind: input, shape index: {}]   ;;  %s23555_s2 = inlined_call_operand.vmem [shape: f32[3,64], index: 2, kind: input, shape index: {}]   ;;  %s23556_s3 = inlined_call_operand.vmem [shape: f32[1,64], index: 3, kind: input, shape index: {}]   ;;  %s23557_s4 = inlined_call_operand.vmem [shape: bf16[64,256], index: 4, kind: input, shape index: {}]   ;;  %s23558_s5 = inlined_call_operand.vmem [shape: f32[1,256], index: 5, kind: input, shape index: {}]   ;;  %s23559_s6 = inlined_call_operand.vmem [shape: bf16[256,512], index: 6, kind: input, shape index: {}]   ;;  %s23560_s7 = inlined_call_operand.vmem [shape: f32[1,512], index: 7, kind: input, shape index: {}]   ;;  %s23561_s8 = inlined_call_operand.vmem [shape: bf16[512,512], index: 8, kind: input, shape index: {}]   ;;  %s23562_s9 = inlined_call_operand.vmem [shape: bf16[1000,512], index: 9, kind: input, shape index: {}]   ;;  %s23563_s10 = inlined_call_operand.vmem [shape: f32[1,512], index: 10, kind: input, shape index: {}]   ;;  %s23564_s11 = inlined_call_operand.vmem [shape: bf16[512,256], index: 11, kind: input, shape index: {}]   ;;  %s23565_s12 = inlined_call_operand.vmem [shape: f32[1,256], index: 12, kind: input, shape index: {}]   ;;  %s23566_s13 = inlined_call_operand.vmem [shape: bf16[256,128], index: 13, kind: input, shape index: {}]   ;;  %s23567_s14 = inlined_call_operand.vmem [shape: f32[1,128], index: 14, kind: input, shape index: {}]   ;;  %s23568_s15 = inlined_call_operand.vmem [shape: bf16[2048,128], index: 15, kind: output, shape index: {}]  }
   0x1 LB: > { %s14268_s19 = sadd.s32 4294967295, %s17693_s18   ;;  %p14272_p0 = scmp.ge.s32.totalorder %s17693_s18, 1  ;;  %s17693_s18 = sphi %s17778_s18, %s25_s18  }
   0x2   : > { %p450_p1 = scmp.lt.s32.totalorder %s17693_s18, 5 }
   0x4   : > { %p451_p2 = pnand %p14272_p0, %p450_p1 }
   0x6   : > { %454 = sbr.rel (%p451_p2) target bundleno = 3467 (0xd8b), region = 80 }
   0xd   : > { %s14273_s20 = sshll.u32 %s14268_s19, 6  ;;  %v17695_v0 = vmov 2   ;;  %v17696_v1 = vmov 1   ;;  %v23569_v2 = vmov 0   ;;  %v16885_v12 = vld [vmem:[%s23557_s4 + $0x4] ss:$8 sps:$4 sm:$0xff]   ;;  %v909_v51 = vlaneseq }
   0xe   : > { %16782 = vset.pattern.permute.xlu0 %v17695_v0  ;;  %16781 = vset.pattern.permute.xlu1 %v17696_v1  ;;  %p505_p3 = scmp.lt.s32.totalorder %s14273_s20, 255  ;;  %v16887_v13 = vld [vmem:[%s23557_s4] ss:$8 sps:$4 sm:$0xff]   ;;  %v16888_v14 = vld [vmem:[%s23557_s4 + $0x14] ss:$8 sps:$4 sm:$0xff]   ;;  %vm1980_vm0 = vcmask 523264  }
   0xf   : > { %2109 = vmatprep.mubr.bf16.mxu0 %v23569_v2  ;;  %2077 = vmatprep.subr.bf16.mxu0 %v16885_v12  ;;  %v16890_v15 = vld [vmem:[%s23557_s4 + $0x10] ss:$8 sps:$4 sm:$0xff]   ;;  %v16891_v16 = vld [vmem:[%s23557_s4 + $0x24] ss:$8 sps:$4 sm:$0xff]   ;;  %v16893_v17 = vld [vmem:[%s23557_s4 + $0x20] ss:$8 sps:$4 sm:$0xff]  }
  0x10   : > { %s23921_s20 = smov (!%p505_p3, %s14273_s20), 255  ;;  %2078 = vmatpush1.bf16.msra.mxu0 %v16887_v13  ;;  %v16894_v19 = vld [vmem:[%s23557_s4 + $0x34] ss:$8 sps:$4 sm:$0xff]   ;;  %v16896_v21 = vld [vmem:[%s23557_s4 + $0x30] ss:$8 sps:$4 sm:$0xff]   ;;  %v17933_v55 = vshrl.u32 %v909_v51, 7 }
  0x11   : > { %s14274_s21 = sshll.u32 %s23921_s20, 3  ;;  %2079 = vmatprep.subr.bf16.mxu0 %v16888_v14  ;;  %v588_v58 = vld [vmem:[%s23555_s2] sm:$0x7]  ;;  %s14978_s19 = sshll.u32 %s23921_s20, 6  ;;  %vm6611_vm1 = vcmask 1043456   ;;  %vm6514_vm2 = vcmask 850944  }
  0x12   : > { %s17795_s24 = scalar_lea.vmem %s23553_s0, %s14274_s21  ;;  %23675 = vst [vmem:[#allocation2_spill] sm:$0xff] %v17933_v55  ;;  %v17943_v59 = vsub.s32 1, %v17933_v55  ;;  %v17946_v61 = vsub.s32 2, %v17933_v55  ;;  %v17949_v62 = vsub.s32 0, %v17933_v55  ;;  %s19592_s23 = scalar_lea.vmem %s23554_s1, %s14978_s19 }
  0x13   : > { %v524_v3 = vld [vmem:[%s17795_s24] sm:$0xff]  ;;  %v526_v4 = vld [vmem:[%s17795_s24 + $0x10] sm:$0xff]  ;;  %v525_v5 = vld [vmem:[%s17795_s24 + $0x8] sm:$0xff]  ;;  %s14279_s28 = sshll.u32 %s23921_s20, 2 }
  0x14   : > { %1366 = vperm.xlu0 %16782, %v524_v3   ;;  %978 = vperm.xlu1 %16781, %v524_v3   ;;  %v528_v6 = vld [vmem:[%s17795_s24 + $0x20] sm:$0xff]  ;;  %v530_v7 = vld [vmem:[%s17795_s24 + $0x30] sm:$0xff]  ;;  %v527_v10 = vld [vmem:[%s17795_s24 + $0x18] sm:$0xff]  ;;  %23676 = vst [vmem:[#allocation3_spill] sm:$0xff] %v17943_v59  ;;  %s23439_s30 = scalar_lea.vmem %s23568_s15, %s14279_s28 }
  0x15   : > { %v17804_v8 = vld [vmem:[%s17795_s24 + $0x40] sm:$0xff]  ;;  %v17808_v9 = vld [vmem:[%s17795_s24 + $0x50] sm:$0xff]  ;;  %2080 = vmatpush1.bf16.msra.mxu0 %v16890_v15  ;;  %v529_v18 = vld [vmem:[%s17795_s24 + $0x28] sm:$0xff]  ;;  %23677 = vst [vmem:[#allocation4_spill] sm:$0xff] %v17946_v61 }
  0x16   : > { %v17814_v11 = vld [vmem:[%s17795_s24 + $0x60] sm:$0xff]  ;;  %2081 = vmatprep.subr.bf16.mxu0 %v16891_v16  ;;  %v531_v20 = vld [vmem:[%s17795_s24 + $0x38] sm:$0xff]  ;;  %v533_v22 = vld [vmem:[%s17795_s24 + $0x48] sm:$0xff]  ;;  %23678 = vst [vmem:[#allocation5_spill] sm:$0xff] %v17949_v62 }
  0x17   : > { %v535_v23 = vld [vmem:[%s17795_s24 + $0x58] sm:$0xff]  ;;  %v537_v24 = vld [vmem:[%s17795_s24 + $0x68] sm:$0xff]  ;;  %v538_v32 = vld [vmem:[%s17795_s24 + $0x70] sm:$0xff] }
  0x18   : > { %1374 = vperm.xlu0 %16782, %v526_v4   ;;  %982 = vperm.xlu1 %16781, %v525_v5   ;;  %v17855_v25 = vld [vmem:[%s17795_s24 + $0x78] sm:$0xff]  ;;  %v17858_v26 = vld [vmem:[%s17795_s24 + $0x88] sm:$0xff]  ;;  %v17881_v33 = vld [vmem:[%s17795_s24 + $0x80] sm:$0xff] }
  0x19   : > { %2082 = vmatpush1.bf16.msra.mxu0 %v16893_v17  ;;  %v17862_v27 = vld [vmem:[%s17795_s24 + $0x98] sm:$0xff]  ;;  %v545_v28 = vld [vmem:[%s17795_s24 + $0xa8] sm:$0xff]  ;;  %v17887_v34 = vld [vmem:[%s17795_s24 + $0x90] sm:$0xff] }
  0x1a   : > { %2083 = vmatprep.subr.bf16.mxu0 %v16894_v19  ;;  %v547_v29 = vld [vmem:[%s17795_s24 + $0xb8] sm:$0xff]  ;;  %v549_v30 = vld [vmem:[%s17795_s24 + $0xc8] sm:$0xff]  ;;  %v17891_v35 = vld [vmem:[%s17795_s24 + $0xa0] sm:$0xff] }
  0x1b   : > { %v551_v31 = vld [vmem:[%s17795_s24 + $0xd8] sm:$0xff]  ;;  %v17896_v36 = vld [vmem:[%s17795_s24 + $0xb0] sm:$0xff]  ;;  %v17900_v37 = vld [vmem:[%s17795_s24 + $0xc0] sm:$0xff] }
  0x1c   : > { %1382 = vperm.xlu0 %16782, %v528_v6   ;;  %16783 = vset.pattern.permute.xlu1 %v17695_v0  ;;  %v17907_v38 = vld [vmem:[%s17795_s24 + $0xd0] sm:$0xff]  ;;  %v552_v39 = vld [vmem:[%s17795_s24 + $0xe0] sm:$0xff]  ;;  %v17927_v53 = vld [vmem:[%s17795_s24 + $0xe8] sm:$0xff] }
  0x1d   : > { %1370 = vperm.xlu1 %16783, %v525_v5   ;;  %2084 = vmatpush1.bf16.msra.mxu0 %v16896_v21  ;;  %v554_v40 = vld [vmem:[%s17795_s24 + $0xf0] sm:$0xff]  ;;  %v556_v43 = vld [vmem:[%s17795_s24 + $0x100] sm:$0xff]  ;;  %v17971_v15 = vld [vmem:[%s17795_s24 + $0xf8] sm:$0xff] }
  0x1e   : > { %v558_v46 = vld [vmem:[%s17795_s24 + $0x110] sm:$0xff]  ;;  %v560_v49 = vld [vmem:[%s17795_s24 + $0x120] sm:$0xff] }
  0x20   : > { %1390 = vperm.xlu0 %16782, %v530_v7  }
  0x21   : > { %16784 = vset.pattern.permute.xlu1 %v23569_v2 }
  0x22   : > { %601 = vperm.xlu1 %16784, %v526_v4  }
  0x24   : > { %1398 = vperm.xlu0 %16782, %v17804_v8  }
  0x26   : > { %16785 = vset.pattern.permute.xlu1 %v17696_v1 }
  0x27   : > { %986 = vperm.xlu1 %16785, %v526_v4   ;;  %v17959_v4 = vrot.slane %v588_v58, %v17946_v61 }
  0x28   : > { %1406 = vperm.xlu0 %16782, %v17808_v9  }
  0x2b   : > { %990 = vperm.xlu1 %16785, %v527_v10  }
  0x2c   : > { %1414 = vperm.xlu0 %16782, %v17814_v11  }
  0x2f   : > { %16786 = vset.pattern.permute.xlu1 %v17695_v0 }
  0x30   : > { %16801 = vset.pattern.permute.xlu0 %v23569_v2  ;;  %1378 = vperm.xlu1 %16786, %v527_v10  }
  0x31   : > { %591 = vperm.xlu0 %16801, %v524_v3   ;;  %v17956_v3 = vrot.slane %v588_v58, %v17943_v59 }
  0x34   : > { %16787 = vset.pattern.permute.xlu1 %v23569_v2 }
  0x35   : > { %596 = vperm.xlu0 %16801, %v525_v5   ;;  %611 = vperm.xlu1 %16787, %v528_v6   ;;  %v17962_v5 = vrot.slane %v588_v58, %v17949_v62 }
  0x39   : > { %606 = vperm.xlu0 %16801, %v527_v10   ;;  %16788 = vset.pattern.permute.xlu1 %v17696_v1 }
  0x3a   : > { %994 = vperm.xlu1 %16788, %v528_v6  }
  0x3d   : > { %616 = vperm.xlu0 %16801, %v529_v18  }
  0x3e   : > { %998 = vperm.xlu1 %16788, %v529_v18  }
  0x41   : > { %626 = vperm.xlu0 %16801, %v531_v20  }
  0x42   : > { %16789 = vset.pattern.permute.xlu1 %v17695_v0 }
  0x43   : > { %1386 = vperm.xlu1 %16789, %v529_v18  }
  0x45   : > { %636 = vperm.xlu0 %16801, %v533_v22  }
  0x47   : > { %16790 = vset.pattern.permute.xlu1 %v23569_v2 }
  0x48   : > { %621 = vperm.xlu1 %16790, %v530_v7  }
  0x49   : > { %646 = vperm.xlu0 %16801, %v535_v23  }
  0x4c   : > { %16791 = vset.pattern.permute.xlu1 %v17696_v1 }
  0x4d   : > { %1002 = vperm.xlu1 %16791, %v530_v7   ;;  %656 = vperm.xlu0 %16801, %v537_v24  }
  0x51   : > { %1006 = vperm.xlu1 %16791, %v531_v20   ;;  %666 = vperm.xlu0 %16801, %v17855_v25  }
  0x55   : > { %16792 = vset.pattern.permute.xlu1 %v17695_v0  ;;  %676 = vperm.xlu0 %16801, %v17858_v26  }
  0x56   : > { %1394 = vperm.xlu1 %16792, %v531_v20   ;;  %v17981_v20 = vld [vmem:[%s23556_s3] ss:$0 sm:$0xff] }
  0x59   : > { %686 = vperm.xlu0 %16801, %v17862_v27  }
  0x5a   : > { %16793 = vset.pattern.permute.xlu1 %v23569_v2 }
  0x5b   : > { %631 = vperm.xlu1 %16793, %v17804_v8  }
  0x5d   : > { %696 = vperm.xlu0 %16801, %v545_v28  }
  0x5f   : > { %16794 = vset.pattern.permute.xlu1 %v17696_v1 }
  0x60   : > { %1010 = vperm.xlu1 %16794, %v17804_v8  }
  0x61   : > { %706 = vperm.xlu0 %16801, %v547_v29  }
  0x64   : > { %1014 = vperm.xlu1 %16794, %v533_v22  }
  0x65   : > { %716 = vperm.xlu0 %16801, %v549_v30  }
  0x68   : > { %16795 = vset.pattern.permute.xlu1 %v17695_v0 }
  0x69   : > { %1402 = vperm.xlu1 %16795, %v533_v22   ;;  %726 = vperm.xlu0 %16801, %v551_v31  }
  0x6d   : > { %16796 = vset.pattern.permute.xlu1 %v23569_v2  ;;  %16822 = vset.pattern.permute.xlu0 %v17695_v0 }
  0x6e   : > { %641 = vperm.xlu1 %16796, %v17808_v9   ;;  %1422 = vperm.xlu0 %16822, %v538_v32  }
  0x72   : > { %16797 = vset.pattern.permute.xlu1 %v17696_v1  ;;  %1430 = vperm.xlu0 %16822, %v17881_v33  }
  0x73   : > { %1018 = vperm.xlu1 %16797, %v17808_v9  }
  0x76   : > { %1438 = vperm.xlu0 %16822, %v17887_v34  }
  0x77   : > { %1022 = vperm.xlu1 %16797, %v535_v23  }
  0x7a   : > { %1446 = vperm.xlu0 %16822, %v17891_v35  }
  0x7b   : > { %16798 = vset.pattern.permute.xlu1 %v17695_v0 }
  0x7c   : > { %1410 = vperm.xlu1 %16798, %v535_v23  }
  0x7e   : > { %1454 = vperm.xlu0 %16822, %v17896_v36  }
  0x80   : > { %16799 = vset.pattern.permute.xlu1 %v23569_v2 }
  0x81   : > { %651 = vperm.xlu1 %16799, %v17814_v11  }
  0x82   : > { %1462 = vperm.xlu0 %16822, %v17900_v37  }
  0x85   : > { %16800 = vset.pattern.permute.xlu1 %v17696_v1 }
  0x86   : > { %1026 = vperm.xlu1 %16800, %v17814_v11   ;;  %1470 = vperm.xlu0 %16822, %v17907_v38  }
  0x8a   : > { %1030 = vperm.xlu1 %16800, %v537_v24   ;;  %1478 = vperm.xlu0 %16822, %v552_v39  }
  0x8e   : > { %16802 = vset.pattern.permute.xlu1 %v17695_v0  ;;  %1486 = vperm.xlu0 %16822, %v554_v40  }
  0x8f   : > { %1418 = vperm.xlu1 %16802, %v537_v24  }
  0x92   : > { %1494 = vperm.xlu0 %16822, %v556_v43  }
  0x93   : > { %16803 = vset.pattern.permute.xlu1 %v23569_v2  ;;  %v979_v41 = vpop.permute.xlu1 %978  ;;  %v1367_v42 = vpop.permute.xlu0 %1366 }
  0x94   : > { %661 = vperm.xlu1 %16803, %v538_v32   ;;  %v1237_v8 = vmul.f32 %v17956_v3, %v979_v41  ;;  %v1625_v9 = vmul.f32 %v17959_v4, %v1367_v42 }
  0x96   : > { %1502 = vperm.xlu0 %16822, %v558_v46  }
  0x97   : > { %v983_v44 = vpop.permute.xlu1 %982  ;;  %v1375_v45 = vpop.permute.xlu0 %1374 }
  0x98   : > { %16804 = vset.pattern.permute.xlu1 %v17696_v1  ;;  %v1238_v16 = vmul.f32 %v17956_v3, %v983_v44  ;;  %v1627_v23 = vmul.f32 %v17959_v4, %v1375_v45 }
  0x99   : > { %1034 = vperm.xlu1 %16804, %v538_v32  }
  0x9a   : > { %1510 = vperm.xlu0 %16822, %v560_v49  }
  0x9b   : > { %v17918_v47 = vpop.permute.xlu0 %1382 }
  0x9c   : > { %v1371_v48 = vpop.permute.xlu1 %1370  ;;  %v1629_v42 = vmul.f32 %v17959_v4, %v17918_v47 }
  0x9d   : > { %1038 = vperm.xlu1 %16804, %v17855_v25   ;;  %v1626_v21 = vmul.f32 %v17959_v4, %v1371_v48 }
  0x9e   : > { %16839 = vset.pattern.permute.xlu0 %v23569_v2 }
  0x9f   : > { %v17922_v50 = vpop.permute.xlu0 %1390  ;;  %736 = vperm.xlu0 %16839, %v17927_v53  }
  0xa1   : > { %16805 = vset.pattern.permute.xlu1 %v17695_v0  ;;  %v602_v52 = vpop.permute.xlu1 %601 }
  0xa2   : > { %1426 = vperm.xlu1 %16805, %v17855_v25   ;;  %v915_v19 = vmul.f32 %v17962_v5, %v602_v52 }
  0xa3   : > { %v17931_v54 = vpop.permute.xlu0 %1398  ;;  %746 = vperm.xlu0 %16839, %v17971_v15  }
  0xa6   : > { %16806 = vset.pattern.permute.xlu1 %v23569_v2  ;;  %v987_v56 = vpop.permute.xlu1 %986 }
  0xa7   : > { %671 = vperm.xlu1 %16806, %v17881_v33   ;;  %v17937_v57 = vpop.permute.xlu0 %1406  ;;  %v1239_v12 = vmul.f32 %v17956_v3, %v987_v56 }
  0xa9   : > { %v1303_v24 = vadd.f32 %v1239_v12, %v915_v19 }
  0xaa   : > { %v991_v60 = vpop.permute.xlu1 %990 }
  0xab   : > { %16807 = vset.pattern.permute.xlu1 %v17696_v1  ;;  %v17952_v63 = vpop.permute.xlu0 %1414  ;;  %v1240_v28 = vmul.f32 %v17956_v3, %v991_v60  ;;  %v1691_v43 = vadd.f32 %v1627_v23, %v1303_v24 }
  0xac   : > { %1042 = vperm.xlu1 %16807, %v17881_v33  }
  0xad   : > { %v1762_v47 = vadd.f32 %v17981_v20, %v1691_v43 }
  0xaf   : > { %v1379_v6 = vpop.permute.xlu1 %1378 }
  0xb0   : > { %v592_v7 = vpop.permute.xlu0 %591  ;;  %1046 = vperm.xlu1 %16807, %v17858_v26   ;;  %v1628_v33 = vmul.f32 %v17959_v4, %v1379_v6 }
  0xb1   : > { %v913_v10 = vmul.f32 %v17962_v5, %v592_v7 }
  0xb3   : > { %v1301_v11 = vadd.f32 %v1237_v8, %v913_v10 }
  0xb4   : > { %v597_v13 = vpop.permute.xlu0 %596  ;;  %16808 = vset.pattern.permute.xlu1 %v17695_v0  ;;  %v612_v14 = vpop.permute.xlu1 %611 }
  0xb5   : > { %v1689_v17 = vadd.f32 %v1625_v9, %v1301_v11  ;;  %v914_v18 = vmul.f32 %v17962_v5, %v597_v13  ;;  %1434 = vperm.xlu1 %16808, %v17858_v26   ;;  %v917_v40 = vmul.f32 %v17962_v5, %v612_v14  ;;  %v1826_v11 = vmax.f32 %v1762_v47, 0.0  ;;  %v16902_v47 = vld [vmem:[%s23559_s6 + $0x20] ss:$16 sps:$4 sm:$0xff]  }
  0xb7   : > { %v1302_v22 = vadd.f32 %v1238_v16, %v914_v18  ;;  %v1760_v26 = vadd.f32 %v17981_v20, %v1689_v17  ;;  %v18010_v17 = vld [vmem:[%s17795_s24 + $0x108] sm:$0xff] }
  0xb8   : > { %v607_v25 = vpop.permute.xlu0 %606  ;;  %756 = vperm.xlu0 %16839, %v18010_v17  }
  0xb9   : > { %v1690_v29 = vadd.f32 %v1626_v21, %v1302_v22  ;;  %v916_v30 = vmul.f32 %v17962_v5, %v607_v25  ;;  %16809 = vset.pattern.permute.xlu1 %v23569_v2  ;;  %v995_v31 = vpop.permute.xlu1 %994  ;;  %v1824_v45 = vmax.f32 %v1760_v26, 0.0  ;;  %v1631_v25 = vmul.f32 %v17959_v4, %v17922_v50 }
  0xba   : > { %v1241_v32 = vmul.f32 %v17956_v3, %v995_v31  ;;  %681 = vperm.xlu1 %16809, %v17887_v34  }
  0xbb   : > { %v1761_v39 = vadd.f32 %v17981_v20, %v1690_v29  ;;  %v1304_v41 = vadd.f32 %v1240_v28, %v916_v30 }
  0xbc   : > { %v617_v44 = vpop.permute.xlu0 %616  ;;  %v1305_v49 = vadd.f32 %v1241_v32, %v917_v40 }
  0xbd   : > { %v1825_v46 = vmax.f32 %v1761_v39, 0.0  ;;  %v1692_v48 = vadd.f32 %v1628_v33, %v1304_v41  ;;  %v999_v51 = vpop.permute.xlu1 %998  ;;  %v918_v56 = vmul.f32 %v17962_v5, %v617_v44  ;;  %v17673_v39 = vld [vmem:[%s17795_s24 + $0xa8] sm:$0xff]  ;;  %v18034_v44 = vld [vmem:[%s17795_s24 + $0x118] sm:$0xff] }
  0xbe   : > { %16810 = vset.pattern.permute.xlu1 %v17696_v1  ;;  %v1242_v58 = vmul.f32 %v17956_v3, %v999_v51  ;;  %v1693_v6 = vadd.f32 %v1629_v42, %v1305_v49  ;;  %766 = vperm.xlu0 %16839, %v18034_v44   ;;  %v16899_v49 = vld [vmem:[%s23559_s6] ss:$16 sps:$4 sm:$0xff]  }
  0xbf   : > { %v1763_v52 = vadd.f32 %v17981_v20, %v1692_v48  ;;  %1050 = vperm.xlu1 %16810, %v17887_v34   ;;  %v1888_v60 = vpack.c.bf16 %v1825_v46, %v1824_v45  ;;  %v16897_v46 = vld [vmem:[%s23559_s6 + $0x4] ss:$16 sps:$4 sm:$0xff]  }
  0xc0   : > { %v1306_v9 = vadd.f32 %v1242_v58, %v918_v56  ;;  %v1764_v12 = vadd.f32 %v17981_v20, %v1693_v6  ;;  %v627_v24 = vpop.permute.xlu0 %626  ;;  %3028 = vmatprep.subr.bf16.mxu1 %v16897_v46  ;;  %v1633_v6 = vmul.f32 %v17959_v4, %v17931_v54  ;;  %v16903_v54 = vld [vmem:[%s23559_s6 + $0x44] ss:$16 sps:$4 sm:$0xff]  }
  0xc1   : > { %14289 = vmatmul.mubr.msk.bf16.vlgmr.msra.gmra.mrb[0].mxu0 %vm1980_vm0, %v1888_v60  ;;  %v1827_v8 = vmax.f32 %v1763_v52, 0.0  ;;  %v920_v29 = vmul.f32 %v17962_v5, %v627_v24  ;;  %3029 = vmatpush1.bf16.msra.mxu1 %v16899_v49  ;;  %v16900_v60 = vld [vmem:[%s23559_s6 + $0x24] ss:$16 sps:$4 sm:$0xff]   ;;  %v1635_v49 = vmul.f32 %v17959_v4, %v17937_v57  ;;  %v18138_v57 = vld [vmem:[%s17795_s24 + $0x178] sm:$0xff] }
  0xc2   : > { %v1387_v7 = vpop.permute.xlu1 %1386  ;;  %2119 = vmatprep.mubr.bf16.mxu0 %v23569_v2  ;;  %v1828_v18 = vmax.f32 %v1764_v12, 0.0  ;;  %3030 = vmatprep.subr.bf16.mxu1 %v16900_v60  ;;  %v18064_v12 = vld [vmem:[%s17795_s24 + $0x128] sm:$0xff]  ;;  %v16915_v46 = vld [vmem:[%s23559_s6 + $0xc4] ss:$16 sps:$4 sm:$0xff]  }
  0xc3   : > { %v1630_v10 = vmul.f32 %v17959_v4, %v1387_v7  ;;  %1054 = vperm.xlu1 %16810, %v17862_v27   ;;  %v1889_v16 = vpack.c.bf16 %v1827_v8, %v1826_v11  ;;  %776 = vperm.xlu0 %16839, %v18064_v12  }
  0xc4   : > { %v637_v52 = vpop.permute.xlu0 %636 }
  0xc5   : > { %v1694_v34 = vadd.f32 %v1630_v10, %v1306_v9  ;;  %v922_v10 = vmul.f32 %v17962_v5, %v637_v52  ;;  %3031 = vmatpush1.bf16.msra.mxu1 %v16902_v47  ;;  %v16918_v47 = vld [vmem:[%s23559_s6 + $0xe4] ss:$16 sps:$4 sm:$0xff]  }
  0xc6   : > { %3032 = vmatprep.subr.bf16.mxu1 %v16903_v54  ;;  %v16921_v54 = vld [vmem:[%s23559_s6 + $0x104] ss:$16 sps:$4 sm:$0xff]  }
  0xc7   : > { %v1765_v13 = vadd.f32 %v17981_v20, %v1694_v34  ;;  %16811 = vset.pattern.permute.xlu1 %v17695_v0  ;;  %v622_v14 = vpop.permute.xlu1 %621  ;;  %v16905_v34 = vld [vmem:[%s23559_s6 + $0x40] ss:$16 sps:$4 sm:$0xff]  }
  0xc8   : > { %1442 = vperm.xlu1 %16811, %v17862_v27   ;;  %v919_v23 = vmul.f32 %v17962_v5, %v622_v14  ;;  %v18057_v9 = vpop.permute.xlu0 %646 }
  0xc9   : > { %v1829_v19 = vmax.f32 %v1765_v13, 0.0  ;;  %14290 = vmatmul.mubr.msk.bf16.gmra.mrb[4].mxu0 %vm1980_vm0, %v1889_v16  ;;  %3033 = vmatpush1.bf16.msra.mxu1 %v16905_v34 }
  0xca   : > { %2129 = vmatprep.mubr.bf16.mxu0 %v23569_v2 }
  0xcb   : > { %v1890_v27 = vpack.c.bf16 %v1829_v19, %v1828_v18 }
  0xcc   : > { %16812 = vset.pattern.permute.xlu1 %v23569_v2  ;;  %v1003_v21 = vpop.permute.xlu1 %1002  ;;  %v18075_v19 = vpop.permute.xlu0 %656 }
  0xcd   : > { %v1243_v22 = vmul.f32 %v17956_v3, %v1003_v21  ;;  %691 = vperm.xlu1 %16812, %v17891_v35   ;;  %v18078_v21 = vld [vmem:[%s17795_s24 + $0x138] sm:$0xff] }
  0xce   : > { %786 = vperm.xlu0 %16839, %v18078_v21  }
  0xcf   : > { %v1307_v28 = vadd.f32 %v1243_v22, %v919_v23  ;;  %v16906_v22 = vld [vmem:[%s23559_s6 + $0x64] ss:$16 sps:$4 sm:$0xff]   ;;  %v16908_v23 = vld [vmem:[%s23559_s6 + $0x60] ss:$16 sps:$4 sm:$0xff]  }
  0xd0   : > { %v1007_v26 = vpop.permute.xlu1 %1006  ;;  %3034 = vmatprep.subr.bf16.mxu1 %v16906_v22 }
  0xd1   : > { %16813 = vset.pattern.permute.xlu1 %v17696_v1  ;;  %14291 = vmatmul.mubr.msk.bf16.gmra.mrb[8].mxu0 %vm1980_vm0, %v1890_v27  ;;  %v1244_v30 = vmul.f32 %v17956_v3, %v1007_v26  ;;  %v1695_v31 = vadd.f32 %v1631_v25, %v1307_v28  ;;  %v18091_v26 = vld [vmem:[%s17795_s24 + $0x148] sm:$0xff] }
  0xd2   : > { %1058 = vperm.xlu1 %16813, %v17891_v35   ;;  %2139 = vmatprep.mubr.bf16.mxu0 %v23569_v2 }
  0xd3   : > { %v1308_v33 = vadd.f32 %v1244_v30, %v920_v29  ;;  %v1766_v40 = vadd.f32 %v17981_v20, %v1695_v31  ;;  %3035 = vmatpush1.bf16.msra.mxu1 %v16908_v23  ;;  %v16909_v29 = vld [vmem:[%s23559_s6 + $0x84] ss:$16 sps:$4 sm:$0xff]   ;;  %796 = vperm.xlu0 %16839, %v18091_v26   ;;  %v16911_v30 = vld [vmem:[%s23559_s6 + $0x80] ss:$16 sps:$4 sm:$0xff]  }
  0xd4   : > { %3036 = vmatprep.subr.bf16.mxu1 %v16909_v29  ;;  %v16924_v23 = vld [vmem:[%s23559_s6 + $0x124] ss:$16 sps:$4 sm:$0xff]  }
  0xd5   : > { %v1395_v32 = vpop.permute.xlu1 %1394  ;;  %v1830_v35 = vmax.f32 %v1766_v40, 0.0  ;;  %v16912_v40 = vld [vmem:[%s23559_s6 + $0xa4] ss:$16 sps:$4 sm:$0xff]  }
  0xd6   : > { %v1632_v50 = vmul.f32 %v17959_v4, %v1395_v32  ;;  %1062 = vperm.xlu1 %16813, %v17673_v39  }
  0xd7   : > { %3037 = vmatpush1.bf16.msra.mxu1 %v16911_v30  ;;  %v16927_v30 = vld [vmem:[%s23559_s6 + $0x144] ss:$16 sps:$4 sm:$0xff]  }
  0xd8   : > { %v1696_v41 = vadd.f32 %v1632_v50, %v1308_v33  ;;  %v18100_v33 = vpop.permute.xlu0 %666  ;;  %3038 = vmatprep.subr.bf16.mxu1 %v16912_v40 }
  0xda   : > { %v1767_v42 = vadd.f32 %v17981_v20, %v1696_v41  ;;  %16814 = vset.pattern.permute.xlu1 %v17695_v0  ;;  %v632_v43 = vpop.permute.xlu1 %631 }
  0xdb   : > { %1450 = vperm.xlu1 %16814, %v17673_v39   ;;  %v921_v58 = vmul.f32 %v17962_v5, %v632_v43  ;;  %v18103_v39 = vld [vmem:[%s17795_s24 + $0x158] sm:$0xff] }
  0xdc   : > { %v1831_v45 = vmax.f32 %v1767_v42, 0.0  ;;  %806 = vperm.xlu0 %16839, %v18103_v39   ;;  %v16914_v42 = vld [vmem:[%s23559_s6 + $0xa0] ss:$16 sps:$4 sm:$0xff]  }
  0xdd   : > { %3039 = vmatpush1.bf16.msra.mxu1 %v16914_v42 }
  0xde   : > { %v1891_v48 = vpack.c.bf16 %v1831_v45, %v1830_v35  ;;  %v18119_v45 = vld [vmem:[%s17795_s24 + $0x168] sm:$0xff]  ;;  %3040 = vmatprep.subr.bf16.mxu1 %v16915_v46  ;;  %v926_v46 = vmul.f32 %v17962_v5, %v18075_v19  ;;  %v16935_v19 = vld [vmem:[%s23559_s6 + $0x180] ss:$16 sps:$4 sm:$0xff]  }
  0xdf   : > { %16815 = vset.pattern.permute.xlu1 %v23569_v2  ;;  %v1011_v51 = vpop.permute.xlu1 %1010 }
  0xe0   : > { %v1245_v56 = vmul.f32 %v17956_v3, %v1011_v51  ;;  %701 = vperm.xlu1 %16815, %v17896_v36   ;;  %14292 = vmatmul.mubr.msk.bf16.gmra.mrb[12].mxu0 %vm1980_vm0, %v1891_v48  ;;  %v18124_v48 = vpop.permute.xlu0 %676 }
  0xe1   : > { %2149 = vmatprep.mubr.bf16.mxu0 %v23569_v2  ;;  %816 = vperm.xlu0 %16839, %v18119_v45  }
  0xe2   : > { %v1309_v7 = vadd.f32 %v1245_v56, %v921_v58  ;;  %v16917_v56 = vld [vmem:[%s23559_s6 + $0xc0] ss:$16 sps:$4 sm:$0xff]   ;;  %v924_v58 = vmul.f32 %v17962_v5, %v18057_v9 }
  0xe3   : > { %v1015_v8 = vpop.permute.xlu1 %1014  ;;  %3041 = vmatpush1.bf16.msra.mxu1 %v16917_v56 }
  0xe4   : > { %16816 = vset.pattern.permute.xlu1 %v17696_v1  ;;  %v1246_v11 = vmul.f32 %v17956_v3, %v1015_v8  ;;  %v1697_v13 = vadd.f32 %v1633_v6, %v1309_v7  ;;  %v16920_v7 = vld [vmem:[%s23559_s6 + $0xe0] ss:$16 sps:$4 sm:$0xff]   ;;  %v18147_v9 = vpop.permute.xlu0 %686  ;;  %3042 = vmatprep.subr.bf16.mxu1 %v16918_v47 }
  0xe5   : > { %1066 = vperm.xlu1 %16816, %v17896_v36   ;;  %v17674_v36 = vld [vmem:[%s17795_s24 + $0xb8] sm:$0xff]  ;;  %826 = vperm.xlu0 %16839, %v18138_v57  }
  0xe6   : > { %v1310_v16 = vadd.f32 %v1246_v11, %v922_v10  ;;  %v1768_v24 = vadd.f32 %v17981_v20, %v1697_v13  ;;  %v17675_v11 = vld [vmem:[%s17795_s24 + $0xc8] sm:$0xff] }
  0xe7   : > { %3043 = vmatpush1.bf16.msra.mxu1 %v16920_v7  ;;  %v17677_v7 = vld [vmem:[%s17795_s24 + $0xd8] sm:$0xff] }
  0xe8   : > { %v1403_v14 = vpop.permute.xlu1 %1402  ;;  %v1832_v31 = vmax.f32 %v1768_v24, 0.0  ;;  %3044 = vmatprep.subr.bf16.mxu1 %v16921_v54  ;;  %v18165_v22 = vpop.permute.xlu0 %696 }
  0xe9   : > { %v1634_v18 = vmul.f32 %v17959_v4, %v1403_v14  ;;  %1070 = vperm.xlu1 %16816, %v17674_v36   ;;  %v18156_v14 = vld [vmem:[%s17795_s24 + $0x130] sm:$0xff]  ;;  %16854 = vset.pattern.permute.xlu0 %v17695_v0 }
  0xea   : > { %1518 = vperm.xlu0 %16854, %v18156_v14  }
  0xeb   : > { %v1698_v27 = vadd.f32 %v1634_v18, %v1310_v16  ;;  %v16923_v16 = vld [vmem:[%s23559_s6 + $0x100] ss:$16 sps:$4 sm:$0xff]  }
  0xec   : > { %3045 = vmatpush1.bf16.msra.mxu1 %v16923_v16  ;;  %v18184_v40 = vpop.permute.xlu0 %706 }
  0xed   : > { %v1769_v25 = vadd.f32 %v17981_v20, %v1698_v27  ;;  %16817 = vset.pattern.permute.xlu1 %v17695_v0  ;;  %v642_v28 = vpop.permute.xlu1 %641  ;;  %3046 = vmatprep.subr.bf16.mxu1 %v16924_v23  ;;  %v16941_v23 = vld [vmem:[%s23559_s6 + $0x1c0] ss:$16 sps:$4 sm:$0xff]  }
  0xee   : > { %1458 = vperm.xlu1 %16817, %v17674_v36   ;;  %v923_v35 = vmul.f32 %v17962_v5, %v642_v28 }
  0xef   : > { %v1833_v32 = vmax.f32 %v1769_v25, 0.0  ;;  %v16926_v25 = vld [vmem:[%s23559_s6 + $0x120] ss:$16 sps:$4 sm:$0xff]  }
  0xf0   : > { %3047 = vmatpush1.bf16.msra.mxu1 %v16926_v25  ;;  %v18204_v56 = vpop.permute.xlu0 %716 }
  0xf1   : > { %v1892_v50 = vpack.c.bf16 %v1833_v32, %v1832_v31  ;;  %v16929_v32 = vld [vmem:[%s23559_s6 + $0x140] ss:$16 sps:$4 sm:$0xff]   ;;  %3048 = vmatprep.subr.bf16.mxu1 %v16927_v30  ;;  %v16942_v30 = vld [vmem:[%s23559_s6 + $0x1e4] ss:$16 sps:$4 sm:$0xff]  }
  0xf2   : > { %16818 = vset.pattern.permute.xlu1 %v23569_v2  ;;  %v1019_v41 = vpop.permute.xlu1 %1018 }
  0xf3   : > { %v1247_v43 = vmul.f32 %v17956_v3, %v1019_v41  ;;  %711 = vperm.xlu1 %16818, %v17900_v37   ;;  %14293 = vmatmul.mubr.msk.bf16.gmra.mrb[16].mxu0 %vm1980_vm0, %v1892_v50  ;;  %v1637_v41 = vmul.f32 %v17959_v4, %v17952_v63  ;;  %v17676_v63 = vld [vmem:[%s17795_s24 + $0xd0] sm:$0xff] }
  0xf4   : > { %2159 = vmatprep.mubr.bf16.mxu0 %v23569_v2  ;;  %3049 = vmatpush1.bf16.msra.mxu1 %v16929_v32  ;;  %v16944_v32 = vld [vmem:[%s23559_s6 + $0x1e0] ss:$16 sps:$4 sm:$0xff]  }
  0xf5   : > { %v1311_v51 = vadd.f32 %v1247_v43, %v923_v35  ;;  %v16930_v43 = vld [vmem:[%s23559_s6 + $0x164] ss:$16 sps:$4 sm:$0xff]   ;;  %v16932_v35 = vld [vmem:[%s23559_s6 + $0x160] ss:$16 sps:$4 sm:$0xff]  }
  0xf6   : > { %v1023_v52 = vpop.permute.xlu1 %1022  ;;  %3050 = vmatprep.subr.bf16.mxu1 %v16930_v43 }
  0xf7   : > { %16819 = vset.pattern.permute.xlu1 %v17696_v1  ;;  %v1248_v60 = vmul.f32 %v17956_v3, %v1023_v52  ;;  %v1699_v6 = vadd.f32 %v1635_v49, %v1311_v51  ;;  %v18201_v51 = vld [vmem:[%s17795_s24 + $0x140] sm:$0xff] }
  0xf8   : > { %1074 = vperm.xlu1 %16819, %v17900_v37   ;;  %1526 = vperm.xlu0 %16854, %v18201_v51  }
  0xf9   : > { %v1312_v37 = vadd.f32 %v1248_v60, %v924_v58  ;;  %v1770_v34 = vadd.f32 %v17981_v20, %v1699_v6  ;;  %3051 = vmatpush1.bf16.msra.mxu1 %v16932_v35  ;;  %v16933_v58 = vld [vmem:[%s23559_s6 + $0x184] ss:$16 sps:$4 sm:$0xff]  }
  0xfa   : > { %3052 = vmatprep.subr.bf16.mxu1 %v16933_v58  ;;  %v18249_v35 = vld [vmem:[%s17795_s24 + $0x150] sm:$0xff] }
  0xfb   : > { %v1411_v8 = vpop.permute.xlu1 %1410  ;;  %v1834_v24 = vmax.f32 %v1770_v34, 0.0 }
  0xfc   : > { %v1636_v10 = vmul.f32 %v17959_v4, %v1411_v8  ;;  %1078 = vperm.xlu1 %16819, %v17675_v11   ;;  %1534 = vperm.xlu0 %16854, %v18249_v35  }
  0xfd   : > { %3053 = vmatpush1.bf16.msra.mxu1 %v16935_v19 }
  0xfe   : > { %v1700_v13 = vadd.f32 %v1636_v10, %v1312_v37  ;;  %v16936_v10 = vld [vmem:[%s23559_s6 + $0x1a4] ss:$16 sps:$4 sm:$0xff]  }
  0xff   : > { %3054 = vmatprep.subr.bf16.mxu1 %v16936_v10  ;;  %v17679_v10 = vld [vmem:[%s17795_s24 + $0xf0] sm:$0xff] }
 0x100   : > { %v1771_v18 = vadd.f32 %v17981_v20, %v1700_v13  ;;  %16820 = vset.pattern.permute.xlu1 %v17695_v0  ;;  %v652_v36 = vpop.permute.xlu1 %651  ;;  %v18223_v13 = vpop.permute.xlu0 %726 }
 0x101   : > { %1466 = vperm.xlu1 %16820, %v17675_v11   ;;  %v925_v50 = vmul.f32 %v17962_v5, %v652_v36  ;;  %v16938_v11 = vld [vmem:[%s23559_s6 + $0x1a0] ss:$16 sps:$4 sm:$0xff]   ;;  %v16939_v36 = vld [vmem:[%s23559_s6 + $0x1c4] ss:$16 sps:$4 sm:$0xff]  }
 0x102   : > { %v1835_v27 = vmax.f32 %v1771_v18, 0.0  ;;  %3055 = vmatpush1.bf16.msra.mxu1 %v16938_v11 }
 0x103   : > { %3056 = vmatprep.subr.bf16.mxu1 %v16939_v36 }
 0x104   : > { %v1893_v28 = vpack.c.bf16 %v1835_v27, %v1834_v24 }
 0x105   : > { %16821 = vset.pattern.permute.xlu1 %v23569_v2  ;;  %v1027_v29 = vpop.permute.xlu1 %1026 }
 0x106   : > { %v1249_v31 = vmul.f32 %v17956_v3, %v1027_v29  ;;  %721 = vperm.xlu1 %16821, %v17907_v38   ;;  %14294 = vmatmul.mubr.msk.bf16.gmra.mrb[20].mxu0 %vm1980_vm0, %v1893_v28  ;;  %v17678_v28 = vld [vmem:[%s17795_s24 + $0xe0] sm:$0xff]  ;;  %v1423_v29 = vpop.permute.xlu0 %1422 }
 0x107   : > { %2169 = vmatprep.mubr.bf16.mxu0 %v23569_v2  ;;  %3057 = vmatpush1.bf16.msra.mxu1 %v16941_v23  ;;  %v18270_v23 = vld [vmem:[%s17795_s24 + $0x160] sm:$0xff] }
 0x108   : > { %v1313_v42 = vadd.f32 %v1249_v31, %v925_v50  ;;  %3058 = vmatprep.subr.bf16.mxu1 %v16942_v30  ;;  %1542 = vperm.xlu0 %16854, %v18270_v23  }
 0x109   : > { %v1031_v38 = vpop.permute.xlu1 %1030 }
 0x10a   : > { %16823 = vset.pattern.permute.xlu1 %v17696_v1  ;;  %v1250_v49 = vmul.f32 %v17956_v3, %v1031_v38  ;;  %v1701_v52 = vadd.f32 %v1637_v41, %v1313_v42  ;;  %v1639_v41 = vmul.f32 %v17959_v4, %v1423_v29  ;;  %v928_v38 = vmul.f32 %v17962_v5, %v18100_v33  ;;  %v1431_v11 = vpop.permute.xlu0 %1430 }
 0x10b   : > { %1082 = vperm.xlu1 %16823, %v17676_v63   ;;  %3059 = vmatpush1.bf16.msra.mxu1 %v16944_v32 }
 0x10c   : > { %v1314_v47 = vadd.f32 %v1250_v49, %v926_v46  ;;  %v1772_v8 = vadd.f32 %v17981_v20, %v1701_v52 }
 0x10e   : > { %v1419_v60 = vpop.permute.xlu1 %1418  ;;  %v1836_v16 = vmax.f32 %v1772_v8, 0.0 }
 0x10f   : > { %v1638_v6 = vmul.f32 %v17959_v4, %v1419_v60  ;;  %1086 = vperm.xlu1 %16823, %v17677_v7  }
 0x111   : > { %v1702_v37 = vadd.f32 %v1638_v6, %v1314_v47 }
 0x113   : > { %v1773_v54 = vadd.f32 %v17981_v20, %v1702_v37  ;;  %16824 = vset.pattern.permute.xlu1 %v17695_v0  ;;  %v662_v34 = vpop.permute.xlu1 %661 }
 0x114   : > { %1474 = vperm.xlu1 %16824, %v17677_v7   ;;  %v927_v31 = vmul.f32 %v17962_v5, %v662_v34 }
 0x115   : > { %v1837_v18 = vmax.f32 %v1773_v54, 0.0 }
 0x117   : > { %v1894_v24 = vpack.c.bf16 %v1837_v18, %v1836_v16  ;;  %v930_v18 = vmul.f32 %v17962_v5, %v18124_v48 }
 0x118   : > { %16825 = vset.pattern.permute.xlu1 %v23569_v2  ;;  %v1035_v27 = vpop.permute.xlu1 %1034 }
 0x119   : > { %v1251_v25 = vmul.f32 %v17956_v3, %v1035_v27  ;;  %731 = vperm.xlu1 %16825, %v17678_v28   ;;  %14295 = vmatmul.mubr.msk.bf16.gmra.mrb[24].mxu0 %vm1980_vm0, %v1894_v24 }
 0x11a   : > { %2179 = vmatprep.mubr.bf16.mxu0 %v23569_v2 }
 0x11b   : > { %v1315_v50 = vadd.f32 %v1251_v25, %v927_v31 }
 0x11c   : > { %v1039_v42 = vpop.permute.xlu1 %1038 }
 0x11d   : > { %16826 = vset.pattern.permute.xlu1 %v17696_v1  ;;  %v1252_v43 = vmul.f32 %v17956_v3, %v1039_v42  ;;  %v1703_v46 = vadd.f32 %v1639_v41, %v1315_v50 }
 0x11e   : > { %1090 = vperm.xlu1 %16826, %v17678_v28  }
 0x11f   : > { %v1316_v63 = vadd.f32 %v1252_v43, %v928_v38  ;;  %v1774_v58 = vadd.f32 %v17981_v20, %v1703_v46  ;;  %v17680_v43 = vld [vmem:[%s17795_s24 + $0x100] sm:$0xff]  ;;  %v1439_v46 = vpop.permute.xlu0 %1438 }
 0x121   : > { %v1427_v49 = vpop.permute.xlu1 %1426  ;;  %v1838_v47 = vmax.f32 %v1774_v58, 0.0  ;;  %v932_v58 = vmul.f32 %v17962_v5, %v18147_v9 }
 0x122   : > { %v1640_v52 = vmul.f32 %v17959_v4, %v1427_v49  ;;  %1094 = vperm.xlu1 %16826, %v17927_v53  }
 0x124   : > { %v1704_v60 = vadd.f32 %v1640_v52, %v1316_v63 }
 0x126   : > { %v1775_v33 = vadd.f32 %v17981_v20, %v1704_v60  ;;  %16827 = vset.pattern.permute.xlu1 %v17695_v0  ;;  %v672_v19 = vpop.permute.xlu1 %671 }
 0x127   : > { %1482 = vperm.xlu1 %16827, %v17927_v53   ;;  %v929_v54 = vmul.f32 %v17962_v5, %v672_v19  ;;  %v1641_v53 = vmul.f32 %v17959_v4, %v1431_v11 }
 0x128   : > { %v1839_v6 = vmax.f32 %v1775_v33, 0.0  ;;  %v18291_v33 = vld [vmem:[%s17795_s24 + $0x170] sm:$0xff] }
 0x129   : > { %1550 = vperm.xlu0 %16854, %v18291_v33  }
 0x12a   : > { %v1895_v7 = vpack.c.bf16 %v1839_v6, %v1838_v47 }
 0x12b   : > { %16828 = vset.pattern.permute.xlu1 %v23569_v2  ;;  %v1043_v8 = vpop.permute.xlu1 %1042 }
 0x12c   : > { %v1253_v37 = vmul.f32 %v17956_v3, %v1043_v8  ;;  %741 = vperm.xlu1 %16828, %v17679_v10   ;;  %14296 = vmatmul.mubr.msk.bf16.gmra.mrb[28].mxu0 %vm1980_vm0, %v1895_v7 }
 0x12d   : > { %2189 = vmatprep.mubr.bf16.mxu0 %v23569_v2 }
 0x12e   : > { %v1317_v34 = vadd.f32 %v1253_v37, %v929_v54 }
 0x12f   : > { %v1047_v16 = vpop.permute.xlu1 %1046 }
 0x130   : > { %16829 = vset.pattern.permute.xlu1 %v17696_v1  ;;  %v1254_v36 = vmul.f32 %v17956_v3, %v1047_v16  ;;  %v1705_v24 = vadd.f32 %v1641_v53, %v1317_v34 }
 0x131   : > { %1098 = vperm.xlu1 %16829, %v17679_v10  }
 0x132   : > { %v1318_v25 = vadd.f32 %v1254_v36, %v930_v18  ;;  %v1776_v29 = vadd.f32 %v17981_v20, %v1705_v24  ;;  %v17681_v18 = vld [vmem:[%s17795_s24 + $0x110] sm:$0xff]  ;;  %v1447_v36 = vpop.permute.xlu0 %1446 }
 0x134   : > { %v1435_v27 = vpop.permute.xlu1 %1434  ;;  %v1840_v32 = vmax.f32 %v1776_v29, 0.0  ;;  %v934_v29 = vmul.f32 %v17962_v5, %v18165_v22 }
 0x135   : > { %v1642_v28 = vmul.f32 %v17959_v4, %v1435_v27  ;;  %1102 = vperm.xlu1 %16829, %v17971_v15   ;;  %v18307_v27 = vld [vmem:[%s17795_s24 + $0x180] sm:$0xff] }
 0x136   : > { %1558 = vperm.xlu0 %16854, %v18307_v27  }
 0x137   : > { %v1706_v30 = vadd.f32 %v1642_v28, %v1318_v25  ;;  %v1645_v25 = vmul.f32 %v17959_v4, %v1447_v36 }
 0x139   : > { %v1777_v48 = vadd.f32 %v17981_v20, %v1706_v30  ;;  %16830 = vset.pattern.permute.xlu1 %v17695_v0  ;;  %v682_v31 = vpop.permute.xlu1 %681 }
 0x13a   : > { %1490 = vperm.xlu1 %16830, %v17971_v15   ;;  %v931_v49 = vmul.f32 %v17962_v5, %v682_v31  ;;  %v1643_v15 = vmul.f32 %v17959_v4, %v1439_v46 }
 0x13b   : > { %v1841_v50 = vmax.f32 %v1777_v48, 0.0  ;;  %v18316_v48 = vld [vmem:[%s17795_s24 + $0x190] sm:$0xff] }
 0x13c   : > { %1566 = vperm.xlu0 %16854, %v18316_v48  }
 0x13d   : > { %v1896_v41 = vpack.c.bf16 %v1841_v50, %v1840_v32 }
 0x13e   : > { %16831 = vset.pattern.permute.xlu1 %v23569_v2  ;;  %v1051_v42 = vpop.permute.xlu1 %1050 }
 0x13f   : > { %v1255_v38 = vmul.f32 %v17956_v3, %v1051_v42  ;;  %751 = vperm.xlu1 %16831, %v17680_v43   ;;  %14297 = vmatmul.mubr.msk.bf16.gmra.mrb[32].mxu0 %vm1980_vm0, %v1896_v41  ;;  %v18322_v42 = vld [vmem:[%s17795_s24 + $0x1a0] sm:$0xff] }
 0x140   : > { %2199 = vmatprep.mubr.bf16.mxu0 %v23569_v2  ;;  %1574 = vperm.xlu0 %16854, %v18322_v42  }
 0x141   : > { %v1319_v63 = vadd.f32 %v1255_v38, %v931_v49  ;;  %v18331_v49 = vld [vmem:[%s17795_s24 + $0x188] sm:$0xff] }
 0x142   : > { %v1055_v52 = vpop.permute.xlu1 %1054 }
 0x143   : > { %16832 = vset.pattern.permute.xlu1 %v17696_v1  ;;  %v1256_v60 = vmul.f32 %v17956_v3, %v1055_v52  ;;  %v1707_v19 = vadd.f32 %v1643_v15, %v1319_v63 }
 0x144   : > { %1106 = vperm.xlu1 %16832, %v17680_v43   ;;  %16865 = vset.pattern.permute.xlu0 %v23569_v2 }
 0x145   : > { %v1320_v6 = vadd.f32 %v1256_v60, %v932_v58  ;;  %v1778_v8 = vadd.f32 %v17981_v20, %v1707_v19  ;;  %836 = vperm.xlu0 %16865, %v18331_v49   ;;  %v17682_v19 = vld [vmem:[%s17795_s24 + $0x120] sm:$0xff] }
 0x147   : > { %v1443_v47 = vpop.permute.xlu1 %1442  ;;  %v1842_v11 = vmax.f32 %v1778_v8, 0.0 }
 0x148   : > { %v1644_v7 = vmul.f32 %v17959_v4, %v1443_v47  ;;  %1110 = vperm.xlu1 %16832, %v18010_v17   ;;  %v1455_v47 = vpop.permute.xlu0 %1454 }
 0x14a   : > { %v1708_v37 = vadd.f32 %v1644_v7, %v1320_v6  ;;  %v1647_v7 = vmul.f32 %v17959_v4, %v1455_v47 }
 0x14c   : > { %v1779_v9 = vadd.f32 %v17981_v20, %v1708_v37  ;;  %16833 = vset.pattern.permute.xlu1 %v17695_v0  ;;  %v692_v10 = vpop.permute.xlu1 %691  ;;  %v936_v37 = vmul.f32 %v17962_v5, %v18184_v40  ;;  %v18352_v40 = vld [vmem:[%s17795_s24 + $0x198] sm:$0xff] }
 0x14d   : > { %1498 = vperm.xlu1 %16833, %v18010_v17   ;;  %v933_v24 = vmul.f32 %v17962_v5, %v692_v10  ;;  %846 = vperm.xlu0 %16865, %v18352_v40  }
 0x14e   : > { %v1843_v54 = vmax.f32 %v1779_v9, 0.0 }
 0x150   : > { %v1897_v34 = vpack.c.bf16 %v1843_v54, %v1842_v11 }
 0x151   : > { %16834 = vset.pattern.permute.xlu1 %v23569_v2  ;;  %v1059_v53 = vpop.permute.xlu1 %1058 }
 0x152   : > { %v1257_v16 = vmul.f32 %v17956_v3, %v1059_v53  ;;  %761 = vperm.xlu1 %16834, %v17681_v18   ;;  %14298 = vmatmul.mubr.msk.bf16.gmra.mrb[36].mxu0 %vm1980_vm0, %v1897_v34 }
 0x153   : > { %2209 = vmatprep.mubr.bf16.mxu0 %v23569_v2 }
 0x154   : > { %v1321_v17 = vadd.f32 %v1257_v16, %v933_v24 }
 0x155   : > { %v1063_v28 = vpop.permute.xlu1 %1062 }
 0x156   : > { %16835 = vset.pattern.permute.xlu1 %v17696_v1  ;;  %v1258_v30 = vmul.f32 %v17956_v3, %v1063_v28  ;;  %v1709_v31 = vadd.f32 %v1645_v25, %v1321_v17 }
 0x157   : > { %1114 = vperm.xlu1 %16835, %v17681_v18  }
 0x158   : > { %v1322_v50 = vadd.f32 %v1258_v30, %v934_v29  ;;  %v1780_v22 = vadd.f32 %v17981_v20, %v1709_v31 }
 0x15a   : > { %v1451_v32 = vpop.permute.xlu1 %1450  ;;  %v1844_v63 = vmax.f32 %v1780_v22, 0.0 }
 0x15b   : > { %v1646_v41 = vmul.f32 %v17959_v4, %v1451_v32  ;;  %1118 = vperm.xlu1 %16835, %v18034_v44  }
 0x15d   : > { %v1710_v38 = vadd.f32 %v1646_v41, %v1322_v50  ;;  %v938_v41 = vmul.f32 %v17962_v5, %v18204_v56 }
 0x15f   : > { %v1781_v43 = vadd.f32 %v17981_v20, %v1710_v38  ;;  %16836 = vset.pattern.permute.xlu1 %v17695_v0  ;;  %v702_v46 = vpop.permute.xlu1 %701 }
 0x160   : > { %1506 = vperm.xlu1 %16836, %v18034_v44   ;;  %v935_v44 = vmul.f32 %v17962_v5, %v702_v46 }
 0x161   : > { %v1845_v15 = vmax.f32 %v1781_v43, 0.0 }
 0x163   : > { %v1898_v52 = vpack.c.bf16 %v1845_v15, %v1844_v63 }
 0x164   : > { %16837 = vset.pattern.permute.xlu1 %v23569_v2  ;;  %v1067_v58 = vpop.permute.xlu1 %1066 }
 0x165   : > { %v1259_v60 = vmul.f32 %v17956_v3, %v1067_v58  ;;  %771 = vperm.xlu1 %16837, %v17682_v19   ;;  %14299 = vmatmul.mubr.msk.bf16.gmra.mrb[40].mxu0 %vm1980_vm0, %v1898_v52  ;;  %v18374_v52 = vld [vmem:[%s23556_s3] ss:$0 sm:$0xff] }
 0x166   : > { %2219 = vmatprep.mubr.bf16.mxu0 %v23569_v2 }
 0x167   : > { %v1323_v6 = vadd.f32 %v1259_v60, %v935_v44 }
 0x168   : > { %v1071_v8 = vpop.permute.xlu1 %1070 }
 0x169   : > { %16838 = vset.pattern.permute.xlu1 %v17696_v1  ;;  %v1260_v9 = vmul.f32 %v17956_v3, %v1071_v8  ;;  %v1711_v10 = vadd.f32 %v1647_v7, %v1323_v6 }
 0x16a   : > { %1122 = vperm.xlu1 %16838, %v17682_v19   ;;  %v18381_v19 = vld [vmem:[%s17795_s24 + $0x1a8] sm:$0xff] }
 0x16b   : > { %v1324_v54 = vadd.f32 %v1260_v9, %v936_v37  ;;  %v1782_v53 = vadd.f32 %v17981_v20, %v1711_v10  ;;  %856 = vperm.xlu0 %16865, %v18381_v19   ;;  %v18388_v37 = vld [vmem:[%s17795_s24 + $0x1b8] sm:$0xff] }
 0x16d   : > { %v1459_v11 = vpop.permute.xlu1 %1458  ;;  %v1846_v24 = vmax.f32 %v1782_v53, 0.0  ;;  %v1928_v53 = vld [vmem:[%s23558_s5] sm:$0x3] }
 0x16e   : > { %v1648_v34 = vmul.f32 %v17959_v4, %v1459_v11  ;;  %1126 = vperm.xlu1 %16838, %v18064_v12  }
 0x16f   : > { %866 = vperm.xlu0 %16865, %v18388_v37  }
 0x170   : > { %v1712_v16 = vadd.f32 %v1648_v34, %v1324_v54 }
 0x172   : > { %v1783_v18 = vadd.f32 %v17981_v20, %v1712_v16  ;;  %16840 = vset.pattern.permute.xlu1 %v17695_v0  ;;  %v712_v36 = vpop.permute.xlu1 %711  ;;  %v1463_v20 = vpop.permute.xlu0 %1462  ;;  %v18403_v16 = vld [vmem:[%s17795_s24 + $0x1c8] sm:$0xff] }
 0x173   : > { %1514 = vperm.xlu1 %16840, %v18064_v12   ;;  %v937_v30 = vmul.f32 %v17962_v5, %v712_v36  ;;  %v1649_v31 = vmul.f32 %v17959_v4, %v1463_v20  ;;  %876 = vperm.xlu0 %16865, %v18403_v16  }
 0x174   : > { %v1847_v17 = vmax.f32 %v1783_v18, 0.0  ;;  %v940_v18 = vmul.f32 %v17962_v5, %v18223_v13 }
 0x176   : > { %v1899_v25 = vpack.c.bf16 %v1847_v17, %v1846_v24  ;;  %v1471_v50 = vpop.permute.xlu0 %1470  ;;  %v18412_v24 = vrot.slane %v1928_v53, %v17949_v62 }
 0x177   : > { %16841 = vset.pattern.permute.xlu1 %v23569_v2  ;;  %v1075_v28 = vpop.permute.xlu1 %1074  ;;  %v1651_v10 = vmul.f32 %v17959_v4, %v1471_v50 }
 0x178   : > { %v1261_v29 = vmul.f32 %v17956_v3, %v1075_v28  ;;  %781 = vperm.xlu1 %16841, %v18156_v14   ;;  %14300 = vmatmul.mubr.msk.bf16.gmra.mrb[44].mxu0 %vm1980_vm0, %v1899_v25  ;;  %v18415_v25 = vrot.slane %v1928_v53, %v17943_v59  ;;  %v18418_v28 = vld [vmem:[%s17795_s24 + $0x1d8] sm:$0xff] }
 0x179   : > { %2229 = vmatprep.mubr.bf16.mxu0 %v23569_v2  ;;  %886 = vperm.xlu0 %16865, %v18418_v28  }
 0x17a   : > { %v1325_v12 = vadd.f32 %v1261_v29, %v937_v30  ;;  %v18369_v15 = vpop.permute.xlu0 %1478 }
 0x17b   : > { %v1079_v32 = vpop.permute.xlu1 %1078 }
 0x17c   : > { %16842 = vset.pattern.permute.xlu1 %v17696_v1  ;;  %v1262_v22 = vmul.f32 %v17956_v3, %v1079_v32  ;;  %v1713_v38 = vadd.f32 %v1649_v31, %v1325_v12 }
 0x17d   : > { %1130 = vperm.xlu1 %16842, %v18156_v14   ;;  %16874 = vset.pattern.permute.xlu0 %v17695_v0 }
 0x17e   : > { %v1326_v46 = vadd.f32 %v1262_v22, %v938_v41  ;;  %v1784_v56 = vadd.f32 %v18374_v52, %v1713_v38  ;;  %v18384_v6 = vpop.permute.xlu0 %1486 }
 0x180   : > { %v1467_v43 = vpop.permute.xlu1 %1466  ;;  %v1848_v47 = vmax.f32 %v1784_v56, 0.0 }
 0x181   : > { %v1650_v63 = vmul.f32 %v17959_v4, %v1467_v43  ;;  %1134 = vperm.xlu1 %16842, %v18078_v21  }
 0x182   : > { %v18397_v34 = vpop.permute.xlu0 %1494 }
 0x183   : > { %v1714_v58 = vadd.f32 %v1650_v63, %v1326_v46 }
 0x185   : > { %v1785_v14 = vadd.f32 %v18374_v52, %v1714_v58  ;;  %16843 = vset.pattern.permute.xlu1 %v17695_v0  ;;  %v722_v60 = vpop.permute.xlu1 %721  ;;  %v18433_v58 = vld [vmem:[%s17795_s24 + $0x1b0] sm:$0xff] }
 0x186   : > { %1522 = vperm.xlu1 %16843, %v18078_v21   ;;  %v939_v21 = vmul.f32 %v17962_v5, %v722_v60  ;;  %1582 = vperm.xlu0 %16874, %v18433_v58  }
 0x187   : > { %v1849_v44 = vmax.f32 %v1785_v14, 0.0 }
 0x189   : > { %v1900_v7 = vpack.c.bf16 %v1849_v44, %v1848_v47 }
 0x18a   : > { %16844 = vset.pattern.permute.xlu1 %v23569_v2  ;;  %v1083_v8 = vpop.permute.xlu1 %1082 }
 0x18b   : > { %v1263_v9 = vmul.f32 %v17956_v3, %v1083_v8  ;;  %791 = vperm.xlu1 %16844, %v18201_v51   ;;  %14301 = vmatmul.mubr.msk.bf16.gmra.mrb[48].mxu0 %vm1980_vm0, %v1900_v7 }
 0x18c   : > { %2239 = vmatprep.mubr.bf16.mxu0 %v23569_v2 }
 0x18d   : > { %v1327_v11 = vadd.f32 %v1263_v9, %v939_v21 }
 0x18e   : > { %v1087_v54 = vpop.permute.xlu1 %1086 }
 0x18f   : > { %16845 = vset.pattern.permute.xlu1 %v17696_v1  ;;  %v1264_v36 = vmul.f32 %v17956_v3, %v1087_v54  ;;  %v1715_v17 = vadd.f32 %v1651_v10, %v1327_v11 }
 0x190   : > { %1138 = vperm.xlu1 %16845, %v18201_v51   ;;  %v18422_v51 = vpop.permute.xlu0 %1502 }
 0x191   : > { %v1328_v20 = vadd.f32 %v1264_v36, %v940_v18  ;;  %v1786_v32 = vadd.f32 %v18374_v52, %v1715_v17 }
 0x193   : > { %v1475_v29 = vpop.permute.xlu1 %1474  ;;  %v1850_v47 = vmax.f32 %v1786_v32, 0.0  ;;  %v1653_v32 = vmul.f32 %v17959_v4, %v18369_v15 }
 0x194   : > { %v1652_v30 = vmul.f32 %v17959_v4, %v1475_v29  ;;  %v2111_v13 = vpop.f32.mrb[0].mxu0  ;;  %1142 = vperm.xlu1 %16845, %v18091_v26   ;;  %v18438_v7 = vpop.permute.xlu0 %1510 }
 0x195   : > { %v2113_v12 = vpop.f32.mrb[1].mxu0  ;;  %v2112_v31 = vadd.f32 %v2111_v13, %v18412_v24 }
 0x196   : > { %v1716_v50 = vadd.f32 %v1652_v30, %v1328_v20  ;;  %v2115_v41 = vpop.f32.mrb[2].mxu0  ;;  %v2114_v22 = vadd.f32 %v2113_v12, %v18415_v25 }
 0x197   : > { %v2117_v38 = vpop.f32.mrb[3].mxu0  ;;  %v2116_v43 = vadd.f32 %v2115_v41, %v18412_v24  ;;  %v2430_v14 = vmax.f32 %v2112_v31, 0.0 }
 0x198   : > { %v1787_v46 = vadd.f32 %v18374_v52, %v1716_v50  ;;  %16846 = vset.pattern.permute.xlu1 %v17695_v0  ;;  %v732_v63 = vpop.permute.xlu1 %731  ;;  %v2118_v56 = vadd.f32 %v2117_v38, %v18415_v25  ;;  %v2431_v8 = vmax.f32 %v2114_v22, 0.0  ;;  %v737_v12 = vpop.permute.xlu0 %736 }
 0x199   : > { %1530 = vperm.xlu1 %16846, %v18091_v26   ;;  %v2432_v60 = vmax.f32 %v2116_v43, 0.0  ;;  %v941_v20 = vmul.f32 %v17962_v5, %v732_v63  ;;  %v942_v63 = vmul.f32 %v17962_v5, %v737_v12 }
 0x19a   : > { %v1851_v44 = vmax.f32 %v1787_v46, 0.0  ;;  %v2433_v9 = vmax.f32 %v2118_v56, 0.0 }
 0x19b   : > { %v18440_v21 = vpack.c.bf16 %v2432_v60, %v2430_v14  ;;  %v18465_v60 = vld [vmem:[%s17795_s24 + $0x1c0] sm:$0xff] }
 0x19c   : > { %v2121_v10 = vpop.f32.mrb[4].mxu0  ;;  %v18442_v11 = vpack.c.bf16 %v2433_v9, %v2431_v8  ;;  %v1901_v54 = vpack.c.bf16 %v1851_v44, %v1850_v47  ;;  %1590 = vperm.xlu0 %16874, %v18465_v60  }
 0x19d   : > { %v2123_v53 = vpop.f32.mrb[5].mxu0  ;;  %16847 = vset.pattern.permute.xlu1 %v23569_v2  ;;  %v1091_v26 = vpop.permute.xlu1 %1090  ;;  %v2122_v18 = vadd.f32 %v2121_v10, %v18412_v24 }
 0x19e   : > { %v1265_v36 = vmul.f32 %v17956_v3, %v1091_v26  ;;  %v2125_v17 = vpop.f32.mrb[6].mxu0  ;;  %3060 = vmatprep.mubr.bf16.mxu1 %v18442_v11  ;;  %801 = vperm.xlu1 %16847, %v18249_v35   ;;  %v2124_v29 = vadd.f32 %v2123_v53, %v18415_v25 }
 0x19f   : > { %14302 = vmatmul.mubr.msk.bf16.gmra.mrb[52].mxu0 %vm1980_vm0, %v1901_v54  ;;  %v2127_v30 = vpop.f32.mrb[7].mxu0  ;;  %3061 = vmatmul.mubr.bf16.vlgmr.msra.gmra.mrb[0].mxu1 %v18440_v21  ;;  %v2126_v13 = vadd.f32 %v2125_v17, %v18412_v24  ;;  %v2434_v22 = vmax.f32 %v2122_v18, 0.0 }
 0x1a0   : > { %v2128_v31 = vadd.f32 %v2127_v30, %v18415_v25  ;;  %2249 = vmatprep.mubr.bf16.mxu0 %v23569_v2  ;;  %v1329_v50 = vadd.f32 %v1265_v36, %v941_v20  ;;  %v2435_v43 = vmax.f32 %v2124_v29, 0.0 }
 0x1a1   : > { %v1095_v41 = vpop.permute.xlu1 %1094  ;;  %v2436_v38 = vmax.f32 %v2126_v13, 0.0 }
 0x1a2   : > { %16848 = vset.pattern.permute.xlu1 %v17696_v1  ;;  %v2437_v46 = vmax.f32 %v2128_v31, 0.0  ;;  %v1266_v56 = vmul.f32 %v17956_v3, %v1095_v41  ;;  %v1717_v44 = vadd.f32 %v1653_v32, %v1329_v50 }
 0x1a3   : > { %1146 = vperm.xlu1 %16848, %v18249_v35   ;;  %v18462_v14 = vpack.c.bf16 %v2436_v38, %v2434_v22 }
 0x1a4   : > { %v2131_v47 = vpop.f32.mrb[8].mxu0  ;;  %v18467_v15 = vpack.c.bf16 %v2437_v46, %v2435_v43  ;;  %v1330_v35 = vadd.f32 %v1266_v56, %v942_v63  ;;  %v1788_v29 = vadd.f32 %v18374_v52, %v1717_v44  ;;  %v747_v44 = vpop.permute.xlu0 %746 }
 0x1a5   : > { %v2133_v8 = vpop.f32.mrb[9].mxu0  ;;  %v2132_v9 = vadd.f32 %v2131_v47, %v18412_v24 }
 0x1a6   : > { %v2135_v10 = vpop.f32.mrb[10].mxu0  ;;  %3070 = vmatprep.mubr.bf16.mxu1 %v18467_v15  ;;  %v1483_v54 = vpop.permute.xlu1 %1482  ;;  %v2134_v53 = vadd.f32 %v2133_v8, %v18415_v25  ;;  %v1852_v38 = vmax.f32 %v1788_v29, 0.0  ;;  %v1655_v8 = vmul.f32 %v17959_v4, %v18384_v6  ;;  %v18504_v6 = vld [vmem:[%s17795_s24 + $0x1d0] sm:$0xff] }
 0x1a7   : > { %v1654_v26 = vmul.f32 %v17959_v4, %v1483_v54  ;;  %v2137_v18 = vpop.f32.mrb[11].mxu0  ;;  %3071 = vmatmul.mubr.bf16.gmra.mrb[4].mxu1 %v18462_v14  ;;  %1150 = vperm.xlu1 %16848, %v18103_v39   ;;  %v2136_v36 = vadd.f32 %v2135_v10, %v18412_v24  ;;  %v2438_v30 = vmax.f32 %v2132_v9, 0.0 }
 0x1a8   : > { %v2138_v17 = vadd.f32 %v2137_v18, %v18415_v25  ;;  %v2439_v12 = vmax.f32 %v2134_v53, 0.0  ;;  %v944_v18 = vmul.f32 %v17962_v5, %v747_v44  ;;  %1598 = vperm.xlu0 %16874, %v18504_v6  }
 0x1a9   : > { %v1718_v20 = vadd.f32 %v1654_v26, %v1330_v35  ;;  %v2440_v13 = vmax.f32 %v2136_v36, 0.0 }
 0x1aa   : > { %v2441_v31 = vmax.f32 %v2138_v17, 0.0 }
 0x1ab   : > { %v1789_v32 = vadd.f32 %v18374_v52, %v1718_v20  ;;  %16849 = vset.pattern.permute.xlu1 %v17695_v0  ;;  %v742_v50 = vpop.permute.xlu1 %741  ;;  %v18481_v41 = vpack.c.bf16 %v2440_v13, %v2438_v30 }
 0x1ac   : > { %1538 = vperm.xlu1 %16849, %v18103_v39   ;;  %v18484_v22 = vpack.c.bf16 %v2441_v31, %v2439_v12  ;;  %v943_v39 = vmul.f32 %v17962_v5, %v742_v50 }
 0x1ad   : > { %v1853_v43 = vmax.f32 %v1789_v32, 0.0 }
 0x1ae   : > { %3080 = vmatprep.mubr.bf16.mxu1 %v18484_v22 }
 0x1af   : > { %3081 = vmatmul.mubr.bf16.gmra.mrb[8].mxu1 %v18481_v41  ;;  %v1902_v46 = vpack.c.bf16 %v1853_v43, %v1852_v38 }
 0x1b0   : > { %16850 = vset.pattern.permute.xlu1 %v23569_v2  ;;  %v1099_v63 = vpop.permute.xlu1 %1098 }
 0x1b1   : > { %v1267_v56 = vmul.f32 %v17956_v3, %v1099_v63  ;;  %811 = vperm.xlu1 %16850, %v18270_v23   ;;  %14303 = vmatmul.mubr.msk.bf16.gmra.mrb[56].mxu0 %vm1980_vm0, %v1902_v46 }
 0x1b2   : > { %2259 = vmatprep.mubr.bf16.mxu0 %v23569_v2 }
 0x1b3   : > { %v2141_v47 = vpop.f32.mrb[12].mxu0  ;;  %v1331_v9 = vadd.f32 %v1267_v56, %v943_v39 }
 0x1b4   : > { %v2143_v10 = vpop.f32.mrb[13].mxu0  ;;  %v1103_v54 = vpop.permute.xlu1 %1102  ;;  %v2142_v53 = vadd.f32 %v2141_v47, %v18412_v24 }
 0x1b5   : > { %v2145_v35 = vpop.f32.mrb[14].mxu0  ;;  %16851 = vset.pattern.permute.xlu1 %v17696_v1  ;;  %v2144_v26 = vadd.f32 %v2143_v10, %v18415_v25  ;;  %v1268_v36 = vmul.f32 %v17956_v3, %v1103_v54  ;;  %v1719_v30 = vadd.f32 %v1655_v8, %v1331_v9 }
 0x1b6   : > { %v2147_v17 = vpop.f32.mrb[15].mxu0  ;;  %1154 = vperm.xlu1 %16851, %v18270_v23   ;;  %v2146_v29 = vadd.f32 %v2145_v35, %v18412_v24  ;;  %v2442_v13 = vmax.f32 %v2142_v53, 0.0 }
 0x1b7   : > { %v2148_v20 = vadd.f32 %v2147_v17, %v18415_v25  ;;  %v2443_v32 = vmax.f32 %v2144_v26, 0.0  ;;  %v1332_v38 = vadd.f32 %v1268_v36, %v944_v18  ;;  %v1790_v63 = vadd.f32 %v18374_v52, %v1719_v30  ;;  %v757_v26 = vpop.permute.xlu0 %756 }
 0x1b8   : > { %v2444_v12 = vmax.f32 %v2146_v29, 0.0 }
 0x1b9   : > { %v1491_v31 = vpop.permute.xlu1 %1490  ;;  %v2445_v50 = vmax.f32 %v2148_v20, 0.0  ;;  %v1854_v44 = vmax.f32 %v1790_v63, 0.0 }
 0x1ba   : > { %v1656_v43 = vmul.f32 %v17959_v4, %v1491_v31  ;;  %1158 = vperm.xlu1 %16851, %v18119_v45   ;;  %v18510_v23 = vpack.c.bf16 %v2444_v12, %v2442_v13  ;;  %v946_v13 = vmul.f32 %v17962_v5, %v757_v26  ;;  %v18554_v26 = vld [vmem:[%s17795_s24 + $0x1e8] sm:$0xff] }
 0x1bb   : > { %v18512_v46 = vpack.c.bf16 %v2445_v50, %v2443_v32 }
 0x1bc   : > { %v1720_v56 = vadd.f32 %v1656_v43, %v1332_v38 }
 0x1bd   : > { %3090 = vmatprep.mubr.bf16.mxu1 %v18512_v46 }
 0x1be   : > { %v1791_v39 = vadd.f32 %v18374_v52, %v1720_v56  ;;  %3091 = vmatmul.mubr.bf16.gmra.mrb[12].mxu1 %v18510_v23  ;;  %16852 = vset.pattern.permute.xlu1 %v17695_v0  ;;  %v752_v47 = vpop.permute.xlu1 %751 }
 0x1bf   : > { %1546 = vperm.xlu1 %16852, %v18119_v45   ;;  %v945_v53 = vmul.f32 %v17962_v5, %v752_v47  ;;  %v1657_v45 = vmul.f32 %v17959_v4, %v18397_v34  ;;  %v18536_v34 = vld [vmem:[%s17795_s24 + $0x1e0] sm:$0xff] }
 0x1c0   : > { %v1855_v8 = vmax.f32 %v1791_v39, 0.0  ;;  %1606 = vperm.xlu0 %16874, %v18536_v34  }
 0x1c2   : > { %v1903_v9 = vpack.c.bf16 %v1855_v8, %v1854_v44 }
 0x1c3   : > { %16853 = vset.pattern.permute.xlu1 %v23569_v2  ;;  %v1107_v10 = vpop.permute.xlu1 %1106 }
 0x1c4   : > { %v1269_v54 = vmul.f32 %v17956_v3, %v1107_v10  ;;  %821 = vperm.xlu1 %16853, %v18291_v33   ;;  %14304 = vmatmul.mubr.msk.bf16.gmra.mrb[60].mxu0 %vm1980_vm0, %v1903_v9 }
 0x1c5   : > { %2269 = vmatprep.mubr.bf16.mxu0 %v23569_v2  ;;  %16879 = vset.pattern.permute.xlu0 %v23569_v2 }
 0x1c6   : > { %v2151_v35 = vpop.f32.mrb[16].mxu0  ;;  %v1333_v18 = vadd.f32 %v1269_v54, %v945_v53  ;;  %896 = vperm.xlu0 %16879, %v18554_v26  }
 0x1c7   : > { %v2153_v36 = vpop.f32.mrb[17].mxu0  ;;  %v1111_v17 = vpop.permute.xlu1 %1110  ;;  %v2152_v29 = vadd.f32 %v2151_v35, %v18412_v24 }
 0x1c8   : > { %v2155_v20 = vpop.f32.mrb[18].mxu0  ;;  %16855 = vset.pattern.permute.xlu1 %v17696_v1  ;;  %v2154_v30 = vadd.f32 %v2153_v36, %v18415_v25  ;;  %v1270_v12 = vmul.f32 %v17956_v3, %v1111_v17  ;;  %v1721_v38 = vadd.f32 %v1657_v45, %v1333_v18  ;;  %v767_v17 = vpop.permute.xlu0 %766 }
 0x1c9   : > { %v2157_v31 = vpop.f32.mrb[19].mxu0  ;;  %1162 = vperm.xlu1 %16855, %v18291_v33   ;;  %v2156_v32 = vadd.f32 %v2155_v20, %v18412_v24  ;;  %v2446_v43 = vmax.f32 %v2152_v29, 0.0 }
 0x1ca   : > { %v2158_v50 = vadd.f32 %v2157_v31, %v18415_v25  ;;  %v2447_v39 = vmax.f32 %v2154_v30, 0.0  ;;  %v1334_v44 = vadd.f32 %v1270_v12, %v946_v13  ;;  %v1792_v10 = vadd.f32 %v18374_v52, %v1721_v38 }
 0x1cb   : > { %v2448_v63 = vmax.f32 %v2156_v32, 0.0  ;;  %v1659_v12 = vmul.f32 %v17959_v4, %v18422_v51 }
 0x1cc   : > { %v1499_v56 = vpop.permute.xlu1 %1498  ;;  %v2449_v47 = vmax.f32 %v2158_v50, 0.0  ;;  %v1856_v45 = vmax.f32 %v1792_v10, 0.0  ;;  %v777_v13 = vpop.permute.xlu0 %776 }
 0x1cd   : > { %v1658_v8 = vmul.f32 %v17959_v4, %v1499_v56  ;;  %1166 = vperm.xlu1 %16855, %v18138_v57   ;;  %v18542_v33 = vpack.c.bf16 %v2448_v63, %v2446_v43  ;;  %v948_v56 = vmul.f32 %v17962_v5, %v767_v17 }
 0x1ce   : > { %v18544_v9 = vpack.c.bf16 %v2449_v47, %v2447_v39 }
 0x1cf   : > { %v1722_v54 = vadd.f32 %v1658_v8, %v1334_v44 }
 0x1d0   : > { %3100 = vmatprep.mubr.bf16.mxu1 %v18544_v9 }
 0x1d1   : > { %v1793_v53 = vadd.f32 %v18374_v52, %v1722_v54  ;;  %3101 = vmatmul.mubr.bf16.gmra.mrb[16].mxu1 %v18542_v33  ;;  %16856 = vset.pattern.permute.xlu1 %v17695_v0  ;;  %v762_v35 = vpop.permute.xlu1 %761 }
 0x1d2   : > { %1554 = vperm.xlu1 %16856, %v18138_v57   ;;  %v947_v30 = vmul.f32 %v17962_v5, %v762_v35 }
 0x1d3   : > { %v1857_v18 = vmax.f32 %v1793_v53, 0.0  ;;  %v18574_v53 = vld [vmem:[%s17795_s24 + $0x1f8] sm:$0xff] }
 0x1d4   : > { %906 = vperm.xlu0 %16879, %v18574_v53  }
 0x1d5   : > { %v1904_v36 = vpack.c.bf16 %v1857_v18, %v1856_v45 }
 0x1d6   : > { %16857 = vset.pattern.permute.xlu1 %v23569_v2  ;;  %v1115_v29 = vpop.permute.xlu1 %1114 }
 0x1d7   : > { %v1271_v20 = vmul.f32 %v17956_v3, %v1115_v29  ;;  %831 = vperm.xlu1 %16857, %v18307_v27   ;;  %14305 = vmatmul.mubr.msk.bf16.gmra.mrb[64].mxu0 %vm1980_vm0, %v1904_v36  ;;  %v18576_v36 = vpop.permute.xlu0 %786 }
 0x1d8   : > { %2279 = vmatprep.mubr.bf16.mxu0 %v23569_v2  ;;  %16883 = vset.pattern.permute.xlu0 %v17695_v0 }
 0x1d9   : > { %v2161_v57 = vpop.f32.mrb[20].mxu0  ;;  %v1335_v31 = vadd.f32 %v1271_v20, %v947_v30 }
 0x1da   : > { %v2163_v32 = vpop.f32.mrb[21].mxu0  ;;  %v1119_v50 = vpop.permute.xlu1 %1118  ;;  %v2162_v38 = vadd.f32 %v2161_v57, %v18412_v24 }
 0x1db   : > { %v2165_v43 = vpop.f32.mrb[22].mxu0  ;;  %16858 = vset.pattern.permute.xlu1 %v17696_v1  ;;  %v2164_v63 = vadd.f32 %v2163_v32, %v18415_v25  ;;  %v1272_v39 = vmul.f32 %v17956_v3, %v1119_v50  ;;  %v1723_v8 = vadd.f32 %v1659_v12, %v1335_v31  ;;  %v18592_v32 = vld [vmem:[%s17795_s24 + $0x1f0] sm:$0xff]  ;;  %v18595_v50 = vpop.permute.xlu0 %796 }
 0x1dc   : > { %v2167_v47 = vpop.f32.mrb[23].mxu0  ;;  %1170 = vperm.xlu1 %16858, %v18307_v27   ;;  %v2166_v51 = vadd.f32 %v2165_v43, %v18412_v24  ;;  %v2450_v10 = vmax.f32 %v2162_v38, 0.0  ;;  %1614 = vperm.xlu0 %16883, %v18592_v32  }
 0x1dd   : > { %v2168_v44 = vadd.f32 %v2167_v47, %v18415_v25  ;;  %v2451_v45 = vmax.f32 %v2164_v63, 0.0  ;;  %v1336_v17 = vadd.f32 %v1272_v39, %v948_v56  ;;  %v1794_v30 = vadd.f32 %v18374_v52, %v1723_v8 }
 0x1de   : > { %v2452_v54 = vmax.f32 %v2166_v51, 0.0 }
 0x1df   : > { %v1507_v35 = vpop.permute.xlu1 %1506  ;;  %v2453_v18 = vmax.f32 %v2168_v44, 0.0  ;;  %v1858_v38 = vmax.f32 %v1794_v30, 0.0  ;;  %v18603_v51 = vpop.permute.xlu0 %806  ;;  %v1661_v44 = vmul.f32 %v17959_v4, %v18438_v7 }
 0x1e0   : > { %v1660_v27 = vmul.f32 %v17959_v4, %v1507_v35  ;;  %1174 = vperm.xlu1 %16858, %v18331_v49   ;;  %v18581_v29 = vpack.c.bf16 %v2452_v54, %v2450_v10 }
 0x1e1   : > { %v18583_v20 = vpack.c.bf16 %v2453_v18, %v2451_v45 }
 0x1e2   : > { %v1724_v57 = vadd.f32 %v1660_v27, %v1336_v17  ;;  %v950_v17 = vmul.f32 %v17962_v5, %v777_v13 }
 0x1e3   : > { %3110 = vmatprep.mubr.bf16.mxu1 %v18583_v20 }
 0x1e4   : > { %v1795_v12 = vadd.f32 %v18374_v52, %v1724_v57  ;;  %3111 = vmatmul.mubr.bf16.gmra.mrb[20].mxu1 %v18581_v29  ;;  %16859 = vset.pattern.permute.xlu1 %v17695_v0  ;;  %v772_v31 = vpop.permute.xlu1 %771 }
 0x1e5   : > { %1562 = vperm.xlu1 %16859, %v18331_v49   ;;  %v949_v47 = vmul.f32 %v17962_v5, %v772_v31  ;;  %v18616_v31 = vpop.permute.xlu0 %816 }
 0x1e6   : > { %v1859_v43 = vmax.f32 %v1795_v12, 0.0 }
 0x1e8   : > { %v1905_v63 = vpack.c.bf16 %v1859_v43, %v1858_v38 }
 0x1e9   : > { %16860 = vset.pattern.permute.xlu1 %v23569_v2  ;;  %v1123_v56 = vpop.permute.xlu1 %1122 }
 0x1ea   : > { %v1273_v39 = vmul.f32 %v17956_v3, %v1123_v56  ;;  %841 = vperm.xlu1 %16860, %v18316_v48   ;;  %14306 = vmatmul.mubr.msk.bf16.gmra.mrb[68].mxu0 %vm1980_vm0, %v1905_v63 }
 0x1eb   : > { %2289 = vmatprep.mubr.bf16.mxu0 %v23569_v2 }
 0x1ec   : > { %v2171_v49 = vpop.f32.mrb[24].mxu0  ;;  %v1337_v8 = vadd.f32 %v1273_v39, %v949_v47 }
 0x1ed   : > { %v2173_v10 = vpop.f32.mrb[25].mxu0  ;;  %v1127_v54 = vpop.permute.xlu1 %1126  ;;  %v2172_v35 = vadd.f32 %v2171_v49, %v18412_v24 }
 0x1ee   : > { %v2175_v45 = vpop.f32.mrb[26].mxu0  ;;  %16861 = vset.pattern.permute.xlu1 %v17696_v1  ;;  %v2174_v18 = vadd.f32 %v2173_v10, %v18415_v25  ;;  %v1274_v27 = vmul.f32 %v17956_v3, %v1127_v54  ;;  %v1725_v12 = vadd.f32 %v1661_v44, %v1337_v8 }
 0x1ef   : > { %v2177_v30 = vpop.f32.mrb[27].mxu0  ;;  %1178 = vperm.xlu1 %16861, %v18316_v48   ;;  %v2176_v57 = vadd.f32 %v2175_v45, %v18412_v24  ;;  %v2454_v38 = vmax.f32 %v2172_v35, 0.0  ;;  %v18629_v35 = vpop.permute.xlu0 %826 }
 0x1f0   : > { %v2178_v7 = vadd.f32 %v2177_v30, %v18415_v25  ;;  %v2455_v56 = vmax.f32 %v2174_v18, 0.0  ;;  %v1338_v47 = vadd.f32 %v1274_v27, %v950_v17  ;;  %v1796_v10 = vadd.f32 %v18374_v52, %v1725_v12 }
 0x1f1   : > { %v2456_v43 = vmax.f32 %v2176_v57, 0.0 }
 0x1f2   : > { %v1515_v63 = vpop.permute.xlu1 %1514  ;;  %v2457_v39 = vmax.f32 %v2178_v7, 0.0  ;;  %v1860_v45 = vmax.f32 %v1796_v10, 0.0 }
 0x1f3   : > { %v1662_v13 = vmul.f32 %v17959_v4, %v1515_v63  ;;  %1182 = vperm.xlu1 %16861, %v18352_v40   ;;  %v18620_v49 = vpack.c.bf16 %v2456_v43, %v2454_v38  ;;  %v1519_v57 = vpop.permute.xlu0 %1518 }
 0x1f4   : > { %v18622_v48 = vpack.c.bf16 %v2457_v39, %v2455_v56 }
 0x1f5   : > { %v1726_v54 = vadd.f32 %v1662_v13, %v1338_v47  ;;  %v952_v13 = vmul.f32 %v17962_v5, %v18576_v36 }
 0x1f6   : > { %3120 = vmatprep.mubr.bf16.mxu1 %v18622_v48 }
 0x1f7   : > { %v1797_v44 = vadd.f32 %v18374_v52, %v1726_v54  ;;  %3121 = vmatmul.mubr.bf16.gmra.mrb[24].mxu1 %v18620_v49  ;;  %16862 = vset.pattern.permute.xlu1 %v17695_v0  ;;  %v782_v8 = vpop.permute.xlu1 %781 }
 0x1f8   : > { %1570 = vperm.xlu1 %16862, %v18352_v40   ;;  %v951_v7 = vmul.f32 %v17962_v5, %v782_v8  ;;  %v1663_v40 = vmul.f32 %v17959_v4, %v1519_v57 }
 0x1f9   : > { %v1861_v18 = vmax.f32 %v1797_v44, 0.0 }
 0x1fb   : > { %v1906_v17 = vpack.c.bf16 %v1861_v18, %v1860_v45 }
 0x1fc   : > { %16863 = vset.pattern.permute.xlu1 %v23569_v2  ;;  %v1131_v27 = vpop.permute.xlu1 %1130 }
 0x1fd   : > { %v1275_v30 = vmul.f32 %v17956_v3, %v1131_v27  ;;  %851 = vperm.xlu1 %16863, %v18322_v42   ;;  %14307 = vmatmul.mubr.msk.bf16.gmra.mrb[72].mxu0 %vm1980_vm0, %v1906_v17 }
 0x1fe   : > { %2299 = vmatprep.mubr.bf16.mxu0 %v23569_v2 }
 0x1ff   : > { %v2181_v12 = vpop.f32.mrb[28].mxu0  ;;  %v1339_v38 = vadd.f32 %v1275_v30, %v951_v7 }
 0x200   : > { %v2183_v43 = vpop.f32.mrb[29].mxu0  ;;  %v1135_v63 = vpop.permute.xlu1 %1134  ;;  %v2182_v56 = vadd.f32 %v2181_v12, %v18412_v24 }
 0x201   : > { %v2185_v39 = vpop.f32.mrb[30].mxu0  ;;  %16864 = vset.pattern.permute.xlu1 %v17696_v1  ;;  %v2184_v47 = vadd.f32 %v2183_v43, %v18415_v25  ;;  %v1276_v10 = vmul.f32 %v17956_v3, %v1135_v63  ;;  %v1727_v45 = vadd.f32 %v1663_v40, %v1339_v38 }
 0x202   : > { %v2187_v54 = vpop.f32.mrb[31].mxu0  ;;  %1186 = vperm.xlu1 %16864, %v18322_v42   ;;  %v2186_v44 = vadd.f32 %v2185_v39, %v18412_v24  ;;  %v2458_v18 = vmax.f32 %v2182_v56, 0.0 }
 0x203   : > { %v2188_v8 = vadd.f32 %v2187_v54, %v18415_v25  ;;  %v2459_v30 = vmax.f32 %v2184_v47, 0.0  ;;  %v1340_v7 = vadd.f32 %v1276_v10, %v952_v13  ;;  %v1798_v42 = vadd.f32 %v18374_v52, %v1727_v45  ;;  %v1527_v54 = vpop.permute.xlu0 %1526 }
 0x204   : > { %v2460_v17 = vmax.f32 %v2186_v44, 0.0 }
 0x205   : > { %v1523_v27 = vpop.permute.xlu1 %1522  ;;  %v2461_v57 = vmax.f32 %v2188_v8, 0.0  ;;  %v1862_v56 = vmax.f32 %v1798_v42, 0.0 }
 0x206   : > { %v1664_v12 = vmul.f32 %v17959_v4, %v1523_v27  ;;  %1190 = vperm.xlu1 %16864, %v18381_v19   ;;  %v18650_v36 = vpack.c.bf16 %v2460_v17, %v2458_v18 }
 0x207   : > { %v18652_v43 = vpack.c.bf16 %v2461_v57, %v2459_v30 }
 0x208   : > { %v1728_v63 = vadd.f32 %v1664_v12, %v1340_v7  ;;  %v954_v7 = vmul.f32 %v17962_v5, %v18595_v50 }
 0x209   : > { %3130 = vmatprep.mubr.bf16.mxu1 %v18652_v43 }
 0x20a   : > { %v1799_v38 = vadd.f32 %v18374_v52, %v1728_v63  ;;  %3131 = vmatmul.mubr.bf16.gmra.mrb[28].mxu1 %v18650_v36  ;;  %16866 = vset.pattern.permute.xlu1 %v17695_v0  ;;  %v792_v40 = vpop.permute.xlu1 %791 }
 0x20b   : > { %1578 = vperm.xlu1 %16866, %v18381_v19   ;;  %v953_v44 = vmul.f32 %v17962_v5, %v792_v40  ;;  %v1665_v19 = vmul.f32 %v17959_v4, %v1527_v54 }
 0x20c   : > { %v1863_v39 = vmax.f32 %v1799_v38, 0.0 }
 0x20e   : > { %v1907_v47 = vpack.c.bf16 %v1863_v39, %v1862_v56 }
 0x20f   : > { %16867 = vset.pattern.permute.xlu1 %v23569_v2  ;;  %v1139_v13 = vpop.permute.xlu1 %1138 }
 0x210   : > { %v1277_v10 = vmul.f32 %v17956_v3, %v1139_v13  ;;  %861 = vperm.xlu1 %16867, %v18433_v58   ;;  %14308 = vmatmul.mubr.msk.bf16.gmra.mrb[76].mxu0 %vm1980_vm0, %v1907_v47 }
 0x211   : > { %2309 = vmatprep.mubr.bf16.mxu0 %v23569_v2 }
 0x212   : > { %v2191_v8 = vpop.f32.mrb[32].mxu0  ;;  %v1341_v45 = vadd.f32 %v1277_v10, %v953_v44 }
 0x213   : > { %v2193_v18 = vpop.f32.mrb[33].mxu0  ;;  %v1143_v17 = vpop.permute.xlu1 %1142  ;;  %v2192_v27 = vadd.f32 %v2191_v8, %v18412_v24 }
 0x214   : > { %v2195_v30 = vpop.f32.mrb[34].mxu0  ;;  %16868 = vset.pattern.permute.xlu1 %v17696_v1  ;;  %v2194_v57 = vadd.f32 %v2193_v18, %v18415_v25  ;;  %v1278_v12 = vmul.f32 %v17956_v3, %v1143_v17  ;;  %v1729_v40 = vadd.f32 %v1665_v19, %v1341_v45 }
 0x215   : > { %v2197_v42 = vpop.f32.mrb[35].mxu0  ;;  %1194 = vperm.xlu1 %16868, %v18433_v58   ;;  %v2196_v63 = vadd.f32 %v2195_v30, %v18412_v24  ;;  %v2462_v56 = vmax.f32 %v2192_v27, 0.0 }
 0x216   : > { %v2198_v38 = vadd.f32 %v2197_v42, %v18415_v25  ;;  %v2463_v13 = vmax.f32 %v2194_v57, 0.0  ;;  %v1342_v54 = vadd.f32 %v1278_v12, %v954_v7  ;;  %v1800_v58 = vadd.f32 %v18374_v52, %v1729_v40  ;;  %v1535_v12 = vpop.permute.xlu0 %1534 }
 0x217   : > { %v2464_v39 = vmax.f32 %v2196_v63, 0.0 }
 0x218   : > { %v1531_v47 = vpop.permute.xlu1 %1530  ;;  %v2465_v10 = vmax.f32 %v2198_v38, 0.0  ;;  %v1864_v17 = vmax.f32 %v1800_v58, 0.0 }
 0x219   : > { %v1666_v44 = vmul.f32 %v17959_v4, %v1531_v47  ;;  %1198 = vperm.xlu1 %16868, %v18388_v37   ;;  %v18678_v50 = vpack.c.bf16 %v2464_v39, %v2462_v56 }
 0x21a   : > { %v18680_v8 = vpack.c.bf16 %v2465_v10, %v2463_v13  ;;  %v956_v10 = vmul.f32 %v17962_v5, %v18603_v51 }
 0x21b   : > { %v1730_v18 = vadd.f32 %v1666_v44, %v1342_v54 }
 0x21c   : > { %3140 = vmatprep.mubr.bf16.mxu1 %v18680_v8 }
 0x21d   : > { %v1801_v45 = vadd.f32 %v18374_v52, %v1730_v18  ;;  %3141 = vmatmul.mubr.bf16.gmra.mrb[32].mxu1 %v18678_v50  ;;  %16869 = vset.pattern.permute.xlu1 %v17695_v0  ;;  %v802_v19 = vpop.permute.xlu1 %801 }
 0x21e   : > { %1586 = vperm.xlu1 %16869, %v18388_v37   ;;  %v955_v42 = vmul.f32 %v17962_v5, %v802_v19  ;;  %v1667_v37 = vmul.f32 %v17959_v4, %v1535_v12 }
 0x21f   : > { %v1865_v27 = vmax.f32 %v1801_v45, 0.0 }
 0x221   : > { %v1908_v30 = vpack.c.bf16 %v1865_v27, %v1864_v17 }
 0x222   : > { %16870 = vset.pattern.permute.xlu1 %v23569_v2  ;;  %v1147_v57 = vpop.permute.xlu1 %1146 }
 0x223   : > { %v1279_v7 = vmul.f32 %v17956_v3, %v1147_v57  ;;  %871 = vperm.xlu1 %16870, %v18465_v60   ;;  %14309 = vmatmul.mubr.msk.bf16.gmra.mrb[80].mxu0 %vm1980_vm0, %v1908_v30 }
 0x224   : > { %2319 = vmatprep.mubr.bf16.mxu0 %v23569_v2 }
 0x225   : > { %v2201_v63 = vpop.f32.mrb[36].mxu0  ;;  %v1343_v38 = vadd.f32 %v1279_v7, %v955_v42 }
 0x226   : > { %v2203_v40 = vpop.f32.mrb[37].mxu0  ;;  %v1151_v56 = vpop.permute.xlu1 %1150  ;;  %v2202_v39 = vadd.f32 %v2201_v63, %v18412_v24 }
 0x227   : > { %v2205_v47 = vpop.f32.mrb[38].mxu0  ;;  %16871 = vset.pattern.permute.xlu1 %v17696_v1  ;;  %v2204_v13 = vadd.f32 %v2203_v40, %v18415_v25  ;;  %v1280_v54 = vmul.f32 %v17956_v3, %v1151_v56  ;;  %v1731_v45 = vadd.f32 %v1667_v37, %v1343_v38 }
 0x228   : > { %v2207_v44 = vpop.f32.mrb[39].mxu0  ;;  %1202 = vperm.xlu1 %16871, %v18465_v60   ;;  %v2206_v58 = vadd.f32 %v2205_v47, %v18412_v24  ;;  %v2466_v19 = vmax.f32 %v2202_v39, 0.0 }
 0x229   : > { %v2208_v18 = vadd.f32 %v2207_v44, %v18415_v25  ;;  %v2467_v30 = vmax.f32 %v2204_v13, 0.0  ;;  %v1344_v7 = vadd.f32 %v1280_v54, %v956_v10  ;;  %v1802_v60 = vadd.f32 %v18374_v52, %v1731_v45  ;;  %v1543_v10 = vpop.permute.xlu0 %1542 }
 0x22a   : > { %v2468_v17 = vmax.f32 %v2206_v58, 0.0 }
 0x22b   : > { %v1539_v27 = vpop.permute.xlu1 %1538  ;;  %v2469_v57 = vmax.f32 %v2208_v18, 0.0  ;;  %v1866_v40 = vmax.f32 %v1802_v60, 0.0 }
 0x22c   : > { %v1668_v12 = vmul.f32 %v17959_v4, %v1539_v27  ;;  %1206 = vperm.xlu1 %16871, %v18403_v16   ;;  %v18706_v51 = vpack.c.bf16 %v2468_v17, %v2466_v19 }
 0x22d   : > { %v18708_v42 = vpack.c.bf16 %v2469_v57, %v2467_v30  ;;  %v958_v30 = vmul.f32 %v17962_v5, %v18616_v31  ;;  %v16947_v31 = vld [vmem:[%s23559_s6 + $0xc] ss:$16 sps:$4 sm:$0xff]  }
 0x22e   : > { %v1732_v63 = vadd.f32 %v1668_v12, %v1344_v7  ;;  %3381 = vmatprep.subr.bf16.mxu0 %v16947_v31 }
 0x22f   : > { %3150 = vmatprep.mubr.bf16.mxu1 %v18708_v42 }
 0x230   : > { %v1803_v38 = vadd.f32 %v18374_v52, %v1732_v63  ;;  %3151 = vmatmul.mubr.bf16.gmra.mrb[36].mxu1 %v18706_v51  ;;  %16872 = vset.pattern.permute.xlu1 %v17695_v0  ;;  %v812_v37 = vpop.permute.xlu1 %811 }
 0x231   : > { %1594 = vperm.xlu1 %16872, %v18403_v16   ;;  %v957_v54 = vmul.f32 %v17962_v5, %v812_v37  ;;  %v1669_v16 = vmul.f32 %v17959_v4, %v1543_v10 }
 0x232   : > { %v1867_v56 = vmax.f32 %v1803_v38, 0.0 }
 0x234   : > { %v1909_v39 = vpack.c.bf16 %v1867_v56, %v1866_v40  ;;  %v16945_v40 = vld [vmem:[%s23559_s6 + $0x8] ss:$16 sps:$4 sm:$0xff]  }
 0x235   : > { %16873 = vset.pattern.permute.xlu1 %v23569_v2  ;;  %v1155_v47 = vpop.permute.xlu1 %1154  ;;  %3382 = vmatpush1.bf16.msra.mxu0 %v16945_v40 }
 0x236   : > { %v1281_v13 = vmul.f32 %v17956_v3, %v1155_v47  ;;  %881 = vperm.xlu1 %16873, %v18504_v6   ;;  %14310 = vmatmul.mubr.msk.bf16.gmra.mrb[84].mxu0 %vm1980_vm0, %v1909_v39 }
 0x237   : > { %2329 = vmatprep.mubr.bf16.mxu0 %v23569_v2 }
 0x238   : > { %v2211_v44 = vpop.f32.mrb[40].mxu0  ;;  %v1345_v58 = vadd.f32 %v1281_v13, %v957_v54 }
 0x239   : > { %v2213_v18 = vpop.f32.mrb[41].mxu0  ;;  %v1159_v45 = vpop.permute.xlu1 %1158  ;;  %v2212_v19 = vadd.f32 %v2211_v44, %v18412_v24 }
 0x23a   : > { %v2215_v17 = vpop.f32.mrb[42].mxu0  ;;  %16875 = vset.pattern.permute.xlu1 %v17696_v1  ;;  %v2214_v27 = vadd.f32 %v2213_v18, %v18415_v25  ;;  %v1282_v57 = vmul.f32 %v17956_v3, %v1159_v45  ;;  %v1733_v63 = vadd.f32 %v1669_v16, %v1345_v58  ;;  %v16950_v16 = vld [vmem:[%s23559_s6 + $0x2c] ss:$16 sps:$4 sm:$0xff]   ;;  %v16948_v18 = vld [vmem:[%s23559_s6 + $0x28] ss:$16 sps:$4 sm:$0xff]  }
 0x23b   : > { %v2217_v7 = vpop.f32.mrb[43].mxu0  ;;  %1210 = vperm.xlu1 %16875, %v18504_v6   ;;  %v2216_v12 = vadd.f32 %v2215_v17, %v18412_v24  ;;  %v2470_v38 = vmax.f32 %v2212_v19, 0.0  ;;  %3383 = vmatprep.subr.bf16.mxu0 %v16950_v16  ;;  %v960_v16 = vmul.f32 %v17962_v5, %v18629_v35 }
 0x23c   : > { %v2218_v60 = vadd.f32 %v2217_v7, %v18415_v25  ;;  %v2471_v39 = vmax.f32 %v2214_v27, 0.0  ;;  %v1346_v13 = vadd.f32 %v1282_v57, %v958_v30  ;;  %v1804_v44 = vadd.f32 %v18374_v52, %v1733_v63  ;;  %3384 = vmatpush1.bf16.msra.mxu0 %v16948_v18  ;;  %v16953_v30 = vld [vmem:[%s23559_s6 + $0x4c] ss:$16 sps:$4 sm:$0xff]   ;;  %v16951_v57 = vld [vmem:[%s23559_s6 + $0x48] ss:$16 sps:$4 sm:$0xff]   ;;  %v1551_v7 = vpop.permute.xlu0 %1550 }
 0x23d   : > { %v2472_v37 = vmax.f32 %v2216_v12, 0.0  ;;  %3385 = vmatprep.subr.bf16.mxu0 %v16953_v30 }
 0x23e   : > { %v1547_v56 = vpop.permute.xlu1 %1546  ;;  %v2473_v47 = vmax.f32 %v2218_v60, 0.0  ;;  %v1868_v17 = vmax.f32 %v1804_v44, 0.0  ;;  %v16956_v60 = vld [vmem:[%s23559_s6 + $0x6c] ss:$16 sps:$4 sm:$0xff]  }
 0x23f   : > { %v1670_v6 = vmul.f32 %v17959_v4, %v1547_v56  ;;  %1214 = vperm.xlu1 %16875, %v18418_v28   ;;  %v18740_v10 = vpack.c.bf16 %v2472_v37, %v2470_v38  ;;  %v16954_v38 = vld [vmem:[%s23559_s6 + $0x68] ss:$16 sps:$4 sm:$0xff]   ;;  %v1671_v56 = vmul.f32 %v17959_v4, %v1551_v7 }
 0x240   : > { %v18742_v54 = vpack.c.bf16 %v2473_v47, %v2471_v39  ;;  %3386 = vmatpush1.bf16.msra.mxu0 %v16951_v57  ;;  %v18774_v40 = vpop.permute.xlu0 %1558 }
 0x241   : > { %v1734_v58 = vadd.f32 %v1670_v6, %v1346_v13  ;;  %3387 = vmatprep.subr.bf16.mxu0 %v16956_v60 }
 0x242   : > { %3160 = vmatprep.mubr.bf16.mxu1 %v18742_v54 }
 0x243   : > { %v1805_v45 = vadd.f32 %v18374_v52, %v1734_v58  ;;  %3161 = vmatmul.mubr.bf16.gmra.mrb[40].mxu1 %v18740_v10  ;;  %16876 = vset.pattern.permute.xlu1 %v17695_v0  ;;  %v822_v19 = vpop.permute.xlu1 %821  ;;  %v16959_v58 = vld [vmem:[%s23559_s6 + $0x8c] ss:$16 sps:$4 sm:$0xff]  }
 0x244   : > { %1602 = vperm.xlu1 %16876, %v18418_v28   ;;  %v959_v63 = vmul.f32 %v17962_v5, %v822_v19  ;;  %3388 = vmatpush1.bf16.msra.mxu0 %v16954_v38  ;;  %v18799_v38 = vpop.permute.xlu0 %1566 }
 0x245   : > { %v1869_v27 = vmax.f32 %v1805_v45, 0.0  ;;  %3389 = vmatprep.subr.bf16.mxu0 %v16959_v58  ;;  %v16963_v58 = vld [vmem:[%s23559_s6 + $0xc8] ss:$16 sps:$4 sm:$0xff]  }
 0x247   : > { %v1910_v52 = vpack.c.bf16 %v1869_v27, %v1868_v17  ;;  %v16957_v17 = vld [vmem:[%s23559_s6 + $0x88] ss:$16 sps:$4 sm:$0xff]  }
 0x248   : > { %16877 = vset.pattern.permute.xlu1 %v23569_v2  ;;  %v1163_v12 = vpop.permute.xlu1 %1162  ;;  %3390 = vmatpush1.bf16.msra.mxu0 %v16957_v17 }
 0x249   : > { %v1283_v28 = vmul.f32 %v17956_v3, %v1163_v12  ;;  %891 = vperm.xlu1 %16877, %v18536_v34   ;;  %14311 = vmatmul.mubr.msk.bf16.gmra.mrb[88].mxu0 %vm1980_vm0, %v1910_v52 }
 0x24a   : > { %2339 = vmatprep.mubr.bf16.mxu0 %v23569_v2 }
 0x24b   : > { %v2221_v37 = vpop.f32.mrb[44].mxu0  ;;  %v1347_v31 = vadd.f32 %v1283_v28, %v959_v63 }
 0x24c   : > { %v2223_v39 = vpop.f32.mrb[45].mxu0  ;;  %v1167_v47 = vpop.permute.xlu1 %1166  ;;  %v2222_v13 = vadd.f32 %v2221_v37, %v18412_v24 }
 0x24d   : > { %v2225_v6 = vpop.f32.mrb[46].mxu0  ;;  %16878 = vset.pattern.permute.xlu1 %v17696_v1  ;;  %v2224_v44 = vadd.f32 %v2223_v39, %v18415_v25  ;;  %v1284_v18 = vmul.f32 %v17956_v3, %v1167_v47  ;;  %v1735_v30 = vadd.f32 %v1671_v56, %v1347_v31  ;;  %v16960_v31 = vld [vmem:[%s23559_s6 + $0xa8] ss:$16 sps:$4 sm:$0xff]   ;;  %v18809_v56 = vld [vmem:[%s23556_s3] ss:$0 sm:$0xff] }
 0x24e   : > { %v2227_v45 = vpop.f32.mrb[47].mxu0  ;;  %1218 = vperm.xlu1 %16878, %v18536_v34   ;;  %v2226_v19 = vadd.f32 %v2225_v6, %v18412_v24  ;;  %v2474_v57 = vmax.f32 %v2222_v13, 0.0  ;;  %v16962_v34 = vld [vmem:[%s23559_s6 + $0xac] ss:$16 sps:$4 sm:$0xff]  }
 0x24f   : > { %v2228_v27 = vadd.f32 %v2227_v45, %v18415_v25  ;;  %v2475_v35 = vmax.f32 %v2224_v44, 0.0  ;;  %v1348_v28 = vadd.f32 %v1284_v18, %v960_v16  ;;  %3391 = vmatprep.subr.bf16.mxu0 %v16962_v34  ;;  %v1806_v39 = vadd.f32 %v18809_v56, %v1735_v30  ;;  %v16965_v13 = vld [vmem:[%s23559_s6 + $0xcc] ss:$16 sps:$4 sm:$0xff]   ;;  %v18823_v45 = vpop.permute.xlu0 %1574 }
 0x250   : > { %v2476_v52 = vmax.f32 %v2226_v19, 0.0  ;;  %3392 = vmatpush1.bf16.msra.mxu0 %v16960_v31  ;;  %v16968_v19 = vld [vmem:[%s23559_s6 + $0xec] ss:$16 sps:$4 sm:$0xff]   ;;  %v1673_v34 = vmul.f32 %v17959_v4, %v18774_v40 }
 0x251   : > { %v1555_v7 = vpop.permute.xlu1 %1554  ;;  %v2477_v12 = vmax.f32 %v2228_v27, 0.0  ;;  %v1870_v16 = vmax.f32 %v1806_v39, 0.0  ;;  %3393 = vmatprep.subr.bf16.mxu0 %v16965_v13  ;;  %v16971_v13 = vld [vmem:[%s23562_s9 + $0x4] ss:$16 sps:$4 sm:$0xff]  }
 0x252   : > { %v1672_v60 = vmul.f32 %v17959_v4, %v1555_v7  ;;  %1222 = vperm.xlu1 %16878, %v18554_v26   ;;  %v18797_v63 = vpack.c.bf16 %v2476_v52, %v2474_v57  ;;  %v16974_v52 = vld [vmem:[%s23559_s6 + $0x10c] ss:$16 sps:$4 sm:$0xff]   ;;  %6624 = vmatprep.subr.bf16.mxu1 %v16971_v13 }
 0x253   : > { %v18801_v37 = vpack.c.bf16 %v2477_v12, %v2475_v35  ;;  %v837_v35 = vpop.permute.xlu0 %836  ;;  %v16972_v12 = vld [vmem:[%s23559_s6 + $0x108] ss:$16 sps:$4 sm:$0xff]  }
 0x254   : > { %v1736_v47 = vadd.f32 %v1672_v60, %v1348_v28  ;;  %3394 = vmatpush1.bf16.msra.mxu0 %v16963_v58  ;;  %v962_v40 = vmul.f32 %v17962_v5, %v837_v35 }
 0x255   : > { %3170 = vmatprep.mubr.bf16.mxu1 %v18801_v37  ;;  %3395 = vmatprep.subr.bf16.mxu0 %v16968_v19  ;;  %v16977_v19 = vld [vmem:[%s23559_s6 + $0x12c] ss:$16 sps:$4 sm:$0xff]  }
 0x256   : > { %v1807_v6 = vadd.f32 %v18809_v56, %v1736_v47  ;;  %3171 = vmatmul.mubr.bf16.gmra.mrb[44].mxu1 %v18797_v63  ;;  %16880 = vset.pattern.permute.xlu1 %v17695_v0  ;;  %v832_v44 = vpop.permute.xlu1 %831  ;;  %v16969_v47 = vld [vmem:[%s23562_s9] ss:$16 sps:$4 sm:$0xff]  }
 0x257   : > { %1610 = vperm.xlu1 %16880, %v18554_v26   ;;  %v16966_v26 = vld [vmem:[%s23559_s6 + $0xe8] ss:$16 sps:$4 sm:$0xff]   ;;  %v961_v57 = vmul.f32 %v17962_v5, %v832_v44  ;;  %6625 = vmatpush1.bf16.msra.mxu1 %v16969_v47 }
 0x258   : > { %v1871_v18 = vmax.f32 %v1807_v6, 0.0  ;;  %3396 = vmatpush1.bf16.msra.mxu0 %v16966_v26 }
 0x259   : > { %3397 = vmatprep.subr.bf16.mxu0 %v16974_v52 }
 0x25a   : > { %v1911_v17 = vpack.c.bf16 %v1871_v18, %v1870_v16 }
 0x25b   : > { %16881 = vset.pattern.permute.xlu1 %v23569_v2  ;;  %v1171_v27 = vpop.permute.xlu1 %1170 }
 0x25c   : > { %v1285_v30 = vmul.f32 %v17956_v3, %v1171_v27  ;;  %901 = vperm.xlu1 %16881, %v18592_v32   ;;  %14312 = vmatmul.mubr.msk.bf16.gmra.mrb[92].mxu0 %vm1980_vm0, %v1911_v17 }
 0x25d   : > { %2349 = vmatprep.mubr.bf16.mxu0 %v23569_v2  ;;  %3398 = vmatpush1.bf16.msra.mxu0 %v16972_v12 }
 0x25e   : > { %v2231_v7 = vpop.f32.mrb[48].mxu0  ;;  %v1349_v28 = vadd.f32 %v1285_v30, %v961_v57  ;;  %v16975_v30 = vld [vmem:[%s23559_s6 + $0x128] ss:$16 sps:$4 sm:$0xff]   ;;  %3399 = vmatprep.subr.bf16.mxu0 %v16977_v19 }
 0x25f   : > { %v2233_v60 = vpop.f32.mrb[49].mxu0  ;;  %v1175_v31 = vpop.permute.xlu1 %1174  ;;  %v2232_v39 = vadd.f32 %v2231_v7, %v18412_v24 }
 0x260   : > { %v2235_v6 = vpop.f32.mrb[50].mxu0  ;;  %16882 = vset.pattern.permute.xlu1 %v17696_v1  ;;  %v2234_v44 = vadd.f32 %v2233_v60, %v18415_v25  ;;  %v1286_v58 = vmul.f32 %v17956_v3, %v1175_v31  ;;  %v1737_v1 = vadd.f32 %v1673_v34, %v1349_v28  ;;  %v16980_v34 = vld [vmem:[%s23559_s6 + $0x14c] ss:$16 sps:$4 sm:$0xff]  }
 0x261   : > { %v2237_v16 = vpop.f32.mrb[51].mxu0  ;;  %1226 = vperm.xlu1 %16882, %v18592_v32   ;;  %v2236_v18 = vadd.f32 %v2235_v6, %v18412_v24  ;;  %v2478_v27 = vmax.f32 %v2232_v39, 0.0  ;;  %3400 = vmatpush1.bf16.msra.mxu0 %v16975_v30  ;;  %v16978_v39 = vld [vmem:[%s23559_s6 + $0x148] ss:$16 sps:$4 sm:$0xff]   ;;  %v16983_v6 = vld [vmem:[%s23559_s6 + $0x16c] ss:$16 sps:$4 sm:$0xff]   ;;  %v847_v30 = vpop.permute.xlu0 %846 }
 0x262   : > { %v2238_v17 = vadd.f32 %v2237_v16, %v18415_v25  ;;  %v2479_v32 = vmax.f32 %v2234_v44, 0.0  ;;  %v1350_v7 = vadd.f32 %v1286_v58, %v962_v40  ;;  %v1808_v28 = vadd.f32 %v18809_v56, %v1737_v1  ;;  %3401 = vmatprep.subr.bf16.mxu0 %v16980_v34  ;;  %v16984_v44 = vld [vmem:[%s23562_s9 + $0x20] ss:$16 sps:$4 sm:$0xff]   ;;  %v16986_v40 = vld [vmem:[%s23562_s9 + $0x24] ss:$16 sps:$4 sm:$0xff]  }
 0x263   : > { %v2480_v26 = vmax.f32 %v2236_v18, 0.0  ;;  %v16981_v18 = vld [vmem:[%s23559_s6 + $0x168] ss:$16 sps:$4 sm:$0xff]   ;;  %6626 = vmatprep.subr.bf16.mxu1 %v16986_v40 }
 0x264   : > { %v1563_v57 = vpop.permute.xlu1 %1562  ;;  %v2481_v52 = vmax.f32 %v2238_v17, 0.0  ;;  %v1872_v58 = vmax.f32 %v1808_v28, 0.0  ;;  %6627 = vmatpush1.bf16.msra.mxu1 %v16984_v44 }
 0x265   : > { %v1674_v35 = vmul.f32 %v17959_v4, %v1563_v57  ;;  %1230 = vperm.xlu1 %16882, %v18574_v53   ;;  %v18867_v60 = vpack.c.bf16 %v2480_v26, %v2478_v27  ;;  %3402 = vmatpush1.bf16.msra.mxu0 %v16978_v39  ;;  %v16987_v57 = vld [vmem:[%s23559_s6 + $0x188] ss:$16 sps:$4 sm:$0xff]  }
 0x266   : > { %v18872_v12 = vpack.c.bf16 %v2481_v52, %v2479_v32  ;;  %3403 = vmatprep.subr.bf16.mxu0 %v16983_v6  ;;  %v16992_v52 = vld [vmem:[%s23559_s6 + $0x1ac] ss:$16 sps:$4 sm:$0xff]  }
 0x267   : > { %v1738_v31 = vadd.f32 %v1674_v35, %v1350_v7  ;;  %v1675_v7 = vmul.f32 %v17959_v4, %v18799_v38  ;;  %v16990_v38 = vld [vmem:[%s23559_s6 + $0x1a8] ss:$16 sps:$4 sm:$0xff]  }
 0x268   : > { %3180 = vmatprep.mubr.bf16.mxu1 %v18872_v12 }
 0x269   : > { %v1809_v47 = vadd.f32 %v18809_v56, %v1738_v31  ;;  %3181 = vmatmul.mubr.bf16.gmra.mrb[48].mxu1 %v18867_v60  ;;  %16884 = vset.pattern.permute.xlu1 %v17695_v0  ;;  %v842_v13 = vpop.permute.xlu1 %841  ;;  %v2686_v0 = vld [vmem:[%s23560_s7] sm:$0xf]  ;;  %v964_v31 = vmul.f32 %v17962_v5, %v847_v30 }
 0x26a   : > { %1618 = vperm.xlu1 %16884, %v18574_v53   ;;  %v16989_v53 = vld [vmem:[%s23559_s6 + $0x18c] ss:$16 sps:$4 sm:$0xff]   ;;  %v18904_v27 = vrot.slane %v2686_v0, %v17949_v62  ;;  %v963_v26 = vmul.f32 %v17962_v5, %v842_v13  ;;  %3404 = vmatpush1.bf16.msra.mxu0 %v16981_v18  ;;  %v18912_v32 = vrot.slane %v2686_v0, %v17943_v59 }
 0x26b   : > { %v1873_v16 = vmax.f32 %v1809_v47, 0.0  ;;  %3405 = vmatprep.subr.bf16.mxu0 %v16989_v53 }
 0x26d   : > { %v1912_v19 = vpack.c.bf16 %v1873_v16, %v1872_v58 }
 0x26e   : > { %v1179_v17 = vpop.permute.xlu1 %1178  ;;  %3406 = vmatpush1.bf16.msra.mxu0 %v16987_v57 }
 0x26f   : > { %v1287_v1 = vmul.f32 %v17956_v3, %v1179_v17  ;;  %14313 = vmatmul.mubr.msk.bf16.gmra.mrb[96].mxu0 %vm1980_vm0, %v1912_v19  ;;  %3407 = vmatprep.subr.bf16.mxu0 %v16992_v52  ;;  %v16995_v17 = vld [vmem:[%s23559_s6 + $0x1cc] ss:$16 sps:$4 sm:$0xff]  }
 0x270   : > { %2359 = vmatprep.mubr.bf16.mxu0 %v23569_v2 }
 0x271   : > { %v1351_v35 = vadd.f32 %v1287_v1, %v963_v26 }
 0x272   : > { %v2241_v34 = vpop.f32.mrb[52].mxu0  ;;  %v3062_v28 = vpop.f32.mrb[0].mxu1  ;;  %3408 = vmatpush1.bf16.msra.mxu0 %v16990_v38 }
 0x273   : > { %v2243_v39 = vpop.f32.mrb[53].mxu0  ;;  %v3063_v47 = vadd.f32 %v3062_v28, %v18904_v27  ;;  %v1183_v13 = vpop.permute.xlu1 %1182  ;;  %v2242_v6 = vadd.f32 %v2241_v34, %v18412_v24  ;;  %v1739_v1 = vadd.f32 %v1675_v7, %v1351_v35  ;;  %v16993_v7 = vld [vmem:[%s23559_s6 + $0x1c8] ss:$16 sps:$4 sm:$0xff]   ;;  %3409 = vmatprep.subr.bf16.mxu0 %v16995_v17 }
 0x274   : > { %v1288_v44 = vmul.f32 %v17956_v3, %v1183_v13  ;;  %v2245_v40 = vpop.f32.mrb[54].mxu0  ;;  %v3064_v58 = vpop.f32.mrb[1].mxu1  ;;  %v2244_v16 = vadd.f32 %v2243_v39, %v18415_v25 }
 0x275   : > { %v3065_v0 = vadd.f32 %v3064_v58, %v18912_v32  ;;  %v2247_v18 = vpop.f32.mrb[55].mxu0  ;;  %v3066_v19 = vpop.f32.mrb[2].mxu1  ;;  %v2246_v53 = vadd.f32 %v2245_v40, %v18412_v24  ;;  %v3734_v26 = vmax.f32 %v3063_v47, 0.0  ;;  %v2482_v58 = vmax.f32 %v2242_v6, 0.0  ;;  %v17001_v47 = vld [vmem:[%s23562_s9 + $0x44] ss:$16 sps:$4 sm:$0xff]  }
 0x276   : > { %v3067_v30 = vadd.f32 %v3066_v19, %v18904_v27  ;;  %v3068_v57 = vpop.f32.mrb[3].mxu1  ;;  %v2248_v34 = vadd.f32 %v2247_v18, %v18415_v25  ;;  %v1352_v28 = vadd.f32 %v1288_v44, %v964_v31  ;;  %v2483_v40 = vmax.f32 %v2244_v16, 0.0  ;;  %v16998_v31 = vld [vmem:[%s23559_s6 + $0x1ec] ss:$16 sps:$4 sm:$0xff]   ;;  %6628 = vmatprep.subr.bf16.mxu1 %v17001_v47  ;;  %3410 = vmatpush1.bf16.msra.mxu0 %v16993_v7 }
 0x277   : > { %v3069_v39 = vadd.f32 %v3068_v57, %v18912_v32  ;;  %v1571_v13 = vpop.permute.xlu1 %1570  ;;  %v2484_v2 = vmax.f32 %v2246_v53, 0.0  ;;  %v3735_v6 = vmax.f32 %v3065_v0, 0.0  ;;  %v1810_v16 = vadd.f32 %v18809_v56, %v1739_v1  ;;  %3411 = vmatprep.subr.bf16.mxu0 %v16998_v31 }
 0x278   : > { %v3738_v59 = vmax.f32 %v3067_v30, 0.0  ;;  %v1676_v52 = vmul.f32 %v17959_v4, %v1571_v13  ;;  %v2485_v62 = vmax.f32 %v2248_v34, 0.0 }
 0x279   : > { %v18939_v35 = vpack.c.bf16 %v2484_v2, %v2482_v58  ;;  %v3739_v44 = vmax.f32 %v3069_v39, 0.0  ;;  %v16999_v2 = vld [vmem:[%s23562_s9 + $0x40] ss:$16 sps:$4 sm:$0xff]   ;;  %v857_v39 = vpop.permute.xlu0 %856  ;;  %v1874_v13 = vmax.f32 %v1810_v16, 0.0 }
 0x27a   : > { %v18948_v38 = vpack.c.bf16 %v3738_v59, %v3734_v26  ;;  %v1740_v18 = vadd.f32 %v1676_v52, %v1352_v28  ;;  %v3072_v19 = vpop.f32.mrb[4].mxu1  ;;  %v18950_v53 = vpack.c.bf16 %v2485_v62, %v2483_v40  ;;  %v16996_v62 = vld [vmem:[%s23559_s6 + $0x1e8] ss:$16 sps:$4 sm:$0xff]   ;;  %6629 = vmatpush1.bf16.msra.mxu1 %v16999_v2 }
 0x27b   : > { %v3073_v17 = vadd.f32 %v3072_v19, %v18904_v27  ;;  %v3074_v30 = vpop.f32.mrb[5].mxu1  ;;  %v18956_v57 = vpack.c.bf16 %v3739_v44, %v3735_v6  ;;  %3412 = vmatpush1.bf16.msra.mxu0 %v16996_v62  ;;  %v23683_v62 = vmov 0  }
 0x27c   : > { %23679 = vst [vmem:[#allocation6_spill] sm:$0xff] %v18948_v38  ;;  %v1811_v0 = vadd.f32 %v18809_v56, %v1740_v18  ;;  %v3075_v1 = vadd.f32 %v3074_v30, %v18912_v32  ;;  %3190 = vmatprep.mubr.bf16.mxu1 %v18950_v53  ;;  %v3076_v59 = vpop.f32.mrb[6].mxu1  ;;  %v852_v26 = vpop.permute.xlu1 %851 }
 0x27d   : > { %23680 = vst [vmem:[#allocation7_spill] sm:$0xff] %v18956_v57  ;;  %v3077_v34 = vadd.f32 %v3076_v59, %v18904_v27  ;;  %3191 = vmatmul.mubr.bf16.gmra.mrb[52].mxu1 %v18939_v35  ;;  %v3078_v28 = vpop.f32.mrb[7].mxu1  ;;  %v3742_v40 = vmax.f32 %v3073_v17, 0.0  ;;  %v965_v16 = vmul.f32 %v17962_v5, %v852_v26 }
 0x27e   : > { %v1875_v58 = vmax.f32 %v1811_v0, 0.0  ;;  %v3079_v52 = vadd.f32 %v3078_v28, %v18912_v32  ;;  %v3743_v7 = vmax.f32 %v3075_v1, 0.0  ;;  %v18975_v0 = vpop.permute.xlu0 %866 }
 0x27f   : > { %v3746_v47 = vmax.f32 %v3077_v34, 0.0 }
 0x280   : > { %v1913_v6 = vpack.c.bf16 %v1875_v58, %v1874_v13  ;;  %v3747_v44 = vmax.f32 %v3079_v52, 0.0  ;;  %v1677_v13 = vmul.f32 %v17959_v4, %v18823_v45 }
 0x281   : > { %v1187_v18 = vpop.permute.xlu1 %1186  ;;  %v18967_v19 = vpack.c.bf16 %v3746_v47, %v3742_v40 }
 0x282   : > { %v1289_v30 = vmul.f32 %v17956_v3, %v1187_v18  ;;  %14314 = vmatmul.mubr.msk.bf16.gmra.mrb[100].mxu0 %vm1980_vm0, %v1913_v6  ;;  %v3082_v59 = vpop.f32.mrb[8].mxu1  ;;  %v18971_v31 = vpack.c.bf16 %v3747_v44, %v3743_v7  ;;  %v966_v6 = vmul.f32 %v17962_v5, %v857_v39  ;;  %v18989_v57 = vpop.permute.xlu0 %876 }
 0x283   : > { %23681 = vst [vmem:[#allocation8_spill] sm:$0xff] %v18967_v19  ;;  %v3083_v2 = vadd.f32 %v3082_v59, %v18904_v27  ;;  %v3084_v17 = vpop.f32.mrb[9].mxu1  ;;  %2369 = vmatprep.mubr.bf16.mxu0 %v23683_v62 }
 0x284   : > { %23682 = vst [vmem:[#allocation9_spill] sm:$0xff] %v18971_v31  ;;  %v3085_v1 = vadd.f32 %v3084_v17, %v18912_v32  ;;  %v2251_v34 = vpop.f32.mrb[56].mxu0  ;;  %v3086_v28 = vpop.f32.mrb[10].mxu1  ;;  %v1353_v58 = vadd.f32 %v1289_v30, %v965_v16 }
 0x285   : > { %v3087_v52 = vadd.f32 %v3086_v28, %v18904_v27  ;;  %v2253_v40 = vpop.f32.mrb[57].mxu0  ;;  %v3088_v47 = vpop.f32.mrb[11].mxu1  ;;  %v2252_v26 = vadd.f32 %v2251_v34, %v18412_v24  ;;  %v3750_v30 = vmax.f32 %v3083_v2, 0.0 }
 0x286   : > { %v3089_v7 = vadd.f32 %v3088_v47, %v18912_v32  ;;  %v1191_v44 = vpop.permute.xlu1 %1190  ;;  %v2255_v18 = vpop.f32.mrb[58].mxu0  ;;  %v2254_v59 = vadd.f32 %v2253_v40, %v18415_v25  ;;  %v3751_v31 = vmax.f32 %v3085_v1, 0.0  ;;  %v1741_v34 = vadd.f32 %v1677_v13, %v1353_v58  ;;  %v17002_v40 = vld [vmem:[%s23562_s9 + $0x60] ss:$16 sps:$4 sm:$0xff]  }
 0x287   : > { %v1290_v17 = vmul.f32 %v17956_v3, %v1191_v44  ;;  %v2257_v19 = vpop.f32.mrb[59].mxu0  ;;  %v2256_v45 = vadd.f32 %v2255_v18, %v18412_v24  ;;  %v3754_v16 = vmax.f32 %v3087_v52, 0.0  ;;  %v2486_v39 = vmax.f32 %v2252_v26, 0.0  ;;  %v17004_v44 = vld [vmem:[%s23562_s9 + $0x64] ss:$16 sps:$4 sm:$0xff]  }
 0x288   : > { %v2258_v28 = vadd.f32 %v2257_v19, %v18415_v25  ;;  %v3755_v38 = vmax.f32 %v3089_v7, 0.0  ;;  %v2487_v52 = vmax.f32 %v2254_v59, 0.0  ;;  %6630 = vmatprep.subr.bf16.mxu1 %v17004_v44 }
 0x289   : > { %v2488_v47 = vmax.f32 %v2256_v45, 0.0  ;;  %v18997_v18 = vpack.c.bf16 %v3754_v16, %v3750_v30  ;;  %v1354_v13 = vadd.f32 %v1290_v17, %v966_v6  ;;  %6631 = vmatpush1.bf16.msra.mxu1 %v17002_v40  ;;  %v1812_v45 = vadd.f32 %v18809_v56, %v1741_v34 }
 0x28a   : > { %v1579_v2 = vpop.permute.xlu1 %1578  ;;  %v2489_v19 = vmax.f32 %v2258_v28, 0.0  ;;  %v18999_v1 = vpack.c.bf16 %v3755_v38, %v3751_v31  ;;  %v19010_v31 = vpop.permute.xlu0 %886 }
 0x28b   : > { %23684 = vst [vmem:[#allocation10_spill] sm:$0xff] %v18997_v18  ;;  %v1678_v58 = vmul.f32 %v17959_v4, %v1579_v2  ;;  %v19002_v26 = vpack.c.bf16 %v2488_v47, %v2486_v39  ;;  %v1876_v6 = vmax.f32 %v1812_v45, 0.0 }
 0x28c   : > { %23685 = vst [vmem:[#allocation11_spill] sm:$0xff] %v18999_v1  ;;  %v19004_v7 = vpack.c.bf16 %v2489_v19, %v2487_v52 }
 0x28d   : > { %v1742_v61 = vadd.f32 %v1678_v58, %v1354_v13 }
 0x28e   : > { %3200 = vmatprep.mubr.bf16.mxu1 %v19004_v7  ;;  %v1583_v19 = vpop.permute.xlu0 %1582 }
 0x28f   : > { %v1813_v30 = vadd.f32 %v18809_v56, %v1742_v61  ;;  %3201 = vmatmul.mubr.bf16.gmra.mrb[56].mxu1 %v19002_v26  ;;  %v862_v38 = vpop.permute.xlu1 %861 }
 0x290   : > { %v967_v13 = vmul.f32 %v17962_v5, %v862_v38 }
 0x291   : > { %v1877_v59 = vmax.f32 %v1813_v30, 0.0  ;;  %v3092_v17 = vpop.f32.mrb[12].mxu1 }
 0x292   : > { %v3093_v16 = vadd.f32 %v3092_v17, %v18904_v27  ;;  %v3094_v28 = vpop.f32.mrb[13].mxu1 }
 0x293   : > { %v1914_v39 = vpack.c.bf16 %v1877_v59, %v1876_v6  ;;  %v3095_v47 = vadd.f32 %v3094_v28, %v18912_v32  ;;  %v3096_v34 = vpop.f32.mrb[14].mxu1  ;;  %v1679_v28 = vmul.f32 %v17959_v4, %v1583_v19  ;;  %v17007_v19 = vld [vmem:[%s23562_s9 + $0x84] ss:$16 sps:$4 sm:$0xff]  }
 0x294   : > { %v3097_v40 = vadd.f32 %v3096_v34, %v18904_v27  ;;  %v3098_v44 = vpop.f32.mrb[15].mxu1  ;;  %v1195_v2 = vpop.permute.xlu1 %1194  ;;  %v3758_v58 = vmax.f32 %v3093_v16, 0.0  ;;  %v968_v16 = vmul.f32 %v17962_v5, %v18975_v0  ;;  %6632 = vmatprep.subr.bf16.mxu1 %v17007_v19 }
 0x295   : > { %v3099_v61 = vadd.f32 %v3098_v44, %v18912_v32  ;;  %v1291_v52 = vmul.f32 %v17956_v3, %v1195_v2  ;;  %14315 = vmatmul.mubr.msk.bf16.gmra.mrb[104].mxu0 %vm1980_vm0, %v1914_v39  ;;  %v3759_v6 = vmax.f32 %v3095_v47, 0.0 }
 0x296   : > { %2379 = vmatprep.mubr.bf16.mxu0 %v23683_v62  ;;  %v3762_v45 = vmax.f32 %v3097_v40, 0.0 }
 0x297   : > { %v2261_v30 = vpop.f32.mrb[60].mxu0  ;;  %v3763_v59 = vmax.f32 %v3099_v61, 0.0  ;;  %v1355_v17 = vadd.f32 %v1291_v52, %v967_v13  ;;  %v17005_v52 = vld [vmem:[%s23562_s9 + $0x80] ss:$16 sps:$4 sm:$0xff]  }
 0x298   : > { %v2263_v34 = vpop.f32.mrb[61].mxu0  ;;  %v1199_v18 = vpop.permute.xlu1 %1198  ;;  %v2262_v44 = vadd.f32 %v2261_v30, %v18412_v24  ;;  %v19022_v2 = vpack.c.bf16 %v3762_v45, %v3758_v58  ;;  %6633 = vmatpush1.bf16.msra.mxu1 %v17005_v52 }
 0x299   : > { %v2265_v39 = vpop.f32.mrb[62].mxu0  ;;  %v2264_v1 = vadd.f32 %v2263_v34, %v18415_v25  ;;  %v19025_v38 = vpack.c.bf16 %v3763_v59, %v3759_v6  ;;  %v1292_v47 = vmul.f32 %v17956_v3, %v1199_v18  ;;  %v1743_v58 = vadd.f32 %v1679_v28, %v1355_v17 }
 0x29a   : > { %23686 = vst [vmem:[#allocation12_spill] sm:$0xff] %v19022_v2  ;;  %v2267_v40 = vpop.f32.mrb[63].mxu0  ;;  %v2266_v61 = vadd.f32 %v2265_v39, %v18412_v24  ;;  %v2490_v45 = vmax.f32 %v2262_v44, 0.0 }
 0x29b   : > { %23687 = vst [vmem:[#allocation13_spill] sm:$0xff] %v19025_v38  ;;  %v2268_v13 = vadd.f32 %v2267_v40, %v18415_v25  ;;  %v2491_v6 = vmax.f32 %v2264_v1, 0.0  ;;  %v1356_v59 = vadd.f32 %v1292_v47, %v968_v16  ;;  %v1814_v38 = vadd.f32 %v18809_v56, %v1743_v58 }
 0x29c   : > { %v2492_v30 = vmax.f32 %v2266_v61, 0.0 }
 0x29d   : > { %v1587_v0 = vpop.permute.xlu1 %1586  ;;  %v2493_v18 = vmax.f32 %v2268_v13, 0.0  ;;  %v1878_v1 = vmax.f32 %v1814_v38, 0.0  ;;  %v1591_v38 = vpop.permute.xlu0 %1590 }
 0x29e   : > { %v1680_v34 = vmul.f32 %v17959_v4, %v1587_v0  ;;  %v19039_v39 = vpack.c.bf16 %v2492_v30, %v2490_v45 }
 0x29f   : > { %v19041_v2 = vpack.c.bf16 %v2493_v18, %v2491_v6 }
 0x2a0   : > { %23688 = vst [vmem:[#allocation14_spill] sm:$0xff] %v19039_v39  ;;  %v1744_v55 = vadd.f32 %v1680_v34, %v1356_v59 }
 0x2a1   : > { %3210 = vmatprep.mubr.bf16.mxu1 %v19041_v2 }
 0x2a2   : > { %v1815_v17 = vadd.f32 %v18809_v56, %v1744_v55  ;;  %3211 = vmatmul.mubr.bf16.gmra.mrb[60].mxu1 %v19039_v39  ;;  %v872_v28 = vpop.permute.xlu1 %871 }
 0x2a3   : > { %v969_v0 = vmul.f32 %v17962_v5, %v872_v28 }
 0x2a4   : > { %v1879_v44 = vmax.f32 %v1815_v17, 0.0  ;;  %v3102_v40 = vpop.f32.mrb[16].mxu1  ;;  %v17008_v17 = vld [vmem:[%s23562_s9 + $0xa0] ss:$16 sps:$4 sm:$0xff]  }
 0x2a5   : > { %v3103_v16 = vadd.f32 %v3102_v40, %v18904_v27  ;;  %v3104_v47 = vpop.f32.mrb[17].mxu1 }
 0x2a6   : > { %v1915_v61 = vpack.c.bf16 %v1879_v44, %v1878_v1  ;;  %v3105_v52 = vadd.f32 %v3104_v47, %v18912_v32  ;;  %v3106_v19 = vpop.f32.mrb[18].mxu1  ;;  %v17010_v1 = vld [vmem:[%s23562_s9 + $0xa4] ss:$16 sps:$4 sm:$0xff]   ;;  %v1681_v47 = vmul.f32 %v17959_v4, %v1591_v38 }
 0x2a7   : > { %v3107_v13 = vadd.f32 %v3106_v19, %v18904_v27  ;;  %v3108_v58 = vpop.f32.mrb[19].mxu1  ;;  %v1203_v45 = vpop.permute.xlu1 %1202  ;;  %v3766_v18 = vmax.f32 %v3103_v16, 0.0  ;;  %6634 = vmatprep.subr.bf16.mxu1 %v17010_v1 }
 0x2a8   : > { %v3109_v30 = vadd.f32 %v3108_v58, %v18912_v32  ;;  %v1293_v55 = vmul.f32 %v17956_v3, %v1203_v45  ;;  %14316 = vmatmul.mubr.msk.bf16.gmra.mrb[108].mxu0 %vm1980_vm0, %v1915_v61  ;;  %v3767_v6 = vmax.f32 %v3105_v52, 0.0  ;;  %v970_v45 = vmul.f32 %v17962_v5, %v18989_v57  ;;  %6635 = vmatpush1.bf16.msra.mxu1 %v17008_v17 }
 0x2a9   : > { %2389 = vmatprep.mubr.bf16.mxu0 %v23683_v62  ;;  %v3770_v59 = vmax.f32 %v3107_v13, 0.0 }
 0x2aa   : > { %v2271_v34 = vpop.f32.mrb[64].mxu0  ;;  %v3771_v44 = vmax.f32 %v3109_v30, 0.0  ;;  %v1357_v40 = vadd.f32 %v1293_v55, %v969_v0 }
 0x2ab   : > { %v2273_v61 = vpop.f32.mrb[65].mxu0  ;;  %v1207_v28 = vpop.permute.xlu1 %1206  ;;  %v2272_v19 = vadd.f32 %v2271_v34, %v18412_v24  ;;  %v19063_v52 = vpack.c.bf16 %v3770_v59, %v3766_v18 }
 0x2ac   : > { %v2275_v16 = vpop.f32.mrb[66].mxu0  ;;  %v2274_v13 = vadd.f32 %v2273_v61, %v18415_v25  ;;  %v19066_v58 = vpack.c.bf16 %v3771_v44, %v3767_v6  ;;  %v1294_v30 = vmul.f32 %v17956_v3, %v1207_v28  ;;  %v1745_v34 = vadd.f32 %v1681_v47, %v1357_v40 }
 0x2ad   : > { %23689 = vst [vmem:[#allocation15_spill] sm:$0xff] %v19063_v52  ;;  %v2277_v55 = vpop.f32.mrb[67].mxu0  ;;  %v2276_v38 = vadd.f32 %v2275_v16, %v18412_v24  ;;  %v2494_v18 = vmax.f32 %v2272_v19, 0.0 }
 0x2ae   : > { %23690 = vst [vmem:[#allocation16_spill] sm:$0xff] %v19066_v58  ;;  %v2278_v0 = vadd.f32 %v2277_v55, %v18415_v25  ;;  %v2495_v39 = vmax.f32 %v2274_v13, 0.0  ;;  %v1358_v1 = vadd.f32 %v1294_v30, %v970_v45  ;;  %v1816_v28 = vadd.f32 %v18809_v56, %v1745_v34  ;;  %v17011_v55 = vld [vmem:[%s23562_s9 + $0xc0] ss:$16 sps:$4 sm:$0xff]  }
 0x2af   : > { %v2496_v59 = vmax.f32 %v2276_v38, 0.0 }
 0x2b0   : > { %v1595_v52 = vpop.permute.xlu1 %1594  ;;  %v2497_v61 = vmax.f32 %v2278_v0, 0.0  ;;  %v1880_v47 = vmax.f32 %v1816_v28, 0.0 }
 0x2b1   : > { %v1682_v6 = vmul.f32 %v17959_v4, %v1595_v52  ;;  %v19074_v44 = vpack.c.bf16 %v2496_v59, %v2494_v18 }
 0x2b2   : > { %v19076_v57 = vpack.c.bf16 %v2497_v61, %v2495_v39  ;;  %v1599_v61 = vpop.permute.xlu0 %1598 }
 0x2b3   : > { %23691 = vst [vmem:[#allocation17_spill] sm:$0xff] %v19074_v44  ;;  %v1746_v58 = vadd.f32 %v1682_v6, %v1358_v1 }
 0x2b4   : > { %3220 = vmatprep.mubr.bf16.mxu1 %v19076_v57 }
 0x2b5   : > { %v1817_v17 = vadd.f32 %v18809_v56, %v1746_v58  ;;  %3221 = vmatmul.mubr.bf16.gmra.mrb[64].mxu1 %v19074_v44  ;;  %v882_v40 = vpop.permute.xlu1 %881  ;;  %v17013_v58 = vld [vmem:[%s23562_s9 + $0xc4] ss:$16 sps:$4 sm:$0xff]  }
 0x2b6   : > { %6636 = vmatprep.subr.bf16.mxu1 %v17013_v58  ;;  %v971_v1 = vmul.f32 %v17962_v5, %v882_v40 }
 0x2b7   : > { %v1881_v19 = vmax.f32 %v1817_v17, 0.0  ;;  %v3112_v16 = vpop.f32.mrb[20].mxu1  ;;  %6637 = vmatpush1.bf16.msra.mxu1 %v17011_v55 }
 0x2b8   : > { %v3113_v13 = vadd.f32 %v3112_v16, %v18904_v27  ;;  %v3114_v52 = vpop.f32.mrb[21].mxu1 }
 0x2b9   : > { %v1916_v45 = vpack.c.bf16 %v1881_v19, %v1880_v47  ;;  %v3115_v39 = vadd.f32 %v3114_v52, %v18912_v32  ;;  %v3116_v30 = vpop.f32.mrb[22].mxu1  ;;  %v1683_v52 = vmul.f32 %v17959_v4, %v1599_v61 }
 0x2ba   : > { %v3117_v38 = vadd.f32 %v3116_v30, %v18904_v27  ;;  %v3118_v0 = vpop.f32.mrb[23].mxu1  ;;  %v1211_v34 = vpop.permute.xlu1 %1210  ;;  %v3774_v6 = vmax.f32 %v3113_v13, 0.0 }
 0x2bb   : > { %v3119_v18 = vadd.f32 %v3118_v0, %v18912_v32  ;;  %v1295_v59 = vmul.f32 %v17956_v3, %v1211_v34  ;;  %14317 = vmatmul.mubr.msk.bf16.gmra.mrb[112].mxu0 %vm1980_vm0, %v1916_v45  ;;  %v3775_v47 = vmax.f32 %v3115_v39, 0.0 }
 0x2bc   : > { %2399 = vmatprep.mubr.bf16.mxu0 %v23683_v62  ;;  %v3778_v28 = vmax.f32 %v3117_v38, 0.0 }
 0x2bd   : > { %v2281_v17 = vpop.f32.mrb[68].mxu0  ;;  %v3779_v19 = vmax.f32 %v3119_v18, 0.0  ;;  %v1359_v16 = vadd.f32 %v1295_v59, %v971_v1  ;;  %v972_v18 = vmul.f32 %v17962_v5, %v19010_v31  ;;  %v17016_v31 = vld [vmem:[%s23562_s9 + $0xe4] ss:$16 sps:$4 sm:$0xff]  }
 0x2be   : > { %v2283_v30 = vpop.f32.mrb[69].mxu0  ;;  %v1215_v0 = vpop.permute.xlu1 %1214  ;;  %v2282_v34 = vadd.f32 %v2281_v17, %v18412_v24  ;;  %v19098_v45 = vpack.c.bf16 %v3778_v28, %v3774_v6  ;;  %6638 = vmatprep.subr.bf16.mxu1 %v17016_v31 }
 0x2bf   : > { %v2285_v58 = vpop.f32.mrb[70].mxu0  ;;  %v2284_v40 = vadd.f32 %v2283_v30, %v18415_v25  ;;  %v19101_v44 = vpack.c.bf16 %v3779_v19, %v3775_v47  ;;  %v1296_v13 = vmul.f32 %v17956_v3, %v1215_v0  ;;  %v1747_v59 = vadd.f32 %v1683_v52, %v1359_v16  ;;  %v17014_v0 = vld [vmem:[%s23562_s9 + $0xe0] ss:$16 sps:$4 sm:$0xff]  }
 0x2c0   : > { %23692 = vst [vmem:[#allocation18_spill] sm:$0xff] %v19098_v45  ;;  %v2287_v55 = vpop.f32.mrb[71].mxu0  ;;  %v2286_v39 = vadd.f32 %v2285_v58, %v18412_v24  ;;  %v2498_v61 = vmax.f32 %v2282_v34, 0.0  ;;  %6639 = vmatpush1.bf16.msra.mxu1 %v17014_v0 }
 0x2c1   : > { %23693 = vst [vmem:[#allocation19_spill] sm:$0xff] %v19101_v44  ;;  %v2288_v38 = vadd.f32 %v2287_v55, %v18415_v25  ;;  %v2499_v28 = vmax.f32 %v2284_v40, 0.0  ;;  %v1360_v45 = vadd.f32 %v1296_v13, %v972_v18  ;;  %v1818_v16 = vadd.f32 %v18809_v56, %v1747_v59 }
 0x2c2   : > { %v2500_v1 = vmax.f32 %v2286_v39, 0.0 }
 0x2c3   : > { %v1603_v6 = vpop.permute.xlu1 %1602  ;;  %v2501_v17 = vmax.f32 %v2288_v38, 0.0  ;;  %v1882_v40 = vmax.f32 %v1818_v16, 0.0 }
 0x2c4   : > { %v1684_v47 = vmul.f32 %v17959_v4, %v1603_v6  ;;  %v19109_v19 = vpack.c.bf16 %v2500_v1, %v2498_v61  ;;  %v1607_v61 = vpop.permute.xlu0 %1606 }
 0x2c5   : > { %v19111_v30 = vpack.c.bf16 %v2501_v17, %v2499_v28 }
 0x2c6   : > { %23694 = vst [vmem:[#allocation20_spill] sm:$0xff] %v19109_v19  ;;  %v1748_v52 = vadd.f32 %v1684_v47, %v1360_v45 }
 0x2c7   : > { %23695 = vst [vmem:[#allocation21_spill] sm:$0xff] %v19111_v30  ;;  %3230 = vmatprep.mubr.bf16.mxu1 %v19111_v30 }
 0x2c8   : > { %v1819_v34 = vadd.f32 %v18809_v56, %v1748_v52  ;;  %3231 = vmatmul.mubr.bf16.gmra.mrb[68].mxu1 %v19109_v19  ;;  %v892_v58 = vpop.permute.xlu1 %891 }
 0x2c9   : > { %v973_v0 = vmul.f32 %v17962_v5, %v892_v58  ;;  %v1685_v58 = vmul.f32 %v17959_v4, %v1607_v61 }
 0x2ca   : > { %v1883_v13 = vmax.f32 %v1819_v34, 0.0  ;;  %v3122_v55 = vpop.f32.mrb[24].mxu1  ;;  %v897_v34 = vpop.permute.xlu0 %896 }
 0x2cb   : > { %v3123_v39 = vadd.f32 %v3122_v55, %v18904_v27  ;;  %v3124_v38 = vpop.f32.mrb[25].mxu1 }
 0x2cc   : > { %v1917_v18 = vpack.c.bf16 %v1883_v13, %v1882_v40  ;;  %v3125_v59 = vadd.f32 %v3124_v38, %v18912_v32  ;;  %v3126_v45 = vpop.f32.mrb[26].mxu1 }
 0x2cd   : > { %v3127_v1 = vadd.f32 %v3126_v45, %v18904_v27  ;;  %v3128_v6 = vpop.f32.mrb[27].mxu1  ;;  %v1219_v28 = vpop.permute.xlu1 %1218  ;;  %v3782_v31 = vmax.f32 %v3123_v39, 0.0  ;;  %v974_v39 = vmul.f32 %v17962_v5, %v897_v34  ;;  %v17017_v34 = vld [vmem:[%s23562_s9 + $0x100] ss:$16 sps:$4 sm:$0xff]  }
 0x2ce   : > { %v3129_v17 = vadd.f32 %v3128_v6, %v18912_v32  ;;  %v1297_v47 = vmul.f32 %v17956_v3, %v1219_v28  ;;  %14318 = vmatmul.mubr.msk.bf16.gmra.mrb[116].mxu0 %vm1980_vm0, %v1917_v18  ;;  %v3783_v40 = vmax.f32 %v3125_v59, 0.0 }
 0x2cf   : > { %2409 = vmatprep.mubr.bf16.mxu0 %v23683_v62  ;;  %v3786_v16 = vmax.f32 %v3127_v1, 0.0 }
 0x2d0   : > { %v2291_v52 = vpop.f32.mrb[72].mxu0  ;;  %v3787_v13 = vmax.f32 %v3129_v17, 0.0  ;;  %v1361_v55 = vadd.f32 %v1297_v47, %v973_v0 }
 0x2d1   : > { %v2293_v38 = vpop.f32.mrb[73].mxu0  ;;  %v1223_v45 = vpop.permute.xlu1 %1222  ;;  %v2292_v44 = vadd.f32 %v2291_v52, %v18412_v24  ;;  %v19132_v6 = vpack.c.bf16 %v3786_v16, %v3782_v31 }
 0x2d2   : > { %v2295_v28 = vpop.f32.mrb[74].mxu0  ;;  %v2294_v18 = vadd.f32 %v2293_v38, %v18415_v25  ;;  %v19135_v19 = vpack.c.bf16 %v3787_v13, %v3783_v40  ;;  %v1298_v1 = vmul.f32 %v17956_v3, %v1223_v45  ;;  %v1749_v0 = vadd.f32 %v1685_v58, %v1361_v55  ;;  %v17019_v55 = vld [vmem:[%s23562_s9 + $0x104] ss:$16 sps:$4 sm:$0xff]  }
 0x2d3   : > { %23696 = vst [vmem:[#allocation22_spill] sm:$0xff] %v19132_v6  ;;  %v2297_v59 = vpop.f32.mrb[75].mxu0  ;;  %v2296_v17 = vadd.f32 %v2295_v28, %v18412_v24  ;;  %v2502_v52 = vmax.f32 %v2292_v44, 0.0  ;;  %6640 = vmatprep.subr.bf16.mxu1 %v17019_v55 }
 0x2d4   : > { %23697 = vst [vmem:[#allocation23_spill] sm:$0xff] %v19135_v19  ;;  %v2298_v47 = vadd.f32 %v2297_v59, %v18415_v25  ;;  %v2503_v6 = vmax.f32 %v2294_v18, 0.0  ;;  %v1362_v38 = vadd.f32 %v1298_v1, %v974_v39  ;;  %v1820_v44 = vadd.f32 %v18809_v56, %v1749_v0  ;;  %6641 = vmatpush1.bf16.msra.mxu1 %v17017_v34 }
 0x2d5   : > { %v2504_v31 = vmax.f32 %v2296_v17, 0.0 }
 0x2d6   : > { %v1611_v16 = vpop.permute.xlu1 %1610  ;;  %v2505_v30 = vmax.f32 %v2298_v47, 0.0  ;;  %v1884_v18 = vmax.f32 %v1820_v44, 0.0 }
 0x2d7   : > { %v1686_v40 = vmul.f32 %v17959_v4, %v1611_v16  ;;  %v19143_v13 = vpack.c.bf16 %v2504_v31, %v2502_v52 }
 0x2d8   : > { %v19145_v61 = vpack.c.bf16 %v2505_v30, %v2503_v6  ;;  %v907_v6 = vpop.permute.xlu0 %906 }
 0x2d9   : > { %v1750_v45 = vadd.f32 %v1686_v40, %v1362_v38 }
 0x2da   : > { %3240 = vmatprep.mubr.bf16.mxu1 %v19145_v61 }
 0x2db   : > { %v1821_v28 = vadd.f32 %v18809_v56, %v1750_v45  ;;  %3241 = vmatmul.mubr.bf16.gmra.mrb[72].mxu1 %v19143_v13  ;;  %v902_v30 = vpop.permute.xlu1 %901 }
 0x2dc   : > { %v1615_v40 = vpop.permute.xlu0 %1614  ;;  %v975_v34 = vmul.f32 %v17962_v5, %v902_v30 }
 0x2dd   : > { %v1885_v58 = vmax.f32 %v1821_v28, 0.0  ;;  %v3132_v39 = vpop.f32.mrb[28].mxu1 }
 0x2de   : > { %v3133_v1 = vadd.f32 %v3132_v39, %v18904_v27  ;;  %v3134_v59 = vpop.f32.mrb[29].mxu1  ;;  %v1687_v39 = vmul.f32 %v17959_v4, %v1615_v40 }
 0x2df   : > { %v1918_v17 = vpack.c.bf16 %v1885_v58, %v1884_v18  ;;  %v3135_v47 = vadd.f32 %v3134_v59, %v18912_v32  ;;  %v3136_v0 = vpop.f32.mrb[30].mxu1 }
 0x2e0   : > { %v3137_v52 = vadd.f32 %v3136_v0, %v18904_v27  ;;  %v3138_v31 = vpop.f32.mrb[31].mxu1  ;;  %v1227_v16 = vpop.permute.xlu1 %1226  ;;  %v3790_v55 = vmax.f32 %v3133_v1, 0.0 }
 0x2e1   : > { %v3139_v56 = vadd.f32 %v3138_v31, %v18912_v32  ;;  %v1299_v38 = vmul.f32 %v17956_v3, %v1227_v16  ;;  %14319 = vmatmul.mubr.msk.bf16.gmra.mrb[120].mxu0 %vm1980_vm0, %v1918_v17  ;;  %v3791_v28 = vmax.f32 %v3135_v47, 0.0 }
 0x2e2   : > { %2419 = vmatprep.mubr.bf16.mxu0 %v23683_v62  ;;  %v3794_v44 = vmax.f32 %v3137_v52, 0.0 }
 0x2e3   : > { %v2301_v45 = vpop.f32.mrb[76].mxu0  ;;  %v3795_v18 = vmax.f32 %v3139_v56, 0.0  ;;  %v1363_v58 = vadd.f32 %v1299_v38, %v975_v34  ;;  %v976_v38 = vmul.f32 %v17962_v5, %v907_v6 }
 0x2e4   : > { %v2303_v59 = vpop.f32.mrb[77].mxu0  ;;  %v1231_v0 = vpop.permute.xlu1 %1230  ;;  %v2302_v31 = vadd.f32 %v2301_v45, %v18412_v24  ;;  %v19167_v16 = vpack.c.bf16 %v3794_v44, %v3790_v55 }
 0x2e5   : > { %v2305_v17 = vpop.f32.mrb[78].mxu0  ;;  %v2304_v19 = vadd.f32 %v2303_v59, %v18415_v25  ;;  %v19170_v30 = vpack.c.bf16 %v3795_v18, %v3791_v28  ;;  %v1300_v1 = vmul.f32 %v17956_v3, %v1231_v0  ;;  %v1751_v40 = vadd.f32 %v1687_v39, %v1363_v58  ;;  %v17020_v28 = vld [vmem:[%s23562_s9 + $0x120] ss:$16 sps:$4 sm:$0xff]   ;;  %v17022_v3 = vld [vmem:[%s23562_s9 + $0x124] ss:$16 sps:$4 sm:$0xff]  }
 0x2e6   : > { %v2307_v52 = vpop.f32.mrb[79].mxu0  ;;  %v2306_v47 = vadd.f32 %v2305_v17, %v18412_v24  ;;  %v2506_v34 = vmax.f32 %v2302_v31, 0.0  ;;  %6642 = vmatprep.subr.bf16.mxu1 %v17022_v3 }
 0x2e7   : > { %v2308_v56 = vadd.f32 %v2307_v52, %v18415_v25  ;;  %v2507_v55 = vmax.f32 %v2304_v19, 0.0  ;;  %v1364_v18 = vadd.f32 %v1300_v1, %v976_v38  ;;  %v17685_v19 = vld [vmem:[%s23556_s3] ss:$0 sm:$0xff]  ;;  %6643 = vmatpush1.bf16.msra.mxu1 %v17020_v28 }
 0x2e8   : > { %v2508_v62 = vmax.f32 %v2306_v47, 0.0  ;;  %v1822_v6 = vadd.f32 %v17685_v19, %v1751_v40 }
 0x2e9   : > { %v1619_v45 = vpop.permute.xlu1 %1618  ;;  %v2509_v44 = vmax.f32 %v2308_v56, 0.0 }
 0x2ea   : > { %v1688_v59 = vmul.f32 %v17959_v4, %v1619_v45  ;;  %v19183_v0 = vpack.c.bf16 %v2508_v62, %v2506_v34  ;;  %v1886_v31 = vmax.f32 %v1822_v6, 0.0 }
 0x2eb   : > { %v19185_v5 = vpack.c.bf16 %v2509_v44, %v2507_v55 }
 0x2ec   : > { %v1752_v58 = vadd.f32 %v1688_v59, %v1364_v18 }
 0x2ed   : > { %3250 = vmatprep.mubr.bf16.mxu1 %v19185_v5 }
 0x2ee   : > { %v1823_v39 = vadd.f32 %v17685_v19, %v1752_v58  ;;  %3251 = vmatmul.mubr.bf16.gmra.mrb[76].mxu1 %v19183_v0 }
 0x2f0   : > { %v1887_v17 = vmax.f32 %v1823_v39, 0.0  ;;  %v3142_v4 = vpop.f32.mrb[32].mxu1 }
 0x2f1   : > { %v3143_v62 = vadd.f32 %v3142_v4, %v18904_v27  ;;  %v3144_v1 = vpop.f32.mrb[33].mxu1  ;;  %v17025_v4 = vld [vmem:[%s23562_s9 + $0x144] ss:$16 sps:$4 sm:$0xff]  }
 0x2f2   : > { %v1919_v52 = vpack.c.bf16 %v1887_v17, %v1886_v31  ;;  %v3145_v47 = vadd.f32 %v3144_v1, %v18912_v32  ;;  %v3146_v56 = vpop.f32.mrb[34].mxu1  ;;  %6644 = vmatprep.subr.bf16.mxu1 %v17025_v4 }
 0x2f3   : > { %v3147_v38 = vadd.f32 %v3146_v56, %v18904_v27  ;;  %v3148_v40 = vpop.f32.mrb[35].mxu1  ;;  %v3798_v45 = vmax.f32 %v3143_v62, 0.0 }
 0x2f4   : > { %v3149_v34 = vadd.f32 %v3148_v40, %v18912_v32  ;;  %14320 = vmatmul.mubr.msk.bf16.gmra.mrb[124].mxu0 %vm1980_vm0, %v1919_v52  ;;  %v3799_v28 = vmax.f32 %v3145_v47, 0.0 }
 0x2f5   : > { %3413 = vmatprep.mubr.bf16.mxu0 %v18442_v11  ;;  %v3802_v55 = vmax.f32 %v3147_v38, 0.0  ;;  %v17023_v11 = vld [vmem:[%s23562_s9 + $0x140] ss:$16 sps:$4 sm:$0xff]  }
 0x2f6   : > { %v2311_v44 = vpop.f32.mrb[80].mxu0  ;;  %v3803_v3 = vmax.f32 %v3149_v34, 0.0  ;;  %6645 = vmatpush1.bf16.msra.mxu1 %v17023_v11 }
 0x2f7   : > { %v2313_v18 = vpop.f32.mrb[81].mxu0  ;;  %v2312_v59 = vadd.f32 %v2311_v44, %v18412_v24  ;;  %v19199_v19 = vpack.c.bf16 %v3802_v55, %v3798_v45 }
 0x2f8   : > { %v2315_v6 = vpop.f32.mrb[82].mxu0  ;;  %v2314_v58 = vadd.f32 %v2313_v18, %v18415_v25  ;;  %v19202_v39 = vpack.c.bf16 %v3803_v3, %v3799_v28 }
 0x2f9   : > { %v2317_v31 = vpop.f32.mrb[83].mxu0  ;;  %v2316_v17 = vadd.f32 %v2315_v6, %v18412_v24  ;;  %v2510_v1 = vmax.f32 %v2312_v59, 0.0 }
 0x2fa   : > { %v2318_v62 = vadd.f32 %v2317_v31, %v18415_v25  ;;  %v2511_v47 = vmax.f32 %v2314_v58, 0.0 }
 0x2fb   : > { %v2512_v52 = vmax.f32 %v2316_v17, 0.0 }
 0x2fc   : > { %3414 = vmatmul.mubr.bf16.vlgmr.msra.gmra.mrb[128].mxu0 %v18440_v21  ;;  %v2513_v56 = vmax.f32 %v2318_v62, 0.0 }
 0x2fd   : > { %3423 = vmatprep.mubr.bf16.mxu0 %v18467_v15  ;;  %v19214_v38 = vpack.c.bf16 %v2512_v52, %v2510_v1 }
 0x2fe   : > { %v19216_v40 = vpack.c.bf16 %v2513_v56, %v2511_v47 }
 0x300   : > { %3260 = vmatprep.mubr.bf16.mxu1 %v19216_v40 }
 0x301   : > { %3261 = vmatmul.mubr.bf16.gmra.mrb[80].mxu1 %v19214_v38 }
 0x303   : > { %v3152_v34 = vpop.f32.mrb[36].mxu1 }
 0x304   : > { %v3153_v45 = vadd.f32 %v3152_v34, %v18904_v27  ;;  %v3154_v55 = vpop.f32.mrb[37].mxu1  ;;  %3424 = vmatmul.mubr.bf16.gmra.mrb[132].mxu0 %v18462_v14  ;;  %v17026_v14 = vld [vmem:[%s23562_s9 + $0x160] ss:$16 sps:$4 sm:$0xff]  }
 0x305   : > { %v3155_v21 = vadd.f32 %v3154_v55, %v18912_v32  ;;  %v3156_v44 = vpop.f32.mrb[38].mxu1  ;;  %3433 = vmatprep.mubr.bf16.mxu0 %v18484_v22  ;;  %v17028_v22 = vld [vmem:[%s23562_s9 + $0x164] ss:$16 sps:$4 sm:$0xff]  }
 0x306   : > { %v3157_v15 = vadd.f32 %v3156_v44, %v18904_v27  ;;  %v3158_v28 = vpop.f32.mrb[39].mxu1  ;;  %v3806_v18 = vmax.f32 %v3153_v45, 0.0  ;;  %6646 = vmatprep.subr.bf16.mxu1 %v17028_v22 }
 0x307   : > { %v3159_v3 = vadd.f32 %v3158_v28, %v18912_v32  ;;  %v3807_v58 = vmax.f32 %v3155_v21, 0.0  ;;  %6647 = vmatpush1.bf16.msra.mxu1 %v17026_v14 }
 0x308   : > { %v3810_v59 = vmax.f32 %v3157_v15, 0.0 }
 0x309   : > { %v2321_v6 = vpop.f32.mrb[84].mxu0  ;;  %v3811_v31 = vmax.f32 %v3159_v3, 0.0 }
 0x30a   : > { %v2323_v17 = vpop.f32.mrb[85].mxu0  ;;  %v2322_v11 = vadd.f32 %v2321_v6, %v18412_v24  ;;  %v19233_v4 = vpack.c.bf16 %v3810_v59, %v3806_v18 }
 0x30b   : > { %v2325_v62 = vpop.f32.mrb[86].mxu0  ;;  %v2324_v1 = vadd.f32 %v2323_v17, %v18415_v25  ;;  %v19236_v52 = vpack.c.bf16 %v3811_v31, %v3807_v58  ;;  %v17029_v31 = vld [vmem:[%s23562_s9 + $0x180] ss:$16 sps:$4 sm:$0xff]  }
 0x30c   : > { %v2327_v47 = vpop.f32.mrb[87].mxu0  ;;  %3434 = vmatmul.mubr.bf16.gmra.mrb[136].mxu0 %v18481_v41  ;;  %v2326_v56 = vadd.f32 %v2325_v62, %v18412_v24  ;;  %v2514_v45 = vmax.f32 %v2322_v11, 0.0 }
 0x30d   : > { %3443 = vmatprep.mubr.bf16.mxu0 %v18512_v46  ;;  %v2328_v34 = vadd.f32 %v2327_v47, %v18415_v25  ;;  %v2515_v21 = vmax.f32 %v2324_v1, 0.0 }
 0x30e   : > { %v2516_v55 = vmax.f32 %v2326_v56, 0.0 }
 0x30f   : > { %v2517_v44 = vmax.f32 %v2328_v34, 0.0 }
 0x310   : > { %v19242_v15 = vpack.c.bf16 %v2516_v55, %v2514_v45 }
 0x311   : > { %v19244_v28 = vpack.c.bf16 %v2517_v44, %v2515_v21 }
 0x313   : > { %3270 = vmatprep.mubr.bf16.mxu1 %v19244_v28 }
 0x314   : > { %3271 = vmatmul.mubr.bf16.gmra.mrb[84].mxu1 %v19242_v15  ;;  %3444 = vmatmul.mubr.bf16.gmra.mrb[140].mxu0 %v18510_v23  ;;  %v17031_v23 = vld [vmem:[%s23562_s9 + $0x184] ss:$16 sps:$4 sm:$0xff]  }
 0x315   : > { %3453 = vmatprep.mubr.bf16.mxu0 %v18544_v9  ;;  %6648 = vmatprep.subr.bf16.mxu1 %v17031_v23 }
 0x316   : > { %v3162_v41 = vpop.f32.mrb[40].mxu1  ;;  %6649 = vmatpush1.bf16.msra.mxu1 %v17029_v31 }
 0x317   : > { %v3163_v46 = vadd.f32 %v3162_v41, %v18904_v27  ;;  %v3164_v3 = vpop.f32.mrb[41].mxu1 }
 0x318   : > { %v3165_v18 = vadd.f32 %v3164_v3, %v18912_v32  ;;  %v3166_v59 = vpop.f32.mrb[42].mxu1 }
 0x319   : > { %v3167_v6 = vadd.f32 %v3166_v59, %v18904_v27  ;;  %v3168_v58 = vpop.f32.mrb[43].mxu1  ;;  %v3814_v17 = vmax.f32 %v3163_v46, 0.0 }
 0x31a   : > { %v3169_v9 = vadd.f32 %v3168_v58, %v18912_v32  ;;  %v3815_v22 = vmax.f32 %v3165_v18, 0.0  ;;  %v17034_v58 = vld [vmem:[%s23562_s9 + $0x1a4] ss:$16 sps:$4 sm:$0xff]  }
 0x31b   : > { %v3818_v11 = vmax.f32 %v3167_v6, 0.0  ;;  %v17032_v6 = vld [vmem:[%s23562_s9 + $0x1a0] ss:$16 sps:$4 sm:$0xff]   ;;  %6650 = vmatprep.subr.bf16.mxu1 %v17034_v58 }
 0x31c   : > { %v2331_v14 = vpop.f32.mrb[88].mxu0  ;;  %3454 = vmatmul.mubr.bf16.gmra.mrb[144].mxu0 %v18542_v33  ;;  %v3819_v62 = vmax.f32 %v3169_v9, 0.0  ;;  %6651 = vmatpush1.bf16.msra.mxu1 %v17032_v6 }
 0x31d   : > { %v2333_v1 = vpop.f32.mrb[89].mxu0  ;;  %3463 = vmatprep.mubr.bf16.mxu0 %v18583_v20  ;;  %v2332_v47 = vadd.f32 %v2331_v14, %v18412_v24  ;;  %v19263_v56 = vpack.c.bf16 %v3818_v11, %v3814_v17 }
 0x31e   : > { %v2335_v34 = vpop.f32.mrb[90].mxu0  ;;  %v2334_v45 = vadd.f32 %v2333_v1, %v18415_v25  ;;  %v19266_v55 = vpack.c.bf16 %v3819_v62, %v3815_v22 }
 0x31f   : > { %v2337_v21 = vpop.f32.mrb[91].mxu0  ;;  %v2336_v44 = vadd.f32 %v2335_v34, %v18412_v24  ;;  %v2518_v41 = vmax.f32 %v2332_v47, 0.0 }
 0x320   : > { %v2338_v33 = vadd.f32 %v2337_v21, %v18415_v25  ;;  %v2519_v3 = vmax.f32 %v2334_v45, 0.0 }
 0x321   : > { %v2520_v46 = vmax.f32 %v2336_v44, 0.0 }
 0x322   : > { %v2521_v18 = vmax.f32 %v2338_v33, 0.0 }
 0x323   : > { %v19270_v59 = vpack.c.bf16 %v2520_v46, %v2518_v41 }
 0x324   : > { %3464 = vmatmul.mubr.bf16.gmra.mrb[148].mxu0 %v18581_v29  ;;  %v19273_v20 = vpack.c.bf16 %v2521_v18, %v2519_v3 }
 0x325   : > { %3473 = vmatprep.mubr.bf16.mxu0 %v18622_v48 }
 0x326   : > { %3280 = vmatprep.mubr.bf16.mxu1 %v19273_v20 }
 0x327   : > { %3281 = vmatmul.mubr.bf16.gmra.mrb[88].mxu1 %v19270_v59 }
 0x329   : > { %v3172_v31 = vpop.f32.mrb[44].mxu1 }
 0x32a   : > { %v3173_v29 = vadd.f32 %v3172_v31, %v18904_v27  ;;  %v3174_v23 = vpop.f32.mrb[45].mxu1 }
 0x32b   : > { %v3175_v48 = vadd.f32 %v3174_v23, %v18912_v32  ;;  %v3176_v9 = vpop.f32.mrb[46].mxu1 }
 0x32c   : > { %v3177_v17 = vadd.f32 %v3176_v9, %v18904_v27  ;;  %v3178_v11 = vpop.f32.mrb[47].mxu1  ;;  %3474 = vmatmul.mubr.bf16.gmra.mrb[152].mxu0 %v18620_v49  ;;  %v3822_v22 = vmax.f32 %v3173_v29, 0.0  ;;  %v17037_v9 = vld [vmem:[%s23562_s9 + $0x1c4] ss:$16 sps:$4 sm:$0xff]  }
 0x32d   : > { %v3179_v14 = vadd.f32 %v3178_v11, %v18912_v32  ;;  %3483 = vmatprep.mubr.bf16.mxu0 %v18652_v43  ;;  %v3823_v47 = vmax.f32 %v3175_v48, 0.0  ;;  %v17035_v48 = vld [vmem:[%s23562_s9 + $0x1c0] ss:$16 sps:$4 sm:$0xff]   ;;  %6652 = vmatprep.subr.bf16.mxu1 %v17037_v9 }
 0x32e   : > { %v3826_v62 = vmax.f32 %v3177_v17, 0.0  ;;  %6653 = vmatpush1.bf16.msra.mxu1 %v17035_v48  ;;  %v17040_v17 = vld [vmem:[%s23562_s9 + $0xc] ss:$16 sps:$4 sm:$0xff]  }
 0x32f   : > { %v2341_v1 = vpop.f32.mrb[92].mxu0  ;;  %v3827_v34 = vmax.f32 %v3179_v14, 0.0  ;;  %8036 = vmatprep.subr.bf16.mxu0 %v17040_v17 }
 0x330   : > { %v2343_v45 = vpop.f32.mrb[93].mxu0  ;;  %v2342_v21 = vadd.f32 %v2341_v1, %v18412_v24  ;;  %v19291_v44 = vpack.c.bf16 %v3826_v62, %v3822_v22 }
 0x331   : > { %v2345_v33 = vpop.f32.mrb[94].mxu0  ;;  %v2344_v41 = vadd.f32 %v2343_v45, %v18415_v25  ;;  %v19294_v46 = vpack.c.bf16 %v3827_v34, %v3823_v47  ;;  %v17041_v47 = vld [vmem:[%s23562_s9 + $0x28] ss:$16 sps:$4 sm:$0xff]   ;;  %v17043_v34 = vld [vmem:[%s23562_s9 + $0x2c] ss:$16 sps:$4 sm:$0xff]  }
 0x332   : > { %v2347_v49 = vpop.f32.mrb[95].mxu0  ;;  %v2346_v3 = vadd.f32 %v2345_v33, %v18412_v24  ;;  %v2522_v18 = vmax.f32 %v2342_v21, 0.0 }
 0x333   : > { %v2348_v43 = vadd.f32 %v2347_v49, %v18415_v25  ;;  %v2523_v58 = vmax.f32 %v2344_v41, 0.0 }
 0x334   : > { %3484 = vmatmul.mubr.bf16.gmra.mrb[156].mxu0 %v18650_v36  ;;  %v2524_v6 = vmax.f32 %v2346_v3, 0.0 }
 0x335   : > { %3493 = vmatprep.mubr.bf16.mxu0 %v18680_v8  ;;  %v2525_v31 = vmax.f32 %v2348_v43, 0.0  ;;  %v17038_v8 = vld [vmem:[%s23562_s9 + $0x8] ss:$16 sps:$4 sm:$0xff]  }
 0x336   : > { %v19300_v29 = vpack.c.bf16 %v2524_v6, %v2522_v18  ;;  %8037 = vmatpush1.bf16.msra.mxu0 %v17038_v8  ;;  %v17046_v8 = vld [vmem:[%s23562_s9 + $0x4c] ss:$16 sps:$4 sm:$0xff]  }
 0x337   : > { %v19302_v23 = vpack.c.bf16 %v2525_v31, %v2523_v58  ;;  %8038 = vmatprep.subr.bf16.mxu0 %v17043_v34  ;;  %v17050_v34 = vld [vmem:[%s23562_s9 + $0x1e0] ss:$16 sps:$4 sm:$0xff]  }
 0x339   : > { %3290 = vmatprep.mubr.bf16.mxu1 %v19302_v23 }
 0x33a   : > { %3291 = vmatmul.mubr.bf16.gmra.mrb[92].mxu1 %v19300_v29  ;;  %8039 = vmatpush1.bf16.msra.mxu0 %v17041_v47  ;;  %v17047_v47 = vld [vmem:[%s23562_s9 + $0x68] ss:$16 sps:$4 sm:$0xff]  }
 0x33b   : > { %8040 = vmatprep.subr.bf16.mxu0 %v17046_v8 }
 0x33c   : > { %v3182_v36 = vpop.f32.mrb[48].mxu1  ;;  %3494 = vmatmul.mubr.bf16.gmra.mrb[160].mxu0 %v18678_v50 }
 0x33d   : > { %v3183_v11 = vadd.f32 %v3182_v36, %v18904_v27  ;;  %v3184_v14 = vpop.f32.mrb[49].mxu1  ;;  %3503 = vmatprep.mubr.bf16.mxu0 %v18708_v42  ;;  %v17044_v36 = vld [vmem:[%s23562_s9 + $0x48] ss:$16 sps:$4 sm:$0xff]  }
 0x33e   : > { %v3185_v22 = vadd.f32 %v3184_v14, %v18912_v32  ;;  %v3186_v62 = vpop.f32.mrb[50].mxu1  ;;  %8041 = vmatpush1.bf16.msra.mxu0 %v17044_v36 }
 0x33f   : > { %v3187_v1 = vadd.f32 %v3186_v62, %v18904_v27  ;;  %v3188_v50 = vpop.f32.mrb[51].mxu1  ;;  %v3830_v42 = vmax.f32 %v3183_v11, 0.0 }
 0x340   : > { %v3189_v45 = vadd.f32 %v3188_v50, %v18912_v32  ;;  %v3831_v41 = vmax.f32 %v3185_v22, 0.0 }
 0x341   : > { %v3834_v21 = vmax.f32 %v3187_v1, 0.0  ;;  %v17052_v1 = vld [vmem:[%s23562_s9 + $0x1e4] ss:$16 sps:$4 sm:$0xff]  }
 0x342   : > { %v2351_v33 = vpop.f32.mrb[96].mxu0  ;;  %v3835_v49 = vmax.f32 %v3189_v45, 0.0  ;;  %6654 = vmatprep.subr.bf16.mxu1 %v17052_v1  ;;  %v17055_v45 = vld [vmem:[%s23562_s9 + $0x8c] ss:$16 sps:$4 sm:$0xff]  }
 0x343   : > { %v2353_v3 = vpop.f32.mrb[97].mxu0  ;;  %v2352_v43 = vadd.f32 %v2351_v33, %v18412_v24  ;;  %v19331_v18 = vpack.c.bf16 %v3834_v21, %v3830_v42  ;;  %6655 = vmatpush1.bf16.msra.mxu1 %v17050_v34  ;;  %v17053_v42 = vld [vmem:[%s23562_s9 + $0x88] ss:$16 sps:$4 sm:$0xff]  }
 0x344   : > { %v2355_v6 = vpop.f32.mrb[98].mxu0  ;;  %3504 = vmatmul.mubr.bf16.gmra.mrb[164].mxu0 %v18706_v51  ;;  %v2354_v58 = vadd.f32 %v2353_v3, %v18415_v25  ;;  %v19335_v31 = vpack.c.bf16 %v3835_v49, %v3831_v41 }
 0x345   : > { %v2357_v48 = vpop.f32.mrb[99].mxu0  ;;  %3513 = vmatprep.mubr.bf16.mxu0 %v18742_v54  ;;  %v2356_v9 = vadd.f32 %v2355_v6, %v18412_v24  ;;  %v2526_v51 = vmax.f32 %v2352_v43, 0.0  ;;  %v17049_v54 = vld [vmem:[%s23562_s9 + $0x6c] ss:$16 sps:$4 sm:$0xff]  }
 0x346   : > { %v2358_v17 = vadd.f32 %v2357_v48, %v18415_v25  ;;  %v2527_v14 = vmax.f32 %v2354_v58, 0.0  ;;  %8042 = vmatprep.subr.bf16.mxu0 %v17049_v54 }
 0x347   : > { %v2528_v11 = vmax.f32 %v2356_v9, 0.0  ;;  %8043 = vmatpush1.bf16.msra.mxu0 %v17047_v47  ;;  %v17061_v9 = vld [vmem:[%s23562_s9 + $0xcc] ss:$16 sps:$4 sm:$0xff]  }
 0x348   : > { %v2529_v22 = vmax.f32 %v2358_v17, 0.0  ;;  %8044 = vmatprep.subr.bf16.mxu0 %v17055_v45 }
 0x349   : > { %v19349_v62 = vpack.c.bf16 %v2528_v11, %v2526_v51  ;;  %v17059_v11 = vld [vmem:[%s23562_s9 + $0xc8] ss:$16 sps:$4 sm:$0xff]  }
 0x34a   : > { %v19354_v50 = vpack.c.bf16 %v2529_v22, %v2527_v14 }
 0x34b   : > { %8045 = vmatpush1.bf16.msra.mxu0 %v17053_v42  ;;  %v17064_v42 = vld [vmem:[%s23562_s9 + $0xec] ss:$16 sps:$4 sm:$0xff]  }
 0x34c   : > { %3300 = vmatprep.mubr.bf16.mxu1 %v19354_v50  ;;  %3514 = vmatmul.mubr.bf16.gmra.mrb[168].mxu0 %v18740_v10  ;;  %v17058_v10 = vld [vmem:[%s23562_s9 + $0xac] ss:$16 sps:$4 sm:$0xff]  }
 0x34d   : > { %3301 = vmatmul.mubr.bf16.gmra.mrb[96].mxu1 %v19349_v62  ;;  %3523 = vmatprep.mubr.bf16.mxu0 %v18801_v37  ;;  %v17056_v37 = vld [vmem:[%s23562_s9 + $0xa8] ss:$16 sps:$4 sm:$0xff]  }
 0x34e   : > { %8046 = vmatprep.subr.bf16.mxu0 %v17058_v10 }
 0x34f   : > { %8047 = vmatpush1.bf16.msra.mxu0 %v17056_v37  ;;  %v17067_v37 = vld [vmem:[%s23562_s9 + $0x204] ss:$16 sps:$4 sm:$0xff]  }
 0x350   : > { %v3192_v21 = vpop.f32.mrb[52].mxu1  ;;  %8048 = vmatprep.subr.bf16.mxu0 %v17061_v9  ;;  %6977 = vmatprep.subr.bf16.mxu1 %v17067_v37 }
 0x351   : > { %v3193_v33 = vadd.f32 %v3192_v21, %v18904_v27  ;;  %v3194_v41 = vpop.f32.mrb[53].mxu1 }
 0x352   : > { %v3195_v49 = vadd.f32 %v3194_v41, %v18912_v32  ;;  %v3196_v3 = vpop.f32.mrb[54].mxu1  ;;  %v17062_v41 = vld [vmem:[%s23562_s9 + $0xe8] ss:$16 sps:$4 sm:$0xff]  }
 0x353   : > { %v3197_v43 = vadd.f32 %v3196_v3, %v18904_v27  ;;  %v3198_v6 = vpop.f32.mrb[55].mxu1  ;;  %v3838_v36 = vmax.f32 %v3193_v33, 0.0  ;;  %8049 = vmatpush1.bf16.msra.mxu0 %v17059_v11 }
 0x354   : > { %v3199_v58 = vadd.f32 %v3198_v6, %v18912_v32  ;;  %3524 = vmatmul.mubr.bf16.gmra.mrb[172].mxu0 %v18797_v63  ;;  %v3839_v14 = vmax.f32 %v3195_v49, 0.0  ;;  %8050 = vmatprep.subr.bf16.mxu0 %v17064_v42  ;;  %v17070_v6 = vld [vmem:[%s23562_s9 + $0x10c] ss:$16 sps:$4 sm:$0xff]  }
 0x355   : > { %v2361_v48 = vpop.f32.mrb[100].mxu0  ;;  %3533 = vmatprep.mubr.bf16.mxu0 %v18872_v12  ;;  %v3842_v8 = vmax.f32 %v3197_v43, 0.0 }
 0x356   : > { %v2363_v17 = vpop.f32.mrb[101].mxu0  ;;  %v2362_v51 = vadd.f32 %v2361_v48, %v18412_v24  ;;  %v3843_v22 = vmax.f32 %v3199_v58, 0.0  ;;  %v17071_v48 = vld [vmem:[%s23562_s9 + $0x128] ss:$16 sps:$4 sm:$0xff]  }
 0x357   : > { %v2365_v63 = vpop.f32.mrb[102].mxu0  ;;  %v2364_v54 = vadd.f32 %v2363_v17, %v18415_v25  ;;  %v19392_v12 = vpack.c.bf16 %v3842_v8, %v3838_v36  ;;  %8051 = vmatpush1.bf16.msra.mxu0 %v17062_v41 }
 0x358   : > { %v2367_v1 = vpop.f32.mrb[103].mxu0  ;;  %v2366_v47 = vadd.f32 %v2365_v63, %v18412_v24  ;;  %v19395_v34 = vpack.c.bf16 %v3843_v22, %v3839_v14  ;;  %v2530_v21 = vmax.f32 %v2362_v51, 0.0  ;;  %8052 = vmatprep.subr.bf16.mxu0 %v17070_v6  ;;  %v17076_v14 = vld [vmem:[%s23562_s9 + $0x14c] ss:$16 sps:$4 sm:$0xff]   ;;  %v17074_v63 = vld [vmem:[%s23562_s9 + $0x148] ss:$16 sps:$4 sm:$0xff]  }
 0x359   : > { %v2368_v45 = vadd.f32 %v2367_v1, %v18415_v25  ;;  %v2531_v10 = vmax.f32 %v2364_v54, 0.0 }
 0x35a   : > { %v2532_v33 = vmax.f32 %v2366_v47, 0.0 }
 0x35b   : > { %v2533_v49 = vmax.f32 %v2368_v45, 0.0 }
 0x35c   : > { %3534 = vmatmul.mubr.bf16.gmra.mrb[176].mxu0 %v18867_v60  ;;  %v19405_v3 = vpack.c.bf16 %v2532_v33, %v2530_v21  ;;  %v17068_v60 = vld [vmem:[%s23562_s9 + $0x108] ss:$16 sps:$4 sm:$0xff]   ;;  %v17079_v21 = vld [vmem:[%s23562_s9 + $0x16c] ss:$16 sps:$4 sm:$0xff]  }
 0x35d   : > { %3543 = vmatprep.mubr.bf16.mxu0 %v18950_v53  ;;  %v19411_v43 = vpack.c.bf16 %v2533_v49, %v2531_v10  ;;  %v17073_v53 = vld [vmem:[%s23562_s9 + $0x12c] ss:$16 sps:$4 sm:$0xff]   ;;  %8053 = vmatpush1.bf16.msra.mxu0 %v17068_v60  ;;  %v17077_v49 = vld [vmem:[%s23562_s9 + $0x168] ss:$16 sps:$4 sm:$0xff]  }
 0x35e   : > { %8054 = vmatprep.subr.bf16.mxu0 %v17073_v53 }
 0x35f   : > { %3310 = vmatprep.mubr.bf16.mxu1 %v19411_v43 }
 0x360   : > { %3311 = vmatmul.mubr.bf16.gmra.mrb[100].mxu1 %v19405_v3 }
 0x361   : > { %8055 = vmatpush1.bf16.msra.mxu0 %v17071_v48 }
 0x362   : > { %v3202_v58 = vpop.f32.mrb[56].mxu1  ;;  %8056 = vmatprep.subr.bf16.mxu0 %v17076_v14  ;;  %v23698_v14 = vld [vmem:[#allocation14_spill] sm:$0xff] }
 0x363   : > { %v3203_v9 = vadd.f32 %v3202_v58, %v18904_v27  ;;  %v3204_v36 = vpop.f32.mrb[57].mxu1 }
 0x364   : > { %v3205_v8 = vadd.f32 %v3204_v36, %v18912_v32  ;;  %v3206_v17 = vpop.f32.mrb[58].mxu1  ;;  %3544 = vmatmul.mubr.bf16.gmra.mrb[180].mxu0 %v18939_v35 }
 0x365   : > { %v3207_v51 = vadd.f32 %v3206_v17, %v18904_v27  ;;  %v3208_v11 = vpop.f32.mrb[59].mxu1  ;;  %3553 = vmatprep.mubr.bf16.mxu0 %v19004_v7  ;;  %v3846_v54 = vmax.f32 %v3203_v9, 0.0  ;;  %8057 = vmatpush1.bf16.msra.mxu0 %v17074_v63  ;;  %v17085_v9 = vld [vmem:[%s23562_s9 + $0x18c] ss:$16 sps:$4 sm:$0xff]   ;;  %v17083_v17 = vld [vmem:[%s23562_s9 + $0x188] ss:$16 sps:$4 sm:$0xff]  }
 0x366   : > { %v3209_v22 = vadd.f32 %v3208_v11, %v18912_v32  ;;  %v3847_v47 = vmax.f32 %v3205_v8, 0.0  ;;  %8058 = vmatprep.subr.bf16.mxu0 %v17079_v21  ;;  %v17086_v11 = vld [vmem:[%s23562_s9 + $0x1a8] ss:$16 sps:$4 sm:$0xff]   ;;  %v17091_v63 = vld [vmem:[%s23562_s9 + $0x1cc] ss:$16 sps:$4 sm:$0xff]  }
 0x367   : > { %v3850_v1 = vmax.f32 %v3207_v51, 0.0  ;;  %v17094_v21 = vld [vmem:[%s23562_s9 + $0x1ec] ss:$16 sps:$4 sm:$0xff]  }
 0x368   : > { %v2371_v35 = vpop.f32.mrb[104].mxu0  ;;  %v3851_v45 = vmax.f32 %v3209_v22, 0.0 }
 0x369   : > { %v2373_v42 = vpop.f32.mrb[105].mxu0  ;;  %v2372_v7 = vadd.f32 %v2371_v35, %v18412_v24  ;;  %v19443_v33 = vpack.c.bf16 %v3850_v1, %v3846_v54  ;;  %8059 = vmatpush1.bf16.msra.mxu0 %v17077_v49  ;;  %v17089_v35 = vld [vmem:[%s23562_s9 + $0x1c8] ss:$16 sps:$4 sm:$0xff]  }
 0x36a   : > { %v2375_v41 = vpop.f32.mrb[106].mxu0  ;;  %v2374_v10 = vadd.f32 %v2373_v42, %v18415_v25  ;;  %v19449_v37 = vpack.c.bf16 %v3851_v45, %v3847_v47  ;;  %8060 = vmatprep.subr.bf16.mxu0 %v17085_v9 }
 0x36b   : > { %v2377_v6 = vpop.f32.mrb[107].mxu0  ;;  %v2376_v60 = vadd.f32 %v2375_v41, %v18412_v24  ;;  %v2534_v58 = vmax.f32 %v2372_v7, 0.0  ;;  %v17092_v41 = vld [vmem:[%s23562_s9 + $0x1e8] ss:$16 sps:$4 sm:$0xff]  }
 0x36c   : > { %3554 = vmatmul.mubr.bf16.gmra.mrb[184].mxu0 %v19002_v26  ;;  %v2378_v53 = vadd.f32 %v2377_v6, %v18415_v25  ;;  %v2535_v36 = vmax.f32 %v2374_v10, 0.0 }
 0x36d   : > { %3563 = vmatprep.mubr.bf16.mxu0 %v19041_v2  ;;  %v2536_v48 = vmax.f32 %v2376_v60, 0.0  ;;  %v17088_v2 = vld [vmem:[%s23562_s9 + $0x1ac] ss:$16 sps:$4 sm:$0xff]   ;;  %8061 = vmatpush1.bf16.msra.mxu0 %v17083_v17 }
 0x36e   : > { %v2537_v8 = vmax.f32 %v2378_v53, 0.0  ;;  %8062 = vmatprep.subr.bf16.mxu0 %v17088_v2  ;;  %v23700_v17 = vld [vmem:[#allocation21_spill] sm:$0xff] }
 0x36f   : > { %v19461_v51 = vpack.c.bf16 %v2536_v48, %v2534_v58  ;;  %v23699_v48 = vld [vmem:[#allocation17_spill] sm:$0xff] }
 0x370   : > { %v19463_v26 = vpack.c.bf16 %v2537_v8, %v2535_v36 }
 0x371   : > { %8063 = vmatpush1.bf16.msra.mxu0 %v17086_v11 }
 0x372   : > { %3320 = vmatprep.mubr.bf16.mxu1 %v19463_v26  ;;  %8064 = vmatprep.subr.bf16.mxu0 %v17091_v63 }
 0x373   : > { %3321 = vmatmul.mubr.bf16.gmra.mrb[104].mxu1 %v19461_v51 }
 0x374   : > { %3564 = vmatmul.mubr.bf16.gmra.mrb[188].mxu0 %v23698_v14 }
 0x375   : > { %v3212_v22 = vpop.f32.mrb[60].mxu1  ;;  %3573 = vmatprep.mubr.bf16.mxu0 %v19076_v57  ;;  %8065 = vmatpush1.bf16.msra.mxu0 %v17089_v35 }
 0x376   : > { %v3213_v54 = vadd.f32 %v3212_v22, %v18904_v27  ;;  %v3214_v1 = vpop.f32.mrb[61].mxu1  ;;  %8066 = vmatprep.subr.bf16.mxu0 %v17094_v21 }
 0x377   : > { %v3215_v47 = vadd.f32 %v3214_v1, %v18912_v32  ;;  %v3216_v45 = vpop.f32.mrb[62].mxu1 }
 0x378   : > { %v3217_v42 = vadd.f32 %v3216_v45, %v18904_v27  ;;  %v3218_v7 = vpop.f32.mrb[63].mxu1  ;;  %v3854_v10 = vmax.f32 %v3213_v54, 0.0 }
 0x379   : > { %v3219_v57 = vadd.f32 %v3218_v7, %v18912_v32  ;;  %v3855_v60 = vmax.f32 %v3215_v47, 0.0  ;;  %8067 = vmatpush1.bf16.msra.mxu0 %v17092_v41  ;;  %v23701_v7 = vld [vmem:[#allocation20_spill] sm:$0xff] }
 0x37a   : > { %v3858_v49 = vmax.f32 %v3217_v42, 0.0 }
 0x37b   : > { %v2381_v6 = vpop.f32.mrb[108].mxu0  ;;  %v3859_v53 = vmax.f32 %v3219_v57, 0.0 }
 0x37c   : > { %v2383_v58 = vpop.f32.mrb[109].mxu0  ;;  %3574 = vmatmul.mubr.bf16.gmra.mrb[192].mxu0 %v23699_v48  ;;  %v2382_v9 = vadd.f32 %v2381_v6, %v18412_v24  ;;  %v19493_v36 = vpack.c.bf16 %v3858_v49, %v3854_v10 }
 0x37d   : > { %v2385_v8 = vpop.f32.mrb[110].mxu0  ;;  %3583 = vmatprep.mubr.bf16.mxu0 %v23700_v17  ;;  %v2384_v2 = vadd.f32 %v2383_v58, %v18415_v25  ;;  %v19497_v11 = vpack.c.bf16 %v3859_v53, %v3855_v60 }
 0x37e   : > { %v2387_v14 = vpop.f32.mrb[111].mxu0  ;;  %v2386_v22 = vadd.f32 %v2385_v8, %v18412_v24  ;;  %v2538_v54 = vmax.f32 %v2382_v9, 0.0 }
 0x37f   : > { %v2388_v63 = vadd.f32 %v2387_v14, %v18415_v25  ;;  %v2539_v35 = vmax.f32 %v2384_v2, 0.0 }
 0x380   : > { %v2540_v1 = vmax.f32 %v2386_v22, 0.0 }
 0x381   : > { %v2541_v47 = vmax.f32 %v2388_v63, 0.0 }
 0x382   : > { %v19501_v45 = vpack.c.bf16 %v2540_v1, %v2538_v54 }
 0x383   : > { %v19503_v42 = vpack.c.bf16 %v2541_v47, %v2539_v35 }
 0x384   : > { %3584 = vmatmul.mubr.bf16.gmra.mrb[196].mxu0 %v23701_v7 }
 0x385   : > { %3330 = vmatprep.mubr.bf16.mxu1 %v19503_v42  ;;  %3593 = vmatprep.mubr.bf16.mxu0 %v19145_v61 }
 0x386   : > { %3331 = vmatmul.mubr.bf16.gmra.mrb[108].mxu1 %v19501_v45 }
 0x388   : > { %v3222_v57 = vpop.f32.mrb[64].mxu1 }
 0x389   : > { %v3223_v21 = vadd.f32 %v3222_v57, %v18904_v27  ;;  %v3224_v41 = vpop.f32.mrb[65].mxu1 }
 0x38a   : > { %v3225_v10 = vadd.f32 %v3224_v41, %v18912_v32  ;;  %v3226_v49 = vpop.f32.mrb[66].mxu1 }
 0x38b   : > { %v3227_v6 = vadd.f32 %v3226_v49, %v18904_v27  ;;  %v3228_v60 = vpop.f32.mrb[67].mxu1  ;;  %v3862_v58 = vmax.f32 %v3223_v21, 0.0 }
 0x38c   : > { %v3229_v53 = vadd.f32 %v3228_v60, %v18912_v32  ;;  %3594 = vmatmul.mubr.bf16.gmra.mrb[200].mxu0 %v19143_v13  ;;  %v3863_v9 = vmax.f32 %v3225_v10, 0.0 }
 0x38d   : > { %3603 = vmatprep.mubr.bf16.mxu0 %v19185_v5  ;;  %v3866_v61 = vmax.f32 %v3227_v6, 0.0 }
 0x38e   : > { %v2391_v48 = vpop.f32.mrb[112].mxu0  ;;  %v3867_v8 = vmax.f32 %v3229_v53, 0.0 }
 0x38f   : > { %v2393_v17 = vpop.f32.mrb[113].mxu0  ;;  %v2392_v2 = vadd.f32 %v2391_v48, %v18412_v24  ;;  %v19516_v14 = vpack.c.bf16 %v3866_v61, %v3862_v58 }
 0x390   : > { %v2395_v22 = vpop.f32.mrb[114].mxu0  ;;  %v2394_v63 = vadd.f32 %v2393_v17, %v18415_v25  ;;  %v19519_v54 = vpack.c.bf16 %v3867_v8, %v3863_v9 }
 0x391   : > { %v2397_v1 = vpop.f32.mrb[115].mxu0  ;;  %v2396_v13 = vadd.f32 %v2395_v22, %v18412_v24  ;;  %v2542_v35 = vmax.f32 %v2392_v2, 0.0 }
 0x392   : > { %v2398_v5 = vadd.f32 %v2397_v1, %v18415_v25  ;;  %v2543_v7 = vmax.f32 %v2394_v63, 0.0 }
 0x393   : > { %v2544_v47 = vmax.f32 %v2396_v13, 0.0 }
 0x394   : > { %3604 = vmatmul.mubr.bf16.gmra.mrb[204].mxu0 %v19183_v0  ;;  %v2545_v57 = vmax.f32 %v2398_v5, 0.0 }
 0x395   : > { %3613 = vmatprep.mubr.bf16.mxu0 %v19216_v40  ;;  %v19525_v21 = vpack.c.bf16 %v2544_v47, %v2542_v35 }
 0x396   : > { %v19527_v41 = vpack.c.bf16 %v2545_v57, %v2543_v7 }
 0x398   : > { %3340 = vmatprep.mubr.bf16.mxu1 %v19527_v41 }
 0x399   : > { %3341 = vmatmul.mubr.bf16.gmra.mrb[112].mxu1 %v19525_v21 }
 0x39b   : > { %v3232_v10 = vpop.f32.mrb[68].mxu1 }
 0x39c   : > { %v3233_v49 = vadd.f32 %v3232_v10, %v18904_v27  ;;  %v3234_v6 = vpop.f32.mrb[69].mxu1  ;;  %3614 = vmatmul.mubr.bf16.gmra.mrb[208].mxu0 %v19214_v38 }
 0x39d   : > { %v3235_v0 = vadd.f32 %v3234_v6, %v18912_v32  ;;  %v3236_v60 = vpop.f32.mrb[70].mxu1  ;;  %3623 = vmatprep.mubr.bf16.mxu0 %v19244_v28 }
 0x39e   : > { %v3237_v40 = vadd.f32 %v3236_v60, %v18904_v27  ;;  %v3238_v53 = vpop.f32.mrb[71].mxu1  ;;  %v3870_v61 = vmax.f32 %v3233_v49, 0.0 }
 0x39f   : > { %v3239_v58 = vadd.f32 %v3238_v53, %v18912_v32  ;;  %v3871_v8 = vmax.f32 %v3235_v0, 0.0 }
 0x3a0   : > { %v3874_v48 = vmax.f32 %v3237_v40, 0.0 }
 0x3a1   : > { %v2401_v9 = vpop.f32.mrb[116].mxu0  ;;  %v3875_v17 = vmax.f32 %v3239_v58, 0.0 }
 0x3a2   : > { %v2403_v2 = vpop.f32.mrb[117].mxu0  ;;  %v2402_v22 = vadd.f32 %v2401_v9, %v18412_v24  ;;  %v19538_v63 = vpack.c.bf16 %v3874_v48, %v3870_v61 }
 0x3a3   : > { %v2405_v38 = vpop.f32.mrb[118].mxu0  ;;  %v2404_v1 = vadd.f32 %v2403_v2, %v18415_v25  ;;  %v19541_v13 = vpack.c.bf16 %v3875_v17, %v3871_v8 }
 0x3a4   : > { %v2407_v28 = vpop.f32.mrb[119].mxu0  ;;  %3624 = vmatmul.mubr.bf16.gmra.mrb[212].mxu0 %v19242_v15  ;;  %v2406_v5 = vadd.f32 %v2405_v38, %v18412_v24  ;;  %v2546_v47 = vmax.f32 %v2402_v22, 0.0 }
 0x3a5   : > { %3633 = vmatprep.mubr.bf16.mxu0 %v19273_v20  ;;  %v2408_v35 = vadd.f32 %v2407_v28, %v18415_v25  ;;  %v2547_v57 = vmax.f32 %v2404_v1, 0.0 }
 0x3a6   : > { %v2548_v7 = vmax.f32 %v2406_v5, 0.0 }
 0x3a7   : > { %v2549_v10 = vmax.f32 %v2408_v35, 0.0 }
 0x3a8   : > { %v19547_v49 = vpack.c.bf16 %v2548_v7, %v2546_v47 }
 0x3a9   : > { %v19549_v6 = vpack.c.bf16 %v2549_v10, %v2547_v57 }
 0x3ab   : > { %3350 = vmatprep.mubr.bf16.mxu1 %v19549_v6 }
 0x3ac   : > { %3351 = vmatmul.mubr.bf16.gmra.mrb[116].mxu1 %v19547_v49  ;;  %3634 = vmatmul.mubr.bf16.gmra.mrb[216].mxu0 %v19270_v59 }
 0x3ad   : > { %3643 = vmatprep.mubr.bf16.mxu0 %v19302_v23 }
 0x3ae   : > { %v3242_v15 = vpop.f32.mrb[72].mxu1 }
 0x3af   : > { %v3243_v20 = vadd.f32 %v3242_v15, %v18904_v27  ;;  %v3244_v0 = vpop.f32.mrb[73].mxu1 }
 0x3b0   : > { %v3245_v60 = vadd.f32 %v3244_v0, %v18912_v32  ;;  %v3246_v40 = vpop.f32.mrb[74].mxu1 }
 0x3b1   : > { %v3247_v53 = vadd.f32 %v3246_v40, %v18904_v27  ;;  %v3248_v58 = vpop.f32.mrb[75].mxu1  ;;  %v3878_v48 = vmax.f32 %v3243_v20, 0.0 }
 0x3b2   : > { %v3249_v61 = vadd.f32 %v3248_v58, %v18912_v32  ;;  %v3879_v59 = vmax.f32 %v3245_v60, 0.0 }
 0x3b3   : > { %v3882_v9 = vmax.f32 %v3247_v53, 0.0 }
 0x3b4   : > { %v2411_v8 = vpop.f32.mrb[120].mxu0  ;;  %3644 = vmatmul.mubr.bf16.gmra.mrb[220].mxu0 %v19300_v29  ;;  %v3883_v17 = vmax.f32 %v3249_v61, 0.0 }
 0x3b5   : > { %v2413_v23 = vpop.f32.mrb[121].mxu0  ;;  %3653 = vmatprep.mubr.bf16.mxu0 %v19354_v50  ;;  %v2412_v2 = vadd.f32 %v2411_v8, %v18412_v24  ;;  %v19562_v22 = vpack.c.bf16 %v3882_v9, %v3878_v48 }
 0x3b6   : > { %v2415_v38 = vpop.f32.mrb[122].mxu0  ;;  %v2414_v1 = vadd.f32 %v2413_v23, %v18415_v25  ;;  %v19565_v28 = vpack.c.bf16 %v3883_v17, %v3879_v59 }
 0x3b7   : > { %v2417_v5 = vpop.f32.mrb[123].mxu0  ;;  %v2416_v35 = vadd.f32 %v2415_v38, %v18412_v24  ;;  %v2550_v29 = vmax.f32 %v2412_v2, 0.0 }
 0x3b8   : > { %v2418_v47 = vadd.f32 %v2417_v5, %v18415_v25  ;;  %v2551_v57 = vmax.f32 %v2414_v1, 0.0  ;;  %v23703_v1 = vld [vmem:[#allocation2_spill] sm:$0xff] }
 0x3b9   : > { %v2552_v7 = vmax.f32 %v2416_v35, 0.0  ;;  %v23598_v5 = vsub.s32 3, %v23703_v1 }
 0x3ba   : > { %v2553_v10 = vmax.f32 %v2418_v47, 0.0 }
 0x3bb   : > { %v19569_v15 = vpack.c.bf16 %v2552_v7, %v2550_v29  ;;  %v17686_v7 = vld [vmem:[%s23560_s7] sm:$0xf] }
 0x3bc   : > { %3654 = vmatmul.mubr.bf16.gmra.mrb[224].mxu0 %v19349_v62  ;;  %v19572_v50 = vpack.c.bf16 %v2553_v10, %v2551_v57  ;;  %v23704_v57 = vld [vmem:[#allocation4_spill] sm:$0xff] }
 0x3bd   : > { %3663 = vmatprep.mubr.bf16.mxu0 %v19411_v43  ;;  %v19603_v10 = vrot.slane %v17686_v7, %v23704_v57 }
 0x3be   : > { %3360 = vmatprep.mubr.bf16.mxu1 %v19572_v50 }
 0x3bf   : > { %3361 = vmatmul.mubr.bf16.gmra.mrb[120].mxu1 %v19569_v15 }
 0x3c1   : > { %v3252_v20 = vpop.f32.mrb[76].mxu1 }
 0x3c2   : > { %v3253_v0 = vadd.f32 %v3252_v20, %v18904_v27  ;;  %v3254_v60 = vpop.f32.mrb[77].mxu1 }
 0x3c3   : > { %v3255_v40 = vadd.f32 %v3254_v60, %v18912_v32  ;;  %v3256_v53 = vpop.f32.mrb[78].mxu1  ;;  %v3991_v60 = vld [vmem:[%s19592_s23 + $0x8] sm:$0xff] }
 0x3c4   : > { %v3257_v58 = vadd.f32 %v3256_v53, %v18904_v27  ;;  %v3258_v61 = vpop.f32.mrb[79].mxu1  ;;  %3664 = vmatmul.mubr.bf16.gmra.mrb[228].mxu0 %v19405_v3  ;;  %v3886_v43 = vmax.f32 %v3253_v0, 0.0 }
 0x3c5   : > { %v3259_v62 = vadd.f32 %v3258_v61, %v18912_v32  ;;  %3673 = vmatprep.mubr.bf16.mxu0 %v19463_v26  ;;  %v3887_v8 = vmax.f32 %v3255_v40, 0.0  ;;  %v3999_v40 = vld [vmem:[%s19592_s23 + $0x48] sm:$0xff] }
 0x3c6   : > { %v3890_v48 = vmax.f32 %v3257_v58, 0.0 }
 0x3c7   : > { %v2421_v9 = vpop.f32.mrb[124].mxu0  ;;  %v3891_v59 = vmax.f32 %v3259_v62, 0.0  ;;  %v19616_v62 = vpack.c.bf16 %v3999_v40, %v3991_v60 }
 0x3c8   : > { %v2423_v17 = vpop.f32.mrb[125].mxu0  ;;  %v2422_v23 = vadd.f32 %v2421_v9, %v18412_v24  ;;  %v19585_v2 = vpack.c.bf16 %v3890_v48, %v3886_v43 }
 0x3c9   : > { %v2425_v38 = vpop.f32.mrb[126].mxu0  ;;  %v2424_v3 = vadd.f32 %v2423_v17, %v18415_v25  ;;  %v19594_v26 = vpack.c.bf16 %v3891_v59, %v3887_v8 }
 0x3ca   : > { %23702 = vst [vmem:[#allocation14_spill] sm:$0xff] %v19585_v2  ;;  %v2427_v35 = vpop.f32.mrb[127].mxu0  ;;  %v2426_v47 = vadd.f32 %v2425_v38, %v18412_v24  ;;  %v2554_v20 = vmax.f32 %v2422_v23, 0.0  ;;  %v19610_v24 = vrot.slane %v17686_v7, %v23598_v5  ;;  %v3990_v23 = vld [vmem:[%s19592_s23] sm:$0xff]  ;;  %v4015_v7 = vld [vmem:[%s19592_s23 + $0xc8] sm:$0xff] }
 0x3cb   : > { %v2428_v29 = vadd.f32 %v2427_v35, %v18415_v25  ;;  %v2555_v25 = vmax.f32 %v2424_v3, 0.0  ;;  %v3998_v38 = vld [vmem:[%s19592_s23 + $0x40] sm:$0xff]  ;;  %v4023_v5 = vld [vmem:[%s19592_s23 + $0x108] sm:$0xff] }
 0x3cc   : > { %3674 = vmatmul.mubr.bf16.gmra.mrb[232].mxu0 %v19461_v51  ;;  %v2556_v0 = vmax.f32 %v2426_v47, 0.0 }
 0x3cd   : > { %3683 = vmatprep.mubr.bf16.mxu0 %v19503_v42  ;;  %v2557_v51 = vmax.f32 %v2428_v29, 0.0  ;;  %v4007_v29 = vld [vmem:[%s19592_s23 + $0x88] sm:$0xff] }
 0x3ce   : > { %v19612_v53 = vpack.c.bf16 %v2556_v0, %v2554_v20 }
 0x3cf   : > { %v3415_v58 = vpop.f32.mrb[128].mxu0  ;;  %v19614_v61 = vpack.c.bf16 %v2557_v51, %v2555_v25 }
 0x3d0   : > { %v3416_v43 = vadd.f32 %v3415_v58, %v19603_v10  ;;  %v3417_v48 = vpop.f32.mrb[129].mxu0 }
 0x3d1   : > { %v3418_v42 = vadd.f32 %v3417_v48, %v19610_v24  ;;  %3370 = vmatprep.mubr.bf16.mxu1 %v19614_v61  ;;  %v3419_v9 = vpop.f32.mrb[130].mxu0  ;;  %v19635_v48 = vpack.c.bf16 %v3998_v38, %v3990_v23  ;;  %v17082_v38 = vld [vmem:[%s23562_s9 + $0x224] ss:$16 sps:$4 sm:$0xff]  }
 0x3d2   : > { %v3420_v8 = vadd.f32 %v3419_v9, %v19603_v10  ;;  %3371 = vmatmul.mubr.bf16.gmra.mrb[124].mxu1 %v19612_v53  ;;  %v3421_v59 = vpop.f32.mrb[131].mxu0  ;;  %v3736_v3 = vmax.f32 %v3416_v43, 0.0 }
 0x3d3   : > { %v3422_v17 = vadd.f32 %v3421_v59, %v19610_v24  ;;  %6656 = vmatprep.mubr.bf16.mxu1 %v19616_v62  ;;  %v3737_v20 = vmax.f32 %v3418_v42, 0.0  ;;  %v17065_v42 = vld [vmem:[%s23562_s9 + $0x200] ss:$16 sps:$4 sm:$0xff]  }
 0x3d4   : > { %v3740_v35 = vmax.f32 %v3420_v8, 0.0  ;;  %v3262_v47 = vpop.f32.mrb[80].mxu1  ;;  %3684 = vmatmul.mubr.bf16.gmra.mrb[236].mxu0 %v19501_v45  ;;  %v19641_v8 = vpack.c.bf16 %v4015_v7, %v4007_v29 }
 0x3d5   : > { %v3741_v0 = vmax.f32 %v3422_v17, 0.0  ;;  %v3263_v60 = vadd.f32 %v3262_v47, %v18904_v27  ;;  %v3264_v40 = vpop.f32.mrb[81].mxu1  ;;  %3693 = vmatprep.mubr.bf16.mxu0 %v19527_v41 }
 0x3d6   : > { %v19632_v25 = vpack.c.bf16 %v3740_v35, %v3736_v3  ;;  %v3265_v51 = vadd.f32 %v3264_v40, %v18912_v32  ;;  %v3266_v58 = vpop.f32.mrb[82].mxu1 }
 0x3d7   : > { %v3267_v43 = vadd.f32 %v3266_v58, %v18904_v27  ;;  %v3268_v9 = vpop.f32.mrb[83].mxu1  ;;  %v3425_v45 = vpop.f32.mrb[132].mxu0  ;;  %v19643_v59 = vpack.c.bf16 %v3741_v0, %v3737_v20  ;;  %v3894_v47 = vmax.f32 %v3263_v60, 0.0  ;;  %v17080_v60 = vld [vmem:[%s23562_s9 + $0x220] ss:$16 sps:$4 sm:$0xff]  }
 0x3d8   : > { %23705 = vst [vmem:[#allocation17_spill] sm:$0xff] %v19632_v25  ;;  %v3269_v41 = vadd.f32 %v3268_v9, %v18912_v32  ;;  %v3426_v17 = vadd.f32 %v3425_v45, %v19603_v10  ;;  %v3427_v23 = vpop.f32.mrb[133].mxu0  ;;  %v3895_v20 = vmax.f32 %v3265_v51, 0.0  ;;  %v4006_v9 = vld [vmem:[%s19592_s23 + $0x80] sm:$0xff]  ;;  %v4031_v51 = vld [vmem:[%s19592_s23 + $0x148] sm:$0xff] }
 0x3d9   : > { %23706 = vst [vmem:[#allocation21_spill] sm:$0xff] %v19643_v59  ;;  %v3428_v3 = vadd.f32 %v3427_v23, %v19610_v24  ;;  %v3429_v35 = vpop.f32.mrb[134].mxu0  ;;  %v3898_v40 = vmax.f32 %v3267_v43, 0.0  ;;  %v4014_v45 = vld [vmem:[%s19592_s23 + $0xc0] sm:$0xff] }
 0x3da   : > { %v3430_v29 = vadd.f32 %v3429_v35, %v19603_v10  ;;  %v3431_v7 = vpop.f32.mrb[135].mxu0  ;;  %6657 = vmatmul.mubr.bf16.vlgmr.msra.gmra.mrb[128].mxu1 %v19635_v48  ;;  %v3899_v0 = vmax.f32 %v3269_v41, 0.0  ;;  %v3744_v23 = vmax.f32 %v3426_v17, 0.0  ;;  %v19671_v57 = vpack.c.bf16 %v4014_v45, %v4006_v9  ;;  %v4022_v9 = vld [vmem:[%s19592_s23 + $0x100] sm:$0xff] }
 0x3db   : > { %v3432_v58 = vadd.f32 %v3431_v7, %v19610_v24  ;;  %6978 = vmatpush1.bf16.msra.mxu1 %v17065_v42  ;;  %6666 = vmatprep.mubr.bf16.mxu1 %v19641_v8  ;;  %v19660_v43 = vpack.c.bf16 %v3898_v40, %v3894_v47  ;;  %v17097_v42 = vld [vmem:[%s23562_s9 + $0x244] ss:$16 sps:$4 sm:$0xff]   ;;  %v3745_v7 = vmax.f32 %v3428_v3, 0.0 }
 0x3dc   : > { %v3748_v35 = vmax.f32 %v3430_v29, 0.0  ;;  %3694 = vmatmul.mubr.bf16.gmra.mrb[240].mxu0 %v19525_v21  ;;  %6979 = vmatprep.subr.bf16.mxu1 %v17082_v38  ;;  %v19668_v41 = vpack.c.bf16 %v3899_v0, %v3895_v20  ;;  %v19675_v21 = vpack.c.bf16 %v4031_v51, %v4023_v5  ;;  %v17095_v38 = vld [vmem:[%s23562_s9 + $0x240] ss:$16 sps:$4 sm:$0xff]   ;;  %v4039_v51 = vld [vmem:[%s19592_s23 + $0x188] sm:$0xff] }
 0x3dd   : > { %23707 = vst [vmem:[#allocation20_spill] sm:$0xff] %v19660_v43  ;;  %v3749_v1 = vmax.f32 %v3432_v58, 0.0  ;;  %3703 = vmatprep.mubr.bf16.mxu0 %v19549_v6  ;;  %v17100_v6 = vld [vmem:[%s23562_s9 + $0x264] ss:$16 sps:$4 sm:$0xff]  }
 0x3de   : > { %23708 = vst [vmem:[#allocation24_spill] sm:$0xff] %v19668_v41  ;;  %v19673_v47 = vpack.c.bf16 %v3748_v35, %v3744_v23  ;;  %v4030_v45 = vld [vmem:[%s19592_s23 + $0x140] sm:$0xff] }
 0x3df   : > { %v3435_v17 = vpop.f32.mrb[136].mxu0  ;;  %6980 = vmatpush1.bf16.msra.mxu1 %v17080_v60  ;;  %v19680_v40 = vpack.c.bf16 %v3749_v1, %v3745_v7  ;;  %v17098_v60 = vld [vmem:[%s23562_s9 + $0x260] ss:$16 sps:$4 sm:$0xff]   ;;  %v17103_v7 = vld [vmem:[%s23562_s9 + $0x284] ss:$16 sps:$4 sm:$0xff]  }
 0x3e0   : > { %23709 = vst [vmem:[#allocation25_spill] sm:$0xff] %v19673_v47  ;;  %v3436_v3 = vadd.f32 %v3435_v17, %v19603_v10  ;;  %v3437_v29 = vpop.f32.mrb[137].mxu0  ;;  %6981 = vmatprep.subr.bf16.mxu1 %v17097_v42  ;;  %v4047_v42 = vld [vmem:[%s19592_s23 + $0x1c8] sm:$0xff] }
 0x3e1   : > { %23710 = vst [vmem:[#allocation26_spill] sm:$0xff] %v19680_v40  ;;  %v3438_v5 = vadd.f32 %v3437_v29, %v19610_v24  ;;  %v3439_v20 = vpop.f32.mrb[138].mxu0 }
 0x3e2   : > { %v3440_v0 = vadd.f32 %v3439_v20, %v19603_v10  ;;  %v3441_v58 = vpop.f32.mrb[139].mxu0  ;;  %6667 = vmatmul.mubr.bf16.gmra.mrb[132].mxu1 %v19671_v57  ;;  %v3752_v23 = vmax.f32 %v3436_v3, 0.0 }
 0x3e3   : > { %v3442_v1 = vadd.f32 %v3441_v58, %v19610_v24  ;;  %6676 = vmatprep.mubr.bf16.mxu1 %v19675_v21  ;;  %6982 = vmatpush1.bf16.msra.mxu1 %v17095_v38  ;;  %v3753_v17 = vmax.f32 %v3438_v5, 0.0  ;;  %v19703_v38 = vpack.c.bf16 %v4030_v45, %v4022_v9  ;;  %v17106_v9 = vld [vmem:[%s23562_s9 + $0x2a4] ss:$16 sps:$4 sm:$0xff]  }
 0x3e4   : > { %v3756_v35 = vmax.f32 %v3440_v0, 0.0  ;;  %3704 = vmatmul.mubr.bf16.gmra.mrb[244].mxu0 %v19547_v49  ;;  %6983 = vmatprep.subr.bf16.mxu1 %v17100_v6  ;;  %v19707_v0 = vpack.c.bf16 %v4047_v42, %v4039_v51  ;;  %v17101_v49 = vld [vmem:[%s23562_s9 + $0x280] ss:$16 sps:$4 sm:$0xff]  }
 0x3e5   : > { %v3757_v29 = vmax.f32 %v3442_v1, 0.0  ;;  %3713 = vmatprep.mubr.bf16.mxu0 %v19572_v50 }
 0x3e6   : > { %v19705_v20 = vpack.c.bf16 %v3756_v35, %v3752_v23 }
 0x3e7   : > { %v3272_v58 = vpop.f32.mrb[84].mxu1  ;;  %v3445_v3 = vpop.f32.mrb[140].mxu0  ;;  %6984 = vmatpush1.bf16.msra.mxu1 %v17098_v60  ;;  %v19712_v6 = vpack.c.bf16 %v3757_v29, %v3753_v17 }
 0x3e8   : > { %23711 = vst [vmem:[#allocation27_spill] sm:$0xff] %v19705_v20  ;;  %v3446_v5 = vadd.f32 %v3445_v3, %v19603_v10  ;;  %v3274_v50 = vpop.f32.mrb[85].mxu1  ;;  %v3447_v1 = vpop.f32.mrb[141].mxu0  ;;  %6985 = vmatprep.subr.bf16.mxu1 %v17103_v7  ;;  %v3273_v45 = vadd.f32 %v3272_v58, %v18904_v27  ;;  %v4038_v3 = vld [vmem:[%s19592_s23 + $0x180] sm:$0xff] }
 0x3e9   : > { %23712 = vst [vmem:[#allocation28_spill] sm:$0xff] %v19712_v6  ;;  %v3275_v60 = vadd.f32 %v3274_v50, %v18912_v32  ;;  %v3448_v23 = vadd.f32 %v3447_v1, %v19610_v24  ;;  %v3276_v35 = vpop.f32.mrb[86].mxu1  ;;  %v3449_v51 = vpop.f32.mrb[142].mxu0  ;;  %v4046_v20 = vld [vmem:[%s19592_s23 + $0x1c0] sm:$0xff]  ;;  %v4055_v50 = vld [vmem:[%s19592_s23 + $0x208] sm:$0xff] }
 0x3ea   : > { %v3277_v42 = vadd.f32 %v3276_v35, %v18904_v27  ;;  %v3450_v17 = vadd.f32 %v3449_v51, %v19603_v10  ;;  %v3278_v29 = vpop.f32.mrb[87].mxu1  ;;  %v3451_v7 = vpop.f32.mrb[143].mxu0  ;;  %6677 = vmatmul.mubr.bf16.gmra.mrb[136].mxu1 %v19703_v38  ;;  %v4063_v1 = vld [vmem:[%s19592_s23 + $0x248] sm:$0xff]  ;;  %v17104_v35 = vld [vmem:[%s23562_s9 + $0x2a0] ss:$16 sps:$4 sm:$0xff]   ;;  %v3760_v51 = vmax.f32 %v3446_v5, 0.0  ;;  %v19739_v41 = vpack.c.bf16 %v4046_v20, %v4038_v3 }
 0x3eb   : > { %v3279_v6 = vadd.f32 %v3278_v29, %v18912_v32  ;;  %v3452_v58 = vadd.f32 %v3451_v7, %v19610_v24  ;;  %6686 = vmatprep.mubr.bf16.mxu1 %v19707_v0  ;;  %6986 = vmatpush1.bf16.msra.mxu1 %v17101_v49  ;;  %v3761_v47 = vmax.f32 %v3448_v23, 0.0  ;;  %v17109_v29 = vld [vmem:[%s23562_s9 + $0x2c4] ss:$16 sps:$4 sm:$0xff]   ;;  %v3903_v7 = vmax.f32 %v3275_v60, 0.0  ;;  %v17110_v3 = vld [vmem:[%s23562_s9 + $0x2e0] ss:$16 sps:$4 sm:$0xff]  }
 0x3ec   : > { %v3764_v40 = vmax.f32 %v3450_v17, 0.0  ;;  %3714 = vmatmul.mubr.bf16.gmra.mrb[248].mxu0 %v19569_v15  ;;  %6987 = vmatprep.subr.bf16.mxu1 %v17106_v9  ;;  %v3902_v49 = vmax.f32 %v3273_v45, 0.0  ;;  %v3906_v43 = vmax.f32 %v3277_v42, 0.0  ;;  %v19743_v23 = vpack.c.bf16 %v4063_v1, %v4055_v50  ;;  %v17107_v15 = vld [vmem:[%s23562_s9 + $0x2c0] ss:$16 sps:$4 sm:$0xff]   ;;  %v4071_v1 = vld [vmem:[%s19592_s23 + $0x288] sm:$0xff] }
 0x3ed   : > { %v3765_v25 = vmax.f32 %v3452_v58, 0.0  ;;  %3723 = vmatprep.mubr.bf16.mxu0 %v19614_v61  ;;  %v3907_v59 = vmax.f32 %v3279_v6, 0.0  ;;  %v17112_v45 = vld [vmem:[%s23562_s9 + $0x2e4] ss:$16 sps:$4 sm:$0xff]  }
 0x3ee   : > { %v19741_v2 = vpack.c.bf16 %v3764_v40, %v3760_v51  ;;  %v19750_v61 = vpack.c.bf16 %v3906_v43, %v3902_v49  ;;  %v4054_v43 = vld [vmem:[%s19592_s23 + $0x200] sm:$0xff] }
 0x3ef   : > { %v3455_v5 = vpop.f32.mrb[144].mxu0  ;;  %6988 = vmatpush1.bf16.msra.mxu1 %v17104_v35  ;;  %v19748_v9 = vpack.c.bf16 %v3907_v59, %v3903_v7  ;;  %v19752_v6 = vpack.c.bf16 %v3765_v25, %v3761_v47  ;;  %v4062_v47 = vld [vmem:[%s19592_s23 + $0x240] sm:$0xff]  ;;  %v4079_v35 = vld [vmem:[%s19592_s23 + $0x2c8] sm:$0xff] }
 0x3f0   : > { %23713 = vst [vmem:[#allocation29_spill] sm:$0xff] %v19741_v2  ;;  %v3456_v20 = vadd.f32 %v3455_v5, %v19603_v10  ;;  %v3457_v40 = vpop.f32.mrb[145].mxu0  ;;  %6989 = vmatprep.subr.bf16.mxu1 %v17109_v29  ;;  %v17115_v51 = vld [vmem:[%s23562_s9 + $0x304] ss:$16 sps:$4 sm:$0xff]   ;;  %v19775_v49 = vpack.c.bf16 %v4062_v47, %v4054_v43 }
 0x3f1   : > { %23714 = vst [vmem:[#allocation30_spill] sm:$0xff] %v19752_v6  ;;  %v3458_v60 = vadd.f32 %v3457_v40, %v19610_v24  ;;  %v3459_v42 = vpop.f32.mrb[146].mxu0  ;;  %v4070_v47 = vld [vmem:[%s19592_s23 + $0x280] sm:$0xff] }
 0x3f2   : > { %v3460_v59 = vadd.f32 %v3459_v42, %v19603_v10  ;;  %v3461_v17 = vpop.f32.mrb[147].mxu0  ;;  %6687 = vmatmul.mubr.bf16.gmra.mrb[140].mxu1 %v19739_v41  ;;  %v3768_v58 = vmax.f32 %v3456_v20, 0.0  ;;  %v19779_v20 = vpack.c.bf16 %v4079_v35, %v4071_v1  ;;  %v4078_v1 = vld [vmem:[%s19592_s23 + $0x2c0] sm:$0xff]  ;;  %v4087_v35 = vld [vmem:[%s19592_s23 + $0x308] sm:$0xff] }
 0x3f3   : > { %v3462_v25 = vadd.f32 %v3461_v17, %v19610_v24  ;;  %6696 = vmatprep.mubr.bf16.mxu1 %v19743_v23  ;;  %6990 = vmatpush1.bf16.msra.mxu1 %v17107_v15  ;;  %v3769_v29 = vmax.f32 %v3458_v60, 0.0  ;;  %v17118_v60 = vld [vmem:[%s23562_s9 + $0x324] ss:$16 sps:$4 sm:$0xff]  }
 0x3f4   : > { %v3772_v50 = vmax.f32 %v3460_v59, 0.0  ;;  %3724 = vmatmul.mubr.bf16.gmra.mrb[252].mxu0 %v19612_v53  ;;  %6991 = vmatprep.subr.bf16.mxu1 %v17112_v45  ;;  %v17113_v53 = vld [vmem:[%s23562_s9 + $0x300] ss:$16 sps:$4 sm:$0xff]  }
 0x3f5   : > { %v3773_v7 = vmax.f32 %v3462_v25, 0.0  ;;  %8068 = vmatprep.mubr.bf16.mxu0 %v19616_v62 }
 0x3f6   : > { %v19777_v5 = vpack.c.bf16 %v3772_v50, %v3768_v58 }
 0x3f7   : > { %v3465_v15 = vpop.f32.mrb[148].mxu0  ;;  %6992 = vmatpush1.bf16.msra.mxu1 %v17110_v3  ;;  %v19784_v40 = vpack.c.bf16 %v3773_v7, %v3769_v29 }
 0x3f8   : > { %23715 = vst [vmem:[#allocation31_spill] sm:$0xff] %v19777_v5  ;;  %v3466_v45 = vadd.f32 %v3465_v15, %v19603_v10  ;;  %v3467_v62 = vpop.f32.mrb[149].mxu0  ;;  %6993 = vmatprep.subr.bf16.mxu1 %v17115_v51  ;;  %v17116_v51 = vld [vmem:[%s23562_s9 + $0x320] ss:$16 sps:$4 sm:$0xff]  }
 0x3f9   : > { %23716 = vst [vmem:[#allocation32_spill] sm:$0xff] %v19784_v40  ;;  %v3468_v42 = vadd.f32 %v3467_v62, %v19610_v24  ;;  %v3469_v59 = vpop.f32.mrb[150].mxu0 }
 0x3fa   : > { %v3470_v17 = vadd.f32 %v3469_v59, %v19603_v10  ;;  %v3282_v25 = vpop.f32.mrb[88].mxu1  ;;  %v3471_v43 = vpop.f32.mrb[151].mxu0  ;;  %6697 = vmatmul.mubr.bf16.gmra.mrb[144].mxu1 %v19775_v49  ;;  %v3776_v29 = vmax.f32 %v3466_v45, 0.0  ;;  %v4095_v59 = vld [vmem:[%s19592_s23 + $0x348] sm:$0xff] }
 0x3fb   : > { %v3283_v3 = vadd.f32 %v3282_v25, %v18904_v27  ;;  %v3472_v58 = vadd.f32 %v3471_v43, %v19610_v24  ;;  %v3284_v50 = vpop.f32.mrb[89].mxu1  ;;  %6706 = vmatprep.mubr.bf16.mxu1 %v19779_v20  ;;  %6994 = vmatpush1.bf16.msra.mxu1 %v17113_v53  ;;  %v17121_v25 = vld [vmem:[%s23562_s9 + $0x344] ss:$16 sps:$4 sm:$0xff]   ;;  %v3777_v43 = vmax.f32 %v3468_v42, 0.0  ;;  %v19815_v2 = vpack.c.bf16 %v4095_v59, %v4087_v35 }
 0x3fc   : > { %v3780_v7 = vmax.f32 %v3470_v17, 0.0  ;;  %v3285_v15 = vadd.f32 %v3284_v50, %v18912_v32  ;;  %v3286_v62 = vpop.f32.mrb[90].mxu1  ;;  %8069 = vmatmul.mubr.bf16.vlgmr.msra.gmra.mrb[0].mxu0 %v19635_v48  ;;  %6995 = vmatprep.subr.bf16.mxu1 %v17118_v60  ;;  %v19811_v17 = vpack.c.bf16 %v4078_v1, %v4070_v47  ;;  %v17119_v60 = vld [vmem:[%s23562_s9 + $0x340] ss:$16 sps:$4 sm:$0xff]  }
 0x3fd   : > { %v3781_v5 = vmax.f32 %v3472_v58, 0.0  ;;  %v3287_v53 = vadd.f32 %v3286_v62, %v18904_v27  ;;  %v3288_v40 = vpop.f32.mrb[91].mxu1  ;;  %8078 = vmatprep.mubr.bf16.mxu0 %v19641_v8  ;;  %v3910_v42 = vmax.f32 %v3283_v3, 0.0 }
 0x3fe   : > { %v3289_v45 = vadd.f32 %v3288_v40, %v18912_v32  ;;  %v19813_v50 = vpack.c.bf16 %v3780_v7, %v3776_v29  ;;  %v3911_v47 = vmax.f32 %v3285_v15, 0.0  ;;  %v4086_v15 = vld [vmem:[%s19592_s23 + $0x300] sm:$0xff] }
 0x3ff   : > { %v3475_v48 = vpop.f32.mrb[152].mxu0  ;;  %6996 = vmatpush1.bf16.msra.mxu1 %v17116_v51  ;;  %v3914_v58 = vmax.f32 %v3287_v53, 0.0  ;;  %v19820_v62 = vpack.c.bf16 %v3781_v5, %v3777_v43 }
 0x400   : > { %23717 = vst [vmem:[#allocation33_spill] sm:$0xff] %v19813_v50  ;;  %v3476_v8 = vadd.f32 %v3475_v48, %v19603_v10  ;;  %v3477_v40 = vpop.f32.mrb[153].mxu0  ;;  %6997 = vmatprep.subr.bf16.mxu1 %v17121_v25  ;;  %v3915_v1 = vmax.f32 %v3289_v45, 0.0  ;;  %v4094_v25 = vld [vmem:[%s19592_s23 + $0x340] sm:$0xff]  ;;  %v4103_v45 = vld [vmem:[%s19592_s23 + $0x388] sm:$0xff] }
 0x401   : > { %23718 = vst [vmem:[#allocation34_spill] sm:$0xff] %v19820_v62  ;;  %v3478_v35 = vadd.f32 %v3477_v40, %v19610_v24  ;;  %v3479_v51 = vpop.f32.mrb[154].mxu0  ;;  %v19824_v29 = vpack.c.bf16 %v3914_v58, %v3910_v42  ;;  %v4111_v48 = vld [vmem:[%s19592_s23 + $0x3c8] sm:$0xff]  ;;  %v19838_v40 = vpack.c.bf16 %v4094_v25, %v4086_v15  ;;  %v4110_v25 = vld [vmem:[%s19592_s23 + $0x3c0] sm:$0xff] }
 0x402   : > { %v3480_v3 = vadd.f32 %v3479_v51, %v19603_v10  ;;  %v3481_v7 = vpop.f32.mrb[155].mxu0  ;;  %6707 = vmatmul.mubr.bf16.gmra.mrb[148].mxu1 %v19811_v17  ;;  %v19828_v5 = vpack.c.bf16 %v3915_v1, %v3911_v47  ;;  %v3784_v43 = vmax.f32 %v3476_v8, 0.0 }
 0x403   : > { %23719 = vst [vmem:[#allocation35_spill] sm:$0xff] %v19824_v29  ;;  %v3482_v59 = vadd.f32 %v3481_v7, %v19610_v24  ;;  %6716 = vmatprep.mubr.bf16.mxu1 %v19815_v2  ;;  %6998 = vmatpush1.bf16.msra.mxu1 %v17119_v60  ;;  %v3785_v42 = vmax.f32 %v3478_v35, 0.0  ;;  %v19842_v60 = vpack.c.bf16 %v4111_v48, %v4103_v45 }
 0x404   : > { %23720 = vst [vmem:[#allocation36_spill] sm:$0xff] %v19828_v5  ;;  %v3788_v53 = vmax.f32 %v3480_v3, 0.0  ;;  %8079 = vmatmul.mubr.bf16.gmra.mrb[4].mxu0 %v19671_v57 }
 0x405   : > { %v3789_v58 = vmax.f32 %v3482_v59, 0.0  ;;  %8088 = vmatprep.mubr.bf16.mxu0 %v19675_v21  ;;  %v4102_v59 = vld [vmem:[%s19592_s23 + $0x380] sm:$0xff] }
 0x406   : > { %v19840_v47 = vpack.c.bf16 %v3788_v53, %v3784_v43  ;;  %v4119_v43 = vld [vmem:[%s19592_s23 + $0x408] sm:$0xff] }
 0x407   : > { %v3485_v1 = vpop.f32.mrb[156].mxu0  ;;  %v19844_v8 = vpack.c.bf16 %v3789_v58, %v3785_v42  ;;  %v4127_v53 = vld [vmem:[%s19592_s23 + $0x448] sm:$0xff]  ;;  %v17122_v42 = vld [vmem:[%s23562_s9 + $0x360] ss:$16 sps:$4 sm:$0xff]   ;;  %v17124_v58 = vld [vmem:[%s23562_s9 + $0x364] ss:$16 sps:$4 sm:$0xff]  }
 0x408   : > { %23721 = vst [vmem:[#allocation37_spill] sm:$0xff] %v19840_v47  ;;  %v3486_v57 = vadd.f32 %v3485_v1, %v19603_v10  ;;  %v3487_v51 = vpop.f32.mrb[157].mxu0  ;;  %6999 = vmatprep.subr.bf16.mxu1 %v17124_v58  ;;  %v19870_v62 = vpack.c.bf16 %v4127_v53, %v4119_v43 }
 0x409   : > { %23722 = vst [vmem:[#allocation38_spill] sm:$0xff] %v19844_v8  ;;  %v3488_v35 = vadd.f32 %v3487_v51, %v19610_v24  ;;  %v3489_v3 = vpop.f32.mrb[158].mxu0  ;;  %7000 = vmatpush1.bf16.msra.mxu1 %v17122_v42 }
 0x40a   : > { %v3490_v21 = vadd.f32 %v3489_v3, %v19603_v10  ;;  %v3491_v7 = vpop.f32.mrb[159].mxu0  ;;  %6717 = vmatmul.mubr.bf16.gmra.mrb[152].mxu1 %v19838_v40  ;;  %v3792_v45 = vmax.f32 %v3486_v57, 0.0  ;;  %v19865_v57 = vpack.c.bf16 %v4110_v25, %v4102_v59 }
 0x40b   : > { %v3492_v15 = vadd.f32 %v3491_v7, %v19610_v24  ;;  %6726 = vmatprep.mubr.bf16.mxu1 %v19842_v60  ;;  %v3793_v1 = vmax.f32 %v3488_v35, 0.0 }
 0x40c   : > { %v3796_v48 = vmax.f32 %v3490_v21, 0.0  ;;  %8089 = vmatmul.mubr.bf16.gmra.mrb[8].mxu0 %v19703_v38 }
 0x40d   : > { %v3797_v51 = vmax.f32 %v3492_v15, 0.0  ;;  %v3292_v3 = vpop.f32.mrb[92].mxu1  ;;  %8098 = vmatprep.mubr.bf16.mxu0 %v19707_v0 }
 0x40e   : > { %v3293_v7 = vadd.f32 %v3292_v3, %v18904_v27  ;;  %v3294_v47 = vpop.f32.mrb[93].mxu1  ;;  %v19867_v38 = vpack.c.bf16 %v3796_v48, %v3792_v45 }
 0x40f   : > { %v3295_v21 = vadd.f32 %v3294_v47, %v18912_v32  ;;  %v3296_v8 = vpop.f32.mrb[94].mxu1  ;;  %v3495_v50 = vpop.f32.mrb[160].mxu0  ;;  %v19872_v35 = vpack.c.bf16 %v3797_v51, %v3793_v1  ;;  %v4126_v1 = vld [vmem:[%s19592_s23 + $0x440] sm:$0xff] }
 0x410   : > { %23723 = vst [vmem:[#allocation39_spill] sm:$0xff] %v19867_v38  ;;  %v3297_v0 = vadd.f32 %v3296_v8, %v18904_v27  ;;  %v3496_v15 = vadd.f32 %v3495_v50, %v19603_v10  ;;  %v3298_v59 = vpop.f32.mrb[95].mxu1  ;;  %v3497_v25 = vpop.f32.mrb[161].mxu0  ;;  %v3918_v42 = vmax.f32 %v3293_v7, 0.0  ;;  %v4118_v50 = vld [vmem:[%s19592_s23 + $0x400] sm:$0xff]  ;;  %v4135_v38 = vld [vmem:[%s19592_s23 + $0x488] sm:$0xff] }
 0x411   : > { %23724 = vst [vmem:[#allocation40_spill] sm:$0xff] %v19872_v35  ;;  %v3299_v45 = vadd.f32 %v3298_v59, %v18912_v32  ;;  %v3498_v48 = vadd.f32 %v3497_v25, %v19610_v24  ;;  %v3499_v47 = vpop.f32.mrb[162].mxu0  ;;  %v3919_v51 = vmax.f32 %v3295_v21, 0.0  ;;  %v4143_v35 = vld [vmem:[%s19592_s23 + $0x4c8] sm:$0xff] }
 0x412   : > { %v3500_v43 = vadd.f32 %v3499_v47, %v19603_v10  ;;  %v3501_v53 = vpop.f32.mrb[163].mxu0  ;;  %6727 = vmatmul.mubr.bf16.gmra.mrb[156].mxu1 %v19865_v57  ;;  %v3922_v58 = vmax.f32 %v3297_v0, 0.0  ;;  %v3800_v59 = vmax.f32 %v3496_v15, 0.0 }
 0x413   : > { %v3502_v8 = vadd.f32 %v3501_v53, %v19610_v24  ;;  %6736 = vmatprep.mubr.bf16.mxu1 %v19870_v62  ;;  %v3923_v3 = vmax.f32 %v3299_v45, 0.0  ;;  %v3801_v6 = vmax.f32 %v3498_v48, 0.0  ;;  %v19892_v53 = vpack.c.bf16 %v4126_v1, %v4118_v50  ;;  %v4134_v50 = vld [vmem:[%s19592_s23 + $0x480] sm:$0xff] }
 0x414   : > { %v3804_v25 = vmax.f32 %v3500_v43, 0.0  ;;  %8099 = vmatmul.mubr.bf16.gmra.mrb[12].mxu0 %v19739_v41  ;;  %v19887_v47 = vpack.c.bf16 %v3922_v58, %v3918_v42  ;;  %v19896_v41 = vpack.c.bf16 %v4143_v35, %v4135_v38  ;;  %v4142_v38 = vld [vmem:[%s19592_s23 + $0x4c0] sm:$0xff]  ;;  %v4151_v35 = vld [vmem:[%s19592_s23 + $0x508] sm:$0xff] }
 0x415   : > { %v3805_v7 = vmax.f32 %v3502_v8, 0.0  ;;  %8108 = vmatprep.mubr.bf16.mxu0 %v19743_v23  ;;  %v19890_v0 = vpack.c.bf16 %v3923_v3, %v3919_v51 }
 0x416   : > { %23725 = vst [vmem:[#allocation41_spill] sm:$0xff] %v19887_v47  ;;  %v19894_v21 = vpack.c.bf16 %v3804_v25, %v3800_v59  ;;  %v17125_v59 = vld [vmem:[%s23562_s9 + $0x380] ss:$16 sps:$4 sm:$0xff]   ;;  %v17127_v25 = vld [vmem:[%s23562_s9 + $0x384] ss:$16 sps:$4 sm:$0xff]  }
 0x417   : > { %23726 = vst [vmem:[#allocation42_spill] sm:$0xff] %v19890_v0  ;;  %v3505_v15 = vpop.f32.mrb[164].mxu0  ;;  %v19898_v45 = vpack.c.bf16 %v3805_v7, %v3801_v6  ;;  %v4159_v6 = vld [vmem:[%s19592_s23 + $0x548] sm:$0xff]  ;;  %7001 = vmatprep.subr.bf16.mxu1 %v17127_v25 }
 0x418   : > { %23727 = vst [vmem:[#allocation43_spill] sm:$0xff] %v19894_v21  ;;  %v3506_v48 = vadd.f32 %v3505_v15, %v19603_v10  ;;  %v3507_v43 = vpop.f32.mrb[165].mxu0  ;;  %7002 = vmatpush1.bf16.msra.mxu1 %v17125_v59 }
 0x419   : > { %23728 = vst [vmem:[#allocation44_spill] sm:$0xff] %v19898_v45  ;;  %v3508_v42 = vadd.f32 %v3507_v43, %v19610_v24  ;;  %v3509_v23 = vpop.f32.mrb[166].mxu0  ;;  %v19918_v43 = vpack.c.bf16 %v4142_v38, %v4134_v50 }
 0x41a   : > { %v3510_v58 = vadd.f32 %v3509_v23, %v19603_v10  ;;  %v3511_v8 = vpop.f32.mrb[167].mxu0  ;;  %6737 = vmatmul.mubr.bf16.gmra.mrb[160].mxu1 %v19892_v53  ;;  %v3808_v51 = vmax.f32 %v3506_v48, 0.0 }
 0x41b   : > { %v3512_v1 = vadd.f32 %v3511_v8, %v19610_v24  ;;  %6746 = vmatprep.mubr.bf16.mxu1 %v19896_v41  ;;  %v3809_v7 = vmax.f32 %v3508_v42, 0.0 }
 0x41c   : > { %v3812_v3 = vmax.f32 %v3510_v58, 0.0  ;;  %8109 = vmatmul.mubr.bf16.gmra.mrb[16].mxu0 %v19775_v49  ;;  %v19922_v58 = vpack.c.bf16 %v4159_v6, %v4151_v35 }
 0x41d   : > { %v3813_v15 = vmax.f32 %v3512_v1, 0.0  ;;  %8118 = vmatprep.mubr.bf16.mxu0 %v19779_v20 }
 0x41e   : > { %v19920_v23 = vpack.c.bf16 %v3812_v3, %v3808_v51 }
 0x41f   : > { %v3515_v48 = vpop.f32.mrb[168].mxu0  ;;  %v19924_v49 = vpack.c.bf16 %v3813_v15, %v3809_v7  ;;  %v4158_v15 = vld [vmem:[%s19592_s23 + $0x540] sm:$0xff] }
 0x420   : > { %23729 = vst [vmem:[#allocation45_spill] sm:$0xff] %v19920_v23  ;;  %v3516_v8 = vadd.f32 %v3515_v48, %v19603_v10  ;;  %v3302_v21 = vpop.f32.mrb[96].mxu1  ;;  %v3517_v42 = vpop.f32.mrb[169].mxu0  ;;  %v4175_v23 = vld [vmem:[%s19592_s23 + $0x5c8] sm:$0xff] }
 0x421   : > { %23730 = vst [vmem:[#allocation46_spill] sm:$0xff] %v19924_v49  ;;  %v3303_v1 = vadd.f32 %v3302_v21, %v18904_v27  ;;  %v3518_v20 = vadd.f32 %v3517_v42, %v19610_v24  ;;  %v3304_v50 = vpop.f32.mrb[97].mxu1  ;;  %v3519_v38 = vpop.f32.mrb[170].mxu0  ;;  %v4150_v21 = vld [vmem:[%s19592_s23 + $0x500] sm:$0xff] }
 0x422   : > { %v3305_v51 = vadd.f32 %v3304_v50, %v18912_v32  ;;  %v3520_v35 = vadd.f32 %v3519_v38, %v19603_v10  ;;  %v3306_v6 = vpop.f32.mrb[98].mxu1  ;;  %v3521_v3 = vpop.f32.mrb[171].mxu0  ;;  %6747 = vmatmul.mubr.bf16.gmra.mrb[164].mxu1 %v19918_v43  ;;  %v3816_v48 = vmax.f32 %v3516_v8, 0.0  ;;  %v4167_v38 = vld [vmem:[%s19592_s23 + $0x588] sm:$0xff] }
 0x423   : > { %v3307_v59 = vadd.f32 %v3306_v6, %v18904_v27  ;;  %v3522_v25 = vadd.f32 %v3521_v3, %v19610_v24  ;;  %v3308_v7 = vpop.f32.mrb[99].mxu1  ;;  %6756 = vmatprep.mubr.bf16.mxu1 %v19922_v58  ;;  %v3817_v49 = vmax.f32 %v3518_v20, 0.0  ;;  %v3926_v6 = vmax.f32 %v3303_v1, 0.0 }
 0x424   : > { %v3820_v42 = vmax.f32 %v3520_v35, 0.0  ;;  %v3309_v50 = vadd.f32 %v3308_v7, %v18912_v32  ;;  %8119 = vmatmul.mubr.bf16.gmra.mrb[20].mxu0 %v19811_v17  ;;  %v19942_v3 = vpack.c.bf16 %v4158_v15, %v4150_v21  ;;  %v3927_v0 = vmax.f32 %v3305_v51, 0.0 }
 0x425   : > { %v3821_v45 = vmax.f32 %v3522_v25, 0.0  ;;  %8128 = vmatprep.mubr.bf16.mxu0 %v19815_v2  ;;  %v3930_v47 = vmax.f32 %v3307_v59, 0.0  ;;  %v19946_v35 = vpack.c.bf16 %v4175_v23, %v4167_v38  ;;  %v4166_v23 = vld [vmem:[%s19592_s23 + $0x580] sm:$0xff] }
 0x426   : > { %v3931_v29 = vmax.f32 %v3309_v50, 0.0  ;;  %v19944_v5 = vpack.c.bf16 %v3820_v42, %v3816_v48 }
 0x427   : > { %v3525_v8 = vpop.f32.mrb[172].mxu0  ;;  %v19948_v17 = vpack.c.bf16 %v3930_v47, %v3926_v6  ;;  %v19950_v20 = vpack.c.bf16 %v3821_v45, %v3817_v49  ;;  %v4174_v47 = vld [vmem:[%s19592_s23 + $0x5c0] sm:$0xff]  ;;  %v4183_v45 = vld [vmem:[%s19592_s23 + $0x608] sm:$0xff] }
 0x428   : > { %23731 = vst [vmem:[#allocation47_spill] sm:$0xff] %v19944_v5  ;;  %v3526_v2 = vadd.f32 %v3525_v8, %v19603_v10  ;;  %v3527_v1 = vpop.f32.mrb[173].mxu0  ;;  %v19953_v59 = vpack.c.bf16 %v3931_v29, %v3927_v0  ;;  %v4191_v49 = vld [vmem:[%s19592_s23 + $0x648] sm:$0xff]  ;;  %v17128_v29 = vld [vmem:[%s23562_s9 + $0x3a0] ss:$16 sps:$4 sm:$0xff]   ;;  %v19972_v6 = vpack.c.bf16 %v4174_v47, %v4166_v23 }
 0x429   : > { %23732 = vst [vmem:[#allocation48_spill] sm:$0xff] %v19948_v17  ;;  %23733 = vst [vmem:[#allocation49_spill] sm:$0xff] %v19950_v20  ;;  %v3528_v51 = vadd.f32 %v3527_v1, %v19610_v24  ;;  %v3529_v25 = vpop.f32.mrb[174].mxu0  ;;  %v17130_v0 = vld [vmem:[%s23562_s9 + $0x3a4] ss:$16 sps:$4 sm:$0xff]  }
 0x42a   : > { %23734 = vst [vmem:[#allocation50_spill] sm:$0xff] %v19953_v59  ;;  %v3530_v7 = vadd.f32 %v3529_v25, %v19603_v10  ;;  %v3531_v21 = vpop.f32.mrb[175].mxu0  ;;  %6757 = vmatmul.mubr.bf16.gmra.mrb[168].mxu1 %v19942_v3  ;;  %v3824_v48 = vmax.f32 %v3526_v2, 0.0  ;;  %7003 = vmatprep.subr.bf16.mxu1 %v17130_v0  ;;  %v19976_v2 = vpack.c.bf16 %v4191_v49, %v4183_v45  ;;  %v4182_v45 = vld [vmem:[%s19592_s23 + $0x600] sm:$0xff] }
 0x42b   : > { %v3532_v15 = vadd.f32 %v3531_v21, %v19610_v24  ;;  %6766 = vmatprep.mubr.bf16.mxu1 %v19946_v35  ;;  %v3825_v50 = vmax.f32 %v3528_v51, 0.0  ;;  %7004 = vmatpush1.bf16.msra.mxu1 %v17128_v29  ;;  %v4190_v49 = vld [vmem:[%s19592_s23 + $0x640] sm:$0xff] }
 0x42c   : > { %v3828_v42 = vmax.f32 %v3530_v7, 0.0  ;;  %8129 = vmatmul.mubr.bf16.gmra.mrb[24].mxu0 %v19838_v40  ;;  %v19995_v5 = vpack.c.bf16 %v4190_v49, %v4182_v45 }
 0x42d   : > { %v3829_v38 = vmax.f32 %v3532_v15, 0.0  ;;  %8138 = vmatprep.mubr.bf16.mxu0 %v19842_v60 }
 0x42e   : > { %v19974_v8 = vpack.c.bf16 %v3828_v42, %v3824_v48 }
 0x42f   : > { %v3535_v40 = vpop.f32.mrb[176].mxu0  ;;  %v19978_v1 = vpack.c.bf16 %v3829_v38, %v3825_v50  ;;  %v4199_v50 = vld [vmem:[%s19592_s23 + $0x688] sm:$0xff] }
 0x430   : > { %23735 = vst [vmem:[#allocation51_spill] sm:$0xff] %v19974_v8  ;;  %v3536_v25 = vadd.f32 %v3535_v40, %v19603_v10  ;;  %v3537_v7 = vpop.f32.mrb[177].mxu0  ;;  %v4207_v38 = vld [vmem:[%s19592_s23 + $0x6c8] sm:$0xff] }
 0x431   : > { %23736 = vst [vmem:[#allocation52_spill] sm:$0xff] %v19978_v1  ;;  %v3538_v51 = vadd.f32 %v3537_v7, %v19610_v24  ;;  %v3539_v60 = vpop.f32.mrb[178].mxu0 }
 0x432   : > { %v3540_v21 = vadd.f32 %v3539_v60, %v19603_v10  ;;  %v3541_v23 = vpop.f32.mrb[179].mxu0  ;;  %6767 = vmatmul.mubr.bf16.gmra.mrb[172].mxu1 %v19972_v6  ;;  %v3832_v48 = vmax.f32 %v3536_v25, 0.0 }
 0x433   : > { %v3542_v15 = vadd.f32 %v3541_v23, %v19610_v24  ;;  %v3312_v47 = vpop.f32.mrb[100].mxu1  ;;  %6776 = vmatprep.mubr.bf16.mxu1 %v19976_v2  ;;  %v3833_v40 = vmax.f32 %v3538_v51, 0.0 }
 0x434   : > { %v3836_v42 = vmax.f32 %v3540_v21, 0.0  ;;  %v3313_v29 = vadd.f32 %v3312_v47, %v18904_v27  ;;  %v3314_v0 = vpop.f32.mrb[101].mxu1  ;;  %8139 = vmatmul.mubr.bf16.gmra.mrb[28].mxu0 %v19865_v57  ;;  %v20000_v47 = vpack.c.bf16 %v4207_v38, %v4199_v50  ;;  %v4198_v50 = vld [vmem:[%s19592_s23 + $0x680] sm:$0xff] }
 0x435   : > { %v3837_v7 = vmax.f32 %v3542_v15, 0.0  ;;  %v3315_v60 = vadd.f32 %v3314_v0, %v18912_v32  ;;  %v3316_v8 = vpop.f32.mrb[102].mxu1  ;;  %8148 = vmatprep.mubr.bf16.mxu0 %v19870_v62 }
 0x436   : > { %v3317_v23 = vadd.f32 %v3316_v8, %v18904_v27  ;;  %v3318_v1 = vpop.f32.mrb[103].mxu1  ;;  %v19997_v25 = vpack.c.bf16 %v3836_v42, %v3832_v48  ;;  %v3934_v8 = vmax.f32 %v3313_v29, 0.0  ;;  %v4215_v29 = vld [vmem:[%s19592_s23 + $0x708] sm:$0xff] }
 0x437   : > { %v3319_v21 = vadd.f32 %v3318_v1, %v18912_v32  ;;  %v3545_v57 = vpop.f32.mrb[180].mxu0  ;;  %v20002_v51 = vpack.c.bf16 %v3837_v7, %v3833_v40  ;;  %v3935_v48 = vmax.f32 %v3315_v60, 0.0  ;;  %v4206_v7 = vld [vmem:[%s19592_s23 + $0x6c0] sm:$0xff] }
 0x438   : > { %23737 = vst [vmem:[#allocation53_spill] sm:$0xff] %v19997_v25  ;;  %v3546_v15 = vadd.f32 %v3545_v57, %v19603_v10  ;;  %v3547_v62 = vpop.f32.mrb[181].mxu0  ;;  %v3938_v0 = vmax.f32 %v3317_v23, 0.0  ;;  %v4223_v23 = vld [vmem:[%s19592_s23 + $0x748] sm:$0xff] }
 0x439   : > { %23738 = vst [vmem:[#allocation54_spill] sm:$0xff] %v20002_v51  ;;  %v3548_v45 = vadd.f32 %v3547_v62, %v19610_v24  ;;  %v3549_v49 = vpop.f32.mrb[182].mxu0  ;;  %v3939_v42 = vmax.f32 %v3319_v21, 0.0  ;;  %v17131_v21 = vld [vmem:[%s23562_s9 + $0x3c0] ss:$16 sps:$4 sm:$0xff]  }
 0x43a   : > { %v3550_v1 = vadd.f32 %v3549_v49, %v19603_v10  ;;  %v3551_v25 = vpop.f32.mrb[183].mxu0  ;;  %6777 = vmatmul.mubr.bf16.gmra.mrb[176].mxu1 %v19995_v5  ;;  %v20009_v38 = vpack.c.bf16 %v3938_v0, %v3934_v8  ;;  %v3840_v62 = vmax.f32 %v3546_v15, 0.0  ;;  %v17133_v8 = vld [vmem:[%s23562_s9 + $0x3c4] ss:$16 sps:$4 sm:$0xff]   ;;  %v17134_v49 = vld [vmem:[%s23562_s9 + $0x208] ss:$16 sps:$4 sm:$0xff]   ;;  %v20032_v15 = vpack.c.bf16 %v4206_v7, %v4198_v50 }
 0x43b   : > { %v3552_v40 = vadd.f32 %v3551_v25, %v19610_v24  ;;  %6786 = vmatprep.mubr.bf16.mxu1 %v20000_v47  ;;  %v20016_v57 = vpack.c.bf16 %v3939_v42, %v3935_v48  ;;  %v3841_v25 = vmax.f32 %v3548_v45, 0.0  ;;  %7005 = vmatprep.subr.bf16.mxu1 %v17133_v8  ;;  %v4214_v8 = vld [vmem:[%s19592_s23 + $0x700] sm:$0xff] }
 0x43c   : > { %23739 = vst [vmem:[#allocation55_spill] sm:$0xff] %v20009_v38  ;;  %v3844_v60 = vmax.f32 %v3550_v1, 0.0  ;;  %8149 = vmatmul.mubr.bf16.gmra.mrb[32].mxu0 %v19892_v53  ;;  %v17136_v53 = vld [vmem:[%s23562_s9 + $0x20c] ss:$16 sps:$4 sm:$0xff]   ;;  %v20036_v1 = vpack.c.bf16 %v4223_v23, %v4215_v29  ;;  %7006 = vmatpush1.bf16.msra.mxu1 %v17131_v21 }
 0x43d   : > { %23740 = vst [vmem:[#allocation56_spill] sm:$0xff] %v20016_v57  ;;  %v3845_v0 = vmax.f32 %v3552_v40, 0.0  ;;  %8158 = vmatprep.mubr.bf16.mxu0 %v19896_v41  ;;  %8389 = vmatprep.subr.bf16.mxu0 %v17136_v53  ;;  %v17139_v29 = vld [vmem:[%s23562_s9 + $0x22c] ss:$16 sps:$4 sm:$0xff]  }
 0x43e   : > { %v20034_v48 = vpack.c.bf16 %v3844_v60, %v3840_v62  ;;  %8390 = vmatpush1.bf16.msra.mxu0 %v17134_v49  ;;  %v17137_v60 = vld [vmem:[%s23562_s9 + $0x228] ss:$16 sps:$4 sm:$0xff]  }
 0x43f   : > { %v3555_v42 = vpop.f32.mrb[184].mxu0  ;;  %v20038_v41 = vpack.c.bf16 %v3845_v0, %v3841_v25  ;;  %v4222_v25 = vld [vmem:[%s19592_s23 + $0x740] sm:$0xff]  ;;  %8391 = vmatprep.subr.bf16.mxu0 %v17139_v29  ;;  %v4231_v53 = vld [vmem:[%s19592_s23 + $0x788] sm:$0xff] }
 0x440   : > { %23741 = vst [vmem:[#allocation57_spill] sm:$0xff] %v20034_v48  ;;  %v3556_v45 = vadd.f32 %v3555_v42, %v19603_v10  ;;  %v3557_v40 = vpop.f32.mrb[185].mxu0  ;;  %v4239_v42 = vld [vmem:[%s19592_s23 + $0x7c8] sm:$0xff] }
 0x441   : > { %23742 = vst [vmem:[#allocation58_spill] sm:$0xff] %v20038_v41  ;;  %v3558_v50 = vadd.f32 %v3557_v40, %v19610_v24  ;;  %v3559_v7 = vpop.f32.mrb[186].mxu0  ;;  %v17142_v48 = vld [vmem:[%s23562_s9 + $0x24c] ss:$16 sps:$4 sm:$0xff]  }
 0x442   : > { %v3560_v23 = vadd.f32 %v3559_v7, %v19603_v10  ;;  %v3561_v62 = vpop.f32.mrb[187].mxu0  ;;  %6787 = vmatmul.mubr.bf16.gmra.mrb[180].mxu1 %v20032_v15  ;;  %v3848_v0 = vmax.f32 %v3556_v45, 0.0  ;;  %8392 = vmatpush1.bf16.msra.mxu0 %v17137_v60  ;;  %v20064_v45 = vpack.c.bf16 %v4222_v25, %v4214_v8 }
 0x443   : > { %v3562_v21 = vadd.f32 %v3561_v62, %v19610_v24  ;;  %6796 = vmatprep.mubr.bf16.mxu1 %v20036_v1  ;;  %v3849_v40 = vmax.f32 %v3558_v50, 0.0  ;;  %v17140_v62 = vld [vmem:[%s23562_s9 + $0x248] ss:$16 sps:$4 sm:$0xff]   ;;  %v20068_v50 = vpack.c.bf16 %v4239_v42, %v4231_v53  ;;  %8393 = vmatprep.subr.bf16.mxu0 %v17142_v48  ;;  %v17145_v48 = vld [vmem:[%s23562_s9 + $0x26c] ss:$16 sps:$4 sm:$0xff]  }
 0x444   : > { %v3852_v49 = vmax.f32 %v3560_v23, 0.0  ;;  %8159 = vmatmul.mubr.bf16.gmra.mrb[36].mxu0 %v19918_v43  ;;  %v17143_v42 = vld [vmem:[%s23562_s9 + $0x268] ss:$16 sps:$4 sm:$0xff]  }
 0x445   : > { %v3853_v7 = vmax.f32 %v3562_v21, 0.0  ;;  %8168 = vmatprep.mubr.bf16.mxu0 %v19922_v58 }
 0x446   : > { %v3322_v29 = vpop.f32.mrb[104].mxu1  ;;  %v20066_v23 = vpack.c.bf16 %v3852_v49, %v3848_v0  ;;  %8394 = vmatpush1.bf16.msra.mxu0 %v17140_v62 }
 0x447   : > { %v3324_v43 = vpop.f32.mrb[105].mxu1  ;;  %v3565_v41 = vpop.f32.mrb[188].mxu0  ;;  %v20070_v58 = vpack.c.bf16 %v3853_v7, %v3849_v40  ;;  %v3323_v0 = vadd.f32 %v3322_v29, %v18904_v27  ;;  %v4238_v29 = vld [vmem:[%s19592_s23 + $0x7c0] sm:$0xff]  ;;  %8395 = vmatprep.subr.bf16.mxu0 %v17145_v48 }
 0x448   : > { %23743 = vst [vmem:[#allocation59_spill] sm:$0xff] %v20066_v23  ;;  %v3325_v60 = vadd.f32 %v3324_v43, %v18912_v32  ;;  %v3566_v21 = vadd.f32 %v3565_v41, %v19603_v10  ;;  %v3326_v51 = vpop.f32.mrb[106].mxu1  ;;  %v3567_v20 = vpop.f32.mrb[189].mxu0  ;;  %v4247_v43 = vld [vmem:[%s19592_s23 + $0x808] sm:$0xff] }
 0x449   : > { %23744 = vst [vmem:[#allocation60_spill] sm:$0xff] %v20070_v58  ;;  %v3568_v38 = vadd.f32 %v3567_v20, %v19610_v24  ;;  %v3328_v8 = vpop.f32.mrb[107].mxu1  ;;  %v3569_v25 = vpop.f32.mrb[190].mxu0  ;;  %v4230_v20 = vld [vmem:[%s19592_s23 + $0x780] sm:$0xff]  ;;  %v3327_v7 = vadd.f32 %v3326_v51, %v18904_v27 }
 0x44a   : > { %v3329_v49 = vadd.f32 %v3328_v8, %v18912_v32  ;;  %v3570_v41 = vadd.f32 %v3569_v25, %v19603_v10  ;;  %v3571_v53 = vpop.f32.mrb[191].mxu0  ;;  %6797 = vmatmul.mubr.bf16.gmra.mrb[184].mxu1 %v20064_v45  ;;  %v3856_v40 = vmax.f32 %v3566_v21, 0.0  ;;  %v4255_v8 = vld [vmem:[%s19592_s23 + $0x848] sm:$0xff]  ;;  %v3943_v25 = vmax.f32 %v3325_v60, 0.0  ;;  %v17146_v58 = vld [vmem:[%s23562_s9 + $0x3e0] ss:$16 sps:$4 sm:$0xff]   ;;  %8396 = vmatpush1.bf16.msra.mxu0 %v17143_v42 }
 0x44b   : > { %v3572_v62 = vadd.f32 %v3571_v53, %v19610_v24  ;;  %6806 = vmatprep.mubr.bf16.mxu1 %v20068_v50  ;;  %v17148_v51 = vld [vmem:[%s23562_s9 + $0x3e4] ss:$16 sps:$4 sm:$0xff]   ;;  %v3857_v53 = vmax.f32 %v3568_v38, 0.0  ;;  %v17149_v60 = vld [vmem:[%s23562_s9 + $0x288] ss:$16 sps:$4 sm:$0xff]   ;;  %v20106_v48 = vpack.c.bf16 %v4238_v29, %v4230_v20  ;;  %v20115_v42 = vpack.c.bf16 %v4255_v8, %v4247_v43 }
 0x44c   : > { %v3860_v23 = vmax.f32 %v3570_v41, 0.0  ;;  %8169 = vmatmul.mubr.bf16.gmra.mrb[40].mxu0 %v19942_v3  ;;  %v3947_v21 = vmax.f32 %v3329_v49, 0.0  ;;  %v17151_v3 = vld [vmem:[%s23562_s9 + $0x28c] ss:$16 sps:$4 sm:$0xff]   ;;  %7007 = vmatprep.subr.bf16.mxu1 %v17148_v51  ;;  %v3946_v17 = vmax.f32 %v3327_v7, 0.0  ;;  %v4246_v7 = vld [vmem:[%s19592_s23 + $0x800] sm:$0xff] }
 0x44d   : > { %v3861_v57 = vmax.f32 %v3572_v62, 0.0  ;;  %8178 = vmatprep.mubr.bf16.mxu0 %v19946_v35  ;;  %v17154_v49 = vld [vmem:[%s23562_s9 + $0x2ac] ss:$16 sps:$4 sm:$0xff]   ;;  %7008 = vmatpush1.bf16.msra.mxu1 %v17146_v58  ;;  %v3942_v62 = vmax.f32 %v3323_v0, 0.0  ;;  %v4254_v43 = vld [vmem:[%s19592_s23 + $0x840] sm:$0xff] }
 0x44e   : > { %v20111_v38 = vpack.c.bf16 %v3947_v21, %v3943_v25  ;;  %v20113_v41 = vpack.c.bf16 %v3860_v23, %v3856_v40  ;;  %8397 = vmatprep.subr.bf16.mxu0 %v17151_v3  ;;  %v17152_v23 = vld [vmem:[%s23562_s9 + $0x2a8] ss:$16 sps:$4 sm:$0xff]  }
 0x44f   : > { %v3575_v35 = vpop.f32.mrb[192].mxu0  ;;  %v20117_v20 = vpack.c.bf16 %v3861_v57, %v3857_v53  ;;  %8398 = vmatpush1.bf16.msra.mxu0 %v17149_v60  ;;  %v20124_v58 = vpack.c.bf16 %v3946_v17, %v3942_v62  ;;  %v4263_v53 = vld [vmem:[%s19592_s23 + $0x888] sm:$0xff]  ;;  %v20142_v62 = vpack.c.bf16 %v4254_v43, %v4246_v7 }
 0x450   : > { %23745 = vst [vmem:[#allocation61_spill] sm:$0xff] %v20111_v38  ;;  %23746 = vst [vmem:[#allocation62_spill] sm:$0xff] %v20113_v41  ;;  %v3576_v29 = vadd.f32 %v3575_v35, %v19603_v10  ;;  %v3577_v51 = vpop.f32.mrb[193].mxu0  ;;  %8399 = vmatprep.subr.bf16.mxu0 %v17154_v49  ;;  %v4271_v60 = vld [vmem:[%s19592_s23 + $0x8c8] sm:$0xff] }
 0x451   : > { %23747 = vst [vmem:[#allocation63_spill] sm:$0xff] %v20117_v20  ;;  %v3578_v59 = vadd.f32 %v3577_v51, %v19610_v24  ;;  %v3579_v25 = vpop.f32.mrb[194].mxu0  ;;  %23748 = vst [vmem:[#allocation64_spill] sm:$0xff] %v20124_v58  ;;  %v17157_v17 = vld [vmem:[%s23562_s9 + $0x2cc] ss:$16 sps:$4 sm:$0xff]  }
 0x452   : > { %v3580_v0 = vadd.f32 %v3579_v25, %v19603_v10  ;;  %v3581_v40 = vpop.f32.mrb[195].mxu0  ;;  %6807 = vmatmul.mubr.bf16.gmra.mrb[188].mxu1 %v20106_v48  ;;  %v3864_v8 = vmax.f32 %v3576_v29, 0.0  ;;  %v17155_v49 = vld [vmem:[%s23562_s9 + $0x2c8] ss:$16 sps:$4 sm:$0xff]   ;;  %v17163_v29 = vld [vmem:[%s23562_s9 + $0x404] ss:$16 sps:$4 sm:$0xff]  }
 0x453   : > { %v3582_v57 = vadd.f32 %v3581_v40, %v19610_v24  ;;  %6816 = vmatprep.mubr.bf16.mxu1 %v20115_v42  ;;  %v3865_v3 = vmax.f32 %v3578_v59, 0.0  ;;  %8400 = vmatpush1.bf16.msra.mxu0 %v17152_v23  ;;  %v17158_v43 = vld [vmem:[%s23562_s9 + $0x2e8] ss:$16 sps:$4 sm:$0xff]  }
 0x454   : > { %v3868_v21 = vmax.f32 %v3580_v0, 0.0  ;;  %8179 = vmatmul.mubr.bf16.gmra.mrb[44].mxu0 %v19972_v6  ;;  %8401 = vmatprep.subr.bf16.mxu0 %v17157_v17  ;;  %v17160_v6 = vld [vmem:[%s23562_s9 + $0x2ec] ss:$16 sps:$4 sm:$0xff]  }
 0x455   : > { %v3869_v35 = vmax.f32 %v3582_v57, 0.0  ;;  %8188 = vmatprep.mubr.bf16.mxu0 %v19976_v2  ;;  %v20152_v2 = vpack.c.bf16 %v4271_v60, %v4263_v53  ;;  %7330 = vmatprep.subr.bf16.mxu1 %v17163_v29  ;;  %v4270_v29 = vld [vmem:[%s19592_s23 + $0x8c0] sm:$0xff] }
 0x456   : > { %v20150_v59 = vpack.c.bf16 %v3868_v21, %v3864_v8 }
 0x457   : > { %v3585_v51 = vpop.f32.mrb[196].mxu0  ;;  %v20154_v25 = vpack.c.bf16 %v3869_v35, %v3865_v3  ;;  %8402 = vmatpush1.bf16.msra.mxu0 %v17155_v49  ;;  %v4262_v49 = vld [vmem:[%s19592_s23 + $0x880] sm:$0xff] }
 0x458   : > { %23749 = vst [vmem:[#allocation65_spill] sm:$0xff] %v20150_v59  ;;  %v3586_v23 = vadd.f32 %v3585_v51, %v19603_v10  ;;  %v3587_v0 = vpop.f32.mrb[197].mxu0  ;;  %8403 = vmatprep.subr.bf16.mxu0 %v17160_v6  ;;  %v4279_v51 = vld [vmem:[%s19592_s23 + $0x908] sm:$0xff] }
 0x459   : > { %23750 = vst [vmem:[#allocation66_spill] sm:$0xff] %v20154_v25  ;;  %v3588_v40 = vadd.f32 %v3587_v0, %v19610_v24  ;;  %v3332_v57 = vpop.f32.mrb[108].mxu1  ;;  %v3589_v7 = vpop.f32.mrb[198].mxu0  ;;  %v4287_v25 = vld [vmem:[%s19592_s23 + $0x948] sm:$0xff] }
 0x45a   : > { %v3333_v8 = vadd.f32 %v3332_v57, %v18904_v27  ;;  %v3590_v21 = vadd.f32 %v3589_v7, %v19603_v10  ;;  %v3334_v53 = vpop.f32.mrb[109].mxu1  ;;  %v3591_v60 = vpop.f32.mrb[199].mxu0  ;;  %6817 = vmatmul.mubr.bf16.gmra.mrb[192].mxu1 %v20142_v62  ;;  %v3872_v0 = vmax.f32 %v3586_v23, 0.0  ;;  %v17166_v6 = vld [vmem:[%s23562_s9 + $0x30c] ss:$16 sps:$4 sm:$0xff]  }
 0x45b   : > { %v3335_v17 = vadd.f32 %v3334_v53, %v18912_v32  ;;  %v3592_v3 = vadd.f32 %v3591_v60, %v19610_v24  ;;  %v3336_v35 = vpop.f32.mrb[110].mxu1  ;;  %6826 = vmatprep.mubr.bf16.mxu1 %v20152_v2  ;;  %v3873_v53 = vmax.f32 %v3588_v40, 0.0  ;;  %8404 = vmatpush1.bf16.msra.mxu0 %v17158_v43  ;;  %v17164_v23 = vld [vmem:[%s23562_s9 + $0x308] ss:$16 sps:$4 sm:$0xff]  }
 0x45c   : > { %v3876_v57 = vmax.f32 %v3590_v21, 0.0  ;;  %v3337_v7 = vadd.f32 %v3336_v35, %v18904_v27  ;;  %v3338_v59 = vpop.f32.mrb[111].mxu1  ;;  %8189 = vmatmul.mubr.bf16.gmra.mrb[48].mxu0 %v19995_v5  ;;  %v20181_v21 = vpack.c.bf16 %v4270_v29, %v4262_v49  ;;  %8405 = vmatprep.subr.bf16.mxu0 %v17166_v6  ;;  %v17169_v5 = vld [vmem:[%s23562_s9 + $0x32c] ss:$16 sps:$4 sm:$0xff]   ;;  %v3950_v35 = vmax.f32 %v3333_v8, 0.0 }
 0x45d   : > { %v3877_v60 = vmax.f32 %v3592_v3, 0.0  ;;  %v3339_v41 = vadd.f32 %v3338_v59, %v18912_v32  ;;  %8198 = vmatprep.mubr.bf16.mxu0 %v20000_v47  ;;  %v20188_v59 = vpack.c.bf16 %v4287_v25, %v4279_v51  ;;  %v3951_v47 = vmax.f32 %v3335_v17, 0.0  ;;  %v17167_v25 = vld [vmem:[%s23562_s9 + $0x328] ss:$16 sps:$4 sm:$0xff]  }
 0x45e   : > { %v3954_v20 = vmax.f32 %v3337_v7, 0.0  ;;  %v20186_v40 = vpack.c.bf16 %v3876_v57, %v3872_v0  ;;  %v4278_v0 = vld [vmem:[%s19592_s23 + $0x900] sm:$0xff] }
 0x45f   : > { %v3595_v3 = vpop.f32.mrb[200].mxu0  ;;  %v3955_v43 = vmax.f32 %v3339_v41, 0.0  ;;  %v20190_v58 = vpack.c.bf16 %v3877_v60, %v3873_v53  ;;  %8406 = vmatpush1.bf16.msra.mxu0 %v17164_v23  ;;  %v4286_v57 = vld [vmem:[%s19592_s23 + $0x940] sm:$0xff]  ;;  %v4295_v60 = vld [vmem:[%s19592_s23 + $0x988] sm:$0xff] }
 0x460   : > { %23751 = vst [vmem:[#allocation67_spill] sm:$0xff] %v20186_v40  ;;  %v3596_v49 = vadd.f32 %v3595_v3, %v19603_v10  ;;  %v3597_v29 = vpop.f32.mrb[201].mxu0  ;;  %v20193_v6 = vpack.c.bf16 %v3954_v20, %v3950_v35  ;;  %8407 = vmatprep.subr.bf16.mxu0 %v17169_v5  ;;  %v4303_v23 = vld [vmem:[%s19592_s23 + $0x9c8] sm:$0xff] }
 0x461   : > { %23752 = vst [vmem:[#allocation68_spill] sm:$0xff] %v20190_v58  ;;  %v3598_v38 = vadd.f32 %v3597_v29, %v19610_v24  ;;  %v3599_v8 = vpop.f32.mrb[202].mxu0  ;;  %v20199_v41 = vpack.c.bf16 %v3955_v43, %v3951_v47  ;;  %v17172_v35 = vld [vmem:[%s23562_s9 + $0x34c] ss:$16 sps:$4 sm:$0xff]   ;;  %v17170_v5 = vld [vmem:[%s23562_s9 + $0x348] ss:$16 sps:$4 sm:$0xff]   ;;  %v20217_v43 = vpack.c.bf16 %v4286_v57, %v4278_v0 }
 0x462   : > { %23753 = vst [vmem:[#allocation69_spill] sm:$0xff] %v20193_v6  ;;  %v3600_v17 = vadd.f32 %v3599_v8, %v19603_v10  ;;  %v3601_v51 = vpop.f32.mrb[203].mxu0  ;;  %6827 = vmatmul.mubr.bf16.gmra.mrb[196].mxu1 %v20181_v21  ;;  %v3880_v7 = vmax.f32 %v3596_v49, 0.0 }
 0x463   : > { %23754 = vst [vmem:[#allocation70_spill] sm:$0xff] %v20199_v41  ;;  %v3602_v20 = vadd.f32 %v3601_v51, %v19610_v24  ;;  %6836 = vmatprep.mubr.bf16.mxu1 %v20188_v59  ;;  %v3881_v3 = vmax.f32 %v3598_v38, 0.0  ;;  %8408 = vmatpush1.bf16.msra.mxu0 %v17167_v25  ;;  %v20224_v38 = vpack.c.bf16 %v4303_v23, %v4295_v60  ;;  %v4302_v60 = vld [vmem:[%s19592_s23 + $0x9c0] sm:$0xff]  ;;  %v4311_v23 = vld [vmem:[%s19592_s23 + $0xa08] sm:$0xff] }
 0x464   : > { %v3884_v53 = vmax.f32 %v3600_v17, 0.0  ;;  %8199 = vmatmul.mubr.bf16.gmra.mrb[52].mxu0 %v20032_v15  ;;  %8409 = vmatprep.subr.bf16.mxu0 %v17172_v35  ;;  %v17175_v15 = vld [vmem:[%s23562_s9 + $0x36c] ss:$16 sps:$4 sm:$0xff]  }
 0x465   : > { %v3885_v47 = vmax.f32 %v3602_v20, 0.0  ;;  %8208 = vmatprep.mubr.bf16.mxu0 %v20036_v1  ;;  %v17173_v20 = vld [vmem:[%s23562_s9 + $0x368] ss:$16 sps:$4 sm:$0xff]  }
 0x466   : > { %v20222_v49 = vpack.c.bf16 %v3884_v53, %v3880_v7  ;;  %v4294_v53 = vld [vmem:[%s19592_s23 + $0x980] sm:$0xff] }
 0x467   : > { %v3605_v29 = vpop.f32.mrb[204].mxu0  ;;  %v20226_v1 = vpack.c.bf16 %v3885_v47, %v3881_v3  ;;  %8410 = vmatpush1.bf16.msra.mxu0 %v17170_v5  ;;  %v4319_v5 = vld [vmem:[%s19592_s23 + $0xa48] sm:$0xff] }
 0x468   : > { %23755 = vst [vmem:[#allocation71_spill] sm:$0xff] %v20222_v49  ;;  %v3606_v8 = vadd.f32 %v3605_v29, %v19603_v10  ;;  %v3607_v25 = vpop.f32.mrb[205].mxu0  ;;  %8411 = vmatprep.subr.bf16.mxu0 %v17175_v15  ;;  %v17181_v29 = vld [vmem:[%s23562_s9 + $0x38c] ss:$16 sps:$4 sm:$0xff]   ;;  %v20251_v49 = vpack.c.bf16 %v4302_v60, %v4294_v53 }
 0x469   : > { %23756 = vst [vmem:[#allocation72_spill] sm:$0xff] %v20226_v1  ;;  %v3608_v17 = vadd.f32 %v3607_v25, %v19610_v24  ;;  %v3609_v51 = vpop.f32.mrb[206].mxu0  ;;  %v20259_v1 = vpack.c.bf16 %v4319_v5, %v4311_v23 }
 0x46a   : > { %v3610_v0 = vadd.f32 %v3609_v51, %v19603_v10  ;;  %v3611_v57 = vpop.f32.mrb[207].mxu0  ;;  %6837 = vmatmul.mubr.bf16.gmra.mrb[200].mxu1 %v20217_v43  ;;  %v3888_v35 = vmax.f32 %v3606_v8, 0.0  ;;  %v17179_v8 = vld [vmem:[%s23562_s9 + $0x388] ss:$16 sps:$4 sm:$0xff]  }
 0x46b   : > { %v3612_v7 = vadd.f32 %v3611_v57, %v19610_v24  ;;  %6846 = vmatprep.mubr.bf16.mxu1 %v20224_v38  ;;  %v3889_v25 = vmax.f32 %v3608_v17, 0.0  ;;  %8412 = vmatpush1.bf16.msra.mxu0 %v17173_v20  ;;  %v17184_v17 = vld [vmem:[%s23562_s9 + $0x3ac] ss:$16 sps:$4 sm:$0xff]  }
 0x46c   : > { %v3892_v3 = vmax.f32 %v3610_v0, 0.0  ;;  %v3342_v47 = vpop.f32.mrb[112].mxu1  ;;  %8209 = vmatmul.mubr.bf16.gmra.mrb[56].mxu0 %v20064_v45  ;;  %8413 = vmatprep.subr.bf16.mxu0 %v17181_v29 }
 0x46d   : > { %v3893_v51 = vmax.f32 %v3612_v7, 0.0  ;;  %v3343_v15 = vadd.f32 %v3342_v47, %v18904_v27  ;;  %v3344_v57 = vpop.f32.mrb[113].mxu1  ;;  %8218 = vmatprep.mubr.bf16.mxu0 %v20068_v50 }
 0x46e   : > { %v3345_v0 = vadd.f32 %v3344_v57, %v18912_v32  ;;  %v3346_v45 = vpop.f32.mrb[114].mxu1  ;;  %v20256_v7 = vpack.c.bf16 %v3892_v3, %v3888_v35  ;;  %v17182_v35 = vld [vmem:[%s23562_s9 + $0x3a8] ss:$16 sps:$4 sm:$0xff]  }
 0x46f   : > { %v3347_v47 = vadd.f32 %v3346_v45, %v18904_v27  ;;  %v3348_v50 = vpop.f32.mrb[115].mxu1  ;;  %v3615_v20 = vpop.f32.mrb[208].mxu0  ;;  %v20261_v40 = vpack.c.bf16 %v3893_v51, %v3889_v25  ;;  %8414 = vmatpush1.bf16.msra.mxu0 %v17179_v8  ;;  %v3958_v3 = vmax.f32 %v3343_v15, 0.0  ;;  %v4310_v8 = vld [vmem:[%s19592_s23 + $0xa00] sm:$0xff] }
 0x470   : > { %23757 = vst [vmem:[#allocation73_spill] sm:$0xff] %v20256_v7  ;;  %v3349_v57 = vadd.f32 %v3348_v50, %v18912_v32  ;;  %v3616_v53 = vadd.f32 %v3615_v20, %v19603_v10  ;;  %v3617_v60 = vpop.f32.mrb[209].mxu0  ;;  %8415 = vmatprep.subr.bf16.mxu0 %v17184_v17  ;;  %v3959_v51 = vmax.f32 %v3345_v0, 0.0  ;;  %v4318_v20 = vld [vmem:[%s19592_s23 + $0xa40] sm:$0xff]  ;;  %v17187_v17 = vld [vmem:[%s23562_s9 + $0x3cc] ss:$16 sps:$4 sm:$0xff]  }
 0x471   : > { %23758 = vst [vmem:[#allocation74_spill] sm:$0xff] %v20261_v40  ;;  %v3618_v29 = vadd.f32 %v3617_v60, %v19610_v24  ;;  %v3619_v58 = vpop.f32.mrb[210].mxu0  ;;  %v3962_v23 = vmax.f32 %v3347_v47, 0.0  ;;  %v4327_v47 = vld [vmem:[%s19592_s23 + $0xa88] sm:$0xff] }
 0x472   : > { %v3620_v5 = vadd.f32 %v3619_v58, %v19603_v10  ;;  %v3621_v25 = vpop.f32.mrb[211].mxu0  ;;  %6847 = vmatmul.mubr.bf16.gmra.mrb[204].mxu1 %v20251_v49  ;;  %v3963_v45 = vmax.f32 %v3349_v57, 0.0  ;;  %v3896_v15 = vmax.f32 %v3616_v53, 0.0  ;;  %v4335_v58 = vld [vmem:[%s19592_s23 + $0xac8] sm:$0xff] }
 0x473   : > { %v3622_v50 = vadd.f32 %v3621_v25, %v19610_v24  ;;  %6856 = vmatprep.mubr.bf16.mxu1 %v20259_v1  ;;  %v20275_v60 = vpack.c.bf16 %v3962_v23, %v3958_v3  ;;  %v3897_v57 = vmax.f32 %v3618_v29, 0.0  ;;  %8416 = vmatpush1.bf16.msra.mxu0 %v17182_v35  ;;  %v17185_v53 = vld [vmem:[%s23562_s9 + $0x3c8] ss:$16 sps:$4 sm:$0xff]   ;;  %v20289_v3 = vpack.c.bf16 %v4318_v20, %v4310_v8 }
 0x474   : > { %v3900_v7 = vmax.f32 %v3620_v5, 0.0  ;;  %8219 = vmatmul.mubr.bf16.gmra.mrb[60].mxu0 %v20106_v48  ;;  %v20283_v0 = vpack.c.bf16 %v3963_v45, %v3959_v51  ;;  %8417 = vmatprep.subr.bf16.mxu0 %v17187_v17  ;;  %v17190_v48 = vld [vmem:[%s23562_s9 + $0x3ec] ss:$16 sps:$4 sm:$0xff]   ;;  %v20296_v29 = vpack.c.bf16 %v4335_v58, %v4327_v47  ;;  %v4326_v47 = vld [vmem:[%s19592_s23 + $0xa80] sm:$0xff] }
 0x475   : > { %23759 = vst [vmem:[#allocation75_spill] sm:$0xff] %v20275_v60  ;;  %v3901_v25 = vmax.f32 %v3622_v50, 0.0  ;;  %8228 = vmatprep.mubr.bf16.mxu0 %v20115_v42  ;;  %v4334_v58 = vld [vmem:[%s19592_s23 + $0xac0] sm:$0xff] }
 0x476   : > { %23760 = vst [vmem:[#allocation76_spill] sm:$0xff] %v20283_v0  ;;  %v20294_v23 = vpack.c.bf16 %v3900_v7, %v3896_v15  ;;  %v17188_v7 = vld [vmem:[%s23562_s9 + $0x3e8] ss:$16 sps:$4 sm:$0xff]  }
 0x477   : > { %v3625_v5 = vpop.f32.mrb[212].mxu0  ;;  %v20298_v42 = vpack.c.bf16 %v3901_v25, %v3897_v57  ;;  %8418 = vmatpush1.bf16.msra.mxu0 %v17185_v53  ;;  %v4343_v25 = vld [vmem:[%s19592_s23 + $0xb08] sm:$0xff] }
 0x478   : > { %23761 = vst [vmem:[#allocation77_spill] sm:$0xff] %v20294_v23  ;;  %v3626_v35 = vadd.f32 %v3625_v5, %v19603_v10  ;;  %v3627_v51 = vpop.f32.mrb[213].mxu0  ;;  %8419 = vmatprep.subr.bf16.mxu0 %v17190_v48  ;;  %v4351_v53 = vld [vmem:[%s19592_s23 + $0xb48] sm:$0xff] }
 0x479   : > { %23762 = vst [vmem:[#allocation78_spill] sm:$0xff] %v20298_v42  ;;  %v3628_v45 = vadd.f32 %v3627_v51, %v19610_v24  ;;  %v3629_v50 = vpop.f32.mrb[214].mxu0  ;;  %v20319_v42 = vpack.c.bf16 %v4351_v53, %v4343_v25 }
 0x47a   : > { %v3630_v8 = vadd.f32 %v3629_v50, %v19603_v10  ;;  %v3631_v20 = vpop.f32.mrb[215].mxu0  ;;  %6857 = vmatmul.mubr.bf16.gmra.mrb[208].mxu1 %v20289_v3  ;;  %v3904_v17 = vmax.f32 %v3626_v35, 0.0  ;;  %v20315_v50 = vpack.c.bf16 %v4334_v58, %v4326_v47 }
 0x47b   : > { %v3632_v15 = vadd.f32 %v3631_v20, %v19610_v24  ;;  %6866 = vmatprep.mubr.bf16.mxu1 %v20296_v29  ;;  %v3905_v5 = vmax.f32 %v3628_v45, 0.0  ;;  %8420 = vmatpush1.bf16.msra.mxu0 %v17188_v7 }
 0x47c   : > { %v3908_v57 = vmax.f32 %v3630_v8, 0.0  ;;  %8229 = vmatmul.mubr.bf16.gmra.mrb[64].mxu0 %v20142_v62 }
 0x47d   : > { %v3909_v51 = vmax.f32 %v3632_v15, 0.0  ;;  %8238 = vmatprep.mubr.bf16.mxu0 %v20152_v2 }
 0x47e   : > { %v20317_v48 = vpack.c.bf16 %v3908_v57, %v3904_v17 }
 0x47f   : > { %v3352_v20 = vpop.f32.mrb[116].mxu1  ;;  %v3635_v23 = vpop.f32.mrb[216].mxu0  ;;  %v20321_v40 = vpack.c.bf16 %v3909_v51, %v3905_v5  ;;  %v4342_v5 = vld [vmem:[%s19592_s23 + $0xb00] sm:$0xff] }
 0x480   : > { %23763 = vst [vmem:[#allocation79_spill] sm:$0xff] %v20317_v48  ;;  %v3353_v35 = vadd.f32 %v3352_v20, %v18904_v27  ;;  %v3636_v62 = vadd.f32 %v3635_v23, %v19603_v10  ;;  %v3354_v45 = vpop.f32.mrb[117].mxu1  ;;  %v3637_v8 = vpop.f32.mrb[217].mxu0  ;;  %v4350_v51 = vld [vmem:[%s19592_s23 + $0xb40] sm:$0xff] }
 0x481   : > { %23764 = vst [vmem:[#allocation80_spill] sm:$0xff] %v20321_v40  ;;  %v3355_v2 = vadd.f32 %v3354_v45, %v18912_v32  ;;  %v3638_v7 = vadd.f32 %v3637_v8, %v19610_v24  ;;  %v3356_v15 = vpop.f32.mrb[118].mxu1  ;;  %v3639_v47 = vpop.f32.mrb[218].mxu0  ;;  %v4359_v8 = vld [vmem:[%s19592_s23 + $0xb88] sm:$0xff]  ;;  %v20339_v6 = vpack.c.bf16 %v4350_v51, %v4342_v5  ;;  %v4366_v5 = vld [vmem:[%s19592_s23 + $0xbc0] sm:$0xff] }
 0x482   : > { %v3357_v58 = vadd.f32 %v3356_v15, %v18904_v27  ;;  %v3640_v17 = vadd.f32 %v3639_v47, %v19603_v10  ;;  %v3358_v57 = vpop.f32.mrb[119].mxu1  ;;  %v3641_v25 = vpop.f32.mrb[219].mxu0  ;;  %6867 = vmatmul.mubr.bf16.gmra.mrb[212].mxu1 %v20315_v50  ;;  %v3912_v20 = vmax.f32 %v3636_v62, 0.0  ;;  %v4367_v15 = vld [vmem:[%s19592_s23 + $0xbc8] sm:$0xff]  ;;  %v3966_v48 = vmax.f32 %v3353_v35, 0.0 }
 0x483   : > { %v3359_v23 = vadd.f32 %v3358_v57, %v18912_v32  ;;  %v3642_v53 = vadd.f32 %v3641_v25, %v19610_v24  ;;  %6876 = vmatprep.mubr.bf16.mxu1 %v20319_v42  ;;  %v3913_v40 = vmax.f32 %v3638_v7, 0.0  ;;  %v3967_v0 = vmax.f32 %v3355_v2, 0.0  ;;  %v4375_v51 = vld [vmem:[%s19592_s23 + $0xc08] sm:$0xff] }
 0x484   : > { %v3916_v45 = vmax.f32 %v3640_v17, 0.0  ;;  %8239 = vmatmul.mubr.bf16.gmra.mrb[68].mxu0 %v20181_v21  ;;  %v3970_v47 = vmax.f32 %v3357_v58, 0.0  ;;  %v20345_v21 = vpack.c.bf16 %v4367_v15, %v4359_v8 }
 0x485   : > { %v3917_v60 = vmax.f32 %v3642_v53, 0.0  ;;  %8248 = vmatprep.mubr.bf16.mxu0 %v20188_v59  ;;  %v3971_v57 = vmax.f32 %v3359_v23, 0.0 }
 0x486   : > { %v20341_v25 = vpack.c.bf16 %v3970_v47, %v3966_v48  ;;  %v20343_v62 = vpack.c.bf16 %v3916_v45, %v3912_v20  ;;  %v4383_v20 = vld [vmem:[%s19592_s23 + $0xc48] sm:$0xff] }
 0x487   : > { %v3645_v17 = vpop.f32.mrb[220].mxu0  ;;  %v20347_v41 = vpack.c.bf16 %v3971_v57, %v3967_v0  ;;  %v20349_v35 = vpack.c.bf16 %v3917_v60, %v3913_v40  ;;  %v4358_v0 = vld [vmem:[%s19592_s23 + $0xb80] sm:$0xff] }
 0x488   : > { %23765 = vst [vmem:[#allocation81_spill] sm:$0xff] %v20341_v25  ;;  %23766 = vst [vmem:[#allocation82_spill] sm:$0xff] %v20343_v62  ;;  %v3646_v59 = vadd.f32 %v3645_v17, %v19603_v10  ;;  %v3647_v2 = vpop.f32.mrb[221].mxu0  ;;  %v20363_v15 = vpack.c.bf16 %v4366_v5, %v4358_v0  ;;  %v20367_v17 = vpack.c.bf16 %v4383_v20, %v4375_v51  ;;  %v4391_v51 = vld [vmem:[%s19592_s23 + $0xc88] sm:$0xff] }
 0x489   : > { %23767 = vst [vmem:[#allocation83_spill] sm:$0xff] %v20347_v41  ;;  %23768 = vst [vmem:[#allocation84_spill] sm:$0xff] %v20349_v35  ;;  %v3648_v7 = vadd.f32 %v3647_v2, %v19610_v24  ;;  %v3649_v58 = vpop.f32.mrb[222].mxu0  ;;  %v4399_v20 = vld [vmem:[%s19592_s23 + $0xcc8] sm:$0xff] }
 0x48a   : > { %v3650_v48 = vadd.f32 %v3649_v58, %v19603_v10  ;;  %v3651_v23 = vpop.f32.mrb[223].mxu0  ;;  %6877 = vmatmul.mubr.bf16.gmra.mrb[216].mxu1 %v20339_v6  ;;  %v3920_v40 = vmax.f32 %v3646_v59, 0.0  ;;  %v20389_v35 = vpack.c.bf16 %v4399_v20, %v4391_v51 }
 0x48b   : > { %v3652_v53 = vadd.f32 %v3651_v23, %v19610_v24  ;;  %6886 = vmatprep.mubr.bf16.mxu1 %v20345_v21  ;;  %v3921_v45 = vmax.f32 %v3648_v7, 0.0 }
 0x48c   : > { %v3924_v60 = vmax.f32 %v3650_v48, 0.0  ;;  %8249 = vmatmul.mubr.bf16.gmra.mrb[72].mxu0 %v20217_v43 }
 0x48d   : > { %v3925_v8 = vmax.f32 %v3652_v53, 0.0  ;;  %8258 = vmatprep.mubr.bf16.mxu0 %v20224_v38  ;;  %v4374_v53 = vld [vmem:[%s19592_s23 + $0xc00] sm:$0xff] }
 0x48e   : > { %v20365_v47 = vpack.c.bf16 %v3924_v60, %v3920_v40  ;;  %v4382_v60 = vld [vmem:[%s19592_s23 + $0xc40] sm:$0xff] }
 0x48f   : > { %v3655_v57 = vpop.f32.mrb[224].mxu0  ;;  %v20369_v59 = vpack.c.bf16 %v3925_v8, %v3921_v45  ;;  %v20387_v62 = vpack.c.bf16 %v4382_v60, %v4374_v53 }
 0x490   : > { %23769 = vst [vmem:[#allocation85_spill] sm:$0xff] %v20365_v47  ;;  %v3657_v43 = vpop.f32.mrb[225].mxu0  ;;  %v3656_v2 = vadd.f32 %v3655_v57, %v19603_v10 }
 0x491   : > { %23770 = vst [vmem:[#allocation86_spill] sm:$0xff] %v20369_v59  ;;  %v3658_v7 = vadd.f32 %v3657_v43, %v19610_v24  ;;  %v3659_v58 = vpop.f32.mrb[226].mxu0 }
 0x492   : > { %v3660_v38 = vadd.f32 %v3659_v58, %v19603_v10  ;;  %v3362_v48 = vpop.f32.mrb[120].mxu1  ;;  %v3661_v23 = vpop.f32.mrb[227].mxu0  ;;  %6887 = vmatmul.mubr.bf16.gmra.mrb[220].mxu1 %v20363_v15  ;;  %v3928_v43 = vmax.f32 %v3656_v2, 0.0 }
 0x493   : > { %v3363_v0 = vadd.f32 %v3362_v48, %v18904_v27  ;;  %v3662_v5 = vadd.f32 %v3661_v23, %v19610_v24  ;;  %v3364_v40 = vpop.f32.mrb[121].mxu1  ;;  %6896 = vmatprep.mubr.bf16.mxu1 %v20367_v17  ;;  %v3929_v58 = vmax.f32 %v3658_v7, 0.0 }
 0x494   : > { %v3932_v45 = vmax.f32 %v3660_v38, 0.0  ;;  %v3365_v8 = vadd.f32 %v3364_v40, %v18912_v32  ;;  %v3366_v57 = vpop.f32.mrb[122].mxu1  ;;  %8259 = vmatmul.mubr.bf16.gmra.mrb[76].mxu0 %v20251_v49 }
 0x495   : > { %v3933_v47 = vmax.f32 %v3662_v5, 0.0  ;;  %v3367_v59 = vadd.f32 %v3366_v57, %v18904_v27  ;;  %v3368_v48 = vpop.f32.mrb[123].mxu1  ;;  %8268 = vmatprep.mubr.bf16.mxu0 %v20259_v1  ;;  %v3974_v25 = vmax.f32 %v3363_v0, 0.0 }
 0x496   : > { %v3369_v23 = vadd.f32 %v3368_v48, %v18912_v32  ;;  %v20393_v49 = vpack.c.bf16 %v3932_v45, %v3928_v43  ;;  %v3975_v5 = vmax.f32 %v3365_v8, 0.0  ;;  %v4390_v45 = vld [vmem:[%s19592_s23 + $0xc80] sm:$0xff] }
 0x497   : > { %v3665_v38 = vpop.f32.mrb[228].mxu0  ;;  %v3978_v40 = vmax.f32 %v3367_v59, 0.0  ;;  %v20391_v41 = vpack.c.bf16 %v3933_v47, %v3929_v58  ;;  %v4398_v8 = vld [vmem:[%s19592_s23 + $0xcc0] sm:$0xff]  ;;  %v4407_v58 = vld [vmem:[%s19592_s23 + $0xd08] sm:$0xff] }
 0x498   : > { %23771 = vst [vmem:[#allocation87_spill] sm:$0xff] %v20393_v49  ;;  %v3666_v2 = vadd.f32 %v3665_v38, %v19603_v10  ;;  %v3667_v7 = vpop.f32.mrb[229].mxu0  ;;  %v3979_v1 = vmax.f32 %v3369_v23, 0.0  ;;  %v20411_v38 = vpack.c.bf16 %v4398_v8, %v4390_v45  ;;  %v4414_v45 = vld [vmem:[%s19592_s23 + $0xd40] sm:$0xff] }
 0x499   : > { %v3668_v53 = vadd.f32 %v3667_v7, %v19610_v24  ;;  %v3669_v60 = vpop.f32.mrb[230].mxu0  ;;  %v20397_v51 = vpack.c.bf16 %v3978_v40, %v3974_v25  ;;  %v4415_v25 = vld [vmem:[%s19592_s23 + $0xd48] sm:$0xff] }
 0x49a   : > { %v3670_v59 = vadd.f32 %v3669_v60, %v19603_v10  ;;  %v3671_v0 = vpop.f32.mrb[231].mxu0  ;;  %6897 = vmatmul.mubr.bf16.gmra.mrb[224].mxu1 %v20387_v62  ;;  %v20401_v47 = vpack.c.bf16 %v3979_v1, %v3975_v5  ;;  %v3936_v57 = vmax.f32 %v3666_v2, 0.0  ;;  %v20415_v5 = vpack.c.bf16 %v4415_v25, %v4407_v58  ;;  %v4431_v58 = vld [vmem:[%s19592_s23 + $0xdc8] sm:$0xff] }
 0x49b   : > { %v3672_v20 = vadd.f32 %v3671_v0, %v19610_v24  ;;  %6906 = vmatprep.mubr.bf16.mxu1 %v20389_v35  ;;  %v3937_v48 = vmax.f32 %v3668_v53, 0.0 }
 0x49c   : > { %v3940_v43 = vmax.f32 %v3670_v59, 0.0  ;;  %8269 = vmatmul.mubr.bf16.gmra.mrb[80].mxu0 %v20289_v3 }
 0x49d   : > { %v3941_v23 = vmax.f32 %v3672_v20, 0.0  ;;  %8278 = vmatprep.mubr.bf16.mxu0 %v20296_v29  ;;  %v4406_v20 = vld [vmem:[%s19592_s23 + $0xd00] sm:$0xff] }
 0x49e   : > { %v20413_v40 = vpack.c.bf16 %v3940_v43, %v3936_v57  ;;  %v4423_v43 = vld [vmem:[%s19592_s23 + $0xd88] sm:$0xff] }
 0x49f   : > { %v3675_v7 = vpop.f32.mrb[232].mxu0  ;;  %v20417_v2 = vpack.c.bf16 %v3941_v23, %v3937_v48 }
 0x4a0   : > { %23772 = vst [vmem:[#allocation88_spill] sm:$0xff] %v20413_v40  ;;  %v3676_v3 = vadd.f32 %v3675_v7, %v19603_v10  ;;  %v3677_v1 = vpop.f32.mrb[233].mxu0 }
 0x4a1   : > { %23773 = vst [vmem:[#allocation89_spill] sm:$0xff] %v20417_v2  ;;  %v3678_v53 = vadd.f32 %v3677_v1, %v19610_v24  ;;  %v3679_v60 = vpop.f32.mrb[234].mxu0  ;;  %v20437_v2 = vpack.c.bf16 %v4431_v58, %v4423_v43 }
 0x4a2   : > { %v3680_v29 = vadd.f32 %v3679_v60, %v19603_v10  ;;  %v3681_v59 = vpop.f32.mrb[235].mxu0  ;;  %6907 = vmatmul.mubr.bf16.gmra.mrb[228].mxu1 %v20411_v38  ;;  %v3944_v8 = vmax.f32 %v3676_v3, 0.0  ;;  %v20432_v60 = vpack.c.bf16 %v4414_v45, %v4406_v20 }
 0x4a3   : > { %v3682_v0 = vadd.f32 %v3681_v59, %v19610_v24  ;;  %6916 = vmatprep.mubr.bf16.mxu1 %v20415_v5  ;;  %v3945_v25 = vmax.f32 %v3678_v53, 0.0 }
 0x4a4   : > { %v3948_v57 = vmax.f32 %v3680_v29, 0.0  ;;  %8279 = vmatmul.mubr.bf16.gmra.mrb[84].mxu0 %v20315_v50 }
 0x4a5   : > { %v3949_v48 = vmax.f32 %v3682_v0, 0.0  ;;  %v3372_v23 = vpop.f32.mrb[124].mxu1  ;;  %8288 = vmatprep.mubr.bf16.mxu0 %v20319_v42 }
 0x4a6   : > { %v3373_v7 = vadd.f32 %v3372_v23, %v18904_v27  ;;  %v3374_v1 = vpop.f32.mrb[125].mxu1  ;;  %v20434_v59 = vpack.c.bf16 %v3948_v57, %v3944_v8 }
 0x4a7   : > { %v3375_v40 = vadd.f32 %v3374_v1, %v18912_v32  ;;  %v3376_v3 = vpop.f32.mrb[126].mxu1  ;;  %v3685_v29 = vpop.f32.mrb[236].mxu0  ;;  %v20439_v50 = vpack.c.bf16 %v3949_v48, %v3945_v25  ;;  %v4422_v48 = vld [vmem:[%s19592_s23 + $0xd80] sm:$0xff] }
 0x4a8   : > { %23774 = vst [vmem:[#allocation90_spill] sm:$0xff] %v20434_v59  ;;  %v3377_v53 = vadd.f32 %v3376_v3, %v18904_v27  ;;  %v3686_v42 = vadd.f32 %v3685_v29, %v19603_v10  ;;  %v3378_v0 = vpop.f32.mrb[127].mxu1  ;;  %v3687_v23 = vpop.f32.mrb[237].mxu0  ;;  %v3982_v58 = vmax.f32 %v3373_v7, 0.0  ;;  %v4430_v1 = vld [vmem:[%s19592_s23 + $0xdc0] sm:$0xff]  ;;  %v4447_v59 = vld [vmem:[%s19592_s23 + $0xe48] sm:$0xff] }
 0x4a9   : > { %23775 = vst [vmem:[#allocation91_spill] sm:$0xff] %v20439_v50  ;;  %v3379_v20 = vadd.f32 %v3378_v0, %v18912_v32  ;;  %v3688_v45 = vadd.f32 %v3687_v23, %v19610_v24  ;;  %v3689_v8 = vpop.f32.mrb[238].mxu0  ;;  %v3983_v3 = vmax.f32 %v3375_v40, 0.0  ;;  %v4439_v23 = vld [vmem:[%s19592_s23 + $0xe08] sm:$0xff] }
 0x4aa   : > { %v3690_v57 = vadd.f32 %v3689_v8, %v19603_v10  ;;  %v3691_v43 = vpop.f32.mrb[239].mxu0  ;;  %6917 = vmatmul.mubr.bf16.gmra.mrb[232].mxu1 %v20432_v60  ;;  %v3986_v25 = vmax.f32 %v3377_v53, 0.0  ;;  %v3952_v29 = vmax.f32 %v3686_v42, 0.0  ;;  %v20459_v53 = vpack.c.bf16 %v4430_v1, %v4422_v48  ;;  %v4446_v48 = vld [vmem:[%s19592_s23 + $0xe40] sm:$0xff]  ;;  %v4455_v1 = vld [vmem:[%s19592_s23 + $0xe88] sm:$0xff] }
 0x4ab   : > { %v3692_v27 = vadd.f32 %v3691_v43, %v19610_v24  ;;  %6926 = vmatprep.mubr.bf16.mxu1 %v20437_v2  ;;  %v3987_v32 = vmax.f32 %v3379_v20, 0.0  ;;  %v3953_v50 = vmax.f32 %v3688_v45, 0.0  ;;  %v20463_v20 = vpack.c.bf16 %v4447_v59, %v4439_v23  ;;  %v4438_v59 = vld [vmem:[%s19592_s23 + $0xe00] sm:$0xff] }
 0x4ac   : > { %v3956_v0 = vmax.f32 %v3690_v57, 0.0  ;;  %8289 = vmatmul.mubr.bf16.gmra.mrb[88].mxu0 %v20339_v6  ;;  %v20454_v8 = vpack.c.bf16 %v3986_v25, %v3982_v58 }
 0x4ad   : > { %v3957_v49 = vmax.f32 %v3692_v27, 0.0  ;;  %8298 = vmatprep.mubr.bf16.mxu0 %v20345_v21  ;;  %v20457_v7 = vpack.c.bf16 %v3987_v32, %v3983_v3  ;;  %v4463_v3 = vld [vmem:[%s19592_s23 + $0xec8] sm:$0xff] }
 0x4ae   : > { %v20461_v40 = vpack.c.bf16 %v3956_v0, %v3952_v29  ;;  %v20479_v0 = vpack.c.bf16 %v4446_v48, %v4438_v59  ;;  %v4454_v59 = vld [vmem:[%s19592_s23 + $0xe80] sm:$0xff] }
 0x4af   : > { %v3695_v42 = vpop.f32.mrb[240].mxu0  ;;  %v20465_v6 = vpack.c.bf16 %v3957_v49, %v3953_v50  ;;  %v4462_v48 = vld [vmem:[%s19592_s23 + $0xec0] sm:$0xff] }
 0x4b0   : > { %v3696_v45 = vadd.f32 %v3695_v42, %v19603_v10  ;;  %v3697_v57 = vpop.f32.mrb[241].mxu0 }
 0x4b1   : > { %v3698_v21 = vadd.f32 %v3697_v57, %v19610_v24  ;;  %v3699_v43 = vpop.f32.mrb[242].mxu0  ;;  %v20483_v57 = vpack.c.bf16 %v4463_v3, %v4455_v1  ;;  %v4471_v1 = vld [vmem:[%s19592_s23 + $0xf08] sm:$0xff] }
 0x4b2   : > { %v3700_v58 = vadd.f32 %v3699_v43, %v19603_v10  ;;  %v3701_v25 = vpop.f32.mrb[243].mxu0  ;;  %6927 = vmatmul.mubr.bf16.gmra.mrb[236].mxu1 %v20459_v53  ;;  %v3960_v49 = vmax.f32 %v3696_v45, 0.0  ;;  %v4479_v3 = vld [vmem:[%s19592_s23 + $0xf48] sm:$0xff] }
 0x4b3   : > { %v3702_v27 = vadd.f32 %v3701_v25, %v19610_v24  ;;  %6936 = vmatprep.mubr.bf16.mxu1 %v20463_v20  ;;  %v3961_v32 = vmax.f32 %v3698_v21, 0.0 }
 0x4b4   : > { %v3964_v50 = vmax.f32 %v3700_v58, 0.0  ;;  %8299 = vmatmul.mubr.bf16.gmra.mrb[92].mxu0 %v20363_v15 }
 0x4b5   : > { %v3965_v29 = vmax.f32 %v3702_v27, 0.0  ;;  %8308 = vmatprep.mubr.bf16.mxu0 %v20367_v17 }
 0x4b6   : > { %v20481_v23 = vpack.c.bf16 %v3964_v50, %v3960_v49 }
 0x4b7   : > { %v3705_v42 = vpop.f32.mrb[244].mxu0  ;;  %v20485_v45 = vpack.c.bf16 %v3965_v29, %v3961_v32 }
 0x4b8   : > { %23776 = vst [vmem:[#allocation92_spill] sm:$0xff] %v20481_v23  ;;  %v3706_v15 = vadd.f32 %v3705_v42, %v19603_v10  ;;  %v3707_v43 = vpop.f32.mrb[245].mxu0  ;;  %v20499_v42 = vpack.c.bf16 %v4462_v48, %v4454_v59  ;;  %v4470_v48 = vld [vmem:[%s19592_s23 + $0xf00] sm:$0xff] }
 0x4b9   : > { %v3708_v21 = vadd.f32 %v3707_v43, %v19610_v24  ;;  %v3709_v58 = vpop.f32.mrb[246].mxu0 }
 0x4ba   : > { %v3710_v17 = vadd.f32 %v3709_v58, %v19603_v10  ;;  %v3711_v25 = vpop.f32.mrb[247].mxu0  ;;  %6937 = vmatmul.mubr.bf16.gmra.mrb[240].mxu1 %v20479_v0  ;;  %v3968_v49 = vmax.f32 %v3706_v15, 0.0 }
 0x4bb   : > { %v3712_v27 = vadd.f32 %v3711_v25, %v19610_v24  ;;  %6946 = vmatprep.mubr.bf16.mxu1 %v20483_v57  ;;  %v3969_v32 = vmax.f32 %v3708_v21, 0.0  ;;  %v20503_v25 = vpack.c.bf16 %v4479_v3, %v4471_v1  ;;  %v4487_v3 = vld [vmem:[%s19592_s23 + $0xf88] sm:$0xff] }
 0x4bc   : > { %v3972_v50 = vmax.f32 %v3710_v17, 0.0  ;;  %8309 = vmatmul.mubr.bf16.gmra.mrb[96].mxu0 %v20387_v62 }
 0x4bd   : > { %v3973_v29 = vmax.f32 %v3712_v27, 0.0  ;;  %8318 = vmatprep.mubr.bf16.mxu0 %v20389_v35 }
 0x4be   : > { %v20501_v43 = vpack.c.bf16 %v3972_v50, %v3968_v49  ;;  %v4478_v49 = vld [vmem:[%s19592_s23 + $0xf40] sm:$0xff] }
 0x4bf   : > { %v3715_v58 = vpop.f32.mrb[248].mxu0  ;;  %v20505_v15 = vpack.c.bf16 %v3973_v29, %v3969_v32  ;;  %v4495_v32 = vld [vmem:[%s19592_s23 + $0xfc8] sm:$0xff] }
 0x4c0   : > { %23777 = vst [vmem:[#allocation93_spill] sm:$0xff] %v20501_v43  ;;  %v3716_v62 = vadd.f32 %v3715_v58, %v19603_v10  ;;  %v3717_v17 = vpop.f32.mrb[249].mxu0  ;;  %v20523_v43 = vpack.c.bf16 %v4495_v32, %v4487_v3  ;;  %v3993_v32 = vld [vmem:[%s19592_s23 + $0x18] sm:$0xff] }
 0x4c1   : > { %23778 = vst [vmem:[#allocation94_spill] sm:$0xff] %v20505_v15  ;;  %v3718_v21 = vadd.f32 %v3717_v17, %v19610_v24  ;;  %v3719_v27 = vpop.f32.mrb[250].mxu0  ;;  %v20519_v17 = vpack.c.bf16 %v4478_v49, %v4470_v48  ;;  %v4486_v49 = vld [vmem:[%s19592_s23 + $0xf80] sm:$0xff] }
 0x4c2   : > { %v3720_v35 = vadd.f32 %v3719_v27, %v19603_v10  ;;  %v3721_v23 = vpop.f32.mrb[251].mxu0  ;;  %6947 = vmatmul.mubr.bf16.gmra.mrb[244].mxu1 %v20499_v42  ;;  %v3976_v50 = vmax.f32 %v3716_v62, 0.0 }
 0x4c3   : > { %v3722_v59 = vadd.f32 %v3721_v23, %v19610_v24  ;;  %6956 = vmatprep.mubr.bf16.mxu1 %v20503_v25  ;;  %v3977_v29 = vmax.f32 %v3718_v21, 0.0 }
 0x4c4   : > { %v3980_v1 = vmax.f32 %v3720_v35, 0.0  ;;  %8319 = vmatmul.mubr.bf16.gmra.mrb[100].mxu0 %v20411_v38 }
 0x4c5   : > { %v3981_v58 = vmax.f32 %v3722_v59, 0.0  ;;  %8328 = vmatprep.mubr.bf16.mxu0 %v20415_v5 }
 0x4c6   : > { %v20521_v27 = vpack.c.bf16 %v3980_v1, %v3976_v50  ;;  %v4494_v50 = vld [vmem:[%s19592_s23 + $0xfc0] sm:$0xff] }
 0x4c7   : > { %v3725_v23 = vpop.f32.mrb[252].mxu0  ;;  %v20525_v62 = vpack.c.bf16 %v3981_v58, %v3977_v29  ;;  %v4001_v29 = vld [vmem:[%s19592_s23 + $0x58] sm:$0xff] }
 0x4c8   : > { %v3726_v38 = vadd.f32 %v3725_v23, %v19603_v10  ;;  %v3727_v35 = vpop.f32.mrb[253].mxu0  ;;  %v20539_v23 = vpack.c.bf16 %v4494_v50, %v4486_v49  ;;  %v17178_v49 = vld [vmem:[%s23562_s9 + $0x424] ss:$16 sps:$4 sm:$0xff]  }
 0x4c9   : > { %v3728_v21 = vadd.f32 %v3727_v35, %v19610_v24  ;;  %v3729_v59 = vpop.f32.mrb[254].mxu0  ;;  %v4016_v50 = vld [vmem:[%s19592_s23 + $0xd0] sm:$0xff] }
 0x4ca   : > { %v3730_v5 = vadd.f32 %v3729_v59, %v19603_v10  ;;  %v3731_v15 = vpop.f32.mrb[255].mxu0  ;;  %6957 = vmatmul.mubr.bf16.gmra.mrb[248].mxu1 %v20519_v17  ;;  %v3984_v1 = vmax.f32 %v3726_v38, 0.0  ;;  %v4000_v38 = vld [vmem:[%s19592_s23 + $0x50] sm:$0xff] }
 0x4cb   : > { %v3732_v48 = vadd.f32 %v3731_v15, %v19610_v24  ;;  %6966 = vmatprep.mubr.bf16.mxu1 %v20523_v43  ;;  %v3985_v10 = vmax.f32 %v3728_v21, 0.0  ;;  %v20543_v15 = vpack.c.bf16 %v4001_v29, %v3993_v32  ;;  %v4017_v21 = vld [vmem:[%s19592_s23 + $0xd8] sm:$0xff]  ;;  %v17193_v32 = vld [vmem:[%s23562_s9 + $0x444] ss:$16 sps:$4 sm:$0xff]  }
 0x4cc   : > { %v3988_v3 = vmax.f32 %v3730_v5, 0.0  ;;  %8329 = vmatmul.mubr.bf16.gmra.mrb[104].mxu0 %v20432_v60  ;;  %v3992_v60 = vld [vmem:[%s19592_s23 + $0x10] sm:$0xff] }
 0x4cd   : > { %v3989_v58 = vmax.f32 %v3732_v48, 0.0  ;;  %8338 = vmatprep.mubr.bf16.mxu0 %v20437_v2  ;;  %v4009_v2 = vld [vmem:[%s19592_s23 + $0x98] sm:$0xff]  ;;  %v20555_v59 = vpack.c.bf16 %v4000_v38, %v3992_v60  ;;  %v17161_v5 = vld [vmem:[%s23562_s9 + $0x400] ss:$16 sps:$4 sm:$0xff]  }
 0x4ce   : > { %v20541_v24 = vpack.c.bf16 %v3988_v3, %v3984_v1  ;;  %v20560_v48 = vpack.c.bf16 %v4017_v21, %v4009_v2  ;;  %v4025_v1 = vld [vmem:[%s19592_s23 + $0x118] sm:$0xff]  ;;  %v4024_v60 = vld [vmem:[%s19592_s23 + $0x110] sm:$0xff] }
 0x4cf   : > { %v20545_v35 = vpack.c.bf16 %v3989_v58, %v3985_v10  ;;  %v4033_v3 = vld [vmem:[%s19592_s23 + $0x158] sm:$0xff]  ;;  %v17196_v58 = vld [vmem:[%s23562_s9 + $0x464] ss:$16 sps:$4 sm:$0xff]   ;;  %v17194_v38 = vld [vmem:[%s23562_s9 + $0x460] ss:$16 sps:$4 sm:$0xff]  }
 0x4d0   : > { %v20581_v10 = vpack.c.bf16 %v4033_v3, %v4025_v1  ;;  %v4041_v2 = vld [vmem:[%s19592_s23 + $0x198] sm:$0xff]  ;;  %v17200_v1 = vld [vmem:[%s23562_s9 + $0x4a0] ss:$16 sps:$4 sm:$0xff]  }
 0x4d1   : > { %v4049_v21 = vld [vmem:[%s19592_s23 + $0x1d8] sm:$0xff] }
 0x4d2   : > { %6967 = vmatmul.mubr.bf16.gmra.mrb[252].mxu1 %v20539_v23  ;;  %v4057_v3 = vld [vmem:[%s19592_s23 + $0x218] sm:$0xff] }
 0x4d3   : > { %7009 = vmatprep.mubr.bf16.mxu1 %v20543_v15 }
 0x4d4   : > { %8339 = vmatmul.mubr.bf16.gmra.mrb[108].mxu0 %v20459_v53  ;;  %v4008_v53 = vld [vmem:[%s19592_s23 + $0x90] sm:$0xff] }
 0x4d5   : > { %8348 = vmatprep.mubr.bf16.mxu0 %v20463_v20  ;;  %v17176_v20 = vld [vmem:[%s23562_s9 + $0x420] ss:$16 sps:$4 sm:$0xff]   ;;  %v20579_v29 = vpack.c.bf16 %v4016_v50, %v4008_v53  ;;  %v20605_v53 = vpack.c.bf16 %v4049_v21, %v4041_v2  ;;  %v17202_v50 = vld [vmem:[%s23562_s9 + $0x4a4] ss:$16 sps:$4 sm:$0xff]   ;;  %v4073_v21 = vld [vmem:[%s19592_s23 + $0x298] sm:$0xff] }
 0x4d6   : > { %v17206_v2 = vld [vmem:[%s23562_s9 + $0x4e0] ss:$16 sps:$4 sm:$0xff]  }
 0x4da   : > { %7010 = vmatmul.mubr.bf16.vlgmr.msra.gmra.mrb[128].mxu1 %v20555_v59 }
 0x4db   : > { %7331 = vmatpush1.bf16.msra.mxu1 %v17161_v5  ;;  %7019 = vmatprep.mubr.bf16.mxu1 %v20560_v48  ;;  %v17199_v5 = vld [vmem:[%s23562_s9 + $0x484] ss:$16 sps:$4 sm:$0xff]  }
 0x4dc   : > { %8349 = vmatmul.mubr.bf16.gmra.mrb[112].mxu0 %v20479_v0  ;;  %7332 = vmatprep.subr.bf16.mxu1 %v17178_v49  ;;  %v17191_v0 = vld [vmem:[%s23562_s9 + $0x440] ss:$16 sps:$4 sm:$0xff]  }
 0x4dd   : > { %8358 = vmatprep.mubr.bf16.mxu0 %v20483_v57  ;;  %v4032_v57 = vld [vmem:[%s19592_s23 + $0x150] sm:$0xff] }
 0x4de   : > { %v20603_v49 = vpack.c.bf16 %v4032_v57, %v4024_v60  ;;  %v17208_v57 = vld [vmem:[%s23562_s9 + $0x4e4] ss:$16 sps:$4 sm:$0xff]  }
 0x4df   : > { %7333 = vmatpush1.bf16.msra.mxu1 %v17176_v20  ;;  %v4040_v20 = vld [vmem:[%s19592_s23 + $0x190] sm:$0xff] }
 0x4e0   : > { %7334 = vmatprep.subr.bf16.mxu1 %v17193_v32  ;;  %v4065_v32 = vld [vmem:[%s19592_s23 + $0x258] sm:$0xff] }
 0x4e1   : > { %v20629_v60 = vpack.c.bf16 %v4065_v32, %v4057_v3  ;;  %v17212_v3 = vld [vmem:[%s23562_s9 + $0x520] ss:$16 sps:$4 sm:$0xff]   ;;  %v4089_v32 = vld [vmem:[%s19592_s23 + $0x318] sm:$0xff] }
 0x4e2   : > { %7020 = vmatmul.mubr.bf16.gmra.mrb[132].mxu1 %v20579_v29 }
 0x4e3   : > { %7029 = vmatprep.mubr.bf16.mxu1 %v20581_v10  ;;  %7335 = vmatpush1.bf16.msra.mxu1 %v17191_v0  ;;  %v17205_v0 = vld [vmem:[%s23562_s9 + $0x4c4] ss:$16 sps:$4 sm:$0xff]  }
 0x4e4   : > { %8359 = vmatmul.mubr.bf16.gmra.mrb[116].mxu0 %v20499_v42  ;;  %7336 = vmatprep.subr.bf16.mxu1 %v17196_v58  ;;  %v17197_v42 = vld [vmem:[%s23562_s9 + $0x480] ss:$16 sps:$4 sm:$0xff]  }
 0x4e5   : > { %8368 = vmatprep.mubr.bf16.mxu0 %v20503_v25  ;;  %v4048_v25 = vld [vmem:[%s19592_s23 + $0x1d0] sm:$0xff] }
 0x4e6   : > { %v20627_v58 = vpack.c.bf16 %v4048_v25, %v4040_v20  ;;  %v17214_v25 = vld [vmem:[%s23562_s9 + $0x524] ss:$16 sps:$4 sm:$0xff]  }
 0x4e7   : > { %7337 = vmatpush1.bf16.msra.mxu1 %v17194_v38  ;;  %v4056_v38 = vld [vmem:[%s19592_s23 + $0x210] sm:$0xff] }
 0x4e8   : > { %7338 = vmatprep.subr.bf16.mxu1 %v17199_v5  ;;  %v4081_v5 = vld [vmem:[%s19592_s23 + $0x2d8] sm:$0xff] }
 0x4e9   : > { %v20653_v20 = vpack.c.bf16 %v4081_v5, %v4073_v21  ;;  %v4113_v21 = vld [vmem:[%s19592_s23 + $0x3d8] sm:$0xff]  ;;  %v17218_v5 = vld [vmem:[%s23562_s9 + $0x560] ss:$16 sps:$4 sm:$0xff]  }
 0x4ea   : > { %7030 = vmatmul.mubr.bf16.gmra.mrb[136].mxu1 %v20603_v49 }
 0x4eb   : > { %7039 = vmatprep.mubr.bf16.mxu1 %v20605_v53  ;;  %7339 = vmatpush1.bf16.msra.mxu1 %v17197_v42  ;;  %v17211_v42 = vld [vmem:[%s23562_s9 + $0x504] ss:$16 sps:$4 sm:$0xff]  }
 0x4ec   : > { %8369 = vmatmul.mubr.bf16.gmra.mrb[120].mxu0 %v20519_v17  ;;  %7340 = vmatprep.subr.bf16.mxu1 %v17202_v50  ;;  %v17203_v17 = vld [vmem:[%s23562_s9 + $0x4c0] ss:$16 sps:$4 sm:$0xff]  }
 0x4ed   : > { %8378 = vmatprep.mubr.bf16.mxu0 %v20523_v43  ;;  %v4064_v43 = vld [vmem:[%s19592_s23 + $0x250] sm:$0xff] }
 0x4ee   : > { %v20651_v50 = vpack.c.bf16 %v4064_v43, %v4056_v38  ;;  %v17215_v43 = vld [vmem:[%s23562_s9 + $0x540] ss:$16 sps:$4 sm:$0xff]  }
 0x4ef   : > { %7341 = vmatpush1.bf16.msra.mxu1 %v17200_v1  ;;  %v4072_v1 = vld [vmem:[%s19592_s23 + $0x290] sm:$0xff] }
 0x4f0   : > { %7342 = vmatprep.subr.bf16.mxu1 %v17205_v0  ;;  %v4097_v0 = vld [vmem:[%s19592_s23 + $0x358] sm:$0xff] }
 0x4f1   : > { %v4553_v38 = vpack.c.bf16 %v4097_v0, %v4089_v32  ;;  %v4120_v0 = vld [vmem:[%s19592_s23 + $0x410] sm:$0xff] }
 0x4f2   : > { %7040 = vmatmul.mubr.bf16.gmra.mrb[140].mxu1 %v20627_v58 }
 0x4f3   : > { %7049 = vmatprep.mubr.bf16.mxu1 %v20629_v60  ;;  %7343 = vmatpush1.bf16.msra.mxu1 %v17203_v17  ;;  %v17217_v17 = vld [vmem:[%s23562_s9 + $0x544] ss:$16 sps:$4 sm:$0xff]  }
 0x4f4   : > { %8379 = vmatmul.mubr.bf16.gmra.mrb[124].mxu0 %v20539_v23  ;;  %7344 = vmatprep.subr.bf16.mxu1 %v17208_v57  ;;  %v17209_v23 = vld [vmem:[%s23562_s9 + $0x500] ss:$16 sps:$4 sm:$0xff]  }
 0x4f5   : > { %8421 = vmatprep.mubr.bf16.mxu0 %v20543_v15  ;;  %v4080_v15 = vld [vmem:[%s19592_s23 + $0x2d0] sm:$0xff] }
 0x4f6   : > { %v4544_v57 = vpack.c.bf16 %v4080_v15, %v4072_v1  ;;  %v4112_v1 = vld [vmem:[%s19592_s23 + $0x3d0] sm:$0xff]  ;;  %v4121_v15 = vld [vmem:[%s19592_s23 + $0x418] sm:$0xff] }
 0x4f7   : > { %7345 = vmatpush1.bf16.msra.mxu1 %v17206_v2  ;;  %v4096_v2 = vld [vmem:[%s19592_s23 + $0x350] sm:$0xff] }
 0x4f8   : > { %7346 = vmatprep.subr.bf16.mxu1 %v17211_v42  ;;  %v17220_v42 = vld [vmem:[%s23562_s9 + $0x564] ss:$16 sps:$4 sm:$0xff]  }
 0x4fa   : > { %7050 = vmatmul.mubr.bf16.gmra.mrb[144].mxu1 %v20651_v50 }
 0x4fb   : > { %7059 = vmatprep.mubr.bf16.mxu1 %v20653_v20  ;;  %7347 = vmatpush1.bf16.msra.mxu1 %v17209_v23 }
 0x4fc   : > { %8422 = vmatmul.mubr.bf16.vlgmr.msra.gmra.mrb[0].mxu0 %v20555_v59  ;;  %7348 = vmatprep.subr.bf16.mxu1 %v17214_v25  ;;  %v4088_v59 = vld [vmem:[%s19592_s23 + $0x310] sm:$0xff] }
 0x4fd   : > { %8431 = vmatprep.mubr.bf16.mxu0 %v20560_v48  ;;  %v4105_v48 = vld [vmem:[%s19592_s23 + $0x398] sm:$0xff]  ;;  %v4552_v23 = vpack.c.bf16 %v4096_v2, %v4088_v59 }
 0x4fe   : > { %v4561_v25 = vpack.c.bf16 %v4113_v21, %v4105_v48  ;;  %v4145_v59 = vld [vmem:[%s19592_s23 + $0x4d8] sm:$0xff]  ;;  %v4144_v21 = vld [vmem:[%s19592_s23 + $0x4d0] sm:$0xff] }
 0x4ff   : > { %7349 = vmatpush1.bf16.msra.mxu1 %v17212_v3 }
 0x500   : > { %7350 = vmatprep.subr.bf16.mxu1 %v17217_v17  ;;  %v4128_v17 = vld [vmem:[%s19592_s23 + $0x450] sm:$0xff] }
 0x501   : > { %v4568_v2 = vpack.c.bf16 %v4128_v17, %v4120_v0  ;;  %v4177_v0 = vld [vmem:[%s19592_s23 + $0x5d8] sm:$0xff] }
 0x502   : > { %7060 = vmatmul.mubr.bf16.gmra.mrb[148].mxu1 %v4544_v57 }
 0x503   : > { %7069 = vmatprep.mubr.bf16.mxu1 %v4553_v38  ;;  %7351 = vmatpush1.bf16.msra.mxu1 %v17215_v43  ;;  %v4137_v43 = vld [vmem:[%s19592_s23 + $0x498] sm:$0xff] }
 0x504   : > { %8432 = vmatmul.mubr.bf16.gmra.mrb[4].mxu0 %v20579_v29  ;;  %7352 = vmatprep.subr.bf16.mxu1 %v17220_v42  ;;  %v4104_v29 = vld [vmem:[%s19592_s23 + $0x390] sm:$0xff]  ;;  %v4577_v48 = vpack.c.bf16 %v4145_v59, %v4137_v43  ;;  %v4185_v59 = vld [vmem:[%s19592_s23 + $0x618] sm:$0xff] }
 0x505   : > { %8441 = vmatprep.mubr.bf16.mxu0 %v20581_v10  ;;  %v4129_v10 = vld [vmem:[%s19592_s23 + $0x458] sm:$0xff]  ;;  %v4560_v3 = vpack.c.bf16 %v4112_v1, %v4104_v29  ;;  %v4152_v1 = vld [vmem:[%s19592_s23 + $0x510] sm:$0xff] }
 0x506   : > { %v4569_v32 = vpack.c.bf16 %v4129_v10, %v4121_v15  ;;  %v4160_v15 = vld [vmem:[%s19592_s23 + $0x550] sm:$0xff]  ;;  %v4169_v10 = vld [vmem:[%s19592_s23 + $0x598] sm:$0xff] }
 0x507   : > { %7353 = vmatpush1.bf16.msra.mxu1 %v17218_v5  ;;  %v4153_v5 = vld [vmem:[%s19592_s23 + $0x518] sm:$0xff]  ;;  %v20727_v17 = vpack.c.bf16 %v4160_v15, %v4152_v1  ;;  %v20729_v43 = vpack.c.bf16 %v4177_v0, %v4169_v10  ;;  %v17229_v1 = vld [vmem:[%s23562_s9 + $0x5c4] ss:$16 sps:$4 sm:$0xff]  }
 0x508   : > { %v4208_v0 = vld [vmem:[%s19592_s23 + $0x6d0] sm:$0xff] }
 0x50a   : > { %7070 = vmatmul.mubr.bf16.gmra.mrb[152].mxu1 %v4552_v23 }
 0x50b   : > { %7079 = vmatprep.mubr.bf16.mxu1 %v4561_v25 }
 0x50c   : > { %8442 = vmatmul.mubr.bf16.gmra.mrb[8].mxu0 %v20603_v49  ;;  %v17221_v49 = vld [vmem:[%s23562_s9 + $0x580] ss:$16 sps:$4 sm:$0xff]  }
 0x50d   : > { %8451 = vmatprep.mubr.bf16.mxu0 %v20605_v53  ;;  %v17223_v53 = vld [vmem:[%s23562_s9 + $0x584] ss:$16 sps:$4 sm:$0xff]  }
 0x50e   : > { %7354 = vmatprep.subr.bf16.mxu1 %v17223_v53 }
 0x50f   : > { %7355 = vmatpush1.bf16.msra.mxu1 %v17221_v49  ;;  %v4193_v49 = vld [vmem:[%s19592_s23 + $0x658] sm:$0xff] }
 0x512   : > { %7080 = vmatmul.mubr.bf16.gmra.mrb[156].mxu1 %v4560_v3 }
 0x513   : > { %7089 = vmatprep.mubr.bf16.mxu1 %v4569_v32 }
 0x514   : > { %8452 = vmatmul.mubr.bf16.gmra.mrb[12].mxu0 %v20627_v58  ;;  %v4136_v58 = vld [vmem:[%s19592_s23 + $0x490] sm:$0xff] }
 0x515   : > { %8461 = vmatprep.mubr.bf16.mxu0 %v20629_v60  ;;  %v4161_v60 = vld [vmem:[%s19592_s23 + $0x558] sm:$0xff]  ;;  %v4576_v42 = vpack.c.bf16 %v4144_v21, %v4136_v58  ;;  %v20739_v58 = vpack.c.bf16 %v4193_v49, %v4185_v59  ;;  %v4184_v21 = vld [vmem:[%s19592_s23 + $0x610] sm:$0xff] }
 0x516   : > { %v20714_v29 = vpack.c.bf16 %v4161_v60, %v4153_v5  ;;  %v4192_v5 = vld [vmem:[%s19592_s23 + $0x650] sm:$0xff]  ;;  %v4201_v60 = vld [vmem:[%s19592_s23 + $0x698] sm:$0xff] }
 0x517   : > { %v20753_v15 = vpack.c.bf16 %v4192_v5, %v4184_v21  ;;  %v17233_v49 = vld [vmem:[%s23562_s9 + $0x428] ss:$16 sps:$4 sm:$0xff]   ;;  %v4224_v21 = vld [vmem:[%s19592_s23 + $0x750] sm:$0xff] }
 0x518   : > { %v4233_v5 = vld [vmem:[%s19592_s23 + $0x798] sm:$0xff] }
 0x51a   : > { %7090 = vmatmul.mubr.bf16.gmra.mrb[160].mxu1 %v4568_v2 }
 0x51b   : > { %7099 = vmatprep.mubr.bf16.mxu1 %v4577_v48 }
 0x51c   : > { %8462 = vmatmul.mubr.bf16.gmra.mrb[16].mxu0 %v20651_v50  ;;  %v17224_v50 = vld [vmem:[%s23562_s9 + $0x5a0] ss:$16 sps:$4 sm:$0xff]  }
 0x51d   : > { %8471 = vmatprep.mubr.bf16.mxu0 %v20653_v20  ;;  %v17226_v20 = vld [vmem:[%s23562_s9 + $0x5a4] ss:$16 sps:$4 sm:$0xff]  }
 0x51e   : > { %7356 = vmatprep.subr.bf16.mxu1 %v17226_v20  ;;  %v17230_v20 = vld [vmem:[%s23562_s9 + $0x408] ss:$16 sps:$4 sm:$0xff]  }
 0x51f   : > { %7357 = vmatpush1.bf16.msra.mxu1 %v17224_v50  ;;  %v4217_v50 = vld [vmem:[%s19592_s23 + $0x718] sm:$0xff] }
 0x520   : > { %7358 = vmatprep.subr.bf16.mxu1 %v17229_v1  ;;  %v17241_v1 = vld [vmem:[%s23562_s9 + $0x46c] ss:$16 sps:$4 sm:$0xff]  }
 0x522   : > { %7100 = vmatmul.mubr.bf16.gmra.mrb[164].mxu1 %v4576_v42 }
 0x523   : > { %7109 = vmatprep.mubr.bf16.mxu1 %v20714_v29 }
 0x524   : > { %8472 = vmatmul.mubr.bf16.gmra.mrb[20].mxu0 %v4544_v57  ;;  %v4168_v57 = vld [vmem:[%s19592_s23 + $0x590] sm:$0xff] }
 0x525   : > { %8481 = vmatprep.mubr.bf16.mxu0 %v4553_v38  ;;  %v4176_v38 = vld [vmem:[%s19592_s23 + $0x5d0] sm:$0xff] }
 0x526   : > { %v20737_v53 = vpack.c.bf16 %v4176_v38, %v4168_v57  ;;  %v17232_v57 = vld [vmem:[%s23562_s9 + $0x40c] ss:$16 sps:$4 sm:$0xff]  }
 0x527   : > { %v17235_v38 = vld [vmem:[%s23562_s9 + $0x42c] ss:$16 sps:$4 sm:$0xff]   ;;  %8742 = vmatprep.subr.bf16.mxu0 %v17232_v57 }
 0x528   : > { %8743 = vmatpush1.bf16.msra.mxu0 %v17230_v20  ;;  %v4240_v20 = vld [vmem:[%s19592_s23 + $0x7d0] sm:$0xff]  ;;  %v4249_v57 = vld [vmem:[%s19592_s23 + $0x818] sm:$0xff] }
 0x529   : > { %8744 = vmatprep.subr.bf16.mxu0 %v17235_v38  ;;  %v4257_v38 = vld [vmem:[%s19592_s23 + $0x858] sm:$0xff] }
 0x52a   : > { %7110 = vmatmul.mubr.bf16.gmra.mrb[168].mxu1 %v20727_v17 }
 0x52b   : > { %7119 = vmatprep.mubr.bf16.mxu1 %v20729_v43 }
 0x52c   : > { %8482 = vmatmul.mubr.bf16.gmra.mrb[24].mxu0 %v4552_v23  ;;  %v4209_v23 = vld [vmem:[%s19592_s23 + $0x6d8] sm:$0xff] }
 0x52d   : > { %8491 = vmatprep.mubr.bf16.mxu0 %v4561_v25  ;;  %v17227_v25 = vld [vmem:[%s23562_s9 + $0x5c0] ss:$16 sps:$4 sm:$0xff]   ;;  %v20755_v10 = vpack.c.bf16 %v4209_v23, %v4201_v60  ;;  %8745 = vmatpush1.bf16.msra.mxu0 %v17233_v49  ;;  %v4241_v60 = vld [vmem:[%s19592_s23 + $0x7d8] sm:$0xff] }
 0x52e   : > { %7359 = vmatpush1.bf16.msra.mxu1 %v17227_v25  ;;  %v17236_v23 = vld [vmem:[%s23562_s9 + $0x448] ss:$16 sps:$4 sm:$0xff]   ;;  %v17238_v25 = vld [vmem:[%s23562_s9 + $0x44c] ss:$16 sps:$4 sm:$0xff]  }
 0x52f   : > { %8746 = vmatprep.subr.bf16.mxu0 %v17238_v25  ;;  %v17245_v49 = vld [vmem:[%s23562_s9 + $0x488] ss:$16 sps:$4 sm:$0xff]  }
 0x530   : > { %v4265_v25 = vld [vmem:[%s19592_s23 + $0x898] sm:$0xff] }
 0x531   : > { %8747 = vmatpush1.bf16.msra.mxu0 %v17236_v23  ;;  %v4256_v23 = vld [vmem:[%s19592_s23 + $0x850] sm:$0xff] }
 0x532   : > { %7120 = vmatmul.mubr.bf16.gmra.mrb[172].mxu1 %v20737_v53  ;;  %8748 = vmatprep.subr.bf16.mxu0 %v17241_v1  ;;  %v4273_v1 = vld [vmem:[%s19592_s23 + $0x8d8] sm:$0xff] }
 0x533   : > { %7129 = vmatprep.mubr.bf16.mxu1 %v20739_v58 }
 0x534   : > { %8492 = vmatmul.mubr.bf16.gmra.mrb[28].mxu0 %v4560_v3  ;;  %v4200_v3 = vld [vmem:[%s19592_s23 + $0x690] sm:$0xff] }
 0x535   : > { %8501 = vmatprep.mubr.bf16.mxu0 %v4569_v32  ;;  %v4225_v32 = vld [vmem:[%s19592_s23 + $0x758] sm:$0xff]  ;;  %v20772_v59 = vpack.c.bf16 %v4208_v0, %v4200_v3  ;;  %v17244_v0 = vld [vmem:[%s23562_s9 + $0x5e4] ss:$16 sps:$4 sm:$0xff]  }
 0x536   : > { %7360 = vmatprep.subr.bf16.mxu1 %v17244_v0  ;;  %v17253_v0 = vld [vmem:[%s23562_s9 + $0x4cc] ss:$16 sps:$4 sm:$0xff]  }
 0x53a   : > { %7130 = vmatmul.mubr.bf16.gmra.mrb[176].mxu1 %v20753_v15 }
 0x53b   : > { %7139 = vmatprep.mubr.bf16.mxu1 %v20755_v10 }
 0x53c   : > { %8502 = vmatmul.mubr.bf16.gmra.mrb[32].mxu0 %v4568_v2  ;;  %v20774_v2 = vpack.c.bf16 %v4225_v32, %v4217_v50  ;;  %v20803_v50 = vpack.c.bf16 %v4241_v60, %v4233_v5  ;;  %v4232_v32 = vld [vmem:[%s19592_s23 + $0x790] sm:$0xff]  ;;  %v17248_v60 = vld [vmem:[%s23562_s9 + $0x4a8] ss:$16 sps:$4 sm:$0xff]  }
 0x53d   : > { %8511 = vmatprep.mubr.bf16.mxu0 %v4577_v48  ;;  %v4216_v48 = vld [vmem:[%s19592_s23 + $0x710] sm:$0xff]  ;;  %v20825_v5 = vpack.c.bf16 %v4240_v20, %v4232_v32  ;;  %v20854_v20 = vpack.c.bf16 %v4273_v1, %v4265_v25  ;;  %v17263_v25 = vld [vmem:[%s23562_s9 + $0x528] ss:$16 sps:$4 sm:$0xff]  }
 0x53e   : > { %v20795_v3 = vpack.c.bf16 %v4224_v21, %v4216_v48  ;;  %v17247_v48 = vld [vmem:[%s23562_s9 + $0x48c] ss:$16 sps:$4 sm:$0xff]   ;;  %v17259_v32 = vld [vmem:[%s23562_s9 + $0x604] ss:$16 sps:$4 sm:$0xff]  }
 0x53f   : > { %v17250_v21 = vld [vmem:[%s23562_s9 + $0x4ac] ss:$16 sps:$4 sm:$0xff]   ;;  %v4288_v1 = vld [vmem:[%s19592_s23 + $0x950] sm:$0xff] }
 0x542   : > { %7140 = vmatmul.mubr.bf16.gmra.mrb[180].mxu1 %v20772_v59 }
 0x543   : > { %7149 = vmatprep.mubr.bf16.mxu1 %v20774_v2 }
 0x544   : > { %8512 = vmatmul.mubr.bf16.gmra.mrb[36].mxu0 %v4576_v42  ;;  %v17242_v42 = vld [vmem:[%s23562_s9 + $0x5e0] ss:$16 sps:$4 sm:$0xff]  }
 0x545   : > { %8521 = vmatprep.mubr.bf16.mxu0 %v20714_v29  ;;  %v17239_v29 = vld [vmem:[%s23562_s9 + $0x468] ss:$16 sps:$4 sm:$0xff]   ;;  %7361 = vmatpush1.bf16.msra.mxu1 %v17242_v42 }
 0x546   : > { %8749 = vmatpush1.bf16.msra.mxu0 %v17239_v29  ;;  %v17251_v42 = vld [vmem:[%s23562_s9 + $0x4c8] ss:$16 sps:$4 sm:$0xff]   ;;  %v17256_v29 = vld [vmem:[%s23562_s9 + $0x4ec] ss:$16 sps:$4 sm:$0xff]   ;;  %7683 = vmatprep.subr.bf16.mxu1 %v17259_v32 }
 0x547   : > { %8750 = vmatprep.subr.bf16.mxu0 %v17247_v48  ;;  %v4289_v48 = vld [vmem:[%s19592_s23 + $0x958] sm:$0xff] }
 0x548   : > { %v17268_v32 = vld [vmem:[%s23562_s9 + $0x54c] ss:$16 sps:$4 sm:$0xff]  }
 0x54a   : > { %7150 = vmatmul.mubr.bf16.gmra.mrb[184].mxu1 %v20795_v3  ;;  %8751 = vmatpush1.bf16.msra.mxu0 %v17245_v49  ;;  %v4281_v49 = vld [vmem:[%s19592_s23 + $0x918] sm:$0xff] }
 0x54b   : > { %7159 = vmatprep.mubr.bf16.mxu1 %v20803_v50  ;;  %8752 = vmatprep.subr.bf16.mxu0 %v17250_v21  ;;  %v17260_v21 = vld [vmem:[%s23562_s9 + $0x508] ss:$16 sps:$4 sm:$0xff]  }
 0x54c   : > { %8522 = vmatmul.mubr.bf16.gmra.mrb[40].mxu0 %v20727_v17  ;;  %v20827_v17 = vpack.c.bf16 %v4257_v38, %v4249_v57  ;;  %v17254_v57 = vld [vmem:[%s23562_s9 + $0x4e8] ss:$16 sps:$4 sm:$0xff]   ;;  %v4272_v38 = vld [vmem:[%s19592_s23 + $0x8d0] sm:$0xff] }
 0x54d   : > { %8531 = vmatprep.mubr.bf16.mxu0 %v20729_v43  ;;  %v4248_v43 = vld [vmem:[%s19592_s23 + $0x810] sm:$0xff] }
 0x54e   : > { %8753 = vmatpush1.bf16.msra.mxu0 %v17248_v60  ;;  %v17262_v60 = vld [vmem:[%s23562_s9 + $0x50c] ss:$16 sps:$4 sm:$0xff]  }
 0x54f   : > { %8754 = vmatprep.subr.bf16.mxu0 %v17253_v0  ;;  %v4305_v0 = vld [vmem:[%s19592_s23 + $0x9d8] sm:$0xff] }
 0x552   : > { %7160 = vmatmul.mubr.bf16.gmra.mrb[188].mxu1 %v20825_v5  ;;  %8755 = vmatpush1.bf16.msra.mxu0 %v17251_v42  ;;  %v4297_v42 = vld [vmem:[%s19592_s23 + $0x998] sm:$0xff] }
 0x553   : > { %7169 = vmatprep.mubr.bf16.mxu1 %v20827_v17  ;;  %8756 = vmatprep.subr.bf16.mxu0 %v17256_v29  ;;  %v17266_v29 = vld [vmem:[%s23562_s9 + $0x548] ss:$16 sps:$4 sm:$0xff]  }
 0x554   : > { %8532 = vmatmul.mubr.bf16.gmra.mrb[44].mxu0 %v20737_v53  ;;  %v20849_v53 = vpack.c.bf16 %v4256_v23, %v4248_v43  ;;  %v17265_v43 = vld [vmem:[%s23562_s9 + $0x52c] ss:$16 sps:$4 sm:$0xff]  }
 0x555   : > { %8541 = vmatprep.mubr.bf16.mxu0 %v20739_v58  ;;  %v4264_v58 = vld [vmem:[%s19592_s23 + $0x890] sm:$0xff] }
 0x556   : > { %8757 = vmatpush1.bf16.msra.mxu0 %v17254_v57  ;;  %v20876_v23 = vpack.c.bf16 %v4272_v38, %v4264_v58  ;;  %v17271_v57 = vld [vmem:[%s23562_s9 + $0x56c] ss:$16 sps:$4 sm:$0xff]   ;;  %v17269_v38 = vld [vmem:[%s23562_s9 + $0x568] ss:$16 sps:$4 sm:$0xff]  }
 0x557   : > { %8758 = vmatprep.subr.bf16.mxu0 %v17262_v60  ;;  %v17275_v60 = vld [vmem:[%s23562_s9 + $0x588] ss:$16 sps:$4 sm:$0xff]  }
 0x55a   : > { %7170 = vmatmul.mubr.bf16.gmra.mrb[192].mxu1 %v20849_v53  ;;  %8759 = vmatpush1.bf16.msra.mxu0 %v17260_v21  ;;  %v4321_v21 = vld [vmem:[%s19592_s23 + $0xa58] sm:$0xff] }
 0x55b   : > { %7179 = vmatprep.mubr.bf16.mxu1 %v20854_v20  ;;  %8760 = vmatprep.subr.bf16.mxu0 %v17265_v43  ;;  %v17277_v43 = vld [vmem:[%s23562_s9 + $0x58c] ss:$16 sps:$4 sm:$0xff]  }
 0x55c   : > { %8542 = vmatmul.mubr.bf16.gmra.mrb[48].mxu0 %v20753_v15  ;;  %v20878_v15 = vpack.c.bf16 %v4289_v48, %v4281_v49  ;;  %v4304_v49 = vld [vmem:[%s19592_s23 + $0x9d0] sm:$0xff]  ;;  %v4313_v48 = vld [vmem:[%s19592_s23 + $0xa18] sm:$0xff] }
 0x55d   : > { %8551 = vmatprep.mubr.bf16.mxu0 %v20755_v10  ;;  %v4280_v10 = vld [vmem:[%s19592_s23 + $0x910] sm:$0xff] }
 0x55e   : > { %8761 = vmatpush1.bf16.msra.mxu0 %v17263_v25  ;;  %v20900_v58 = vpack.c.bf16 %v4288_v1, %v4280_v10  ;;  %v17280_v25 = vld [vmem:[%s23562_s9 + $0x5ac] ss:$16 sps:$4 sm:$0xff]   ;;  %v17278_v1 = vld [vmem:[%s23562_s9 + $0x5a8] ss:$16 sps:$4 sm:$0xff]  }
 0x55f   : > { %8762 = vmatprep.subr.bf16.mxu0 %v17268_v32  ;;  %v17281_v32 = vld [vmem:[%s23562_s9 + $0x5c8] ss:$16 sps:$4 sm:$0xff]  }
 0x562   : > { %7180 = vmatmul.mubr.bf16.gmra.mrb[196].mxu1 %v20876_v23  ;;  %8763 = vmatpush1.bf16.msra.mxu0 %v17266_v29  ;;  %v4329_v29 = vld [vmem:[%s19592_s23 + $0xa98] sm:$0xff] }
 0x563   : > { %7189 = vmatprep.mubr.bf16.mxu1 %v20878_v15  ;;  %8764 = vmatprep.subr.bf16.mxu0 %v17271_v57  ;;  %v17283_v57 = vld [vmem:[%s23562_s9 + $0x5cc] ss:$16 sps:$4 sm:$0xff]  }
 0x564   : > { %8552 = vmatmul.mubr.bf16.gmra.mrb[52].mxu0 %v20772_v59  ;;  %v20902_v59 = vpack.c.bf16 %v4305_v0, %v4297_v42  ;;  %v4312_v42 = vld [vmem:[%s19592_s23 + $0xa10] sm:$0xff] }
 0x565   : > { %8561 = vmatprep.mubr.bf16.mxu0 %v20774_v2  ;;  %v4296_v2 = vld [vmem:[%s19592_s23 + $0x990] sm:$0xff] }
 0x566   : > { %8765 = vmatpush1.bf16.msra.mxu0 %v17269_v38  ;;  %v4656_v10 = vpack.c.bf16 %v4304_v49, %v4296_v2  ;;  %v4320_v0 = vld [vmem:[%s19592_s23 + $0xa50] sm:$0xff]  ;;  %v17286_v38 = vld [vmem:[%s23562_s9 + $0x5ec] ss:$16 sps:$4 sm:$0xff]   ;;  %v17284_v49 = vld [vmem:[%s23562_s9 + $0x5e8] ss:$16 sps:$4 sm:$0xff]  }
 0x567   : > { %8766 = vmatprep.subr.bf16.mxu0 %v17277_v43  ;;  %v4664_v2 = vpack.c.bf16 %v4320_v0, %v4312_v42  ;;  %v4352_v42 = vld [vmem:[%s19592_s23 + $0xb50] sm:$0xff]  ;;  %v4361_v0 = vld [vmem:[%s19592_s23 + $0xb98] sm:$0xff] }
 0x56a   : > { %7190 = vmatmul.mubr.bf16.gmra.mrb[200].mxu1 %v20900_v58  ;;  %8767 = vmatpush1.bf16.msra.mxu0 %v17275_v60  ;;  %v4353_v60 = vld [vmem:[%s19592_s23 + $0xb58] sm:$0xff] }
 0x56b   : > { %7199 = vmatprep.mubr.bf16.mxu1 %v20902_v59  ;;  %8768 = vmatprep.subr.bf16.mxu0 %v17280_v25 }
 0x56c   : > { %8562 = vmatmul.mubr.bf16.gmra.mrb[56].mxu0 %v20795_v3  ;;  %v4665_v3 = vpack.c.bf16 %v4321_v21, %v4313_v48  ;;  %v4336_v48 = vld [vmem:[%s19592_s23 + $0xad0] sm:$0xff]  ;;  %v4345_v21 = vld [vmem:[%s19592_s23 + $0xb18] sm:$0xff] }
 0x56d   : > { %8571 = vmatprep.mubr.bf16.mxu0 %v20803_v50  ;;  %v4337_v50 = vld [vmem:[%s19592_s23 + $0xad8] sm:$0xff]  ;;  %v4681_v25 = vpack.c.bf16 %v4353_v60, %v4345_v21 }
 0x56e   : > { %8769 = vmatpush1.bf16.msra.mxu0 %v17278_v1  ;;  %v4344_v1 = vld [vmem:[%s19592_s23 + $0xb10] sm:$0xff]  ;;  %v4401_v21 = vld [vmem:[%s19592_s23 + $0xcd8] sm:$0xff] }
 0x56f   : > { %8770 = vmatprep.subr.bf16.mxu0 %v17283_v57  ;;  %v4377_v57 = vld [vmem:[%s19592_s23 + $0xc18] sm:$0xff] }
 0x572   : > { %7200 = vmatmul.mubr.bf16.gmra.mrb[204].mxu1 %v4656_v10  ;;  %8771 = vmatpush1.bf16.msra.mxu0 %v17281_v32  ;;  %v4368_v32 = vld [vmem:[%s19592_s23 + $0xbd0] sm:$0xff] }
 0x573   : > { %7209 = vmatprep.mubr.bf16.mxu1 %v4665_v3  ;;  %8772 = vmatprep.subr.bf16.mxu0 %v17286_v38  ;;  %v4385_v38 = vld [vmem:[%s19592_s23 + $0xc58] sm:$0xff] }
 0x574   : > { %8572 = vmatmul.mubr.bf16.gmra.mrb[60].mxu0 %v20825_v5  ;;  %v4673_v5 = vpack.c.bf16 %v4337_v50, %v4329_v29  ;;  %v4369_v29 = vld [vmem:[%s19592_s23 + $0xbd8] sm:$0xff] }
 0x575   : > { %8581 = vmatprep.mubr.bf16.mxu0 %v20827_v17  ;;  %v4328_v17 = vld [vmem:[%s19592_s23 + $0xa90] sm:$0xff]  ;;  %v4689_v50 = vpack.c.bf16 %v4369_v29, %v4361_v0  ;;  %v4417_v0 = vld [vmem:[%s19592_s23 + $0xd58] sm:$0xff] }
 0x576   : > { %8773 = vmatpush1.bf16.msra.mxu0 %v17284_v49  ;;  %v4672_v43 = vpack.c.bf16 %v4336_v48, %v4328_v17  ;;  %v4697_v49 = vpack.c.bf16 %v4385_v38, %v4377_v57  ;;  %v4384_v17 = vld [vmem:[%s19592_s23 + $0xc50] sm:$0xff]  ;;  %v4393_v48 = vld [vmem:[%s19592_s23 + $0xc98] sm:$0xff] }
 0x577   : > { %v4705_v60 = vpack.c.bf16 %v4401_v21, %v4393_v48  ;;  %v4433_v57 = vld [vmem:[%s19592_s23 + $0xdd8] sm:$0xff] }
 0x578   : > { %v4449_v48 = vld [vmem:[%s19592_s23 + $0xe58] sm:$0xff] }
 0x57a   : > { %7210 = vmatmul.mubr.bf16.gmra.mrb[208].mxu1 %v4664_v2 }
 0x57b   : > { %7219 = vmatprep.mubr.bf16.mxu1 %v4673_v5 }
 0x57c   : > { %8582 = vmatmul.mubr.bf16.gmra.mrb[64].mxu0 %v20849_v53  ;;  %v4680_v53 = vpack.c.bf16 %v4352_v42, %v4344_v1  ;;  %v4400_v1 = vld [vmem:[%s19592_s23 + $0xcd0] sm:$0xff]  ;;  %v4409_v42 = vld [vmem:[%s19592_s23 + $0xd18] sm:$0xff] }
 0x57d   : > { %8591 = vmatprep.mubr.bf16.mxu0 %v20854_v20  ;;  %v4360_v20 = vld [vmem:[%s19592_s23 + $0xb90] sm:$0xff]  ;;  %v4713_v29 = vpack.c.bf16 %v4417_v0, %v4409_v42  ;;  %v4465_v42 = vld [vmem:[%s19592_s23 + $0xed8] sm:$0xff] }
 0x582   : > { %7220 = vmatmul.mubr.bf16.gmra.mrb[212].mxu1 %v4672_v43 }
 0x583   : > { %7229 = vmatprep.mubr.bf16.mxu1 %v4681_v25 }
 0x584   : > { %8592 = vmatmul.mubr.bf16.gmra.mrb[68].mxu0 %v20876_v23  ;;  %v4688_v23 = vpack.c.bf16 %v4368_v32, %v4360_v20  ;;  %v4416_v20 = vld [vmem:[%s19592_s23 + $0xd50] sm:$0xff]  ;;  %v4425_v32 = vld [vmem:[%s19592_s23 + $0xd98] sm:$0xff] }
 0x585   : > { %8601 = vmatprep.mubr.bf16.mxu0 %v20878_v15  ;;  %v4376_v15 = vld [vmem:[%s19592_s23 + $0xc10] sm:$0xff]  ;;  %v4721_v38 = vpack.c.bf16 %v4433_v57, %v4425_v32  ;;  %v4481_v32 = vld [vmem:[%s19592_s23 + $0xf58] sm:$0xff] }
 0x58a   : > { %7230 = vmatmul.mubr.bf16.gmra.mrb[216].mxu1 %v4680_v53 }
 0x58b   : > { %7239 = vmatprep.mubr.bf16.mxu1 %v4689_v50 }
 0x58c   : > { %8602 = vmatmul.mubr.bf16.gmra.mrb[72].mxu0 %v20900_v58  ;;  %v4696_v58 = vpack.c.bf16 %v4384_v17, %v4376_v15  ;;  %v4432_v15 = vld [vmem:[%s19592_s23 + $0xdd0] sm:$0xff]  ;;  %v4441_v17 = vld [vmem:[%s19592_s23 + $0xe18] sm:$0xff] }
 0x58d   : > { %8611 = vmatprep.mubr.bf16.mxu0 %v20902_v59  ;;  %v4392_v59 = vld [vmem:[%s19592_s23 + $0xc90] sm:$0xff]  ;;  %v4729_v21 = vpack.c.bf16 %v4449_v48, %v4441_v17  ;;  %v4497_v17 = vld [vmem:[%s19592_s23 + $0xfd8] sm:$0xff] }
 0x592   : > { %7240 = vmatmul.mubr.bf16.gmra.mrb[220].mxu1 %v4688_v23 }
 0x593   : > { %7249 = vmatprep.mubr.bf16.mxu1 %v4697_v49 }
 0x594   : > { %8612 = vmatmul.mubr.bf16.gmra.mrb[76].mxu0 %v4656_v10  ;;  %v4704_v10 = vpack.c.bf16 %v4400_v1, %v4392_v59  ;;  %v4448_v59 = vld [vmem:[%s19592_s23 + $0xe50] sm:$0xff]  ;;  %v4457_v1 = vld [vmem:[%s19592_s23 + $0xe98] sm:$0xff] }
 0x595   : > { %8621 = vmatprep.mubr.bf16.mxu0 %v4665_v3  ;;  %v4408_v3 = vld [vmem:[%s19592_s23 + $0xd10] sm:$0xff]  ;;  %v4737_v0 = vpack.c.bf16 %v4465_v42, %v4457_v1  ;;  %v3994_v42 = vld [vmem:[%s19592_s23 + $0x20] sm:$0xff] }
 0x59a   : > { %7250 = vmatmul.mubr.bf16.gmra.mrb[224].mxu1 %v4696_v58 }
 0x59b   : > { %7259 = vmatprep.mubr.bf16.mxu1 %v4705_v60 }
 0x59c   : > { %8622 = vmatmul.mubr.bf16.gmra.mrb[80].mxu0 %v4664_v2  ;;  %v4712_v2 = vpack.c.bf16 %v4416_v20, %v4408_v3  ;;  %v4464_v3 = vld [vmem:[%s19592_s23 + $0xed0] sm:$0xff]  ;;  %v4473_v20 = vld [vmem:[%s19592_s23 + $0xf18] sm:$0xff] }
 0x59d   : > { %8631 = vmatprep.mubr.bf16.mxu0 %v4673_v5  ;;  %v4424_v5 = vld [vmem:[%s19592_s23 + $0xd90] sm:$0xff]  ;;  %v4745_v57 = vpack.c.bf16 %v4481_v32, %v4473_v20 }
 0x5a2   : > { %7260 = vmatmul.mubr.bf16.gmra.mrb[228].mxu1 %v4704_v10 }
 0x5a3   : > { %7269 = vmatprep.mubr.bf16.mxu1 %v4713_v29 }
 0x5a4   : > { %8632 = vmatmul.mubr.bf16.gmra.mrb[84].mxu0 %v4672_v43  ;;  %v4720_v43 = vpack.c.bf16 %v4432_v15, %v4424_v5  ;;  %v4480_v5 = vld [vmem:[%s19592_s23 + $0xf50] sm:$0xff]  ;;  %v4489_v15 = vld [vmem:[%s19592_s23 + $0xf98] sm:$0xff] }
 0x5a5   : > { %8641 = vmatprep.mubr.bf16.mxu0 %v4681_v25  ;;  %v4440_v25 = vld [vmem:[%s19592_s23 + $0xe10] sm:$0xff]  ;;  %v20993_v48 = vpack.c.bf16 %v4497_v17, %v4489_v15  ;;  %v4027_v15 = vld [vmem:[%s19592_s23 + $0x128] sm:$0xff] }
 0x5a6   : > { %v4035_v17 = vld [vmem:[%s19592_s23 + $0x168] sm:$0xff] }
 0x5aa   : > { %7270 = vmatmul.mubr.bf16.gmra.mrb[232].mxu1 %v4712_v2 }
 0x5ab   : > { %7279 = vmatprep.mubr.bf16.mxu1 %v4721_v38 }
 0x5ac   : > { %8642 = vmatmul.mubr.bf16.gmra.mrb[88].mxu0 %v4680_v53  ;;  %v4728_v53 = vpack.c.bf16 %v4448_v59, %v4440_v25  ;;  %v4496_v25 = vld [vmem:[%s19592_s23 + $0xfd0] sm:$0xff]  ;;  %v3995_v59 = vld [vmem:[%s19592_s23 + $0x28] sm:$0xff] }
 0x5ad   : > { %8651 = vmatprep.mubr.bf16.mxu0 %v4689_v50  ;;  %v4456_v50 = vld [vmem:[%s19592_s23 + $0xe90] sm:$0xff] }
 0x5b2   : > { %7280 = vmatmul.mubr.bf16.gmra.mrb[236].mxu1 %v4720_v43 }
 0x5b3   : > { %7289 = vmatprep.mubr.bf16.mxu1 %v4729_v21 }
 0x5b4   : > { %8652 = vmatmul.mubr.bf16.gmra.mrb[92].mxu0 %v4688_v23  ;;  %v4736_v23 = vpack.c.bf16 %v4464_v3, %v4456_v50  ;;  %v4002_v50 = vld [vmem:[%s19592_s23 + $0x60] sm:$0xff]  ;;  %v4011_v3 = vld [vmem:[%s19592_s23 + $0xa8] sm:$0xff] }
 0x5b5   : > { %8661 = vmatprep.mubr.bf16.mxu0 %v4697_v49  ;;  %v4472_v49 = vld [vmem:[%s19592_s23 + $0xf10] sm:$0xff]  ;;  %v21011_v20 = vpack.c.bf16 %v4002_v50, %v3994_v42  ;;  %v4026_v42 = vld [vmem:[%s19592_s23 + $0x120] sm:$0xff] }
 0x5b6   : > { %v17290_v50 = vld [vmem:[%s23562_s9 + $0x660] ss:$16 sps:$4 sm:$0xff]  }
 0x5ba   : > { %7290 = vmatmul.mubr.bf16.gmra.mrb[240].mxu1 %v4728_v53 }
 0x5bb   : > { %7299 = vmatprep.mubr.bf16.mxu1 %v4737_v0 }
 0x5bc   : > { %8662 = vmatmul.mubr.bf16.gmra.mrb[96].mxu0 %v4696_v58  ;;  %v20991_v58 = vpack.c.bf16 %v4480_v5, %v4472_v49  ;;  %v17274_v49 = vld [vmem:[%s23562_s9 + $0x624] ss:$16 sps:$4 sm:$0xff]  }
 0x5bd   : > { %8671 = vmatprep.mubr.bf16.mxu0 %v4705_v60  ;;  %v4488_v60 = vld [vmem:[%s19592_s23 + $0xf90] sm:$0xff]  ;;  %v4018_v5 = vld [vmem:[%s19592_s23 + $0xe0] sm:$0xff] }
 0x5be   : > { %v21001_v1 = vpack.c.bf16 %v4496_v25, %v4488_v60  ;;  %v17289_v60 = vld [vmem:[%s23562_s9 + $0x644] ss:$16 sps:$4 sm:$0xff]  }
 0x5c2   : > { %7300 = vmatmul.mubr.bf16.gmra.mrb[244].mxu1 %v4736_v23 }
 0x5c3   : > { %7309 = vmatprep.mubr.bf16.mxu1 %v4745_v57 }
 0x5c4   : > { %8672 = vmatmul.mubr.bf16.gmra.mrb[100].mxu0 %v4704_v10  ;;  %v4003_v10 = vld [vmem:[%s19592_s23 + $0x68] sm:$0xff] }
 0x5c5   : > { %8681 = vmatprep.mubr.bf16.mxu0 %v4713_v29  ;;  %v21003_v29 = vpack.c.bf16 %v4003_v10, %v3995_v59  ;;  %v21035_v59 = vpack.c.bf16 %v4035_v17, %v4027_v15  ;;  %v17287_v10 = vld [vmem:[%s23562_s9 + $0x640] ss:$16 sps:$4 sm:$0xff]   ;;  %v4059_v17 = vld [vmem:[%s19592_s23 + $0x228] sm:$0xff] }
 0x5c6   : > { %v17296_v15 = vld [vmem:[%s23562_s9 + $0x6a0] ss:$16 sps:$4 sm:$0xff]  }
 0x5ca   : > { %7310 = vmatmul.mubr.bf16.gmra.mrb[248].mxu1 %v20991_v58 }
 0x5cb   : > { %7319 = vmatprep.mubr.bf16.mxu1 %v20993_v48 }
 0x5cc   : > { %8682 = vmatmul.mubr.bf16.gmra.mrb[104].mxu0 %v4712_v2  ;;  %v4019_v2 = vld [vmem:[%s19592_s23 + $0xe8] sm:$0xff] }
 0x5cd   : > { %8691 = vmatprep.mubr.bf16.mxu0 %v4721_v38  ;;  %v17257_v38 = vld [vmem:[%s23562_s9 + $0x600] ss:$16 sps:$4 sm:$0xff]   ;;  %v21016_v32 = vpack.c.bf16 %v4019_v2, %v4011_v3  ;;  %v4043_v3 = vld [vmem:[%s19592_s23 + $0x1a8] sm:$0xff] }
 0x5ce   : > { %v4051_v2 = vld [vmem:[%s19592_s23 + $0x1e8] sm:$0xff] }
 0x5d2   : > { %7320 = vmatmul.mubr.bf16.gmra.mrb[252].mxu1 %v21001_v1 }
 0x5d3   : > { %7362 = vmatprep.mubr.bf16.mxu1 %v21003_v29 }
 0x5d4   : > { %8692 = vmatmul.mubr.bf16.gmra.mrb[108].mxu0 %v4720_v43  ;;  %v4010_v43 = vld [vmem:[%s19592_s23 + $0xa0] sm:$0xff] }
 0x5d5   : > { %8701 = vmatprep.mubr.bf16.mxu0 %v4729_v21  ;;  %v17272_v21 = vld [vmem:[%s23562_s9 + $0x620] ss:$16 sps:$4 sm:$0xff]   ;;  %v21033_v25 = vpack.c.bf16 %v4018_v5, %v4010_v43  ;;  %v21057_v43 = vpack.c.bf16 %v4051_v2, %v4043_v3  ;;  %v4075_v2 = vld [vmem:[%s19592_s23 + $0x2a8] sm:$0xff] }
 0x5d6   : > { %v17293_v5 = vld [vmem:[%s23562_s9 + $0x680] ss:$16 sps:$4 sm:$0xff]  }
 0x5d7   : > { %v17302_v3 = vld [vmem:[%s23562_s9 + $0x6e0] ss:$16 sps:$4 sm:$0xff]  }
 0x5da   : > { %7363 = vmatmul.mubr.bf16.vlgmr.msra.gmra.mrb[128].mxu1 %v21011_v20 }
 0x5db   : > { %7684 = vmatpush1.bf16.msra.mxu1 %v17257_v38  ;;  %7372 = vmatprep.mubr.bf16.mxu1 %v21016_v32  ;;  %v17295_v38 = vld [vmem:[%s23562_s9 + $0x684] ss:$16 sps:$4 sm:$0xff]  }
 0x5dc   : > { %8702 = vmatmul.mubr.bf16.gmra.mrb[112].mxu0 %v4728_v53  ;;  %7685 = vmatprep.subr.bf16.mxu1 %v17274_v49  ;;  %v17292_v53 = vld [vmem:[%s23562_s9 + $0x664] ss:$16 sps:$4 sm:$0xff]  }
 0x5dd   : > { %8711 = vmatprep.mubr.bf16.mxu0 %v4737_v0  ;;  %v4034_v0 = vld [vmem:[%s19592_s23 + $0x160] sm:$0xff] }
 0x5de   : > { %v21055_v49 = vpack.c.bf16 %v4034_v0, %v4026_v42  ;;  %v17304_v0 = vld [vmem:[%s23562_s9 + $0x6e4] ss:$16 sps:$4 sm:$0xff]  }
 0x5df   : > { %7686 = vmatpush1.bf16.msra.mxu1 %v17272_v21  ;;  %v4042_v21 = vld [vmem:[%s19592_s23 + $0x1a0] sm:$0xff] }
 0x5e0   : > { %7687 = vmatprep.subr.bf16.mxu1 %v17289_v60  ;;  %v4067_v60 = vld [vmem:[%s19592_s23 + $0x268] sm:$0xff] }
 0x5e1   : > { %v21081_v42 = vpack.c.bf16 %v4067_v60, %v4059_v17  ;;  %v4082_v17 = vld [vmem:[%s19592_s23 + $0x2e0] sm:$0xff]  ;;  %v4091_v60 = vld [vmem:[%s19592_s23 + $0x328] sm:$0xff] }
 0x5e2   : > { %7373 = vmatmul.mubr.bf16.gmra.mrb[132].mxu1 %v21033_v25 }
 0x5e3   : > { %7382 = vmatprep.mubr.bf16.mxu1 %v21035_v59  ;;  %7688 = vmatpush1.bf16.msra.mxu1 %v17287_v10  ;;  %v17301_v10 = vld [vmem:[%s23562_s9 + $0x6c4] ss:$16 sps:$4 sm:$0xff]  }
 0x5e4   : > { %8712 = vmatmul.mubr.bf16.gmra.mrb[116].mxu0 %v4736_v23  ;;  %7689 = vmatprep.subr.bf16.mxu1 %v17292_v53  ;;  %v17298_v23 = vld [vmem:[%s23562_s9 + $0x6a4] ss:$16 sps:$4 sm:$0xff]  }
 0x5e5   : > { %8721 = vmatprep.mubr.bf16.mxu0 %v4745_v57  ;;  %v4050_v57 = vld [vmem:[%s19592_s23 + $0x1e0] sm:$0xff] }
 0x5e6   : > { %v21079_v53 = vpack.c.bf16 %v4050_v57, %v4042_v21  ;;  %v17305_v57 = vld [vmem:[%s23562_s9 + $0x700] ss:$16 sps:$4 sm:$0xff]  }
 0x5e7   : > { %7690 = vmatpush1.bf16.msra.mxu1 %v17290_v50  ;;  %v4058_v50 = vld [vmem:[%s19592_s23 + $0x220] sm:$0xff] }
 0x5e8   : > { %7691 = vmatprep.subr.bf16.mxu1 %v17295_v38  ;;  %v4083_v38 = vld [vmem:[%s19592_s23 + $0x2e8] sm:$0xff] }
 0x5e9   : > { %v21103_v21 = vpack.c.bf16 %v4083_v38, %v4075_v2  ;;  %v4115_v2 = vld [vmem:[%s19592_s23 + $0x3e8] sm:$0xff] }
 0x5ea   : > { %7383 = vmatmul.mubr.bf16.gmra.mrb[136].mxu1 %v21055_v49 }
 0x5eb   : > { %7392 = vmatprep.mubr.bf16.mxu1 %v21057_v43  ;;  %7692 = vmatpush1.bf16.msra.mxu1 %v17293_v5  ;;  %v17307_v5 = vld [vmem:[%s23562_s9 + $0x704] ss:$16 sps:$4 sm:$0xff]  }
 0x5ec   : > { %8722 = vmatmul.mubr.bf16.gmra.mrb[120].mxu0 %v20991_v58  ;;  %7693 = vmatprep.subr.bf16.mxu1 %v17298_v23  ;;  %v17299_v58 = vld [vmem:[%s23562_s9 + $0x6c0] ss:$16 sps:$4 sm:$0xff]  }
 0x5ed   : > { %8731 = vmatprep.mubr.bf16.mxu0 %v20993_v48  ;;  %v4066_v48 = vld [vmem:[%s19592_s23 + $0x260] sm:$0xff] }
 0x5ee   : > { %v4538_v23 = vpack.c.bf16 %v4066_v48, %v4058_v50  ;;  %v17311_v50 = vld [vmem:[%s23562_s9 + $0x740] ss:$16 sps:$4 sm:$0xff]  }
 0x5ef   : > { %7694 = vmatpush1.bf16.msra.mxu1 %v17296_v15  ;;  %v4074_v15 = vld [vmem:[%s19592_s23 + $0x2a0] sm:$0xff] }
 0x5f0   : > { %7695 = vmatprep.subr.bf16.mxu1 %v17301_v10  ;;  %v4099_v10 = vld [vmem:[%s19592_s23 + $0x368] sm:$0xff]  ;;  %v4090_v48 = vld [vmem:[%s19592_s23 + $0x320] sm:$0xff] }
 0x5f2   : > { %7393 = vmatmul.mubr.bf16.gmra.mrb[140].mxu1 %v21079_v53 }
 0x5f3   : > { %7402 = vmatprep.mubr.bf16.mxu1 %v21081_v42  ;;  %7696 = vmatpush1.bf16.msra.mxu1 %v17299_v58  ;;  %v4546_v58 = vpack.c.bf16 %v4082_v17, %v4074_v15  ;;  %v4123_v15 = vld [vmem:[%s19592_s23 + $0x428] sm:$0xff] }
 0x5f4   : > { %8732 = vmatmul.mubr.bf16.gmra.mrb[124].mxu0 %v21001_v1  ;;  %7697 = vmatprep.subr.bf16.mxu1 %v17304_v0  ;;  %v17310_v1 = vld [vmem:[%s23562_s9 + $0x724] ss:$16 sps:$4 sm:$0xff]   ;;  %v4555_v0 = vpack.c.bf16 %v4099_v10, %v4091_v60  ;;  %v4139_v10 = vld [vmem:[%s19592_s23 + $0x4a8] sm:$0xff] }
 0x5f5   : > { %8774 = vmatprep.mubr.bf16.mxu0 %v21003_v29  ;;  %v17308_v29 = vld [vmem:[%s23562_s9 + $0x720] ss:$16 sps:$4 sm:$0xff]  }
 0x5f6   : > { %v4130_v60 = vld [vmem:[%s19592_s23 + $0x460] sm:$0xff] }
 0x5f7   : > { %7698 = vmatpush1.bf16.msra.mxu1 %v17302_v3  ;;  %v4098_v3 = vld [vmem:[%s19592_s23 + $0x360] sm:$0xff] }
 0x5f8   : > { %7699 = vmatprep.subr.bf16.mxu1 %v17307_v5  ;;  %v4554_v38 = vpack.c.bf16 %v4098_v3, %v4090_v48  ;;  %v4146_v3 = vld [vmem:[%s19592_s23 + $0x4e0] sm:$0xff] }
 0x5fa   : > { %7403 = vmatmul.mubr.bf16.gmra.mrb[144].mxu1 %v4538_v23 }
 0x5fb   : > { %7412 = vmatprep.mubr.bf16.mxu1 %v21103_v21  ;;  %7700 = vmatpush1.bf16.msra.mxu1 %v17305_v57  ;;  %v4106_v57 = vld [vmem:[%s19592_s23 + $0x3a0] sm:$0xff] }
 0x5fc   : > { %8775 = vmatmul.mubr.bf16.vlgmr.msra.gmra.mrb[0].mxu0 %v21011_v20  ;;  %7701 = vmatprep.subr.bf16.mxu1 %v17310_v1  ;;  %v17313_v20 = vld [vmem:[%s23562_s9 + $0x744] ss:$16 sps:$4 sm:$0xff]  }
 0x5fd   : > { %8784 = vmatprep.mubr.bf16.mxu0 %v21016_v32  ;;  %v4107_v32 = vld [vmem:[%s19592_s23 + $0x3a8] sm:$0xff]  ;;  %v4114_v1 = vld [vmem:[%s19592_s23 + $0x3e0] sm:$0xff] }
 0x5fe   : > { %v4563_v5 = vpack.c.bf16 %v4115_v2, %v4107_v32  ;;  %v4562_v17 = vpack.c.bf16 %v4114_v1, %v4106_v57  ;;  %v4155_v32 = vld [vmem:[%s19592_s23 + $0x528] sm:$0xff] }
 0x5ff   : > { %7702 = vmatpush1.bf16.msra.mxu1 %v17308_v29  ;;  %v4163_v2 = vld [vmem:[%s19592_s23 + $0x568] sm:$0xff] }
 0x600   : > { %7703 = vmatprep.subr.bf16.mxu1 %v17313_v20  ;;  %v21156_v1 = vpack.c.bf16 %v4163_v2, %v4155_v32  ;;  %v4194_v32 = vld [vmem:[%s19592_s23 + $0x660] sm:$0xff]  ;;  %v4203_v2 = vld [vmem:[%s19592_s23 + $0x6a8] sm:$0xff] }
 0x602   : > { %7413 = vmatmul.mubr.bf16.gmra.mrb[148].mxu1 %v4546_v58 }
 0x603   : > { %7422 = vmatprep.mubr.bf16.mxu1 %v4555_v0  ;;  %7704 = vmatpush1.bf16.msra.mxu1 %v17311_v50  ;;  %v4147_v50 = vld [vmem:[%s19592_s23 + $0x4e8] sm:$0xff] }
 0x604   : > { %8785 = vmatmul.mubr.bf16.gmra.mrb[4].mxu0 %v21033_v25  ;;  %v4131_v25 = vld [vmem:[%s19592_s23 + $0x468] sm:$0xff]  ;;  %v4579_v48 = vpack.c.bf16 %v4147_v50, %v4139_v10  ;;  %v4178_v50 = vld [vmem:[%s19592_s23 + $0x5e0] sm:$0xff] }
 0x605   : > { %8794 = vmatprep.mubr.bf16.mxu0 %v21035_v59  ;;  %v4571_v29 = vpack.c.bf16 %v4131_v25, %v4123_v15  ;;  %v4122_v59 = vld [vmem:[%s19592_s23 + $0x420] sm:$0xff]  ;;  %v4171_v25 = vld [vmem:[%s19592_s23 + $0x5a8] sm:$0xff] }
 0x606   : > { %v4570_v20 = vpack.c.bf16 %v4130_v60, %v4122_v59  ;;  %v4162_v15 = vld [vmem:[%s19592_s23 + $0x560] sm:$0xff]  ;;  %v4179_v59 = vld [vmem:[%s19592_s23 + $0x5e8] sm:$0xff] }
 0x607   : > { %v21171_v10 = vpack.c.bf16 %v4179_v59, %v4171_v25  ;;  %v4210_v59 = vld [vmem:[%s19592_s23 + $0x6e0] sm:$0xff] }
 0x60a   : > { %7423 = vmatmul.mubr.bf16.gmra.mrb[152].mxu1 %v4554_v38 }
 0x60b   : > { %7432 = vmatprep.mubr.bf16.mxu1 %v4563_v5 }
 0x60c   : > { %8795 = vmatmul.mubr.bf16.gmra.mrb[8].mxu0 %v21055_v49  ;;  %v17314_v49 = vld [vmem:[%s23562_s9 + $0x760] ss:$16 sps:$4 sm:$0xff]  }
 0x60d   : > { %8804 = vmatprep.mubr.bf16.mxu0 %v21057_v43  ;;  %v17316_v43 = vld [vmem:[%s23562_s9 + $0x764] ss:$16 sps:$4 sm:$0xff]  }
 0x60e   : > { %7705 = vmatprep.subr.bf16.mxu1 %v17316_v43  ;;  %v4195_v43 = vld [vmem:[%s19592_s23 + $0x668] sm:$0xff] }
 0x60f   : > { %7706 = vmatpush1.bf16.msra.mxu1 %v17314_v49  ;;  %v4187_v49 = vld [vmem:[%s19592_s23 + $0x628] sm:$0xff] }
 0x612   : > { %7433 = vmatmul.mubr.bf16.gmra.mrb[156].mxu1 %v4562_v17 }
 0x613   : > { %7442 = vmatprep.mubr.bf16.mxu1 %v4571_v29 }
 0x614   : > { %8805 = vmatmul.mubr.bf16.gmra.mrb[12].mxu0 %v21079_v53  ;;  %v4138_v53 = vld [vmem:[%s19592_s23 + $0x4a0] sm:$0xff] }
 0x615   : > { %8814 = vmatprep.mubr.bf16.mxu0 %v21081_v42  ;;  %v4578_v57 = vpack.c.bf16 %v4146_v3, %v4138_v53  ;;  %v4154_v42 = vld [vmem:[%s19592_s23 + $0x520] sm:$0xff]  ;;  %v21181_v53 = vpack.c.bf16 %v4195_v43, %v4187_v49 }
 0x616   : > { %v21169_v60 = vpack.c.bf16 %v4162_v15, %v4154_v42  ;;  %v4186_v3 = vld [vmem:[%s19592_s23 + $0x620] sm:$0xff] }
 0x617   : > { %v17322_v42 = vld [vmem:[%s23562_s9 + $0x7a4] ss:$16 sps:$4 sm:$0xff]   ;;  %v21195_v15 = vpack.c.bf16 %v4194_v32, %v4186_v3  ;;  %v4235_v3 = vld [vmem:[%s19592_s23 + $0x7a8] sm:$0xff] }
 0x618   : > { %v4218_v43 = vld [vmem:[%s19592_s23 + $0x720] sm:$0xff]  ;;  %v4243_v32 = vld [vmem:[%s19592_s23 + $0x7e8] sm:$0xff] }
 0x61a   : > { %7443 = vmatmul.mubr.bf16.gmra.mrb[160].mxu1 %v4570_v20 }
 0x61b   : > { %7452 = vmatprep.mubr.bf16.mxu1 %v4579_v48 }
 0x61c   : > { %8815 = vmatmul.mubr.bf16.gmra.mrb[16].mxu0 %v4538_v23  ;;  %v17317_v23 = vld [vmem:[%s23562_s9 + $0x780] ss:$16 sps:$4 sm:$0xff]  }
 0x61d   : > { %8824 = vmatprep.mubr.bf16.mxu0 %v21103_v21  ;;  %v17319_v21 = vld [vmem:[%s23562_s9 + $0x784] ss:$16 sps:$4 sm:$0xff]  }
 0x61e   : > { %7707 = vmatprep.subr.bf16.mxu1 %v17319_v21  ;;  %v4227_v21 = vld [vmem:[%s19592_s23 + $0x768] sm:$0xff] }
 0x61f   : > { %7708 = vmatpush1.bf16.msra.mxu1 %v17317_v23  ;;  %v4219_v23 = vld [vmem:[%s19592_s23 + $0x728] sm:$0xff] }
 0x620   : > { %7709 = vmatprep.subr.bf16.mxu1 %v17322_v42  ;;  %v21213_v49 = vpack.c.bf16 %v4227_v21, %v4219_v23  ;;  %v4234_v21 = vld [vmem:[%s19592_s23 + $0x7a0] sm:$0xff] }
 0x622   : > { %7453 = vmatmul.mubr.bf16.gmra.mrb[164].mxu1 %v4578_v57 }
 0x623   : > { %7462 = vmatprep.mubr.bf16.mxu1 %v21156_v1 }
 0x624   : > { %8825 = vmatmul.mubr.bf16.gmra.mrb[20].mxu0 %v4546_v58  ;;  %v4170_v58 = vld [vmem:[%s19592_s23 + $0x5a0] sm:$0xff] }
 0x625   : > { %8834 = vmatprep.mubr.bf16.mxu0 %v4555_v0  ;;  %v21179_v0 = vpack.c.bf16 %v4178_v50, %v4170_v58  ;;  %v17325_v58 = vld [vmem:[%s23562_s9 + $0x60c] ss:$16 sps:$4 sm:$0xff]  }
 0x626   : > { %9095 = vmatprep.subr.bf16.mxu0 %v17325_v58  ;;  %v4251_v58 = vld [vmem:[%s19592_s23 + $0x828] sm:$0xff] }
 0x62a   : > { %7463 = vmatmul.mubr.bf16.gmra.mrb[168].mxu1 %v21169_v60 }
 0x62b   : > { %7472 = vmatprep.mubr.bf16.mxu1 %v21171_v10 }
 0x62c   : > { %8835 = vmatmul.mubr.bf16.gmra.mrb[24].mxu0 %v4554_v38  ;;  %v4211_v38 = vld [vmem:[%s19592_s23 + $0x6e8] sm:$0xff] }
 0x62d   : > { %8844 = vmatprep.mubr.bf16.mxu0 %v4563_v5  ;;  %v17320_v5 = vld [vmem:[%s23562_s9 + $0x7a0] ss:$16 sps:$4 sm:$0xff]   ;;  %v21197_v25 = vpack.c.bf16 %v4211_v38, %v4203_v2  ;;  %v17326_v2 = vld [vmem:[%s23562_s9 + $0x628] ss:$16 sps:$4 sm:$0xff]  }
 0x62e   : > { %7710 = vmatpush1.bf16.msra.mxu1 %v17320_v5  ;;  %v5262_v38 = vld [vmem:[%s23562_s9 + $0x7c0] sm:$0xff] }
 0x62f   : > { %v14634_v5 = vcombine.high %v5262_v38, %v5262_v38  ;;  %v14633_v42 = vcombine.low %v5262_v38, %v5262_v38  ;;  %v4258_v38 = vld [vmem:[%s19592_s23 + $0x860] sm:$0xff] }
 0x631   : > { %14637 = vmatprep.subr.msk.bf16.mxu1 %vm6611_vm1, %v14634_v5  ;;  %v6613_v23 = vsel %vm6611_vm1, %v14633_v42, 0  ;;  %v4267_v5 = vld [vmem:[%s19592_s23 + $0x8a8] sm:$0xff] }
 0x632   : > { %7473 = vmatmul.mubr.bf16.gmra.mrb[172].mxu1 %v21179_v0  ;;  %v17340_v42 = vld [vmem:[%s23562_s9 + $0x6a8] ss:$16 sps:$4 sm:$0xff]  }
 0x633   : > { %7482 = vmatprep.mubr.bf16.mxu1 %v21181_v53  ;;  %7712 = vmatpush1.bf16.msra.mxu1 %v6613_v23  ;;  %v17345_v23 = vld [vmem:[%s23562_s9 + $0x6cc] ss:$16 sps:$4 sm:$0xff]  }
 0x634   : > { %8845 = vmatmul.mubr.bf16.gmra.mrb[28].mxu0 %v4562_v17  ;;  %v4202_v17 = vld [vmem:[%s19592_s23 + $0x6a0] sm:$0xff] }
 0x635   : > { %8854 = vmatprep.mubr.bf16.mxu0 %v4571_v29  ;;  %v17323_v29 = vld [vmem:[%s23562_s9 + $0x608] ss:$16 sps:$4 sm:$0xff]   ;;  %v21211_v50 = vpack.c.bf16 %v4210_v59, %v4202_v17  ;;  %v21236_v59 = vpack.c.bf16 %v4243_v32, %v4235_v3  ;;  %v17336_v3 = vld [vmem:[%s23562_s9 + $0x66c] ss:$16 sps:$4 sm:$0xff]  }
 0x636   : > { %9096 = vmatpush1.bf16.msra.mxu0 %v17323_v29  ;;  %v4242_v29 = vld [vmem:[%s19592_s23 + $0x7e0] sm:$0xff]  ;;  %v17339_v32 = vld [vmem:[%s23562_s9 + $0x68c] ss:$16 sps:$4 sm:$0xff]  }
 0x63a   : > { %7483 = vmatmul.mubr.bf16.gmra.mrb[176].mxu1 %v21195_v15 }
 0x63b   : > { %7492 = vmatprep.mubr.bf16.mxu1 %v21197_v25 }
 0x63c   : > { %8855 = vmatmul.mubr.bf16.gmra.mrb[32].mxu0 %v4570_v20  ;;  %v4226_v20 = vld [vmem:[%s19592_s23 + $0x760] sm:$0xff] }
 0x63d   : > { %8864 = vmatprep.mubr.bf16.mxu0 %v4579_v48  ;;  %v17328_v48 = vld [vmem:[%s23562_s9 + $0x62c] ss:$16 sps:$4 sm:$0xff]   ;;  %v21234_v17 = vpack.c.bf16 %v4226_v20, %v4218_v43  ;;  %v17334_v20 = vld [vmem:[%s23562_s9 + $0x668] ss:$16 sps:$4 sm:$0xff]  }
 0x63e   : > { %9097 = vmatprep.subr.bf16.mxu0 %v17328_v48  ;;  %v4259_v43 = vld [vmem:[%s19592_s23 + $0x868] sm:$0xff] }
 0x63f   : > { %9098 = vmatpush1.bf16.msra.mxu0 %v17326_v2  ;;  %v21260_v2 = vpack.c.bf16 %v4242_v29, %v4234_v21  ;;  %v17337_v48 = vld [vmem:[%s23562_s9 + $0x688] ss:$16 sps:$4 sm:$0xff]   ;;  %v17348_v21 = vld [vmem:[%s23561_s8 + $0x4] ss:$16 sps:$4 sm:$0xff]  }
 0x640   : > { %10088 = vmatprep.subr.bf16.mxu1 %v17348_v21  ;;  %v17357_v21 = vld [vmem:[%s23562_s9 + $0x72c] ss:$16 sps:$4 sm:$0xff]  }
 0x642   : > { %7493 = vmatmul.mubr.bf16.gmra.mrb[180].mxu1 %v21211_v50 }
 0x643   : > { %7502 = vmatprep.mubr.bf16.mxu1 %v21213_v49 }
 0x644   : > { %8865 = vmatmul.mubr.bf16.gmra.mrb[36].mxu0 %v4578_v57  ;;  %v17332_v57 = vld [vmem:[%s23562_s9 + $0x64c] ss:$16 sps:$4 sm:$0xff]  }
 0x645   : > { %8874 = vmatprep.mubr.bf16.mxu0 %v21156_v1  ;;  %v17330_v1 = vld [vmem:[%s23562_s9 + $0x648] ss:$16 sps:$4 sm:$0xff]   ;;  %9099 = vmatprep.subr.bf16.mxu0 %v17332_v57 }
 0x646   : > { %9100 = vmatpush1.bf16.msra.mxu0 %v17330_v1  ;;  %v4275_v57 = vld [vmem:[%s19592_s23 + $0x8e8] sm:$0xff] }
 0x647   : > { %9101 = vmatprep.subr.bf16.mxu0 %v17336_v3  ;;  %v17342_v1 = vld [vmem:[%s23562_s9 + $0x6ac] ss:$16 sps:$4 sm:$0xff]   ;;  %v21289_v29 = vpack.c.bf16 %v4275_v57, %v4267_v5  ;;  %v17352_v5 = vld [vmem:[%s23562_s9 + $0x708] ss:$16 sps:$4 sm:$0xff]   ;;  %v4290_v57 = vld [vmem:[%s19592_s23 + $0x960] sm:$0xff] }
 0x648   : > { %v4291_v3 = vld [vmem:[%s19592_s23 + $0x968] sm:$0xff] }
 0x64a   : > { %7503 = vmatmul.mubr.bf16.gmra.mrb[184].mxu1 %v21234_v17  ;;  %9102 = vmatpush1.bf16.msra.mxu0 %v17334_v20  ;;  %v4283_v20 = vld [vmem:[%s19592_s23 + $0x928] sm:$0xff] }
 0x64b   : > { %7512 = vmatprep.mubr.bf16.mxu1 %v21236_v59  ;;  %9103 = vmatprep.subr.bf16.mxu0 %v17339_v32  ;;  %v17349_v32 = vld [vmem:[%s23562_s9 + $0x6e8] ss:$16 sps:$4 sm:$0xff]  }
 0x64c   : > { %8875 = vmatmul.mubr.bf16.gmra.mrb[40].mxu0 %v21169_v60  ;;  %v21262_v60 = vpack.c.bf16 %v4259_v43, %v4251_v58  ;;  %v17343_v58 = vld [vmem:[%s23562_s9 + $0x6c8] ss:$16 sps:$4 sm:$0xff]   ;;  %v4274_v43 = vld [vmem:[%s19592_s23 + $0x8e0] sm:$0xff] }
 0x64d   : > { %8884 = vmatprep.mubr.bf16.mxu0 %v21171_v10  ;;  %v4250_v10 = vld [vmem:[%s19592_s23 + $0x820] sm:$0xff] }
 0x64e   : > { %9104 = vmatpush1.bf16.msra.mxu0 %v17337_v48  ;;  %v17351_v48 = vld [vmem:[%s23562_s9 + $0x6ec] ss:$16 sps:$4 sm:$0xff]  }
 0x64f   : > { %9105 = vmatprep.subr.bf16.mxu0 %v17342_v1  ;;  %v4307_v1 = vld [vmem:[%s19592_s23 + $0x9e8] sm:$0xff] }
 0x652   : > { %7513 = vmatmul.mubr.bf16.gmra.mrb[188].mxu1 %v21260_v2  ;;  %9106 = vmatpush1.bf16.msra.mxu0 %v17340_v42  ;;  %v4299_v42 = vld [vmem:[%s19592_s23 + $0x9a8] sm:$0xff] }
 0x653   : > { %7522 = vmatprep.mubr.bf16.mxu1 %v21262_v60  ;;  %9107 = vmatprep.subr.bf16.mxu0 %v17345_v23  ;;  %v17355_v23 = vld [vmem:[%s23562_s9 + $0x728] ss:$16 sps:$4 sm:$0xff]  }
 0x654   : > { %8885 = vmatmul.mubr.bf16.gmra.mrb[44].mxu0 %v21179_v0  ;;  %v21284_v0 = vpack.c.bf16 %v4258_v38, %v4250_v10  ;;  %v17354_v10 = vld [vmem:[%s23562_s9 + $0x70c] ss:$16 sps:$4 sm:$0xff]  }
 0x655   : > { %8894 = vmatprep.mubr.bf16.mxu0 %v21181_v53  ;;  %v4266_v53 = vld [vmem:[%s19592_s23 + $0x8a0] sm:$0xff] }
 0x656   : > { %9108 = vmatpush1.bf16.msra.mxu0 %v17343_v58  ;;  %v21311_v38 = vpack.c.bf16 %v4274_v43, %v4266_v53  ;;  %v17360_v58 = vld [vmem:[%s23562_s9 + $0x74c] ss:$16 sps:$4 sm:$0xff]   ;;  %v17358_v43 = vld [vmem:[%s23562_s9 + $0x748] ss:$16 sps:$4 sm:$0xff]  }
 0x657   : > { %9109 = vmatprep.subr.bf16.mxu0 %v17351_v48  ;;  %v17364_v48 = vld [vmem:[%s23562_s9 + $0x768] ss:$16 sps:$4 sm:$0xff]  }
 0x65a   : > { %7523 = vmatmul.mubr.bf16.gmra.mrb[192].mxu1 %v21284_v0  ;;  %9110 = vmatpush1.bf16.msra.mxu0 %v17349_v32  ;;  %v4323_v32 = vld [vmem:[%s19592_s23 + $0xa68] sm:$0xff] }
 0x65b   : > { %7532 = vmatprep.mubr.bf16.mxu1 %v21289_v29  ;;  %9111 = vmatprep.subr.bf16.mxu0 %v17354_v10  ;;  %v17366_v10 = vld [vmem:[%s23562_s9 + $0x76c] ss:$16 sps:$4 sm:$0xff]  }
 0x65c   : > { %8895 = vmatmul.mubr.bf16.gmra.mrb[48].mxu0 %v21195_v15  ;;  %v21313_v15 = vpack.c.bf16 %v4291_v3, %v4283_v20  ;;  %v4306_v20 = vld [vmem:[%s19592_s23 + $0x9e0] sm:$0xff]  ;;  %v4315_v3 = vld [vmem:[%s19592_s23 + $0xa28] sm:$0xff] }
 0x65d   : > { %8904 = vmatprep.mubr.bf16.mxu0 %v21197_v25  ;;  %v4282_v25 = vld [vmem:[%s19592_s23 + $0x920] sm:$0xff] }
 0x65e   : > { %9112 = vmatpush1.bf16.msra.mxu0 %v17352_v5  ;;  %v21335_v53 = vpack.c.bf16 %v4290_v57, %v4282_v25  ;;  %v17369_v5 = vld [vmem:[%s23562_s9 + $0x78c] ss:$16 sps:$4 sm:$0xff]   ;;  %v17367_v57 = vld [vmem:[%s23562_s9 + $0x788] ss:$16 sps:$4 sm:$0xff]  }
 0x65f   : > { %9113 = vmatprep.subr.bf16.mxu0 %v17357_v21  ;;  %v4339_v21 = vld [vmem:[%s19592_s23 + $0xae8] sm:$0xff] }
 0x662   : > { %7533 = vmatmul.mubr.bf16.gmra.mrb[196].mxu1 %v21311_v38  ;;  %9114 = vmatpush1.bf16.msra.mxu0 %v17355_v23  ;;  %v4331_v23 = vld [vmem:[%s19592_s23 + $0xaa8] sm:$0xff] }
 0x663   : > { %7542 = vmatprep.mubr.bf16.mxu1 %v21313_v15  ;;  %9115 = vmatprep.subr.bf16.mxu0 %v17360_v58  ;;  %v17372_v58 = vld [vmem:[%s23562_s9 + $0x7ac] ss:$16 sps:$4 sm:$0xff]  }
 0x664   : > { %8905 = vmatmul.mubr.bf16.gmra.mrb[52].mxu0 %v21211_v50  ;;  %v21337_v50 = vpack.c.bf16 %v4307_v1, %v4299_v42  ;;  %v4314_v42 = vld [vmem:[%s19592_s23 + $0xa20] sm:$0xff] }
 0x665   : > { %8914 = vmatprep.mubr.bf16.mxu0 %v21213_v49  ;;  %v4298_v49 = vld [vmem:[%s19592_s23 + $0x9a0] sm:$0xff] }
 0x666   : > { %9116 = vmatpush1.bf16.msra.mxu0 %v17358_v43  ;;  %v4658_v25 = vpack.c.bf16 %v4306_v20, %v4298_v49  ;;  %v4322_v1 = vld [vmem:[%s19592_s23 + $0xa60] sm:$0xff]  ;;  %v5263_v43 = vld [vmem:[%s23562_s9 + $0x7c8] sm:$0xff] }
 0x667   : > { %9117 = vmatprep.subr.bf16.mxu0 %v17366_v10  ;;  %v14636_v49 = vcombine.high %v5263_v43, %v5263_v43  ;;  %v14635_v20 = vcombine.low %v5263_v43, %v5263_v43  ;;  %v4338_v10 = vld [vmem:[%s19592_s23 + $0xae0] sm:$0xff] }
 0x668   : > { %v4370_v43 = vld [vmem:[%s19592_s23 + $0xbe0] sm:$0xff] }
 0x66a   : > { %7543 = vmatmul.mubr.bf16.gmra.mrb[200].mxu1 %v21335_v53  ;;  %9118 = vmatpush1.bf16.msra.mxu0 %v17364_v48  ;;  %v4330_v48 = vld [vmem:[%s19592_s23 + $0xaa0] sm:$0xff] }
 0x66b   : > { %7552 = vmatprep.mubr.bf16.mxu1 %v21337_v50  ;;  %9119 = vmatprep.subr.bf16.mxu0 %v17369_v5  ;;  %v4355_v5 = vld [vmem:[%s19592_s23 + $0xb68] sm:$0xff] }
 0x66c   : > { %8915 = vmatmul.mubr.bf16.gmra.mrb[56].mxu0 %v21234_v17  ;;  %v4667_v17 = vpack.c.bf16 %v4323_v32, %v4315_v3  ;;  %v4675_v3 = vpack.c.bf16 %v4339_v21, %v4331_v23  ;;  %v6619_v32 = vsel %vm6611_vm1, %v14635_v20, 0  ;;  %v4354_v23 = vld [vmem:[%s19592_s23 + $0xb60] sm:$0xff]  ;;  %v4363_v21 = vld [vmem:[%s19592_s23 + $0xba8] sm:$0xff] }
 0x66d   : > { %8924 = vmatprep.mubr.bf16.mxu0 %v21236_v59  ;;  %v17370_v59 = vld [vmem:[%s23562_s9 + $0x7a8] ss:$16 sps:$4 sm:$0xff]  }
 0x66e   : > { %9120 = vmatpush1.bf16.msra.mxu0 %v17367_v57  ;;  %v4674_v57 = vpack.c.bf16 %v4338_v10, %v4330_v48  ;;  %v4387_v20 = vld [vmem:[%s19592_s23 + $0xc68] sm:$0xff]  ;;  %v4386_v48 = vld [vmem:[%s19592_s23 + $0xc60] sm:$0xff] }
 0x66f   : > { %9121 = vmatprep.subr.bf16.mxu0 %v17372_v58  ;;  %v4395_v10 = vld [vmem:[%s19592_s23 + $0xca8] sm:$0xff] }
 0x672   : > { %7553 = vmatmul.mubr.bf16.gmra.mrb[204].mxu1 %v4658_v25  ;;  %9122 = vmatpush1.bf16.msra.mxu0 %v17370_v59  ;;  %v4371_v59 = vld [vmem:[%s19592_s23 + $0xbe8] sm:$0xff] }
 0x673   : > { %7562 = vmatprep.mubr.bf16.mxu1 %v4667_v17  ;;  %14670 = vmatprep.subr.msk.bf16.mxu0 %vm6611_vm1, %v14636_v49  ;;  %v4691_v58 = vpack.c.bf16 %v4371_v59, %v4363_v21  ;;  %v4379_v49 = vld [vmem:[%s19592_s23 + $0xc28] sm:$0xff] }
 0x674   : > { %8925 = vmatmul.mubr.bf16.gmra.mrb[60].mxu0 %v21260_v2  ;;  %v4666_v2 = vpack.c.bf16 %v4322_v1, %v4314_v42  ;;  %v4346_v1 = vld [vmem:[%s19592_s23 + $0xb20] sm:$0xff]  ;;  %v4419_v21 = vld [vmem:[%s19592_s23 + $0xd68] sm:$0xff] }
 0x675   : > { %8934 = vmatprep.mubr.bf16.mxu0 %v21262_v60  ;;  %v4347_v60 = vld [vmem:[%s19592_s23 + $0xb28] sm:$0xff] }
 0x676   : > { %9124 = vmatpush1.bf16.msra.mxu0 %v6619_v32  ;;  %v4683_v42 = vpack.c.bf16 %v4355_v5, %v4347_v60  ;;  %v4699_v32 = vpack.c.bf16 %v4387_v20, %v4379_v49  ;;  %v4403_v60 = vld [vmem:[%s19592_s23 + $0xce8] sm:$0xff] }
 0x677   : > { %v4707_v5 = vpack.c.bf16 %v4403_v60, %v4395_v10  ;;  %v4435_v49 = vld [vmem:[%s19592_s23 + $0xde8] sm:$0xff] }
 0x678   : > { %v4451_v10 = vld [vmem:[%s19592_s23 + $0xe68] sm:$0xff] }
 0x67a   : > { %7563 = vmatmul.mubr.bf16.gmra.mrb[208].mxu1 %v4666_v2 }
 0x67b   : > { %7572 = vmatprep.mubr.bf16.mxu1 %v4675_v3 }
 0x67c   : > { %8935 = vmatmul.mubr.bf16.gmra.mrb[64].mxu0 %v21284_v0  ;;  %v4682_v0 = vpack.c.bf16 %v4354_v23, %v4346_v1  ;;  %v4402_v1 = vld [vmem:[%s19592_s23 + $0xce0] sm:$0xff]  ;;  %v4411_v23 = vld [vmem:[%s19592_s23 + $0xd28] sm:$0xff] }
 0x67d   : > { %8944 = vmatprep.mubr.bf16.mxu0 %v21289_v29  ;;  %v4362_v29 = vld [vmem:[%s19592_s23 + $0xba0] sm:$0xff]  ;;  %v4715_v59 = vpack.c.bf16 %v4419_v21, %v4411_v23  ;;  %v4467_v23 = vld [vmem:[%s19592_s23 + $0xee8] sm:$0xff] }
 0x682   : > { %7573 = vmatmul.mubr.bf16.gmra.mrb[212].mxu1 %v4674_v57 }
 0x683   : > { %7582 = vmatprep.mubr.bf16.mxu1 %v4683_v42 }
 0x684   : > { %8945 = vmatmul.mubr.bf16.gmra.mrb[68].mxu0 %v21311_v38  ;;  %v4690_v38 = vpack.c.bf16 %v4370_v43, %v4362_v29  ;;  %v4418_v29 = vld [vmem:[%s19592_s23 + $0xd60] sm:$0xff]  ;;  %v4427_v43 = vld [vmem:[%s19592_s23 + $0xda8] sm:$0xff] }
 0x685   : > { %8954 = vmatprep.mubr.bf16.mxu0 %v21313_v15  ;;  %v4378_v15 = vld [vmem:[%s19592_s23 + $0xc20] sm:$0xff]  ;;  %v4723_v20 = vpack.c.bf16 %v4435_v49, %v4427_v43  ;;  %v4483_v43 = vld [vmem:[%s19592_s23 + $0xf68] sm:$0xff] }
 0x68a   : > { %7583 = vmatmul.mubr.bf16.gmra.mrb[216].mxu1 %v4682_v0 }
 0x68b   : > { %7592 = vmatprep.mubr.bf16.mxu1 %v4691_v58 }
 0x68c   : > { %8955 = vmatmul.mubr.bf16.gmra.mrb[72].mxu0 %v21335_v53  ;;  %v4698_v53 = vpack.c.bf16 %v4386_v48, %v4378_v15  ;;  %v4434_v15 = vld [vmem:[%s19592_s23 + $0xde0] sm:$0xff]  ;;  %v4443_v48 = vld [vmem:[%s19592_s23 + $0xe28] sm:$0xff] }
 0x68d   : > { %8964 = vmatprep.mubr.bf16.mxu0 %v21337_v50  ;;  %v4394_v50 = vld [vmem:[%s19592_s23 + $0xca0] sm:$0xff]  ;;  %v4731_v60 = vpack.c.bf16 %v4451_v10, %v4443_v48  ;;  %v4499_v48 = vld [vmem:[%s19592_s23 + $0xfe8] sm:$0xff] }
 0x692   : > { %7593 = vmatmul.mubr.bf16.gmra.mrb[220].mxu1 %v4690_v38 }
 0x693   : > { %7602 = vmatprep.mubr.bf16.mxu1 %v4699_v32 }
 0x694   : > { %8965 = vmatmul.mubr.bf16.gmra.mrb[76].mxu0 %v4658_v25  ;;  %v4706_v25 = vpack.c.bf16 %v4402_v1, %v4394_v50  ;;  %v4450_v50 = vld [vmem:[%s19592_s23 + $0xe60] sm:$0xff]  ;;  %v4459_v1 = vld [vmem:[%s19592_s23 + $0xea8] sm:$0xff] }
 0x695   : > { %8974 = vmatprep.mubr.bf16.mxu0 %v4667_v17  ;;  %v4410_v17 = vld [vmem:[%s19592_s23 + $0xd20] sm:$0xff]  ;;  %v4739_v21 = vpack.c.bf16 %v4467_v23, %v4459_v1  ;;  %v3996_v23 = vld [vmem:[%s19592_s23 + $0x30] sm:$0xff] }
 0x69a   : > { %7603 = vmatmul.mubr.bf16.gmra.mrb[224].mxu1 %v4698_v53 }
 0x69b   : > { %7612 = vmatprep.mubr.bf16.mxu1 %v4707_v5 }
 0x69c   : > { %8975 = vmatmul.mubr.bf16.gmra.mrb[80].mxu0 %v4666_v2  ;;  %v4714_v2 = vpack.c.bf16 %v4418_v29, %v4410_v17  ;;  %v4466_v17 = vld [vmem:[%s19592_s23 + $0xee0] sm:$0xff]  ;;  %v4475_v29 = vld [vmem:[%s19592_s23 + $0xf28] sm:$0xff] }
 0x69d   : > { %8984 = vmatprep.mubr.bf16.mxu0 %v4675_v3  ;;  %v4426_v3 = vld [vmem:[%s19592_s23 + $0xda0] sm:$0xff]  ;;  %v4747_v49 = vpack.c.bf16 %v4483_v43, %v4475_v29 }
 0x69e   : > { %v17346_v29 = vld [vmem:[%s23561_s8] ss:$16 sps:$4 sm:$0xff]  }
 0x6a2   : > { %7613 = vmatmul.mubr.bf16.gmra.mrb[228].mxu1 %v4706_v25 }
 0x6a3   : > { %7622 = vmatprep.mubr.bf16.mxu1 %v4715_v59 }
 0x6a4   : > { %8985 = vmatmul.mubr.bf16.gmra.mrb[84].mxu0 %v4674_v57  ;;  %v4722_v57 = vpack.c.bf16 %v4434_v15, %v4426_v3  ;;  %v4482_v3 = vld [vmem:[%s19592_s23 + $0xf60] sm:$0xff]  ;;  %v4491_v15 = vld [vmem:[%s19592_s23 + $0xfa8] sm:$0xff] }
 0x6a5   : > { %8994 = vmatprep.mubr.bf16.mxu0 %v4683_v42  ;;  %v4442_v42 = vld [vmem:[%s19592_s23 + $0xe20] sm:$0xff] }
 0x6aa   : > { %7623 = vmatmul.mubr.bf16.gmra.mrb[232].mxu1 %v4714_v2 }
 0x6ab   : > { %7632 = vmatprep.mubr.bf16.mxu1 %v4723_v20 }
 0x6ac   : > { %8995 = vmatmul.mubr.bf16.gmra.mrb[88].mxu0 %v4682_v0  ;;  %v4730_v0 = vpack.c.bf16 %v4450_v50, %v4442_v42  ;;  %v4498_v42 = vld [vmem:[%s19592_s23 + $0xfe0] sm:$0xff]  ;;  %v3997_v50 = vld [vmem:[%s19592_s23 + $0x38] sm:$0xff] }
 0x6ad   : > { %9004 = vmatprep.mubr.bf16.mxu0 %v4691_v58  ;;  %v4458_v58 = vld [vmem:[%s19592_s23 + $0xea0] sm:$0xff] }
 0x6b2   : > { %7633 = vmatmul.mubr.bf16.gmra.mrb[236].mxu1 %v4722_v57 }
 0x6b3   : > { %7642 = vmatprep.mubr.bf16.mxu1 %v4731_v60 }
 0x6b4   : > { %9005 = vmatmul.mubr.bf16.gmra.mrb[92].mxu0 %v4690_v38  ;;  %v4738_v38 = vpack.c.bf16 %v4466_v17, %v4458_v58  ;;  %v4004_v58 = vld [vmem:[%s19592_s23 + $0x70] sm:$0xff]  ;;  %v4021_v17 = vld [vmem:[%s19592_s23 + $0xf8] sm:$0xff] }
 0x6b5   : > { %9014 = vmatprep.mubr.bf16.mxu0 %v4699_v32  ;;  %v4474_v32 = vld [vmem:[%s19592_s23 + $0xf20] sm:$0xff] }
 0x6b6   : > { %v21425_v10 = vpack.c.bf16 %v4482_v3, %v4474_v32  ;;  %v17363_v32 = vld [vmem:[%s23561_s8 + $0x24] ss:$16 sps:$4 sm:$0xff]   ;;  %v17361_v3 = vld [vmem:[%s23561_s8 + $0x20] ss:$16 sps:$4 sm:$0xff]  }
 0x6ba   : > { %7643 = vmatmul.mubr.bf16.gmra.mrb[240].mxu1 %v4730_v0 }
 0x6bb   : > { %7652 = vmatprep.mubr.bf16.mxu1 %v4739_v21 }
 0x6bc   : > { %9015 = vmatmul.mubr.bf16.gmra.mrb[96].mxu0 %v4698_v53  ;;  %v21427_v53 = vpack.c.bf16 %v4499_v48, %v4491_v15  ;;  %v4029_v15 = vld [vmem:[%s19592_s23 + $0x138] sm:$0xff] }
 0x6bd   : > { %9024 = vmatprep.mubr.bf16.mxu0 %v4707_v5  ;;  %v4490_v5 = vld [vmem:[%s19592_s23 + $0xfa0] sm:$0xff]  ;;  %v4037_v48 = vld [vmem:[%s19592_s23 + $0x178] sm:$0xff] }
 0x6be   : > { %v21435_v1 = vpack.c.bf16 %v4498_v42, %v4490_v5  ;;  %v17377_v5 = vld [vmem:[%s23561_s8 + $0x44] ss:$16 sps:$4 sm:$0xff]  }
 0x6c2   : > { %7653 = vmatmul.mubr.bf16.gmra.mrb[244].mxu1 %v4738_v38 }
 0x6c3   : > { %7662 = vmatprep.mubr.bf16.mxu1 %v4747_v49 }
 0x6c4   : > { %9025 = vmatmul.mubr.bf16.gmra.mrb[100].mxu0 %v4706_v25  ;;  %v4005_v25 = vld [vmem:[%s19592_s23 + $0x78] sm:$0xff] }
 0x6c5   : > { %9034 = vmatprep.mubr.bf16.mxu0 %v4715_v59  ;;  %v21437_v59 = vpack.c.bf16 %v4005_v25, %v3997_v50  ;;  %v21471_v50 = vpack.c.bf16 %v4037_v48, %v4029_v15  ;;  %v17375_v25 = vld [vmem:[%s23561_s8 + $0x40] ss:$16 sps:$4 sm:$0xff]   ;;  %v4061_v48 = vld [vmem:[%s19592_s23 + $0x238] sm:$0xff] }
 0x6c6   : > { %v17384_v15 = vld [vmem:[%s23561_s8 + $0xa0] ss:$16 sps:$4 sm:$0xff]  }
 0x6ca   : > { %7663 = vmatmul.mubr.bf16.gmra.mrb[248].mxu1 %v21425_v10 }
 0x6cb   : > { %7672 = vmatprep.mubr.bf16.mxu1 %v21427_v53 }
 0x6cc   : > { %9035 = vmatmul.mubr.bf16.gmra.mrb[104].mxu0 %v4714_v2  ;;  %v4013_v2 = vld [vmem:[%s19592_s23 + $0xb8] sm:$0xff] }
 0x6cd   : > { %9044 = vmatprep.mubr.bf16.mxu0 %v4723_v20  ;;  %v21446_v20 = vpack.c.bf16 %v4004_v58, %v3996_v23  ;;  %v21451_v43 = vpack.c.bf16 %v4021_v17, %v4013_v2  ;;  %v4036_v23 = vld [vmem:[%s19592_s23 + $0x170] sm:$0xff]  ;;  %v4045_v2 = vld [vmem:[%s19592_s23 + $0x1b8] sm:$0xff] }
 0x6ce   : > { %v17378_v58 = vld [vmem:[%s23561_s8 + $0x60] ss:$16 sps:$4 sm:$0xff]   ;;  %v4053_v17 = vld [vmem:[%s19592_s23 + $0x1f8] sm:$0xff] }
 0x6d2   : > { %7673 = vmatmul.mubr.bf16.gmra.mrb[252].mxu1 %v21435_v1 }
 0x6d3   : > { %14638 = vmatprep.mubr.msk.bf16.mxu1 %vm6514_vm2, %v21437_v59 }
 0x6d4   : > { %9045 = vmatmul.mubr.bf16.gmra.mrb[108].mxu0 %v4722_v57  ;;  %v4012_v57 = vld [vmem:[%s19592_s23 + $0xb0] sm:$0xff] }
 0x6d5   : > { %9054 = vmatprep.mubr.bf16.mxu0 %v4731_v60  ;;  %v4020_v60 = vld [vmem:[%s19592_s23 + $0xf0] sm:$0xff] }
 0x6d6   : > { %v21469_v42 = vpack.c.bf16 %v4020_v60, %v4012_v57  ;;  %v21494_v57 = vpack.c.bf16 %v4053_v17, %v4045_v2  ;;  %v17381_v60 = vld [vmem:[%s23561_s8 + $0x80] ss:$16 sps:$4 sm:$0xff]   ;;  %v4077_v17 = vld [vmem:[%s19592_s23 + $0x2b8] sm:$0xff] }
 0x6d7   : > { %v17390_v2 = vld [vmem:[%s23561_s8 + $0xe0] ss:$16 sps:$4 sm:$0xff]  }
 0x6da   : > { %7716 = vmatmul.mubr.bf16.vlgmr.msra.gmra.mrb[128].mxu1 %v21446_v20 }
 0x6db   : > { %10089 = vmatpush1.bf16.msra.mxu1 %v17346_v29  ;;  %14639 = vmatprep.mubr.msk.bf16.mxu1 %vm6514_vm2, %v21451_v43  ;;  %v17383_v29 = vld [vmem:[%s23561_s8 + $0x84] ss:$16 sps:$4 sm:$0xff]  }
 0x6dc   : > { %9055 = vmatmul.mubr.bf16.gmra.mrb[112].mxu0 %v4730_v0  ;;  %10090 = vmatprep.subr.bf16.mxu1 %v17363_v32  ;;  %v17380_v0 = vld [vmem:[%s23561_s8 + $0x64] ss:$16 sps:$4 sm:$0xff]  }
 0x6dd   : > { %9064 = vmatprep.mubr.bf16.mxu0 %v4739_v21  ;;  %v4028_v21 = vld [vmem:[%s19592_s23 + $0x130] sm:$0xff] }
 0x6de   : > { %v21492_v32 = vpack.c.bf16 %v4036_v23, %v4028_v21  ;;  %v17392_v23 = vld [vmem:[%s23561_s8 + $0xe4] ss:$16 sps:$4 sm:$0xff]  }
 0x6df   : > { %10091 = vmatpush1.bf16.msra.mxu1 %v17361_v3  ;;  %v4052_v3 = vld [vmem:[%s19592_s23 + $0x1f0] sm:$0xff] }
 0x6e0   : > { %10092 = vmatprep.subr.bf16.mxu1 %v17377_v5  ;;  %v4069_v5 = vld [vmem:[%s19592_s23 + $0x278] sm:$0xff] }
 0x6e1   : > { %v21519_v21 = vpack.c.bf16 %v4069_v5, %v4061_v48  ;;  %v17396_v48 = vld [vmem:[%s23561_s8 + $0x120] ss:$16 sps:$4 sm:$0xff]   ;;  %v4093_v5 = vld [vmem:[%s19592_s23 + $0x338] sm:$0xff] }
 0x6e2   : > { %7726 = vmatmul.mubr.bf16.gmra.mrb[132].mxu1 %v21469_v42 }
 0x6e3   : > { %14640 = vmatprep.mubr.msk.bf16.mxu1 %vm6514_vm2, %v21471_v50  ;;  %10093 = vmatpush1.bf16.msra.mxu1 %v17375_v25  ;;  %v17389_v25 = vld [vmem:[%s23561_s8 + $0xc4] ss:$16 sps:$4 sm:$0xff]  }
 0x6e4   : > { %9065 = vmatmul.mubr.bf16.gmra.mrb[116].mxu0 %v4738_v38  ;;  %10094 = vmatprep.subr.bf16.mxu1 %v17380_v0  ;;  %v17386_v38 = vld [vmem:[%s23561_s8 + $0xa4] ss:$16 sps:$4 sm:$0xff]  }
 0x6e5   : > { %9074 = vmatprep.mubr.bf16.mxu0 %v4747_v49  ;;  %v4044_v49 = vld [vmem:[%s19592_s23 + $0x1b0] sm:$0xff] }
 0x6e6   : > { %v21517_v0 = vpack.c.bf16 %v4052_v3, %v4044_v49  ;;  %v17398_v3 = vld [vmem:[%s23561_s8 + $0x124] ss:$16 sps:$4 sm:$0xff]  }
 0x6e7   : > { %10095 = vmatpush1.bf16.msra.mxu1 %v17378_v58  ;;  %v4068_v58 = vld [vmem:[%s19592_s23 + $0x270] sm:$0xff] }
 0x6e8   : > { %10096 = vmatprep.subr.bf16.mxu1 %v17383_v29  ;;  %v4085_v29 = vld [vmem:[%s19592_s23 + $0x2f8] sm:$0xff] }
 0x6e9   : > { %v21545_v49 = vpack.c.bf16 %v4085_v29, %v4077_v17  ;;  %v4117_v17 = vld [vmem:[%s19592_s23 + $0x3f8] sm:$0xff]  ;;  %v17402_v29 = vld [vmem:[%s23561_s8 + $0x160] ss:$16 sps:$4 sm:$0xff]  }
 0x6ea   : > { %7736 = vmatmul.mubr.bf16.gmra.mrb[136].mxu1 %v21492_v32 }
 0x6eb   : > { %14641 = vmatprep.mubr.msk.bf16.mxu1 %vm6514_vm2, %v21494_v57  ;;  %10097 = vmatpush1.bf16.msra.mxu1 %v17381_v60  ;;  %v17395_v60 = vld [vmem:[%s23561_s8 + $0x104] ss:$16 sps:$4 sm:$0xff]  }
 0x6ec   : > { %9075 = vmatmul.mubr.bf16.gmra.mrb[120].mxu0 %v21425_v10  ;;  %10098 = vmatprep.subr.bf16.mxu1 %v17386_v38  ;;  %v17387_v10 = vld [vmem:[%s23561_s8 + $0xc0] ss:$16 sps:$4 sm:$0xff]  }
 0x6ed   : > { %9084 = vmatprep.mubr.bf16.mxu0 %v21427_v53  ;;  %v4060_v53 = vld [vmem:[%s19592_s23 + $0x230] sm:$0xff] }
 0x6ee   : > { %v21543_v38 = vpack.c.bf16 %v4068_v58, %v4060_v53  ;;  %v17399_v58 = vld [vmem:[%s23561_s8 + $0x140] ss:$16 sps:$4 sm:$0xff]  }
 0x6ef   : > { %10099 = vmatpush1.bf16.msra.mxu1 %v17384_v15  ;;  %v4084_v15 = vld [vmem:[%s19592_s23 + $0x2f0] sm:$0xff] }
 0x6f0   : > { %10100 = vmatprep.subr.bf16.mxu1 %v17389_v25  ;;  %v4101_v25 = vld [vmem:[%s19592_s23 + $0x378] sm:$0xff] }
 0x6f1   : > { %v4557_v53 = vpack.c.bf16 %v4101_v25, %v4093_v5  ;;  %v4124_v25 = vld [vmem:[%s19592_s23 + $0x430] sm:$0xff] }
 0x6f2   : > { %7746 = vmatmul.mubr.bf16.gmra.mrb[140].mxu1 %v21517_v0 }
 0x6f3   : > { %14642 = vmatprep.mubr.msk.bf16.mxu1 %vm6514_vm2, %v21519_v21  ;;  %10101 = vmatpush1.bf16.msra.mxu1 %v17387_v10  ;;  %v17401_v10 = vld [vmem:[%s23561_s8 + $0x144] ss:$16 sps:$4 sm:$0xff]  }
 0x6f4   : > { %9085 = vmatmul.mubr.bf16.gmra.mrb[124].mxu0 %v21435_v1  ;;  %10102 = vmatprep.subr.bf16.mxu1 %v17392_v23  ;;  %v17393_v1 = vld [vmem:[%s23561_s8 + $0x100] ss:$16 sps:$4 sm:$0xff]  }
 0x6f5   : > { %14671 = vmatprep.mubr.msk.bf16.mxu0 %vm6514_vm2, %v21437_v59  ;;  %v4076_v59 = vld [vmem:[%s19592_s23 + $0x2b0] sm:$0xff] }
 0x6f6   : > { %v4548_v23 = vpack.c.bf16 %v4084_v15, %v4076_v59  ;;  %v4116_v59 = vld [vmem:[%s19592_s23 + $0x3f0] sm:$0xff]  ;;  %v4133_v15 = vld [vmem:[%s19592_s23 + $0x478] sm:$0xff] }
 0x6f7   : > { %10103 = vmatpush1.bf16.msra.mxu1 %v17390_v2  ;;  %v4100_v2 = vld [vmem:[%s19592_s23 + $0x370] sm:$0xff] }
 0x6f8   : > { %10104 = vmatprep.subr.bf16.mxu1 %v17395_v60  ;;  %v17404_v60 = vld [vmem:[%s23561_s8 + $0x164] ss:$16 sps:$4 sm:$0xff]  }
 0x6fa   : > { %7756 = vmatmul.mubr.bf16.gmra.mrb[144].mxu1 %v21543_v38 }
 0x6fb   : > { %14643 = vmatprep.mubr.msk.bf16.mxu1 %vm6514_vm2, %v21545_v49  ;;  %10105 = vmatpush1.bf16.msra.mxu1 %v17393_v1 }
 0x6fc   : > { %9128 = vmatmul.mubr.bf16.vlgmr.msra.gmra.mrb[0].mxu0 %v21446_v20  ;;  %10106 = vmatprep.subr.bf16.mxu1 %v17398_v3  ;;  %v4092_v20 = vld [vmem:[%s19592_s23 + $0x330] sm:$0xff] }
 0x6fd   : > { %14672 = vmatprep.mubr.msk.bf16.mxu0 %vm6514_vm2, %v21451_v43  ;;  %v4109_v43 = vld [vmem:[%s19592_s23 + $0x3b8] sm:$0xff]  ;;  %v4556_v1 = vpack.c.bf16 %v4100_v2, %v4092_v20  ;;  %v17405_v20 = vld [vmem:[%s23561_s8 + $0x180] ss:$16 sps:$4 sm:$0xff]  }
 0x6fe   : > { %v4565_v3 = vpack.c.bf16 %v4117_v17, %v4109_v43  ;;  %v4148_v17 = vld [vmem:[%s19592_s23 + $0x4f0] sm:$0xff] }
 0x6ff   : > { %10107 = vmatpush1.bf16.msra.mxu1 %v17396_v48 }
 0x700   : > { %10108 = vmatprep.subr.bf16.mxu1 %v17401_v10  ;;  %v4132_v10 = vld [vmem:[%s19592_s23 + $0x470] sm:$0xff] }
 0x701   : > { %v4572_v2 = vpack.c.bf16 %v4132_v10, %v4124_v25  ;;  %v17410_v25 = vld [vmem:[%s23561_s8 + $0x1a4] ss:$16 sps:$4 sm:$0xff]  }
 0x702   : > { %7766 = vmatmul.mubr.bf16.gmra.mrb[148].mxu1 %v4548_v23 }
 0x703   : > { %14644 = vmatprep.mubr.msk.bf16.mxu1 %vm6514_vm2, %v4557_v53  ;;  %10109 = vmatpush1.bf16.msra.mxu1 %v17399_v58  ;;  %v4141_v58 = vld [vmem:[%s19592_s23 + $0x4b8] sm:$0xff] }
 0x704   : > { %9138 = vmatmul.mubr.bf16.gmra.mrb[4].mxu0 %v21469_v42  ;;  %10110 = vmatprep.subr.bf16.mxu1 %v17404_v60  ;;  %v4108_v42 = vld [vmem:[%s19592_s23 + $0x3b0] sm:$0xff] }
 0x705   : > { %14673 = vmatprep.mubr.msk.bf16.mxu0 %vm6514_vm2, %v21471_v50  ;;  %v4125_v50 = vld [vmem:[%s19592_s23 + $0x438] sm:$0xff]  ;;  %v4564_v48 = vpack.c.bf16 %v4116_v59, %v4108_v42  ;;  %v4156_v59 = vld [vmem:[%s19592_s23 + $0x530] sm:$0xff] }
 0x706   : > { %v4573_v5 = vpack.c.bf16 %v4133_v15, %v4125_v50  ;;  %v4164_v50 = vld [vmem:[%s19592_s23 + $0x570] sm:$0xff]  ;;  %v4181_v15 = vld [vmem:[%s19592_s23 + $0x5f8] sm:$0xff] }
 0x707   : > { %10111 = vmatpush1.bf16.msra.mxu1 %v17402_v29  ;;  %v4165_v29 = vld [vmem:[%s19592_s23 + $0x578] sm:$0xff]  ;;  %v21631_v10 = vpack.c.bf16 %v4164_v50, %v4156_v59  ;;  %v17413_v59 = vld [vmem:[%s23561_s8 + $0x1c4] ss:$16 sps:$4 sm:$0xff]  }
 0x70a   : > { %7776 = vmatmul.mubr.bf16.gmra.mrb[152].mxu1 %v4556_v1 }
 0x70b   : > { %14645 = vmatprep.mubr.msk.bf16.mxu1 %vm6514_vm2, %v4565_v3 }
 0x70c   : > { %9148 = vmatmul.mubr.bf16.gmra.mrb[8].mxu0 %v21492_v32  ;;  %v4149_v32 = vld [vmem:[%s19592_s23 + $0x4f8] sm:$0xff] }
 0x70d   : > { %14674 = vmatprep.mubr.msk.bf16.mxu0 %vm6514_vm2, %v21494_v57  ;;  %v17407_v57 = vld [vmem:[%s23561_s8 + $0x184] ss:$16 sps:$4 sm:$0xff]   ;;  %v4581_v43 = vpack.c.bf16 %v4149_v32, %v4141_v58  ;;  %v4189_v32 = vld [vmem:[%s19592_s23 + $0x638] sm:$0xff] }
 0x70e   : > { %10112 = vmatprep.subr.bf16.mxu1 %v17407_v57 }
 0x70f   : > { %10113 = vmatpush1.bf16.msra.mxu1 %v17405_v20  ;;  %v4197_v20 = vld [vmem:[%s19592_s23 + $0x678] sm:$0xff] }
 0x710   : > { %10114 = vmatprep.subr.bf16.mxu1 %v17410_v25  ;;  %v17414_v25 = vld [vmem:[%s23561_s8 + $0x8] ss:$16 sps:$4 sm:$0xff]  }
 0x712   : > { %7786 = vmatmul.mubr.bf16.gmra.mrb[156].mxu1 %v4564_v48 }
 0x713   : > { %14646 = vmatprep.mubr.msk.bf16.mxu1 %vm6514_vm2, %v4573_v5 }
 0x714   : > { %9158 = vmatmul.mubr.bf16.gmra.mrb[12].mxu0 %v21517_v0  ;;  %v4140_v0 = vld [vmem:[%s19592_s23 + $0x4b0] sm:$0xff] }
 0x715   : > { %14675 = vmatprep.mubr.msk.bf16.mxu0 %vm6514_vm2, %v21519_v21  ;;  %v4157_v21 = vld [vmem:[%s19592_s23 + $0x538] sm:$0xff]  ;;  %v4580_v60 = vpack.c.bf16 %v4148_v17, %v4140_v0  ;;  %v21645_v0 = vpack.c.bf16 %v4197_v20, %v4189_v32  ;;  %v4188_v17 = vld [vmem:[%s19592_s23 + $0x630] sm:$0xff] }
 0x716   : > { %v21616_v42 = vpack.c.bf16 %v4165_v29, %v4157_v21  ;;  %v4196_v21 = vld [vmem:[%s19592_s23 + $0x670] sm:$0xff]  ;;  %v4213_v29 = vld [vmem:[%s19592_s23 + $0x6f8] sm:$0xff] }
 0x717   : > { %v21661_v50 = vpack.c.bf16 %v4196_v21, %v4188_v17  ;;  %v17417_v20 = vld [vmem:[%s23561_s8 + $0x28] ss:$16 sps:$4 sm:$0xff]   ;;  %v4228_v17 = vld [vmem:[%s19592_s23 + $0x770] sm:$0xff] }
 0x718   : > { %v4237_v21 = vld [vmem:[%s19592_s23 + $0x7b8] sm:$0xff] }
 0x71a   : > { %7796 = vmatmul.mubr.bf16.gmra.mrb[160].mxu1 %v4572_v2 }
 0x71b   : > { %14647 = vmatprep.mubr.msk.bf16.mxu1 %vm6514_vm2, %v4581_v43 }
 0x71c   : > { %9168 = vmatmul.mubr.bf16.gmra.mrb[16].mxu0 %v21543_v38  ;;  %v4173_v38 = vld [vmem:[%s19592_s23 + $0x5b8] sm:$0xff] }
 0x71d   : > { %14676 = vmatprep.mubr.msk.bf16.mxu0 %vm6514_vm2, %v21545_v49  ;;  %v17408_v49 = vld [vmem:[%s23561_s8 + $0x1a0] ss:$16 sps:$4 sm:$0xff]   ;;  %v21633_v58 = vpack.c.bf16 %v4181_v15, %v4173_v38 }
 0x71e   : > { %10115 = vmatpush1.bf16.msra.mxu1 %v17408_v49  ;;  %v4212_v15 = vld [vmem:[%s19592_s23 + $0x6f0] sm:$0xff]  ;;  %v4221_v49 = vld [vmem:[%s19592_s23 + $0x738] sm:$0xff] }
 0x71f   : > { %10116 = vmatprep.subr.bf16.mxu1 %v17413_v59  ;;  %v17425_v59 = vld [vmem:[%s23561_s8 + $0x6c] ss:$16 sps:$4 sm:$0xff]  }
 0x722   : > { %7806 = vmatmul.mubr.bf16.gmra.mrb[164].mxu1 %v4580_v60 }
 0x723   : > { %14648 = vmatprep.mubr.msk.bf16.mxu1 %vm6514_vm2, %v21616_v42 }
 0x724   : > { %9178 = vmatmul.mubr.bf16.gmra.mrb[20].mxu0 %v4548_v23  ;;  %v4172_v23 = vld [vmem:[%s19592_s23 + $0x5b0] sm:$0xff] }
 0x725   : > { %14677 = vmatprep.mubr.msk.bf16.mxu0 %vm6514_vm2, %v4557_v53  ;;  %v4180_v53 = vld [vmem:[%s19592_s23 + $0x5f0] sm:$0xff] }
 0x726   : > { %v21643_v57 = vpack.c.bf16 %v4180_v53, %v4172_v23  ;;  %v17416_v23 = vld [vmem:[%s23561_s8 + $0xc] ss:$16 sps:$4 sm:$0xff]  }
 0x727   : > { %v17419_v53 = vld [vmem:[%s23561_s8 + $0x2c] ss:$16 sps:$4 sm:$0xff]   ;;  %10794 = vmatprep.subr.bf16.mxu0 %v17416_v23 }
 0x728   : > { %10795 = vmatpush1.bf16.msra.mxu0 %v17414_v25  ;;  %v4244_v25 = vld [vmem:[%s19592_s23 + $0x7f0] sm:$0xff]  ;;  %v4253_v23 = vld [vmem:[%s19592_s23 + $0x838] sm:$0xff] }
 0x729   : > { %10796 = vmatprep.subr.bf16.mxu0 %v17419_v53  ;;  %v4261_v53 = vld [vmem:[%s19592_s23 + $0x878] sm:$0xff] }
 0x72a   : > { %7816 = vmatmul.mubr.bf16.gmra.mrb[168].mxu1 %v21631_v10 }
 0x72b   : > { %14649 = vmatprep.mubr.msk.bf16.mxu1 %vm6514_vm2, %v21633_v58 }
 0x72c   : > { %9188 = vmatmul.mubr.bf16.gmra.mrb[24].mxu0 %v4556_v1  ;;  %v4205_v1 = vld [vmem:[%s19592_s23 + $0x6b8] sm:$0xff] }
 0x72d   : > { %14678 = vmatprep.mubr.msk.bf16.mxu0 %vm6514_vm2, %v4565_v3  ;;  %v17411_v3 = vld [vmem:[%s23561_s8 + $0x1c0] ss:$16 sps:$4 sm:$0xff]   ;;  %v21663_v38 = vpack.c.bf16 %v4213_v29, %v4205_v1  ;;  %10797 = vmatpush1.bf16.msra.mxu0 %v17417_v20  ;;  %v4245_v1 = vld [vmem:[%s19592_s23 + $0x7f8] sm:$0xff] }
 0x72e   : > { %10117 = vmatpush1.bf16.msra.mxu1 %v17411_v3  ;;  %v17420_v29 = vld [vmem:[%s23561_s8 + $0x48] ss:$16 sps:$4 sm:$0xff]   ;;  %v17422_v3 = vld [vmem:[%s23561_s8 + $0x4c] ss:$16 sps:$4 sm:$0xff]  }
 0x72f   : > { %10798 = vmatprep.subr.bf16.mxu0 %v17422_v3  ;;  %v17429_v20 = vld [vmem:[%s23561_s8 + $0x88] ss:$16 sps:$4 sm:$0xff]  }
 0x730   : > { %v4269_v3 = vld [vmem:[%s19592_s23 + $0x8b8] sm:$0xff] }
 0x731   : > { %10799 = vmatpush1.bf16.msra.mxu0 %v17420_v29  ;;  %v4260_v29 = vld [vmem:[%s19592_s23 + $0x870] sm:$0xff] }
 0x732   : > { %7826 = vmatmul.mubr.bf16.gmra.mrb[172].mxu1 %v21643_v57  ;;  %10800 = vmatprep.subr.bf16.mxu0 %v17425_v59  ;;  %v4277_v59 = vld [vmem:[%s19592_s23 + $0x8f8] sm:$0xff] }
 0x733   : > { %14650 = vmatprep.mubr.msk.bf16.mxu1 %vm6514_vm2, %v21645_v0 }
 0x734   : > { %9198 = vmatmul.mubr.bf16.gmra.mrb[28].mxu0 %v4564_v48  ;;  %v4204_v48 = vld [vmem:[%s19592_s23 + $0x6b0] sm:$0xff] }
 0x735   : > { %14679 = vmatprep.mubr.msk.bf16.mxu0 %vm6514_vm2, %v4573_v5  ;;  %v4229_v5 = vld [vmem:[%s19592_s23 + $0x778] sm:$0xff]  ;;  %v21682_v32 = vpack.c.bf16 %v4212_v15, %v4204_v48  ;;  %v17426_v48 = vld [vmem:[%s23561_s8 + $0x1e0] ss:$16 sps:$4 sm:$0xff]   ;;  %v17428_v15 = vld [vmem:[%s23561_s8 + $0x1e4] ss:$16 sps:$4 sm:$0xff]  }
 0x736   : > { %10118 = vmatprep.subr.bf16.mxu1 %v17428_v15  ;;  %v17437_v15 = vld [vmem:[%s23561_s8 + $0xcc] ss:$16 sps:$4 sm:$0xff]  }
 0x737   : > { %10119 = vmatpush1.bf16.msra.mxu1 %v17426_v48  ;;  %v17435_v48 = vld [vmem:[%s23561_s8 + $0xc8] ss:$16 sps:$4 sm:$0xff]  }
 0x73a   : > { %7836 = vmatmul.mubr.bf16.gmra.mrb[176].mxu1 %v21661_v50 }
 0x73b   : > { %14651 = vmatprep.mubr.msk.bf16.mxu1 %vm6514_vm2, %v21663_v38 }
 0x73c   : > { %9208 = vmatmul.mubr.bf16.gmra.mrb[32].mxu0 %v4572_v2  ;;  %v21684_v2 = vpack.c.bf16 %v4229_v5, %v4221_v49  ;;  %v21715_v49 = vpack.c.bf16 %v4245_v1, %v4237_v21  ;;  %v4236_v5 = vld [vmem:[%s19592_s23 + $0x7b0] sm:$0xff]  ;;  %v17432_v1 = vld [vmem:[%s23561_s8 + $0xa8] ss:$16 sps:$4 sm:$0xff]  }
 0x73d   : > { %14680 = vmatprep.mubr.msk.bf16.mxu0 %vm6514_vm2, %v4581_v43  ;;  %v4220_v43 = vld [vmem:[%s19592_s23 + $0x730] sm:$0xff]  ;;  %v21739_v21 = vpack.c.bf16 %v4244_v25, %v4236_v5  ;;  %v21770_v25 = vpack.c.bf16 %v4277_v59, %v4269_v3  ;;  %v17447_v3 = vld [vmem:[%s23561_s8 + $0x128] ss:$16 sps:$4 sm:$0xff]  }
 0x73e   : > { %v4292_v59 = vld [vmem:[%s19592_s23 + $0x970] sm:$0xff] }
 0x742   : > { %7846 = vmatmul.mubr.bf16.gmra.mrb[180].mxu1 %v21682_v32 }
 0x743   : > { %14652 = vmatprep.mubr.msk.bf16.mxu1 %vm6514_vm2, %v21684_v2 }
 0x744   : > { %9218 = vmatmul.mubr.bf16.gmra.mrb[36].mxu0 %v4580_v60  ;;  %v21707_v60 = vpack.c.bf16 %v4228_v17, %v4220_v43  ;;  %v17431_v43 = vld [vmem:[%s23561_s8 + $0x8c] ss:$16 sps:$4 sm:$0xff]  }
 0x745   : > { %14681 = vmatprep.mubr.msk.bf16.mxu0 %vm6514_vm2, %v21616_v42  ;;  %v17423_v42 = vld [vmem:[%s23561_s8 + $0x68] ss:$16 sps:$4 sm:$0xff]   ;;  %v17434_v17 = vld [vmem:[%s23561_s8 + $0xac] ss:$16 sps:$4 sm:$0xff]  }
 0x746   : > { %10801 = vmatpush1.bf16.msra.mxu0 %v17423_v42  ;;  %v17440_v42 = vld [vmem:[%s23561_s8 + $0xec] ss:$16 sps:$4 sm:$0xff]  }
 0x747   : > { %10802 = vmatprep.subr.bf16.mxu0 %v17431_v43  ;;  %v4293_v43 = vld [vmem:[%s19592_s23 + $0x978] sm:$0xff] }
 0x74a   : > { %7856 = vmatmul.mubr.bf16.gmra.mrb[184].mxu1 %v21707_v60  ;;  %10803 = vmatpush1.bf16.msra.mxu0 %v17429_v20  ;;  %v4285_v20 = vld [vmem:[%s19592_s23 + $0x938] sm:$0xff] }
 0x74b   : > { %14653 = vmatprep.mubr.msk.bf16.mxu1 %vm6514_vm2, %v21715_v49  ;;  %10804 = vmatprep.subr.bf16.mxu0 %v17434_v17  ;;  %v17444_v17 = vld [vmem:[%s23561_s8 + $0x108] ss:$16 sps:$4 sm:$0xff]  }
 0x74c   : > { %9228 = vmatmul.mubr.bf16.gmra.mrb[40].mxu0 %v21631_v10  ;;  %v21741_v10 = vpack.c.bf16 %v4261_v53, %v4253_v23  ;;  %v17438_v23 = vld [vmem:[%s23561_s8 + $0xe8] ss:$16 sps:$4 sm:$0xff]   ;;  %v4276_v53 = vld [vmem:[%s19592_s23 + $0x8f0] sm:$0xff] }
 0x74d   : > { %14682 = vmatprep.mubr.msk.bf16.mxu0 %vm6514_vm2, %v21633_v58  ;;  %v4252_v58 = vld [vmem:[%s19592_s23 + $0x830] sm:$0xff] }
 0x74e   : > { %10805 = vmatpush1.bf16.msra.mxu0 %v17432_v1  ;;  %v21768_v5 = vpack.c.bf16 %v4260_v29, %v4252_v58  ;;  %v17446_v1 = vld [vmem:[%s23561_s8 + $0x10c] ss:$16 sps:$4 sm:$0xff]  }
 0x74f   : > { %10806 = vmatprep.subr.bf16.mxu0 %v17437_v15  ;;  %v17449_v58 = vld [vmem:[%s23561_s8 + $0x12c] ss:$16 sps:$4 sm:$0xff]  }
 0x750   : > { %v4309_v15 = vld [vmem:[%s19592_s23 + $0x9f8] sm:$0xff] }
 0x752   : > { %7866 = vmatmul.mubr.bf16.gmra.mrb[188].mxu1 %v21739_v21  ;;  %10807 = vmatpush1.bf16.msra.mxu0 %v17435_v48  ;;  %v4301_v48 = vld [vmem:[%s19592_s23 + $0x9b8] sm:$0xff] }
 0x753   : > { %14654 = vmatprep.mubr.msk.bf16.mxu1 %vm6514_vm2, %v21741_v10  ;;  %10808 = vmatprep.subr.bf16.mxu0 %v17440_v42  ;;  %v17450_v42 = vld [vmem:[%s23561_s8 + $0x148] ss:$16 sps:$4 sm:$0xff]  }
 0x754   : > { %9238 = vmatmul.mubr.bf16.gmra.mrb[44].mxu0 %v21643_v57  ;;  %v17443_v57 = vld [vmem:[%s23561_s8 + $0x204] ss:$16 sps:$4 sm:$0xff]  }
 0x755   : > { %14683 = vmatprep.mubr.msk.bf16.mxu0 %vm6514_vm2, %v21645_v0  ;;  %10441 = vmatprep.subr.bf16.mxu1 %v17443_v57  ;;  %v4268_v0 = vld [vmem:[%s19592_s23 + $0x8b0] sm:$0xff]  ;;  %v17452_v57 = vld [vmem:[%s23561_s8 + $0x14c] ss:$16 sps:$4 sm:$0xff]  }
 0x756   : > { %10809 = vmatpush1.bf16.msra.mxu0 %v17438_v23  ;;  %v21794_v29 = vpack.c.bf16 %v4276_v53, %v4268_v0  ;;  %v17455_v23 = vld [vmem:[%s23561_s8 + $0x16c] ss:$16 sps:$4 sm:$0xff]   ;;  %v17453_v53 = vld [vmem:[%s23561_s8 + $0x168] ss:$16 sps:$4 sm:$0xff]  }
 0x757   : > { %10810 = vmatprep.subr.bf16.mxu0 %v17446_v1  ;;  %v17459_v1 = vld [vmem:[%s23561_s8 + $0x188] ss:$16 sps:$4 sm:$0xff]  }
 0x75a   : > { %7876 = vmatmul.mubr.bf16.gmra.mrb[192].mxu1 %v21768_v5  ;;  %10811 = vmatpush1.bf16.msra.mxu0 %v17444_v17  ;;  %v4325_v17 = vld [vmem:[%s19592_s23 + $0xa78] sm:$0xff] }
 0x75b   : > { %14655 = vmatprep.mubr.msk.bf16.mxu1 %vm6514_vm2, %v21770_v25  ;;  %10812 = vmatprep.subr.bf16.mxu0 %v17449_v58  ;;  %v17461_v58 = vld [vmem:[%s23561_s8 + $0x18c] ss:$16 sps:$4 sm:$0xff]  }
 0x75c   : > { %9248 = vmatmul.mubr.bf16.gmra.mrb[48].mxu0 %v21661_v50  ;;  %v21796_v50 = vpack.c.bf16 %v4293_v43, %v4285_v20  ;;  %v4308_v20 = vld [vmem:[%s19592_s23 + $0x9f0] sm:$0xff]  ;;  %v4317_v43 = vld [vmem:[%s19592_s23 + $0xa38] sm:$0xff] }
 0x75d   : > { %14684 = vmatprep.mubr.msk.bf16.mxu0 %vm6514_vm2, %v21663_v38  ;;  %v4284_v38 = vld [vmem:[%s19592_s23 + $0x930] sm:$0xff] }
 0x75e   : > { %10813 = vmatpush1.bf16.msra.mxu0 %v17447_v3  ;;  %v21820_v0 = vpack.c.bf16 %v4292_v59, %v4284_v38  ;;  %v17464_v3 = vld [vmem:[%s23561_s8 + $0x1ac] ss:$16 sps:$4 sm:$0xff]   ;;  %v17462_v59 = vld [vmem:[%s23561_s8 + $0x1a8] ss:$16 sps:$4 sm:$0xff]  }
 0x75f   : > { %10814 = vmatprep.subr.bf16.mxu0 %v17452_v57  ;;  %v17465_v57 = vld [vmem:[%s23561_s8 + $0x1c8] ss:$16 sps:$4 sm:$0xff]  }
 0x762   : > { %7886 = vmatmul.mubr.bf16.gmra.mrb[196].mxu1 %v21794_v29  ;;  %10815 = vmatpush1.bf16.msra.mxu0 %v17450_v42  ;;  %v4333_v42 = vld [vmem:[%s19592_s23 + $0xab8] sm:$0xff] }
 0x763   : > { %14656 = vmatprep.mubr.msk.bf16.mxu1 %vm6514_vm2, %v21796_v50  ;;  %10816 = vmatprep.subr.bf16.mxu0 %v17455_v23  ;;  %v17467_v23 = vld [vmem:[%s23561_s8 + $0x1cc] ss:$16 sps:$4 sm:$0xff]  }
 0x764   : > { %9258 = vmatmul.mubr.bf16.gmra.mrb[52].mxu0 %v21682_v32  ;;  %v21822_v32 = vpack.c.bf16 %v4309_v15, %v4301_v48  ;;  %v4316_v48 = vld [vmem:[%s19592_s23 + $0xa30] sm:$0xff] }
 0x765   : > { %14685 = vmatprep.mubr.msk.bf16.mxu0 %vm6514_vm2, %v21684_v2  ;;  %v4300_v2 = vld [vmem:[%s19592_s23 + $0x9b0] sm:$0xff] }
 0x766   : > { %10817 = vmatpush1.bf16.msra.mxu0 %v17453_v53  ;;  %v4660_v38 = vpack.c.bf16 %v4308_v20, %v4300_v2  ;;  %v4324_v15 = vld [vmem:[%s19592_s23 + $0xa70] sm:$0xff]  ;;  %v17470_v53 = vld [vmem:[%s23561_s8 + $0x1ec] ss:$16 sps:$4 sm:$0xff]   ;;  %v17468_v20 = vld [vmem:[%s23561_s8 + $0x1e8] ss:$16 sps:$4 sm:$0xff]  }
 0x767   : > { %10818 = vmatprep.subr.bf16.mxu0 %v17461_v58  ;;  %v4668_v2 = vpack.c.bf16 %v4324_v15, %v4316_v48  ;;  %v4356_v48 = vld [vmem:[%s19592_s23 + $0xb70] sm:$0xff]  ;;  %v4365_v15 = vld [vmem:[%s19592_s23 + $0xbb8] sm:$0xff] }
 0x76a   : > { %7896 = vmatmul.mubr.bf16.gmra.mrb[200].mxu1 %v21820_v0  ;;  %10819 = vmatpush1.bf16.msra.mxu0 %v17459_v1  ;;  %v4357_v1 = vld [vmem:[%s19592_s23 + $0xb78] sm:$0xff] }
 0x76b   : > { %14657 = vmatprep.mubr.msk.bf16.mxu1 %vm6514_vm2, %v21822_v32  ;;  %10820 = vmatprep.subr.bf16.mxu0 %v17464_v3 }
 0x76c   : > { %9268 = vmatmul.mubr.bf16.gmra.mrb[56].mxu0 %v21707_v60  ;;  %v4669_v60 = vpack.c.bf16 %v4325_v17, %v4317_v43  ;;  %v4340_v43 = vld [vmem:[%s19592_s23 + $0xaf0] sm:$0xff]  ;;  %v4349_v17 = vld [vmem:[%s19592_s23 + $0xb38] sm:$0xff] }
 0x76d   : > { %14686 = vmatprep.mubr.msk.bf16.mxu0 %vm6514_vm2, %v21715_v49  ;;  %v4341_v49 = vld [vmem:[%s19592_s23 + $0xaf8] sm:$0xff]  ;;  %v4685_v3 = vpack.c.bf16 %v4357_v1, %v4349_v17 }
 0x76e   : > { %10821 = vmatpush1.bf16.msra.mxu0 %v17462_v59  ;;  %v4348_v59 = vld [vmem:[%s19592_s23 + $0xb30] sm:$0xff]  ;;  %v4405_v17 = vld [vmem:[%s19592_s23 + $0xcf8] sm:$0xff] }
 0x76f   : > { %10822 = vmatprep.subr.bf16.mxu0 %v17467_v23  ;;  %v4381_v23 = vld [vmem:[%s19592_s23 + $0xc38] sm:$0xff] }
 0x772   : > { %7906 = vmatmul.mubr.bf16.gmra.mrb[204].mxu1 %v4660_v38  ;;  %10823 = vmatpush1.bf16.msra.mxu0 %v17465_v57  ;;  %v4372_v57 = vld [vmem:[%s19592_s23 + $0xbf0] sm:$0xff] }
 0x773   : > { %14658 = vmatprep.mubr.msk.bf16.mxu1 %vm6514_vm2, %v4669_v60  ;;  %10824 = vmatprep.subr.bf16.mxu0 %v17470_v53 }
 0x774   : > { %9278 = vmatmul.mubr.bf16.gmra.mrb[60].mxu0 %v21739_v21  ;;  %v4677_v21 = vpack.c.bf16 %v4341_v49, %v4333_v42  ;;  %v4364_v49 = vld [vmem:[%s19592_s23 + $0xbb0] sm:$0xff] }
 0x775   : > { %14687 = vmatprep.mubr.msk.bf16.mxu0 %vm6514_vm2, %v21741_v10  ;;  %v4332_v10 = vld [vmem:[%s19592_s23 + $0xab0] sm:$0xff] }
 0x776   : > { %10825 = vmatpush1.bf16.msra.mxu0 %v17468_v20  ;;  %v4676_v58 = vpack.c.bf16 %v4340_v43, %v4332_v10  ;;  %v4380_v20 = vld [vmem:[%s19592_s23 + $0xc30] sm:$0xff]  ;;  %v4397_v43 = vld [vmem:[%s19592_s23 + $0xcb8] sm:$0xff] }
 0x777   : > { %v4388_v10 = vld [vmem:[%s19592_s23 + $0xc70] sm:$0xff]  ;;  %v4709_v1 = vpack.c.bf16 %v4405_v17, %v4397_v43  ;;  %v4453_v43 = vld [vmem:[%s19592_s23 + $0xe78] sm:$0xff] }
 0x77a   : > { %7916 = vmatmul.mubr.bf16.gmra.mrb[208].mxu1 %v4668_v2 }
 0x77b   : > { %14659 = vmatprep.mubr.msk.bf16.mxu1 %vm6514_vm2, %v4677_v21 }
 0x77c   : > { %9288 = vmatmul.mubr.bf16.gmra.mrb[64].mxu0 %v21768_v5  ;;  %v4373_v5 = vld [vmem:[%s19592_s23 + $0xbf8] sm:$0xff] }
 0x77d   : > { %14688 = vmatprep.mubr.msk.bf16.mxu0 %vm6514_vm2, %v21770_v25  ;;  %v4684_v25 = vpack.c.bf16 %v4356_v48, %v4348_v59  ;;  %v4693_v42 = vpack.c.bf16 %v4373_v5, %v4365_v15  ;;  %v4404_v59 = vld [vmem:[%s19592_s23 + $0xcf0] sm:$0xff]  ;;  %v4413_v48 = vld [vmem:[%s19592_s23 + $0xd38] sm:$0xff] }
 0x77e   : > { %v4421_v15 = vld [vmem:[%s19592_s23 + $0xd78] sm:$0xff] }
 0x77f   : > { %v4717_v5 = vpack.c.bf16 %v4421_v15, %v4413_v48  ;;  %v4469_v48 = vld [vmem:[%s19592_s23 + $0xef8] sm:$0xff] }
 0x782   : > { %7926 = vmatmul.mubr.bf16.gmra.mrb[212].mxu1 %v4676_v58 }
 0x783   : > { %14660 = vmatprep.mubr.msk.bf16.mxu1 %vm6514_vm2, %v4685_v3 }
 0x784   : > { %9298 = vmatmul.mubr.bf16.gmra.mrb[68].mxu0 %v21794_v29  ;;  %v4389_v29 = vld [vmem:[%s19592_s23 + $0xc78] sm:$0xff] }
 0x785   : > { %14689 = vmatprep.mubr.msk.bf16.mxu0 %vm6514_vm2, %v21796_v50  ;;  %v4692_v50 = vpack.c.bf16 %v4372_v57, %v4364_v49  ;;  %v4701_v53 = vpack.c.bf16 %v4389_v29, %v4381_v23  ;;  %v4420_v49 = vld [vmem:[%s19592_s23 + $0xd70] sm:$0xff]  ;;  %v4429_v57 = vld [vmem:[%s19592_s23 + $0xdb8] sm:$0xff] }
 0x786   : > { %v4437_v23 = vld [vmem:[%s19592_s23 + $0xdf8] sm:$0xff] }
 0x787   : > { %v4725_v29 = vpack.c.bf16 %v4437_v23, %v4429_v57  ;;  %v4485_v57 = vld [vmem:[%s19592_s23 + $0xf78] sm:$0xff] }
 0x78a   : > { %7936 = vmatmul.mubr.bf16.gmra.mrb[216].mxu1 %v4684_v25 }
 0x78b   : > { %14661 = vmatprep.mubr.msk.bf16.mxu1 %vm6514_vm2, %v4693_v42 }
 0x78c   : > { %9308 = vmatmul.mubr.bf16.gmra.mrb[72].mxu0 %v21820_v0  ;;  %v4700_v0 = vpack.c.bf16 %v4388_v10, %v4380_v20  ;;  %v4436_v20 = vld [vmem:[%s19592_s23 + $0xdf0] sm:$0xff]  ;;  %v4445_v10 = vld [vmem:[%s19592_s23 + $0xe38] sm:$0xff] }
 0x78d   : > { %14690 = vmatprep.mubr.msk.bf16.mxu0 %vm6514_vm2, %v21822_v32  ;;  %v4396_v32 = vld [vmem:[%s19592_s23 + $0xcb0] sm:$0xff]  ;;  %v4733_v17 = vpack.c.bf16 %v4453_v43, %v4445_v10  ;;  %v4501_v10 = vld [vmem:[%s19592_s23 + $0xff8] sm:$0xff] }
 0x792   : > { %7946 = vmatmul.mubr.bf16.gmra.mrb[220].mxu1 %v4692_v50 }
 0x793   : > { %14662 = vmatprep.mubr.msk.bf16.mxu1 %vm6514_vm2, %v4701_v53 }
 0x794   : > { %9318 = vmatmul.mubr.bf16.gmra.mrb[76].mxu0 %v4660_v38  ;;  %v4708_v38 = vpack.c.bf16 %v4404_v59, %v4396_v32  ;;  %v4452_v32 = vld [vmem:[%s19592_s23 + $0xe70] sm:$0xff]  ;;  %v4461_v59 = vld [vmem:[%s19592_s23 + $0xeb8] sm:$0xff] }
 0x795   : > { %14691 = vmatprep.mubr.msk.bf16.mxu0 %vm6514_vm2, %v4669_v60  ;;  %v4412_v60 = vld [vmem:[%s19592_s23 + $0xd30] sm:$0xff]  ;;  %v4741_v15 = vpack.c.bf16 %v4469_v48, %v4461_v59  ;;  %v23779_v59 = vld [vmem:[#allocation7_spill] sm:$0xff]  ;;  %v23780_v48 = vld [vmem:[#allocation6_spill] sm:$0xff] }
 0x79a   : > { %7956 = vmatmul.mubr.bf16.gmra.mrb[224].mxu1 %v4700_v0 }
 0x79b   : > { %14663 = vmatprep.mubr.msk.bf16.mxu1 %vm6514_vm2, %v4709_v1 }
 0x79c   : > { %9328 = vmatmul.mubr.bf16.gmra.mrb[80].mxu0 %v4668_v2  ;;  %v4716_v2 = vpack.c.bf16 %v4420_v49, %v4412_v60  ;;  %v4468_v60 = vld [vmem:[%s19592_s23 + $0xef0] sm:$0xff]  ;;  %v4477_v49 = vld [vmem:[%s19592_s23 + $0xf38] sm:$0xff] }
 0x79d   : > { %14692 = vmatprep.mubr.msk.bf16.mxu0 %vm6514_vm2, %v4677_v21  ;;  %v4428_v21 = vld [vmem:[%s19592_s23 + $0xdb0] sm:$0xff]  ;;  %v4749_v23 = vpack.c.bf16 %v4485_v57, %v4477_v49 }
 0x79e   : > { %v17474_v49 = vld [vmem:[%s23561_s8 + $0x260] ss:$16 sps:$4 sm:$0xff]  }
 0x79f   : > { %v17477_v57 = vld [vmem:[%s23561_s8 + $0x280] ss:$16 sps:$4 sm:$0xff]  }
 0x7a2   : > { %7966 = vmatmul.mubr.bf16.gmra.mrb[228].mxu1 %v4708_v38 }
 0x7a3   : > { %14664 = vmatprep.mubr.msk.bf16.mxu1 %vm6514_vm2, %v4717_v5 }
 0x7a4   : > { %9338 = vmatmul.mubr.bf16.gmra.mrb[84].mxu0 %v4676_v58  ;;  %v4724_v58 = vpack.c.bf16 %v4436_v20, %v4428_v21  ;;  %v4484_v21 = vld [vmem:[%s19592_s23 + $0xf70] sm:$0xff]  ;;  %v4493_v20 = vld [vmem:[%s19592_s23 + $0xfb8] sm:$0xff] }
 0x7a5   : > { %14693 = vmatprep.mubr.msk.bf16.mxu0 %vm6514_vm2, %v4685_v3  ;;  %v4444_v3 = vld [vmem:[%s19592_s23 + $0xe30] sm:$0xff] }
 0x7aa   : > { %7976 = vmatmul.mubr.bf16.gmra.mrb[232].mxu1 %v4716_v2 }
 0x7ab   : > { %14665 = vmatprep.mubr.msk.bf16.mxu1 %vm6514_vm2, %v4725_v29 }
 0x7ac   : > { %9348 = vmatmul.mubr.bf16.gmra.mrb[88].mxu0 %v4684_v25  ;;  %v4732_v25 = vpack.c.bf16 %v4452_v32, %v4444_v3  ;;  %v4492_v3 = vld [vmem:[%s19592_s23 + $0xfb0] sm:$0xff] }
 0x7ad   : > { %14694 = vmatprep.mubr.msk.bf16.mxu0 %vm6514_vm2, %v4693_v42  ;;  %v4460_v42 = vld [vmem:[%s19592_s23 + $0xeb0] sm:$0xff] }
 0x7b2   : > { %7986 = vmatmul.mubr.bf16.gmra.mrb[236].mxu1 %v4724_v58 }
 0x7b3   : > { %14666 = vmatprep.mubr.msk.bf16.mxu1 %vm6514_vm2, %v4733_v17 }
 0x7b4   : > { %9358 = vmatmul.mubr.bf16.gmra.mrb[92].mxu0 %v4692_v50  ;;  %v4740_v50 = vpack.c.bf16 %v4468_v60, %v4460_v42  ;;  %v17476_v42 = vld [vmem:[%s23561_s8 + $0x264] ss:$16 sps:$4 sm:$0xff]  }
 0x7b5   : > { %14695 = vmatprep.mubr.msk.bf16.mxu0 %vm6514_vm2, %v4701_v53  ;;  %v4476_v53 = vld [vmem:[%s19592_s23 + $0xf30] sm:$0xff] }
 0x7b6   : > { %v4748_v43 = vpack.c.bf16 %v4484_v21, %v4476_v53  ;;  %v23782_v60 = vld [vmem:[#allocation8_spill] sm:$0xff]  ;;  %v23784_v21 = vld [vmem:[#allocation10_spill] sm:$0xff] }
 0x7b7   : > { %v17482_v53 = vld [vmem:[%s23561_s8 + $0x2a4] ss:$16 sps:$4 sm:$0xff]  }
 0x7ba   : > { %7996 = vmatmul.mubr.bf16.gmra.mrb[240].mxu1 %v4732_v25 }
 0x7bb   : > { %14667 = vmatprep.mubr.msk.bf16.mxu1 %vm6514_vm2, %v4741_v15 }
 0x7bc   : > { %9368 = vmatmul.mubr.bf16.gmra.mrb[96].mxu0 %v4700_v0  ;;  %v4757_v0 = vpack.c.bf16 %v4501_v10, %v4493_v20  ;;  %v17480_v20 = vld [vmem:[%s23561_s8 + $0x2a0] ss:$16 sps:$4 sm:$0xff]  }
 0x7bd   : > { %14696 = vmatprep.mubr.msk.bf16.mxu0 %vm6514_vm2, %v4709_v1  ;;  %v4500_v1 = vld [vmem:[%s19592_s23 + $0xff0] sm:$0xff] }
 0x7be   : > { %v4756_v32 = vpack.c.bf16 %v4500_v1, %v4492_v3  ;;  %v17483_v10 = vld [vmem:[%s23561_s8 + $0x2c0] ss:$16 sps:$4 sm:$0xff]   ;;  %v17488_v3 = vld [vmem:[%s23561_s8 + $0x2e4] ss:$16 sps:$4 sm:$0xff]  }
 0x7bf   : > { %v23786_v1 = vld [vmem:[#allocation12_spill] sm:$0xff] }
 0x7c2   : > { %8006 = vmatmul.mubr.bf16.gmra.mrb[244].mxu1 %v4740_v50 }
 0x7c3   : > { %14668 = vmatprep.mubr.msk.bf16.mxu1 %vm6514_vm2, %v4749_v23 }
 0x7c4   : > { %9378 = vmatmul.mubr.bf16.gmra.mrb[100].mxu0 %v4708_v38  ;;  %v17441_v38 = vld [vmem:[%s23561_s8 + $0x200] ss:$16 sps:$4 sm:$0xff]  }
 0x7c5   : > { %14697 = vmatprep.mubr.msk.bf16.mxu0 %vm6514_vm2, %v4717_v5  ;;  %v17458_v5 = vld [vmem:[%s23561_s8 + $0x224] ss:$16 sps:$4 sm:$0xff]  }
 0x7ca   : > { %8016 = vmatmul.mubr.bf16.gmra.mrb[248].mxu1 %v4748_v43 }
 0x7cb   : > { %14669 = vmatprep.mubr.msk.bf16.mxu1 %vm6514_vm2, %v4757_v0 }
 0x7cc   : > { %9388 = vmatmul.mubr.bf16.gmra.mrb[104].mxu0 %v4716_v2  ;;  %v23781_v2 = vld [vmem:[#allocation9_spill] sm:$0xff] }
 0x7cd   : > { %14698 = vmatprep.mubr.msk.bf16.mxu0 %vm6514_vm2, %v4725_v29  ;;  %v17456_v29 = vld [vmem:[%s23561_s8 + $0x220] ss:$16 sps:$4 sm:$0xff]  }
 0x7d2   : > { %8026 = vmatmul.mubr.bf16.gmra.mrb[252].mxu1 %v4756_v32 }
 0x7d3   : > { %10120 = vmatprep.mubr.bf16.mxu1 %v23779_v59 }
 0x7d4   : > { %9398 = vmatmul.mubr.bf16.gmra.mrb[108].mxu0 %v4724_v58  ;;  %v17473_v58 = vld [vmem:[%s23561_s8 + $0x244] ss:$16 sps:$4 sm:$0xff]  }
 0x7d5   : > { %14699 = vmatprep.mubr.msk.bf16.mxu0 %vm6514_vm2, %v4733_v17  ;;  %v17471_v17 = vld [vmem:[%s23561_s8 + $0x240] ss:$16 sps:$4 sm:$0xff]  }
 0x7da   : > { %10121 = vmatmul.mubr.bf16.vlgmr.msra.gmra.mrb[128].mxu1 %v23780_v48 }
 0x7db   : > { %10442 = vmatpush1.bf16.msra.mxu1 %v17441_v38  ;;  %10130 = vmatprep.mubr.bf16.mxu1 %v23781_v2  ;;  %v17486_v38 = vld [vmem:[%s23561_s8 + $0x2e0] ss:$16 sps:$4 sm:$0xff]  }
 0x7dc   : > { %9408 = vmatmul.mubr.bf16.gmra.mrb[112].mxu0 %v4732_v25  ;;  %10443 = vmatprep.subr.bf16.mxu1 %v17458_v5  ;;  %v23783_v25 = vld [vmem:[#allocation11_spill] sm:$0xff]  ;;  %v17489_v5 = vld [vmem:[%s23561_s8 + $0x300] ss:$16 sps:$4 sm:$0xff]  }
 0x7dd   : > { %14700 = vmatprep.mubr.msk.bf16.mxu0 %vm6514_vm2, %v4741_v15  ;;  %v17479_v15 = vld [vmem:[%s23561_s8 + $0x284] ss:$16 sps:$4 sm:$0xff]  }
 0x7df   : > { %10444 = vmatpush1.bf16.msra.mxu1 %v17456_v29  ;;  %v17494_v29 = vld [vmem:[%s23561_s8 + $0x324] ss:$16 sps:$4 sm:$0xff]  }
 0x7e0   : > { %10445 = vmatprep.subr.bf16.mxu1 %v17473_v58  ;;  %v23788_v58 = vld [vmem:[#allocation15_spill] sm:$0xff] }
 0x7e2   : > { %10131 = vmatmul.mubr.bf16.gmra.mrb[132].mxu1 %v23782_v60 }
 0x7e3   : > { %10140 = vmatprep.mubr.bf16.mxu1 %v23783_v25  ;;  %10446 = vmatpush1.bf16.msra.mxu1 %v17471_v17  ;;  %v17492_v17 = vld [vmem:[%s23561_s8 + $0x320] ss:$16 sps:$4 sm:$0xff]  }
 0x7e4   : > { %9418 = vmatmul.mubr.bf16.gmra.mrb[116].mxu0 %v4740_v50  ;;  %10447 = vmatprep.subr.bf16.mxu1 %v17476_v42  ;;  %v23785_v50 = vld [vmem:[#allocation13_spill] sm:$0xff]  ;;  %v17495_v42 = vld [vmem:[%s23561_s8 + $0x340] ss:$16 sps:$4 sm:$0xff]  }
 0x7e5   : > { %14701 = vmatprep.mubr.msk.bf16.mxu0 %vm6514_vm2, %v4749_v23  ;;  %v17485_v23 = vld [vmem:[%s23561_s8 + $0x2c4] ss:$16 sps:$4 sm:$0xff]  }
 0x7e7   : > { %10448 = vmatpush1.bf16.msra.mxu1 %v17474_v49  ;;  %v23790_v49 = vld [vmem:[#allocation18_spill] sm:$0xff] }
 0x7e8   : > { %10449 = vmatprep.subr.bf16.mxu1 %v17479_v15  ;;  %v23791_v15 = vld [vmem:[#allocation23_spill] sm:$0xff] }
 0x7ea   : > { %10141 = vmatmul.mubr.bf16.gmra.mrb[136].mxu1 %v23784_v21 }
 0x7eb   : > { %10150 = vmatprep.mubr.bf16.mxu1 %v23785_v50  ;;  %10450 = vmatpush1.bf16.msra.mxu1 %v17477_v57  ;;  %v23792_v57 = vld [vmem:[#allocation22_spill] sm:$0xff] }
 0x7ec   : > { %9428 = vmatmul.mubr.bf16.gmra.mrb[120].mxu0 %v4748_v43  ;;  %10451 = vmatprep.subr.bf16.mxu1 %v17482_v53  ;;  %v23787_v43 = vld [vmem:[#allocation16_spill] sm:$0xff] }
 0x7ed   : > { %14702 = vmatprep.mubr.msk.bf16.mxu0 %vm6514_vm2, %v4757_v0  ;;  %v17491_v0 = vld [vmem:[%s23561_s8 + $0x304] ss:$16 sps:$4 sm:$0xff]   ;;  %v17504_v53 = vld [vmem:[%s23561_s8 + $0x3a0] ss:$16 sps:$4 sm:$0xff]  }
 0x7ef   : > { %10452 = vmatpush1.bf16.msra.mxu1 %v17480_v20  ;;  %v17509_v20 = vld [vmem:[%s23561_s8 + $0x3c4] ss:$16 sps:$4 sm:$0xff]  }
 0x7f0   : > { %10453 = vmatprep.subr.bf16.mxu1 %v17485_v23  ;;  %v17518_v23 = vld [vmem:[%s23561_s8 + $0x24c] ss:$16 sps:$4 sm:$0xff]  }
 0x7f2   : > { %10151 = vmatmul.mubr.bf16.gmra.mrb[140].mxu1 %v23786_v1 }
 0x7f3   : > { %10160 = vmatprep.mubr.bf16.mxu1 %v23787_v43  ;;  %10454 = vmatpush1.bf16.msra.mxu1 %v17483_v10  ;;  %v17521_v10 = vld [vmem:[%s23561_s8 + $0x26c] ss:$16 sps:$4 sm:$0xff]  }
 0x7f4   : > { %9438 = vmatmul.mubr.bf16.gmra.mrb[124].mxu0 %v4756_v32  ;;  %10455 = vmatprep.subr.bf16.mxu1 %v17488_v3  ;;  %v23789_v32 = vld [vmem:[#allocation19_spill] sm:$0xff]  ;;  %v17522_v3 = vld [vmem:[%s23561_s8 + $0x3e0] ss:$16 sps:$4 sm:$0xff]  }
 0x7f5   : > { %10826 = vmatprep.mubr.bf16.mxu0 %v23779_v59  ;;  %v17497_v59 = vld [vmem:[%s23561_s8 + $0x344] ss:$16 sps:$4 sm:$0xff]  }
 0x7f7   : > { %10456 = vmatpush1.bf16.msra.mxu1 %v17486_v38  ;;  %v17530_v38 = vld [vmem:[%s23561_s8 + $0x2ac] ss:$16 sps:$4 sm:$0xff]  }
 0x7f8   : > { %10457 = vmatprep.subr.bf16.mxu1 %v17491_v0  ;;  %v17533_v0 = vld [vmem:[%s23561_s8 + $0x2cc] ss:$16 sps:$4 sm:$0xff]  }
 0x7fa   : > { %10161 = vmatmul.mubr.bf16.gmra.mrb[144].mxu1 %v23788_v58 }
 0x7fb   : > { %10170 = vmatprep.mubr.bf16.mxu1 %v23789_v32  ;;  %10458 = vmatpush1.bf16.msra.mxu1 %v17489_v5  ;;  %v17536_v5 = vld [vmem:[%s23561_s8 + $0x2ec] ss:$16 sps:$4 sm:$0xff]  }
 0x7fc   : > { %10827 = vmatmul.mubr.bf16.vlgmr.msra.gmra.mrb[0].mxu0 %v23780_v48  ;;  %10459 = vmatprep.subr.bf16.mxu1 %v17494_v29  ;;  %v17498_v48 = vld [vmem:[%s23561_s8 + $0x360] ss:$16 sps:$4 sm:$0xff]   ;;  %v17539_v29 = vld [vmem:[%s23564_s11 + $0x4] ss:$8 sps:$4 sm:$0xff]  }
 0x7fd   : > { %10836 = vmatprep.mubr.bf16.mxu0 %v23781_v2  ;;  %v17500_v2 = vld [vmem:[%s23561_s8 + $0x364] ss:$16 sps:$4 sm:$0xff]  }
 0x7ff   : > { %10460 = vmatpush1.bf16.msra.mxu1 %v17492_v17  ;;  %v17548_v17 = vld [vmem:[%s23561_s8 + $0x34c] ss:$16 sps:$4 sm:$0xff]  }
 0x800   : > { %10461 = vmatprep.subr.bf16.mxu1 %v17497_v59  ;;  %v17551_v59 = vld [vmem:[%s23561_s8 + $0x36c] ss:$16 sps:$4 sm:$0xff]  }
 0x802   : > { %10171 = vmatmul.mubr.bf16.gmra.mrb[148].mxu1 %v23790_v49 }
 0x803   : > { %10180 = vmatprep.mubr.bf16.mxu1 %v23791_v15  ;;  %10462 = vmatpush1.bf16.msra.mxu1 %v17495_v42  ;;  %v17557_v42 = vld [vmem:[%s23561_s8 + $0x38c] ss:$16 sps:$4 sm:$0xff]  }
 0x804   : > { %10837 = vmatmul.mubr.bf16.gmra.mrb[4].mxu0 %v23782_v60  ;;  %10463 = vmatprep.subr.bf16.mxu1 %v17500_v2  ;;  %v17501_v60 = vld [vmem:[%s23561_s8 + $0x380] ss:$16 sps:$4 sm:$0xff]   ;;  %v17563_v2 = vld [vmem:[%s23561_s8 + $0x3cc] ss:$16 sps:$4 sm:$0xff]  }
 0x805   : > { %10846 = vmatprep.mubr.bf16.mxu0 %v23783_v25  ;;  %v17503_v25 = vld [vmem:[%s23561_s8 + $0x384] ss:$16 sps:$4 sm:$0xff]  }
 0x807   : > { %10464 = vmatpush1.bf16.msra.mxu1 %v17498_v48  ;;  %v23794_v48 = vld [vmem:[#allocation24_spill] sm:$0xff] }
 0x808   : > { %10465 = vmatprep.subr.bf16.mxu1 %v17503_v25  ;;  %v23796_v25 = vmov 0  }
 0x80a   : > { %10181 = vmatmul.mubr.bf16.gmra.mrb[152].mxu1 %v23792_v57 }
 0x80b   : > { %10190 = vmatprep.mubr.bf16.mxu1 %v19170_v30  ;;  %10466 = vmatpush1.bf16.msra.mxu1 %v17501_v60  ;;  %v23795_v60 = vld [vmem:[#allocation20_spill] sm:$0xff] }
 0x80c   : > { %10847 = vmatmul.mubr.bf16.gmra.mrb[8].mxu0 %v23784_v21  ;;  %v17506_v21 = vld [vmem:[%s23561_s8 + $0x3a4] ss:$16 sps:$4 sm:$0xff]  }
 0x80d   : > { %10856 = vmatprep.mubr.bf16.mxu0 %v23785_v50  ;;  %10467 = vmatprep.subr.bf16.mxu1 %v17506_v21  ;;  %v17507_v50 = vld [vmem:[%s23561_s8 + $0x3c0] ss:$16 sps:$4 sm:$0xff]  }
 0x80e   : > { %v23799_v21 = vld [vmem:[#allocation42_spill] sm:$0xff] }
 0x80f   : > { %10468 = vmatpush1.bf16.msra.mxu1 %v17504_v53  ;;  %v23798_v53 = vld [vmem:[#allocation35_spill] sm:$0xff] }
 0x810   : > { %10469 = vmatprep.subr.bf16.mxu1 %v17509_v20  ;;  %v23807_v20 = vld [vmem:[#allocation70_spill] sm:$0xff] }
 0x812   : > { %10191 = vmatmul.mubr.bf16.gmra.mrb[156].mxu1 %v19167_v16 }
 0x813   : > { %10200 = vmatprep.mubr.bf16.mxu1 %v19202_v39  ;;  %10470 = vmatpush1.bf16.msra.mxu1 %v17507_v50  ;;  %v23801_v50 = vld [vmem:[#allocation50_spill] sm:$0xff] }
 0x814   : > { %10857 = vmatmul.mubr.bf16.gmra.mrb[12].mxu0 %v23786_v1  ;;  %v17519_v1 = vld [vmem:[%s23561_s8 + $0x268] ss:$16 sps:$4 sm:$0xff]  }
 0x815   : > { %10866 = vmatprep.mubr.bf16.mxu0 %v23787_v43  ;;  %v17527_v43 = vld [vmem:[%s23561_s8 + $0x28c] ss:$16 sps:$4 sm:$0xff]  }
 0x81a   : > { %10201 = vmatmul.mubr.bf16.gmra.mrb[160].mxu1 %v19199_v19 }
 0x81b   : > { %10210 = vmatprep.mubr.bf16.mxu1 %v19236_v52 }
 0x81c   : > { %10867 = vmatmul.mubr.bf16.gmra.mrb[16].mxu0 %v23788_v58  ;;  %v17542_v58 = vld [vmem:[%s23561_s8 + $0x30c] ss:$16 sps:$4 sm:$0xff]  }
 0x81d   : > { %10876 = vmatprep.mubr.bf16.mxu0 %v23789_v32  ;;  %v17545_v32 = vld [vmem:[%s23561_s8 + $0x32c] ss:$16 sps:$4 sm:$0xff]  }
 0x822   : > { %10211 = vmatmul.mubr.bf16.gmra.mrb[164].mxu1 %v19233_v4 }
 0x823   : > { %10220 = vmatprep.mubr.bf16.mxu1 %v19266_v55 }
 0x824   : > { %10877 = vmatmul.mubr.bf16.gmra.mrb[20].mxu0 %v23790_v49  ;;  %v17560_v49 = vld [vmem:[%s23561_s8 + $0x3ac] ss:$16 sps:$4 sm:$0xff]  }
 0x825   : > { %10886 = vmatprep.mubr.bf16.mxu0 %v23791_v15  ;;  %v23793_v15 = vld [vmem:[#allocation14_spill] sm:$0xff] }
 0x82a   : > { %10221 = vmatmul.mubr.bf16.gmra.mrb[168].mxu1 %v19263_v56 }
 0x82b   : > { %10230 = vmatprep.mubr.bf16.mxu1 %v19294_v46 }
 0x82c   : > { %10887 = vmatmul.mubr.bf16.gmra.mrb[24].mxu0 %v23792_v57  ;;  %v17566_v57 = vld [vmem:[%s23561_s8 + $0x3ec] ss:$16 sps:$4 sm:$0xff]  }
 0x82d   : > { %10896 = vmatprep.mubr.bf16.mxu0 %v19170_v30  ;;  %v17512_v30 = vld [vmem:[%s23561_s8 + $0x20c] ss:$16 sps:$4 sm:$0xff]  }
 0x82e   : > { %11147 = vmatprep.subr.bf16.mxu0 %v17512_v30  ;;  %v23809_v30 = vld [vmem:[#allocation76_spill] sm:$0xff] }
 0x832   : > { %10231 = vmatmul.mubr.bf16.gmra.mrb[172].mxu1 %v19291_v44 }
 0x833   : > { %10240 = vmatprep.mubr.bf16.mxu1 %v19335_v31 }
 0x834   : > { %10897 = vmatmul.mubr.bf16.gmra.mrb[28].mxu0 %v19167_v16  ;;  %v17510_v16 = vld [vmem:[%s23561_s8 + $0x208] ss:$16 sps:$4 sm:$0xff]  }
 0x835   : > { %10906 = vmatprep.mubr.bf16.mxu0 %v19202_v39  ;;  %v17515_v39 = vld [vmem:[%s23561_s8 + $0x22c] ss:$16 sps:$4 sm:$0xff]   ;;  %11148 = vmatpush1.bf16.msra.mxu0 %v17510_v16 }
 0x836   : > { %11149 = vmatprep.subr.bf16.mxu0 %v17515_v39  ;;  %v23808_v16 = vld [vmem:[#allocation69_spill] sm:$0xff] }
 0x837   : > { %v23812_v39 = vld [vmem:[#allocation81_spill] sm:$0xff] }
 0x83a   : > { %10241 = vmatmul.mubr.bf16.gmra.mrb[176].mxu1 %v19331_v18 }
 0x83b   : > { %10250 = vmatprep.mubr.bf16.mxu1 %v19395_v34 }
 0x83c   : > { %10907 = vmatmul.mubr.bf16.gmra.mrb[32].mxu0 %v19199_v19  ;;  %v17513_v19 = vld [vmem:[%s23561_s8 + $0x228] ss:$16 sps:$4 sm:$0xff]  }
 0x83d   : > { %10916 = vmatprep.mubr.bf16.mxu0 %v19236_v52  ;;  %11150 = vmatpush1.bf16.msra.mxu0 %v17513_v19  ;;  %v17516_v52 = vld [vmem:[%s23561_s8 + $0x248] ss:$16 sps:$4 sm:$0xff]  }
 0x83e   : > { %11151 = vmatprep.subr.bf16.mxu0 %v17518_v23  ;;  %v23813_v19 = vld [vmem:[#allocation21_spill] sm:$0xff] }
 0x83f   : > { %v17554_v23 = vld [vmem:[%s23564_s11 + $0x14] ss:$8 sps:$4 sm:$0xff]  }
 0x841   : > { %11152 = vmatpush1.bf16.msra.mxu0 %v17516_v52  ;;  %v17537_v52 = vld [vmem:[%s23564_s11] ss:$8 sps:$4 sm:$0xff]  }
 0x842   : > { %10251 = vmatmul.mubr.bf16.gmra.mrb[180].mxu1 %v19392_v12  ;;  %11153 = vmatprep.subr.bf16.mxu0 %v17521_v10  ;;  %v23814_v10 = vld [vmem:[#allocation17_spill] sm:$0xff] }
 0x843   : > { %10260 = vmatprep.mubr.bf16.mxu1 %v19449_v37 }
 0x844   : > { %10917 = vmatmul.mubr.bf16.gmra.mrb[36].mxu0 %v19233_v4  ;;  %v17524_v4 = vld [vmem:[%s23561_s8 + $0x3e4] ss:$16 sps:$4 sm:$0xff]  }
 0x845   : > { %10926 = vmatprep.mubr.bf16.mxu0 %v19266_v55  ;;  %10471 = vmatprep.subr.bf16.mxu1 %v17524_v4  ;;  %v17525_v55 = vld [vmem:[%s23561_s8 + $0x288] ss:$16 sps:$4 sm:$0xff]  }
 0x846   : > { %10472 = vmatpush1.bf16.msra.mxu1 %v17522_v3  ;;  %11154 = vmatpush1.bf16.msra.mxu0 %v17519_v1  ;;  %v23815_v3 = vld [vmem:[#allocation26_spill] sm:$0xff]  ;;  %v17552_v4 = vld [vmem:[%s23564_s11 + $0x10] ss:$8 sps:$4 sm:$0xff]  }
 0x847   : > { %11155 = vmatprep.subr.bf16.mxu0 %v17527_v43  ;;  %12558 = vmatprep.subr.bf16.mxu1 %v17539_v29  ;;  %v17569_v1 = vld [vmem:[%s23564_s11 + $0x24] ss:$8 sps:$4 sm:$0xff]   ;;  %v17572_v43 = vld [vmem:[%s23564_s11 + $0x34] ss:$8 sps:$4 sm:$0xff]  }
 0x848   : > { %v17578_v29 = vld [vmem:[%s23564_s11 + $0x54] ss:$8 sps:$4 sm:$0xff]  }
 0x84a   : > { %10261 = vmatmul.mubr.bf16.gmra.mrb[184].mxu1 %v19443_v33  ;;  %11156 = vmatpush1.bf16.msra.mxu0 %v17525_v55  ;;  %v17567_v55 = vld [vmem:[%s23564_s11 + $0x20] ss:$8 sps:$4 sm:$0xff]  }
 0x84b   : > { %10270 = vmatprep.mubr.bf16.mxu1 %v19497_v11  ;;  %11157 = vmatprep.subr.bf16.mxu0 %v17530_v38  ;;  %v23816_v38 = vld [vmem:[#allocation25_spill] sm:$0xff] }
 0x84c   : > { %10927 = vmatmul.mubr.bf16.gmra.mrb[40].mxu0 %v19263_v56  ;;  %v17528_v56 = vld [vmem:[%s23561_s8 + $0x2a8] ss:$16 sps:$4 sm:$0xff]  }
 0x84d   : > { %10936 = vmatprep.mubr.bf16.mxu0 %v19294_v46  ;;  %v17531_v46 = vld [vmem:[%s23561_s8 + $0x2c8] ss:$16 sps:$4 sm:$0xff]  }
 0x84e   : > { %11158 = vmatpush1.bf16.msra.mxu0 %v17528_v56  ;;  %v23817_v56 = vld [vmem:[#allocation28_spill] sm:$0xff] }
 0x84f   : > { %11159 = vmatprep.subr.bf16.mxu0 %v17533_v0  ;;  %v17575_v0 = vld [vmem:[%s23564_s11 + $0x44] ss:$8 sps:$4 sm:$0xff]  }
 0x852   : > { %10271 = vmatmul.mubr.bf16.gmra.mrb[188].mxu1 %v19493_v36  ;;  %11160 = vmatpush1.bf16.msra.mxu0 %v17531_v46  ;;  %v17570_v46 = vld [vmem:[%s23564_s11 + $0x30] ss:$8 sps:$4 sm:$0xff]  }
 0x853   : > { %10280 = vmatprep.mubr.bf16.mxu1 %v19519_v54  ;;  %11161 = vmatprep.subr.bf16.mxu0 %v17536_v5  ;;  %v17573_v5 = vld [vmem:[%s23564_s11 + $0x40] ss:$8 sps:$4 sm:$0xff]  }
 0x854   : > { %10937 = vmatmul.mubr.bf16.gmra.mrb[44].mxu0 %v19291_v44  ;;  %v17534_v44 = vld [vmem:[%s23561_s8 + $0x2e8] ss:$16 sps:$4 sm:$0xff]  }
 0x855   : > { %10946 = vmatprep.mubr.bf16.mxu0 %v19335_v31  ;;  %v17540_v31 = vld [vmem:[%s23561_s8 + $0x308] ss:$16 sps:$4 sm:$0xff]  }
 0x856   : > { %11162 = vmatpush1.bf16.msra.mxu0 %v17534_v44  ;;  %v23818_v44 = vld [vmem:[#allocation27_spill] sm:$0xff] }
 0x857   : > { %11163 = vmatprep.subr.bf16.mxu0 %v17542_v58  ;;  %v17576_v58 = vld [vmem:[%s23564_s11 + $0x50] ss:$8 sps:$4 sm:$0xff]  }
 0x85a   : > { %10281 = vmatmul.mubr.bf16.gmra.mrb[192].mxu1 %v19516_v14  ;;  %11164 = vmatpush1.bf16.msra.mxu0 %v17540_v31  ;;  %v23819_v31 = vld [vmem:[#allocation30_spill] sm:$0xff] }
 0x85b   : > { %10290 = vmatprep.mubr.bf16.mxu1 %v19541_v13  ;;  %11165 = vmatprep.subr.bf16.mxu0 %v17545_v32  ;;  %v17579_v32 = vld [vmem:[%s23564_s11 + $0x60] ss:$8 sps:$4 sm:$0xff]  }
 0x85c   : > { %10947 = vmatmul.mubr.bf16.gmra.mrb[48].mxu0 %v19331_v18  ;;  %v17543_v18 = vld [vmem:[%s23561_s8 + $0x328] ss:$16 sps:$4 sm:$0xff]  }
 0x85d   : > { %10956 = vmatprep.mubr.bf16.mxu0 %v19395_v34  ;;  %v17546_v34 = vld [vmem:[%s23561_s8 + $0x348] ss:$16 sps:$4 sm:$0xff]  }
 0x85e   : > { %11166 = vmatpush1.bf16.msra.mxu0 %v17543_v18  ;;  %v17584_v18 = vld [vmem:[%s23564_s11 + $0x74] ss:$8 sps:$4 sm:$0xff]  }
 0x85f   : > { %11167 = vmatprep.subr.bf16.mxu0 %v17548_v17  ;;  %v17582_v17 = vld [vmem:[%s23564_s11 + $0x70] ss:$8 sps:$4 sm:$0xff]  }
 0x862   : > { %10291 = vmatmul.mubr.bf16.gmra.mrb[196].mxu1 %v19538_v63  ;;  %11168 = vmatpush1.bf16.msra.mxu0 %v17546_v34  ;;  %v23820_v34 = vld [vmem:[#allocation29_spill] sm:$0xff] }
 0x863   : > { %10300 = vmatprep.mubr.bf16.mxu1 %v19565_v28  ;;  %11169 = vmatprep.subr.bf16.mxu0 %v17551_v59  ;;  %v17585_v59 = vld [vmem:[%s23564_s11 + $0x80] ss:$8 sps:$4 sm:$0xff]  }
 0x864   : > { %10957 = vmatmul.mubr.bf16.gmra.mrb[52].mxu0 %v19392_v12  ;;  %v17549_v12 = vld [vmem:[%s23561_s8 + $0x368] ss:$16 sps:$4 sm:$0xff]  }
 0x865   : > { %10966 = vmatprep.mubr.bf16.mxu0 %v19449_v37  ;;  %v17555_v37 = vld [vmem:[%s23561_s8 + $0x388] ss:$16 sps:$4 sm:$0xff]  }
 0x866   : > { %11170 = vmatpush1.bf16.msra.mxu0 %v17549_v12  ;;  %v17590_v12 = vld [vmem:[%s23564_s11 + $0x94] ss:$8 sps:$4 sm:$0xff]  }
 0x867   : > { %11171 = vmatprep.subr.bf16.mxu0 %v17557_v42  ;;  %v17588_v42 = vld [vmem:[%s23564_s11 + $0x90] ss:$8 sps:$4 sm:$0xff]  }
 0x86a   : > { %10301 = vmatmul.mubr.bf16.gmra.mrb[200].mxu1 %v19562_v22  ;;  %11172 = vmatpush1.bf16.msra.mxu0 %v17555_v37  ;;  %v23822_v37 = vld [vmem:[#allocation31_spill] sm:$0xff] }
 0x86b   : > { %10310 = vmatprep.mubr.bf16.mxu1 %v19594_v26  ;;  %11173 = vmatprep.subr.bf16.mxu0 %v17560_v49  ;;  %v17593_v49 = vld [vmem:[%s23564_s11 + $0xa4] ss:$8 sps:$4 sm:$0xff]  }
 0x86c   : > { %10967 = vmatmul.mubr.bf16.gmra.mrb[56].mxu0 %v19443_v33  ;;  %v17558_v33 = vld [vmem:[%s23561_s8 + $0x3a8] ss:$16 sps:$4 sm:$0xff]  }
 0x86d   : > { %10976 = vmatprep.mubr.bf16.mxu0 %v19497_v11  ;;  %v17561_v11 = vld [vmem:[%s23561_s8 + $0x3c8] ss:$16 sps:$4 sm:$0xff]  }
 0x86e   : > { %11174 = vmatpush1.bf16.msra.mxu0 %v17558_v33  ;;  %v17591_v33 = vld [vmem:[%s23564_s11 + $0xa0] ss:$8 sps:$4 sm:$0xff]  }
 0x86f   : > { %11175 = vmatprep.subr.bf16.mxu0 %v17563_v2  ;;  %v17596_v2 = vld [vmem:[%s23564_s11 + $0xb4] ss:$8 sps:$4 sm:$0xff]  }
 0x872   : > { %10311 = vmatmul.mubr.bf16.gmra.mrb[204].mxu1 %v23793_v15  ;;  %11176 = vmatpush1.bf16.msra.mxu0 %v17561_v11  ;;  %v17594_v11 = vld [vmem:[%s23564_s11 + $0xb0] ss:$8 sps:$4 sm:$0xff]  }
 0x873   : > { %10320 = vmatprep.mubr.bf16.mxu1 %v23794_v48  ;;  %11177 = vmatprep.subr.bf16.mxu0 %v17566_v57  ;;  %v23826_v57 = vld [vmem:[#allocation37_spill] sm:$0xff] }
 0x874   : > { %10977 = vmatmul.mubr.bf16.gmra.mrb[60].mxu0 %v19493_v36  ;;  %v17564_v36 = vld [vmem:[%s23561_s8 + $0x3e8] ss:$16 sps:$4 sm:$0xff]  }
 0x875   : > { %10986 = vmatprep.mubr.bf16.mxu0 %v19519_v54  ;;  %v23797_v54 = vld [vmem:[#allocation36_spill] sm:$0xff] }
 0x876   : > { %11178 = vmatpush1.bf16.msra.mxu0 %v17564_v36  ;;  %v23827_v36 = vld [vmem:[#allocation40_spill] sm:$0xff] }
 0x877   : > { %13591 = vmatprep.subr.bf16.mxu0 %v23796_v25 }
 0x87a   : > { %10321 = vmatmul.mubr.bf16.gmra.mrb[208].mxu1 %v23795_v60 }
 0x87b   : > { %10330 = vmatprep.mubr.bf16.mxu1 %v19748_v9 }
 0x87c   : > { %10987 = vmatmul.mubr.bf16.gmra.mrb[64].mxu0 %v19516_v14  ;;  %v23800_v14 = vld [vmem:[#allocation41_spill] sm:$0xff] }
 0x87d   : > { %10996 = vmatprep.mubr.bf16.mxu0 %v19541_v13  ;;  %v23802_v13 = vld [vmem:[#allocation48_spill] sm:$0xff] }
 0x882   : > { %10331 = vmatmul.mubr.bf16.gmra.mrb[212].mxu1 %v19750_v61 }
 0x883   : > { %10340 = vmatprep.mubr.bf16.mxu1 %v23797_v54 }
 0x884   : > { %10997 = vmatmul.mubr.bf16.gmra.mrb[68].mxu0 %v19538_v63  ;;  %v23803_v63 = vld [vmem:[#allocation56_spill] sm:$0xff] }
 0x885   : > { %11006 = vmatprep.mubr.bf16.mxu0 %v19565_v28  ;;  %v23804_v28 = vld [vmem:[#allocation55_spill] sm:$0xff] }
 0x88a   : > { %10341 = vmatmul.mubr.bf16.gmra.mrb[216].mxu1 %v23798_v53 }
 0x88b   : > { %10350 = vmatprep.mubr.bf16.mxu1 %v23799_v21 }
 0x88c   : > { %11007 = vmatmul.mubr.bf16.gmra.mrb[72].mxu0 %v19562_v22  ;;  %v23805_v22 = vld [vmem:[#allocation61_spill] sm:$0xff] }
 0x88d   : > { %11016 = vmatprep.mubr.bf16.mxu0 %v19594_v26  ;;  %v23806_v26 = vld [vmem:[#allocation64_spill] sm:$0xff] }
 0x892   : > { %10351 = vmatmul.mubr.bf16.gmra.mrb[220].mxu1 %v23800_v14 }
 0x893   : > { %10360 = vmatprep.mubr.bf16.mxu1 %v23801_v50 }
 0x894   : > { %11017 = vmatmul.mubr.bf16.gmra.mrb[76].mxu0 %v23793_v15  ;;  %v23824_v15 = vld [vmem:[#allocation33_spill] sm:$0xff] }
 0x895   : > { %11026 = vmatprep.mubr.bf16.mxu0 %v23794_v48  ;;  %v23825_v48 = vld [vmem:[#allocation38_spill] sm:$0xff] }
 0x89a   : > { %10361 = vmatmul.mubr.bf16.gmra.mrb[224].mxu1 %v23802_v13 }
 0x89b   : > { %10370 = vmatprep.mubr.bf16.mxu1 %v23803_v63 }
 0x89c   : > { %11027 = vmatmul.mubr.bf16.gmra.mrb[80].mxu0 %v23795_v60  ;;  %v23828_v60 = vld [vmem:[#allocation39_spill] sm:$0xff] }
 0x89d   : > { %11036 = vmatprep.mubr.bf16.mxu0 %v19748_v9  ;;  %v23810_v9 = vld [vmem:[#allocation75_spill] sm:$0xff] }
 0x8a2   : > { %10371 = vmatmul.mubr.bf16.gmra.mrb[228].mxu1 %v23804_v28 }
 0x8a3   : > { %10380 = vmatprep.mubr.bf16.mxu1 %v23805_v22 }
 0x8a4   : > { %11037 = vmatmul.mubr.bf16.gmra.mrb[84].mxu0 %v19750_v61  ;;  %v23811_v61 = vld [vmem:[#allocation83_spill] sm:$0xff] }
 0x8a5   : > { %11046 = vmatprep.mubr.bf16.mxu0 %v23797_v54  ;;  %v23829_v54 = vld [vmem:[#allocation44_spill] sm:$0xff] }
 0x8aa   : > { %10381 = vmatmul.mubr.bf16.gmra.mrb[232].mxu1 %v23806_v26 }
 0x8ab   : > { %10390 = vmatprep.mubr.bf16.mxu1 %v23807_v20 }
 0x8ac   : > { %11047 = vmatmul.mubr.bf16.gmra.mrb[88].mxu0 %v23798_v53  ;;  %v17597_v53 = vld [vmem:[%s23564_s11 + $0xc0] ss:$8 sps:$4 sm:$0xff]  }
 0x8ad   : > { %11056 = vmatprep.mubr.bf16.mxu0 %v23799_v21  ;;  %v17599_v21 = vld [vmem:[%s23564_s11 + $0xc4] ss:$8 sps:$4 sm:$0xff]  }
 0x8b2   : > { %10391 = vmatmul.mubr.bf16.gmra.mrb[236].mxu1 %v23808_v16 }
 0x8b3   : > { %10400 = vmatprep.mubr.bf16.mxu1 %v23809_v30 }
 0x8b4   : > { %11057 = vmatmul.mubr.bf16.gmra.mrb[92].mxu0 %v23800_v14  ;;  %v23830_v14 = vld [vmem:[#allocation43_spill] sm:$0xff] }
 0x8b5   : > { %11066 = vmatprep.mubr.bf16.mxu0 %v23801_v50  ;;  %v23831_v50 = vld [vmem:[#allocation46_spill] sm:$0xff] }
 0x8ba   : > { %10401 = vmatmul.mubr.bf16.gmra.mrb[240].mxu1 %v23810_v9 }
 0x8bb   : > { %10410 = vmatprep.mubr.bf16.mxu1 %v23811_v61 }
 0x8bc   : > { %11067 = vmatmul.mubr.bf16.gmra.mrb[96].mxu0 %v23802_v13  ;;  %v23832_v13 = vld [vmem:[#allocation45_spill] sm:$0xff] }
 0x8bd   : > { %11076 = vmatprep.mubr.bf16.mxu0 %v23803_v63  ;;  %v23833_v63 = vld [vmem:[#allocation49_spill] sm:$0xff] }
 0x8c2   : > { %10411 = vmatmul.mubr.bf16.gmra.mrb[244].mxu1 %v23812_v39 }
 0x8c3   : > { %10420 = vmatprep.mubr.bf16.mxu1 %v20401_v47 }
 0x8c4   : > { %11077 = vmatmul.mubr.bf16.gmra.mrb[100].mxu0 %v23804_v28  ;;  %v17600_v28 = vld [vmem:[%s23564_s11 + $0xd0] ss:$8 sps:$4 sm:$0xff]  }
 0x8c5   : > { %11086 = vmatprep.mubr.bf16.mxu0 %v23805_v22  ;;  %v17602_v22 = vld [vmem:[%s23564_s11 + $0xd4] ss:$8 sps:$4 sm:$0xff]  }
 0x8ca   : > { %10421 = vmatmul.mubr.bf16.gmra.mrb[248].mxu1 %v20397_v51 }
 0x8cb   : > { %10430 = vmatprep.mubr.bf16.mxu1 %v20457_v7 }
 0x8cc   : > { %11087 = vmatmul.mubr.bf16.gmra.mrb[104].mxu0 %v23806_v26  ;;  %v23834_v26 = vld [vmem:[#allocation47_spill] sm:$0xff] }
 0x8cd   : > { %11096 = vmatprep.mubr.bf16.mxu0 %v23807_v20  ;;  %v23835_v20 = vld [vmem:[#allocation52_spill] sm:$0xff] }
 0x8d2   : > { %10431 = vmatmul.mubr.bf16.gmra.mrb[252].mxu1 %v20454_v8 }
 0x8d3   : > { %10473 = vmatprep.mubr.bf16.mxu1 %v23813_v19 }
 0x8d4   : > { %11097 = vmatmul.mubr.bf16.gmra.mrb[108].mxu0 %v23808_v16  ;;  %v23836_v16 = vld [vmem:[#allocation51_spill] sm:$0xff] }
 0x8d5   : > { %11106 = vmatprep.mubr.bf16.mxu0 %v23809_v30  ;;  %v23837_v30 = vld [vmem:[#allocation54_spill] sm:$0xff] }
 0x8da   : > { %10474 = vmatmul.mubr.bf16.vlgmr.msra.gmra.mrb[128].mxu1 %v23814_v10 }
 0x8db   : > { %12559 = vmatpush1.bf16.msra.mxu1 %v17537_v52  ;;  %10483 = vmatprep.mubr.bf16.mxu1 %v23815_v3  ;;  %v23840_v52 = vld [vmem:[#allocation57_spill] sm:$0xff] }
 0x8dc   : > { %11107 = vmatmul.mubr.bf16.gmra.mrb[112].mxu0 %v23810_v9  ;;  %12560 = vmatprep.subr.bf16.mxu1 %v17554_v23  ;;  %v23838_v9 = vld [vmem:[#allocation53_spill] sm:$0xff]  ;;  %v23841_v23 = vld [vmem:[#allocation60_spill] sm:$0xff] }
 0x8dd   : > { %11116 = vmatprep.mubr.bf16.mxu0 %v23811_v61  ;;  %v23839_v61 = vld [vmem:[#allocation58_spill] sm:$0xff] }
 0x8df   : > { %12561 = vmatpush1.bf16.msra.mxu1 %v17552_v4  ;;  %v17606_v4 = vld [vmem:[%s23564_s11 + $0xf0] ss:$8 sps:$4 sm:$0xff]  }
 0x8e0   : > { %12562 = vmatprep.subr.bf16.mxu1 %v17569_v1  ;;  %v17608_v1 = vld [vmem:[%s23564_s11 + $0xf4] ss:$8 sps:$4 sm:$0xff]  }
 0x8e2   : > { %10484 = vmatmul.mubr.bf16.gmra.mrb[132].mxu1 %v23816_v38 }
 0x8e3   : > { %10493 = vmatprep.mubr.bf16.mxu1 %v23817_v56  ;;  %12563 = vmatpush1.bf16.msra.mxu1 %v17567_v55  ;;  %v23844_v55 = vld [vmem:[#allocation62_spill] sm:$0xff] }
 0x8e4   : > { %11117 = vmatmul.mubr.bf16.gmra.mrb[116].mxu0 %v23812_v39  ;;  %12564 = vmatprep.subr.bf16.mxu1 %v17572_v43  ;;  %v17603_v39 = vld [vmem:[%s23564_s11 + $0xe0] ss:$8 sps:$4 sm:$0xff]  }
 0x8e5   : > { %11126 = vmatprep.mubr.bf16.mxu0 %v20401_v47  ;;  %v17581_v47 = vld [vmem:[%s23564_s11 + $0x64] ss:$8 sps:$4 sm:$0xff]  }
 0x8e6   : > { %v23845_v43 = vld [vmem:[#allocation66_spill] sm:$0xff] }
 0x8e7   : > { %12565 = vmatpush1.bf16.msra.mxu1 %v17570_v46  ;;  %v17611_v46 = vld [vmem:[%s23564_s11 + $0x104] ss:$8 sps:$4 sm:$0xff]  }
 0x8e8   : > { %12566 = vmatprep.subr.bf16.mxu1 %v17575_v0  ;;  %v23848_v0 = vld [vmem:[#allocation67_spill] sm:$0xff] }
 0x8ea   : > { %10494 = vmatmul.mubr.bf16.gmra.mrb[136].mxu1 %v23818_v44 }
 0x8eb   : > { %10503 = vmatprep.mubr.bf16.mxu1 %v23819_v31  ;;  %12567 = vmatpush1.bf16.msra.mxu1 %v17573_v5  ;;  %v23849_v5 = vld [vmem:[#allocation72_spill] sm:$0xff] }
 0x8ec   : > { %11127 = vmatmul.mubr.bf16.gmra.mrb[120].mxu0 %v20397_v51  ;;  %12568 = vmatprep.subr.bf16.mxu1 %v17578_v29  ;;  %v23821_v51 = vld [vmem:[#allocation32_spill] sm:$0xff]  ;;  %v23850_v29 = vld [vmem:[#allocation71_spill] sm:$0xff] }
 0x8ed   : > { %11136 = vmatprep.mubr.bf16.mxu0 %v20457_v7  ;;  %v17587_v7 = vld [vmem:[%s23564_s11 + $0x84] ss:$8 sps:$4 sm:$0xff]  }
 0x8ef   : > { %12569 = vmatpush1.bf16.msra.mxu1 %v17576_v58  ;;  %v23853_v58 = vld [vmem:[#allocation78_spill] sm:$0xff] }
 0x8f0   : > { %12570 = vmatprep.subr.bf16.mxu1 %v17581_v47  ;;  %v23854_v47 = vld [vmem:[#allocation77_spill] sm:$0xff] }
 0x8f2   : > { %10504 = vmatmul.mubr.bf16.gmra.mrb[140].mxu1 %v23820_v34 }
 0x8f3   : > { %10513 = vmatprep.mubr.bf16.mxu1 %v23821_v51  ;;  %12571 = vmatpush1.bf16.msra.mxu1 %v17579_v32  ;;  %v23855_v32 = vld [vmem:[#allocation80_spill] sm:$0xff] }
 0x8f4   : > { %11137 = vmatmul.mubr.bf16.gmra.mrb[124].mxu0 %v20454_v8  ;;  %12572 = vmatprep.subr.bf16.mxu1 %v17584_v18  ;;  %v23823_v8 = vld [vmem:[#allocation34_spill] sm:$0xff]  ;;  %v23856_v18 = vld [vmem:[#allocation79_spill] sm:$0xff] }
 0x8f5   : > { %11179 = vmatprep.mubr.bf16.mxu0 %v23813_v19  ;;  %v17605_v19 = vld [vmem:[%s23564_s11 + $0xe4] ss:$8 sps:$4 sm:$0xff]  }
 0x8f7   : > { %12573 = vmatpush1.bf16.msra.mxu1 %v17582_v17  ;;  %v23859_v17 = vld [vmem:[#allocation86_spill] sm:$0xff] }
 0x8f8   : > { %12574 = vmatprep.subr.bf16.mxu1 %v17587_v7  ;;  %v23860_v7 = vld [vmem:[#allocation85_spill] sm:$0xff] }
 0x8fa   : > { %10514 = vmatmul.mubr.bf16.gmra.mrb[144].mxu1 %v23822_v37 }
 0x8fb   : > { %10523 = vmatprep.mubr.bf16.mxu1 %v23823_v8  ;;  %12575 = vmatpush1.bf16.msra.mxu1 %v17585_v59  ;;  %v23861_v59 = vld [vmem:[#allocation87_spill] sm:$0xff] }
 0x8fc   : > { %11180 = vmatmul.mubr.bf16.vlgmr.msra.gmra.mrb[0].mxu0 %v23814_v10  ;;  %12576 = vmatprep.subr.bf16.mxu1 %v17590_v12  ;;  %v23842_v10 = vld [vmem:[#allocation59_spill] sm:$0xff]  ;;  %v23862_v12 = vld [vmem:[#allocation89_spill] sm:$0xff] }
 0x8fd   : > { %11189 = vmatprep.mubr.bf16.mxu0 %v23815_v3  ;;  %v23843_v3 = vld [vmem:[#allocation63_spill] sm:$0xff] }
 0x8ff   : > { %12577 = vmatpush1.bf16.msra.mxu1 %v17588_v42  ;;  %v22461_v42 = vld [vmem:[%s23563_s10] sm:$0xf] }
 0x900   : > { %12578 = vmatprep.subr.bf16.mxu1 %v17593_v49  ;;  %v23865_v49 = vld [vmem:[#allocation90_spill] sm:$0xff] }
 0x902   : > { %10524 = vmatmul.mubr.bf16.gmra.mrb[148].mxu1 %v23824_v15 }
 0x903   : > { %10533 = vmatprep.mubr.bf16.mxu1 %v23825_v48  ;;  %12579 = vmatpush1.bf16.msra.mxu1 %v17591_v33  ;;  %v23866_v33 = vld [vmem:[#allocation5_spill] sm:$0xff] }
 0x904   : > { %11190 = vmatmul.mubr.bf16.gmra.mrb[4].mxu0 %v23816_v38  ;;  %12580 = vmatprep.subr.bf16.mxu1 %v17596_v2  ;;  %v23846_v38 = vld [vmem:[#allocation65_spill] sm:$0xff] }
 0x905   : > { %11199 = vmatprep.mubr.bf16.mxu0 %v23817_v56  ;;  %v23847_v56 = vld [vmem:[#allocation68_spill] sm:$0xff] }
 0x907   : > { %12581 = vmatpush1.bf16.msra.mxu1 %v17594_v11 }
 0x908   : > { %12582 = vmatprep.subr.bf16.mxu1 %v17599_v21 }
 0x90a   : > { %10534 = vmatmul.mubr.bf16.gmra.mrb[152].mxu1 %v23826_v57 }
 0x90b   : > { %10543 = vmatprep.mubr.bf16.mxu1 %v23827_v36  ;;  %12583 = vmatpush1.bf16.msra.mxu1 %v17597_v53 }
 0x90c   : > { %11200 = vmatmul.mubr.bf16.gmra.mrb[8].mxu0 %v23818_v44  ;;  %12584 = vmatprep.subr.bf16.mxu1 %v17602_v22  ;;  %v23851_v44 = vld [vmem:[#allocation74_spill] sm:$0xff] }
 0x90d   : > { %11209 = vmatprep.mubr.bf16.mxu0 %v23819_v31  ;;  %v23852_v31 = vld [vmem:[#allocation73_spill] sm:$0xff] }
 0x90f   : > { %12585 = vmatpush1.bf16.msra.mxu1 %v17600_v28 }
 0x910   : > { %12586 = vmatprep.subr.bf16.mxu1 %v17605_v19 }
 0x912   : > { %10544 = vmatmul.mubr.bf16.gmra.mrb[156].mxu1 %v23828_v60 }
 0x913   : > { %10553 = vmatprep.mubr.bf16.mxu1 %v23829_v54  ;;  %12587 = vmatpush1.bf16.msra.mxu1 %v17603_v39 }
 0x914   : > { %11210 = vmatmul.mubr.bf16.gmra.mrb[12].mxu0 %v23820_v34  ;;  %12588 = vmatprep.subr.bf16.mxu1 %v17608_v1  ;;  %v23857_v34 = vld [vmem:[#allocation84_spill] sm:$0xff] }
 0x915   : > { %11219 = vmatprep.mubr.bf16.mxu0 %v23821_v51  ;;  %v23858_v51 = vld [vmem:[#allocation82_spill] sm:$0xff] }
 0x917   : > { %12589 = vmatpush1.bf16.msra.mxu1 %v17606_v4 }
 0x918   : > { %12911 = vmatprep.subr.bf16.mxu1 %v17611_v46 }
 0x91a   : > { %10554 = vmatmul.mubr.bf16.gmra.mrb[160].mxu1 %v23830_v14 }
 0x91b   : > { %10563 = vmatprep.mubr.bf16.mxu1 %v23831_v50 }
 0x91c   : > { %11220 = vmatmul.mubr.bf16.gmra.mrb[16].mxu0 %v23822_v37  ;;  %v23863_v37 = vld [vmem:[#allocation88_spill] sm:$0xff] }
 0x91d   : > { %11229 = vmatprep.mubr.bf16.mxu0 %v23823_v8  ;;  %v23864_v8 = vld [vmem:[#allocation91_spill] sm:$0xff] }
 0x922   : > { %10564 = vmatmul.mubr.bf16.gmra.mrb[164].mxu1 %v23832_v13 }
 0x923   : > { %10573 = vmatprep.mubr.bf16.mxu1 %v23833_v63 }
 0x924   : > { %11230 = vmatmul.mubr.bf16.gmra.mrb[20].mxu0 %v23824_v15  ;;  %v22466_v15 = vrot.slane %v22461_v42, %v23866_v33 }
 0x925   : > { %11239 = vmatprep.mubr.bf16.mxu0 %v23825_v48  ;;  %v23867_v48 = vld [vmem:[#allocation3_spill] sm:$0xff] }
 0x926   : > { %v22471_v11 = vrot.slane %v22461_v42, %v23867_v48 }
 0x92a   : > { %10574 = vmatmul.mubr.bf16.gmra.mrb[168].mxu1 %v23834_v26 }
 0x92b   : > { %10583 = vmatprep.mubr.bf16.mxu1 %v23835_v20 }
 0x92c   : > { %11240 = vmatmul.mubr.bf16.gmra.mrb[24].mxu0 %v23826_v57 }
 0x92d   : > { %11249 = vmatprep.mubr.bf16.mxu0 %v23827_v36 }
 0x932   : > { %10584 = vmatmul.mubr.bf16.gmra.mrb[172].mxu1 %v23836_v16 }
 0x933   : > { %10593 = vmatprep.mubr.bf16.mxu1 %v23837_v30 }
 0x934   : > { %11250 = vmatmul.mubr.bf16.gmra.mrb[28].mxu0 %v23828_v60 }
 0x935   : > { %11259 = vmatprep.mubr.bf16.mxu0 %v23829_v54 }
 0x93a   : > { %10594 = vmatmul.mubr.bf16.gmra.mrb[176].mxu1 %v23838_v9 }
 0x93b   : > { %10603 = vmatprep.mubr.bf16.mxu1 %v23839_v61 }
 0x93c   : > { %11260 = vmatmul.mubr.bf16.gmra.mrb[32].mxu0 %v23830_v14 }
 0x93d   : > { %11269 = vmatprep.mubr.bf16.mxu0 %v23831_v50 }
 0x942   : > { %10604 = vmatmul.mubr.bf16.gmra.mrb[180].mxu1 %v23840_v52 }
 0x943   : > { %10613 = vmatprep.mubr.bf16.mxu1 %v23841_v23 }
 0x944   : > { %11270 = vmatmul.mubr.bf16.gmra.mrb[36].mxu0 %v23832_v13 }
 0x945   : > { %11279 = vmatprep.mubr.bf16.mxu0 %v23833_v63 }
 0x94a   : > { %10614 = vmatmul.mubr.bf16.gmra.mrb[184].mxu1 %v23842_v10 }
 0x94b   : > { %10623 = vmatprep.mubr.bf16.mxu1 %v23843_v3 }
 0x94c   : > { %11280 = vmatmul.mubr.bf16.gmra.mrb[40].mxu0 %v23834_v26 }
 0x94d   : > { %11289 = vmatprep.mubr.bf16.mxu0 %v23835_v20 }
 0x952   : > { %10624 = vmatmul.mubr.bf16.gmra.mrb[188].mxu1 %v23844_v55 }
 0x953   : > { %10633 = vmatprep.mubr.bf16.mxu1 %v23845_v43 }
 0x954   : > { %11290 = vmatmul.mubr.bf16.gmra.mrb[44].mxu0 %v23836_v16 }
 0x955   : > { %11299 = vmatprep.mubr.bf16.mxu0 %v23837_v30 }
 0x95a   : > { %10634 = vmatmul.mubr.bf16.gmra.mrb[192].mxu1 %v23846_v38 }
 0x95b   : > { %10643 = vmatprep.mubr.bf16.mxu1 %v23847_v56 }
 0x95c   : > { %11300 = vmatmul.mubr.bf16.gmra.mrb[48].mxu0 %v23838_v9 }
 0x95d   : > { %11309 = vmatprep.mubr.bf16.mxu0 %v23839_v61 }
 0x962   : > { %10644 = vmatmul.mubr.bf16.gmra.mrb[196].mxu1 %v23848_v0 }
 0x963   : > { %10653 = vmatprep.mubr.bf16.mxu1 %v23849_v5 }
 0x964   : > { %11310 = vmatmul.mubr.bf16.gmra.mrb[52].mxu0 %v23840_v52 }
 0x965   : > { %11319 = vmatprep.mubr.bf16.mxu0 %v23841_v23 }
 0x96a   : > { %10654 = vmatmul.mubr.bf16.gmra.mrb[200].mxu1 %v23850_v29 }
 0x96b   : > { %10663 = vmatprep.mubr.bf16.mxu1 %v23851_v44 }
 0x96c   : > { %11320 = vmatmul.mubr.bf16.gmra.mrb[56].mxu0 %v23842_v10 }
 0x96d   : > { %11329 = vmatprep.mubr.bf16.mxu0 %v23843_v3  ;;  %v23868_v3 = vld [vmem:[#allocation92_spill] sm:$0xff] }
 0x972   : > { %10664 = vmatmul.mubr.bf16.gmra.mrb[204].mxu1 %v23852_v31 }
 0x973   : > { %10673 = vmatprep.mubr.bf16.mxu1 %v23853_v58 }
 0x974   : > { %11330 = vmatmul.mubr.bf16.gmra.mrb[60].mxu0 %v23844_v55  ;;  %v23869_v55 = vld [vmem:[#allocation94_spill] sm:$0xff] }
 0x975   : > { %11339 = vmatprep.mubr.bf16.mxu0 %v23845_v43 }
 0x97a   : > { %10674 = vmatmul.mubr.bf16.gmra.mrb[208].mxu1 %v23854_v47 }
 0x97b   : > { %10683 = vmatprep.mubr.bf16.mxu1 %v23855_v32 }
 0x97c   : > { %11340 = vmatmul.mubr.bf16.gmra.mrb[64].mxu0 %v23846_v38 }
 0x97d   : > { %11349 = vmatprep.mubr.bf16.mxu0 %v23847_v56 }
 0x982   : > { %10684 = vmatmul.mubr.bf16.gmra.mrb[212].mxu1 %v23856_v18 }
 0x983   : > { %10693 = vmatprep.mubr.bf16.mxu1 %v23857_v34 }
 0x984   : > { %11350 = vmatmul.mubr.bf16.gmra.mrb[68].mxu0 %v23848_v0 }
 0x985   : > { %11359 = vmatprep.mubr.bf16.mxu0 %v23849_v5 }
 0x98a   : > { %10694 = vmatmul.mubr.bf16.gmra.mrb[216].mxu1 %v23858_v51 }
 0x98b   : > { %10703 = vmatprep.mubr.bf16.mxu1 %v23859_v17 }
 0x98c   : > { %11360 = vmatmul.mubr.bf16.gmra.mrb[72].mxu0 %v23850_v29 }
 0x98d   : > { %11369 = vmatprep.mubr.bf16.mxu0 %v23851_v44 }
 0x992   : > { %10704 = vmatmul.mubr.bf16.gmra.mrb[220].mxu1 %v23860_v7 }
 0x993   : > { %10713 = vmatprep.mubr.bf16.mxu1 %v20391_v41 }
 0x994   : > { %11370 = vmatmul.mubr.bf16.gmra.mrb[76].mxu0 %v23852_v31 }
 0x995   : > { %11379 = vmatprep.mubr.bf16.mxu0 %v23853_v58 }
 0x99a   : > { %10714 = vmatmul.mubr.bf16.gmra.mrb[224].mxu1 %v23861_v59 }
 0x99b   : > { %10723 = vmatprep.mubr.bf16.mxu1 %v23862_v12 }
 0x99c   : > { %11380 = vmatmul.mubr.bf16.gmra.mrb[80].mxu0 %v23854_v47 }
 0x99d   : > { %11389 = vmatprep.mubr.bf16.mxu0 %v23855_v32  ;;  %v23870_v32 = vld [vmem:[#allocation93_spill] sm:$0xff] }
 0x9a2   : > { %10724 = vmatmul.mubr.bf16.gmra.mrb[228].mxu1 %v23863_v37 }
 0x9a3   : > { %10733 = vmatprep.mubr.bf16.mxu1 %v23864_v8 }
 0x9a4   : > { %11390 = vmatmul.mubr.bf16.gmra.mrb[84].mxu0 %v23856_v18 }
 0x9a5   : > { %11399 = vmatprep.mubr.bf16.mxu0 %v23857_v34 }
 0x9aa   : > { %10734 = vmatmul.mubr.bf16.gmra.mrb[232].mxu1 %v23865_v49 }
 0x9ab   : > { %10743 = vmatprep.mubr.bf16.mxu1 %v20465_v6 }
 0x9ac   : > { %11400 = vmatmul.mubr.bf16.gmra.mrb[88].mxu0 %v23858_v51 }
 0x9ad   : > { %v10475_v2 = vpop.f32.mrb[128].mxu1  ;;  %11409 = vmatprep.mubr.bf16.mxu0 %v23859_v17 }
 0x9ae   : > { %v11522_v57 = vadd.f32 %v22466_v15, %v10475_v2  ;;  %v10477_v36 = vpop.f32.mrb[129].mxu1 }
 0x9af   : > { %v11523_v60 = vadd.f32 %v22471_v11, %v10477_v36  ;;  %v10479_v54 = vpop.f32.mrb[130].mxu1 }
 0x9b0   : > { %v11526_v53 = vadd.f32 %v22466_v15, %v10479_v54  ;;  %v10481_v21 = vpop.f32.mrb[131].mxu1  ;;  %v11778_v50 = vmax.f32 %v11522_v57, 0.0 }
 0x9b1   : > { %v11527_v14 = vadd.f32 %v22471_v11, %v10481_v21  ;;  %v11779_v63 = vmax.f32 %v11523_v60, 0.0 }
 0x9b2   : > { %v11782_v13 = vmax.f32 %v11526_v53, 0.0  ;;  %10744 = vmatmul.mubr.bf16.gmra.mrb[236].mxu1 %v20461_v40 }
 0x9b3   : > { %v11783_v28 = vmax.f32 %v11527_v14, 0.0  ;;  %10753 = vmatprep.mubr.bf16.mxu1 %v20485_v45 }
 0x9b4   : > { %v22481_v22 = vpack.c.bf16 %v11782_v13, %v11778_v50  ;;  %11410 = vmatmul.mubr.bf16.gmra.mrb[92].mxu0 %v23860_v7  ;;  %v23871_v50 = vld [vmem:[#allocation4_spill] sm:$0xff] }
 0x9b5   : > { %v22484_v26 = vpack.c.bf16 %v11783_v28, %v11779_v63  ;;  %v10485_v20 = vpop.f32.mrb[132].mxu1  ;;  %11419 = vmatprep.mubr.bf16.mxu0 %v20391_v41  ;;  %v22522_v13 = vrot.slane %v22461_v42, %v23871_v50 }
 0x9b6   : > { %v11530_v16 = vadd.f32 %v22466_v15, %v10485_v20  ;;  %v10487_v30 = vpop.f32.mrb[133].mxu1  ;;  %v23872_v20 = vld [vmem:[#allocation2_spill] sm:$0xff] }
 0x9b7   : > { %v11531_v9 = vadd.f32 %v22471_v11, %v10487_v30  ;;  %v10489_v61 = vpop.f32.mrb[134].mxu1 }
 0x9b8   : > { %v11534_v39 = vadd.f32 %v22466_v15, %v10489_v61  ;;  %v10491_v19 = vpop.f32.mrb[135].mxu1  ;;  %v11786_v23 = vmax.f32 %v11530_v16, 0.0  ;;  %v23873_v16 = vsub.s32 3, %v23872_v20 }
 0x9b9   : > { %v11535_v52 = vadd.f32 %v22471_v11, %v10491_v19  ;;  %v11787_v4 = vmax.f32 %v11531_v9, 0.0 }
 0x9ba   : > { %v11790_v10 = vmax.f32 %v11534_v39, 0.0  ;;  %10754 = vmatmul.mubr.bf16.gmra.mrb[240].mxu1 %v23868_v3  ;;  %v22530_v30 = vrot.slane %v22461_v42, %v23873_v16 }
 0x9bb   : > { %v11791_v1 = vmax.f32 %v11535_v52, 0.0  ;;  %10763 = vmatprep.mubr.bf16.mxu1 %v23869_v55 }
 0x9bc   : > { %v22493_v41 = vpack.c.bf16 %v11790_v10, %v11786_v23  ;;  %11420 = vmatmul.mubr.bf16.gmra.mrb[96].mxu0 %v23861_v59 }
 0x9bd   : > { %v22496_v43 = vpack.c.bf16 %v11791_v1, %v11787_v4  ;;  %v10495_v38 = vpop.f32.mrb[136].mxu1  ;;  %11429 = vmatprep.mubr.bf16.mxu0 %v23862_v12 }
 0x9be   : > { %v11538_v56 = vadd.f32 %v22466_v15, %v10495_v38  ;;  %v10497_v46 = vpop.f32.mrb[137].mxu1 }
 0x9bf   : > { %v11539_v0 = vadd.f32 %v22471_v11, %v10497_v46  ;;  %v10499_v5 = vpop.f32.mrb[138].mxu1 }
 0x9c0   : > { %v11542_v29 = vadd.f32 %v22466_v15, %v10499_v5  ;;  %v10501_v44 = vpop.f32.mrb[139].mxu1  ;;  %v11794_v58 = vmax.f32 %v11538_v56, 0.0 }
 0x9c1   : > { %v11543_v31 = vadd.f32 %v22471_v11, %v10501_v44  ;;  %v11795_v18 = vmax.f32 %v11539_v0, 0.0 }
 0x9c2   : > { %v11798_v47 = vmax.f32 %v11542_v29, 0.0  ;;  %10764 = vmatmul.mubr.bf16.gmra.mrb[244].mxu1 %v23870_v32 }
 0x9c3   : > { %v11799_v34 = vmax.f32 %v11543_v31, 0.0  ;;  %10773 = vmatprep.mubr.bf16.mxu1 %v20525_v62 }
 0x9c4   : > { %v22505_v51 = vpack.c.bf16 %v11798_v47, %v11794_v58  ;;  %11430 = vmatmul.mubr.bf16.gmra.mrb[100].mxu0 %v23863_v37 }
 0x9c5   : > { %v22508_v17 = vpack.c.bf16 %v11799_v34, %v11795_v18  ;;  %v10505_v7 = vpop.f32.mrb[140].mxu1  ;;  %11439 = vmatprep.mubr.bf16.mxu0 %v23864_v8 }
 0x9c6   : > { %v11546_v59 = vadd.f32 %v22466_v15, %v10505_v7  ;;  %v10507_v12 = vpop.f32.mrb[141].mxu1 }
 0x9c7   : > { %v11547_v2 = vadd.f32 %v22471_v11, %v10507_v12  ;;  %v10509_v57 = vpop.f32.mrb[142].mxu1 }
 0x9c8   : > { %v11550_v36 = vadd.f32 %v22466_v15, %v10509_v57  ;;  %v10511_v60 = vpop.f32.mrb[143].mxu1  ;;  %v11802_v53 = vmax.f32 %v11546_v59, 0.0 }
 0x9c9   : > { %v11551_v54 = vadd.f32 %v22471_v11, %v10511_v60  ;;  %v11803_v37 = vmax.f32 %v11547_v2, 0.0 }
 0x9ca   : > { %v11806_v21 = vmax.f32 %v11550_v36, 0.0  ;;  %10774 = vmatmul.mubr.bf16.gmra.mrb[248].mxu1 %v20521_v27 }
 0x9cb   : > { %v11807_v14 = vmax.f32 %v11551_v54, 0.0  ;;  %10783 = vmatprep.mubr.bf16.mxu1 %v20545_v35 }
 0x9cc   : > { %v22517_v8 = vpack.c.bf16 %v11806_v21, %v11802_v53  ;;  %11440 = vmatmul.mubr.bf16.gmra.mrb[104].mxu0 %v23865_v49 }
 0x9cd   : > { %v22524_v63 = vpack.c.bf16 %v11807_v14, %v11803_v37  ;;  %v10515_v28 = vpop.f32.mrb[144].mxu1  ;;  %11449 = vmatprep.mubr.bf16.mxu0 %v20465_v6  ;;  %v17614_v14 = vld [vmem:[%s23564_s11 + $0x114] ss:$8 sps:$4 sm:$0xff]  }
 0x9ce   : > { %v11554_v9 = vadd.f32 %v22466_v15, %v10515_v28  ;;  %v10517_v61 = vpop.f32.mrb[145].mxu1 }
 0x9cf   : > { %v11555_v39 = vadd.f32 %v22471_v11, %v10517_v61  ;;  %v10519_v49 = vpop.f32.mrb[146].mxu1  ;;  %v11181_v19 = vpop.f32.mrb[0].mxu0 }
 0x9d0   : > { %v11558_v52 = vadd.f32 %v22466_v15, %v10519_v49  ;;  %v11524_v23 = vadd.f32 %v22522_v13, %v11181_v19  ;;  %v10521_v10 = vpop.f32.mrb[147].mxu1  ;;  %v11183_v4 = vpop.f32.mrb[1].mxu0  ;;  %v11810_v42 = vmax.f32 %v11554_v9, 0.0 }
 0x9d1   : > { %v11559_v6 = vadd.f32 %v22471_v11, %v10521_v10  ;;  %v11525_v1 = vadd.f32 %v22530_v30, %v11183_v4  ;;  %v11185_v38 = vpop.f32.mrb[2].mxu0  ;;  %v11811_v5 = vmax.f32 %v11555_v39, 0.0 }
 0x9d2   : > { %v11814_v56 = vmax.f32 %v11558_v52, 0.0  ;;  %v11528_v46 = vadd.f32 %v22522_v13, %v11185_v38  ;;  %10784 = vmatmul.mubr.bf16.gmra.mrb[252].mxu1 %v20541_v24  ;;  %v11187_v0 = vpop.f32.mrb[3].mxu0  ;;  %v11780_v58 = vmax.f32 %v11524_v23, 0.0  ;;  %v17612_v23 = vld [vmem:[%s23564_s11 + $0x110] ss:$8 sps:$4 sm:$0xff]  }
 0x9d3   : > { %v11815_v29 = vmax.f32 %v11559_v6, 0.0  ;;  %v11529_v44 = vadd.f32 %v22530_v30, %v11187_v0  ;;  %12590 = vmatprep.mubr.bf16.mxu1 %v22484_v26  ;;  %v11781_v34 = vmax.f32 %v11525_v1, 0.0 }
 0x9d4   : > { %v22542_v31 = vpack.c.bf16 %v11814_v56, %v11810_v42  ;;  %v11784_v47 = vmax.f32 %v11528_v46, 0.0  ;;  %11450 = vmatmul.mubr.bf16.gmra.mrb[108].mxu0 %v20461_v40  ;;  %v17609_v40 = vld [vmem:[%s23564_s11 + $0x100] ss:$8 sps:$4 sm:$0xff]  }
 0x9d5   : > { %v22545_v18 = vpack.c.bf16 %v11815_v29, %v11811_v5  ;;  %v11785_v7 = vmax.f32 %v11529_v44, 0.0  ;;  %v10525_v59 = vpop.f32.mrb[148].mxu1  ;;  %11459 = vmatprep.mubr.bf16.mxu0 %v20485_v45 }
 0x9d6   : > { %v22548_v12 = vpack.c.bf16 %v11784_v47, %v11780_v58  ;;  %v11562_v2 = vadd.f32 %v22466_v15, %v10525_v59  ;;  %v10527_v57 = vpop.f32.mrb[149].mxu1  ;;  %v17615_v58 = vld [vmem:[%s23564_s11 + $0x120] ss:$8 sps:$4 sm:$0xff]   ;;  %v17620_v59 = vld [vmem:[%s23564_s11 + $0x134] ss:$8 sps:$4 sm:$0xff]  }
 0x9d7   : > { %v22551_v36 = vpack.c.bf16 %v11785_v7, %v11781_v34  ;;  %v11563_v26 = vadd.f32 %v22471_v11, %v10527_v57  ;;  %v10529_v60 = vpop.f32.mrb[150].mxu1  ;;  %v11191_v54 = vpop.f32.mrb[4].mxu0 }
 0x9d8   : > { %v11566_v53 = vadd.f32 %v22466_v15, %v10529_v60  ;;  %v11532_v21 = vadd.f32 %v22522_v13, %v11191_v54  ;;  %v10531_v45 = vpop.f32.mrb[151].mxu1  ;;  %v11193_v37 = vpop.f32.mrb[5].mxu0  ;;  %v11818_v16 = vmax.f32 %v11562_v2, 0.0 }
 0x9d9   : > { %v11567_v50 = vadd.f32 %v22471_v11, %v10531_v45  ;;  %v11533_v28 = vadd.f32 %v22530_v30, %v11193_v37  ;;  %v11195_v20 = vpop.f32.mrb[6].mxu0  ;;  %v11819_v49 = vmax.f32 %v11563_v26, 0.0 }
 0x9da   : > { %v11822_v9 = vmax.f32 %v11566_v53, 0.0  ;;  %v11536_v61 = vadd.f32 %v22522_v13, %v11195_v20  ;;  %v11197_v39 = vpop.f32.mrb[7].mxu0  ;;  %12591 = vmatmul.mubr.bf16.vlgmr.msra.gmra.mrb[0].mxu1 %v22481_v22  ;;  %v11788_v4 = vmax.f32 %v11532_v21, 0.0  ;;  %v17617_v22 = vld [vmem:[%s23564_s11 + $0x124] ss:$8 sps:$4 sm:$0xff]  }
 0x9db   : > { %v11823_v19 = vmax.f32 %v11567_v50, 0.0  ;;  %v11537_v52 = vadd.f32 %v22530_v30, %v11197_v39  ;;  %12912 = vmatpush1.bf16.msra.mxu1 %v17609_v40  ;;  %12600 = vmatprep.mubr.bf16.mxu1 %v22496_v43  ;;  %v11789_v38 = vmax.f32 %v11533_v28, 0.0 }
 0x9dc   : > { %v22571_v10 = vpack.c.bf16 %v11822_v9, %v11818_v16  ;;  %v11792_v6 = vmax.f32 %v11536_v61, 0.0  ;;  %11460 = vmatmul.mubr.bf16.gmra.mrb[112].mxu0 %v23868_v3  ;;  %12913 = vmatprep.subr.bf16.mxu1 %v17614_v14  ;;  %v17618_v14 = vld [vmem:[%s23564_s11 + $0x130] ss:$8 sps:$4 sm:$0xff]  }
 0x9dd   : > { %v22577_v1 = vpack.c.bf16 %v11823_v19, %v11819_v49  ;;  %v11793_v42 = vmax.f32 %v11537_v52, 0.0  ;;  %v10535_v43 = vpop.f32.mrb[152].mxu1  ;;  %11469 = vmatprep.mubr.bf16.mxu0 %v23869_v55 }
 0x9de   : > { %v22580_v56 = vpack.c.bf16 %v11792_v6, %v11788_v4  ;;  %v11570_v46 = vadd.f32 %v22466_v15, %v10535_v43  ;;  %v10537_v0 = vpop.f32.mrb[153].mxu1  ;;  %v17621_v6 = vld [vmem:[%s23564_s11 + $0x140] ss:$8 sps:$4 sm:$0xff]   ;;  %v17626_v43 = vld [vmem:[%s23564_s11 + $0x154] ss:$8 sps:$4 sm:$0xff]  }
 0x9df   : > { %v22583_v5 = vpack.c.bf16 %v11793_v42, %v11789_v38  ;;  %v11571_v3 = vadd.f32 %v22471_v11, %v10537_v0  ;;  %v10539_v29 = vpop.f32.mrb[154].mxu1  ;;  %v11201_v44 = vpop.f32.mrb[8].mxu0  ;;  %12914 = vmatpush1.bf16.msra.mxu1 %v17612_v23 }
 0x9e0   : > { %v11574_v47 = vadd.f32 %v22466_v15, %v10539_v29  ;;  %v11540_v55 = vadd.f32 %v22522_v13, %v11201_v44  ;;  %v10541_v34 = vpop.f32.mrb[155].mxu1  ;;  %v11203_v7 = vpop.f32.mrb[9].mxu0  ;;  %12915 = vmatprep.subr.bf16.mxu1 %v17617_v22  ;;  %v11826_v60 = vmax.f32 %v11570_v46, 0.0 }
 0x9e1   : > { %v11575_v2 = vadd.f32 %v22471_v11, %v10541_v34  ;;  %v11541_v57 = vadd.f32 %v22530_v30, %v11203_v7  ;;  %v11205_v26 = vpop.f32.mrb[10].mxu0  ;;  %v11827_v21 = vmax.f32 %v11571_v3, 0.0 }
 0x9e2   : > { %v11830_v54 = vmax.f32 %v11574_v47, 0.0  ;;  %v11544_v40 = vadd.f32 %v22522_v13, %v11205_v26  ;;  %v11207_v53 = vpop.f32.mrb[11].mxu0  ;;  %12601 = vmatmul.mubr.bf16.gmra.mrb[4].mxu1 %v22493_v41  ;;  %v11796_v28 = vmax.f32 %v11540_v55, 0.0  ;;  %v17623_v41 = vld [vmem:[%s23564_s11 + $0x144] ss:$8 sps:$4 sm:$0xff]  }
 0x9e3   : > { %v11831_v45 = vmax.f32 %v11575_v2, 0.0  ;;  %v11545_v37 = vadd.f32 %v22530_v30, %v11207_v53  ;;  %12610 = vmatprep.mubr.bf16.mxu1 %v22508_v17  ;;  %12916 = vmatpush1.bf16.msra.mxu1 %v17615_v58  ;;  %v11797_v9 = vmax.f32 %v11541_v57, 0.0 }
 0x9e4   : > { %v22603_v50 = vpack.c.bf16 %v11830_v54, %v11826_v60  ;;  %v11800_v20 = vmax.f32 %v11544_v40, 0.0  ;;  %11470 = vmatmul.mubr.bf16.gmra.mrb[116].mxu0 %v23870_v32  ;;  %12917 = vmatprep.subr.bf16.mxu1 %v17620_v59  ;;  %v17624_v59 = vld [vmem:[%s23564_s11 + $0x150] ss:$8 sps:$4 sm:$0xff]  }
 0x9e5   : > { %v22609_v16 = vpack.c.bf16 %v11831_v45, %v11827_v21  ;;  %v11801_v17 = vmax.f32 %v11545_v37, 0.0  ;;  %v10545_v61 = vpop.f32.mrb[156].mxu1  ;;  %11479 = vmatprep.mubr.bf16.mxu0 %v20525_v62 }
 0x9e6   : > { %v22612_v39 = vpack.c.bf16 %v11800_v20, %v11796_v28  ;;  %v11578_v49 = vadd.f32 %v22466_v15, %v10545_v61  ;;  %v10547_v19 = vpop.f32.mrb[157].mxu1  ;;  %v17627_v20 = vld [vmem:[%s23564_s11 + $0x160] ss:$8 sps:$4 sm:$0xff]   ;;  %v17632_v61 = vld [vmem:[%s23564_s11 + $0x174] ss:$8 sps:$4 sm:$0xff]  }
 0x9e7   : > { %v22615_v52 = vpack.c.bf16 %v11801_v17, %v11797_v9  ;;  %v11579_v32 = vadd.f32 %v22471_v11, %v10547_v19  ;;  %v10549_v23 = vpop.f32.mrb[158].mxu1  ;;  %v11211_v4 = vpop.f32.mrb[12].mxu0  ;;  %12918 = vmatpush1.bf16.msra.mxu1 %v17618_v14 }
 0x9e8   : > { %v11582_v22 = vadd.f32 %v22466_v15, %v10549_v23  ;;  %v11548_v62 = vadd.f32 %v22522_v13, %v11211_v4  ;;  %v10551_v38 = vpop.f32.mrb[159].mxu1  ;;  %v11213_v42 = vpop.f32.mrb[13].mxu0  ;;  %12919 = vmatprep.subr.bf16.mxu1 %v17623_v41  ;;  %v11834_v29 = vmax.f32 %v11578_v49, 0.0 }
 0x9e9   : > { %v11583_v46 = vadd.f32 %v22471_v11, %v10551_v38  ;;  %v11549_v0 = vadd.f32 %v22530_v30, %v11213_v42  ;;  %v11215_v3 = vpop.f32.mrb[14].mxu0  ;;  %v11835_v55 = vmax.f32 %v11579_v32, 0.0 }
 0x9ea   : > { %v11838_v44 = vmax.f32 %v11582_v22, 0.0  ;;  %v11552_v58 = vadd.f32 %v22522_v13, %v11215_v3  ;;  %v11217_v47 = vpop.f32.mrb[15].mxu0  ;;  %12611 = vmatmul.mubr.bf16.gmra.mrb[8].mxu1 %v22505_v51  ;;  %v11804_v57 = vmax.f32 %v11548_v62, 0.0  ;;  %v17629_v51 = vld [vmem:[%s23564_s11 + $0x164] ss:$8 sps:$4 sm:$0xff]  }
 0x9eb   : > { %v11839_v34 = vmax.f32 %v11583_v46, 0.0  ;;  %v11553_v7 = vadd.f32 %v22530_v30, %v11217_v47  ;;  %12620 = vmatprep.mubr.bf16.mxu1 %v22524_v63  ;;  %12920 = vmatpush1.bf16.msra.mxu1 %v17621_v6  ;;  %v11805_v54 = vmax.f32 %v11549_v0, 0.0 }
 0x9ec   : > { %v22635_v2 = vpack.c.bf16 %v11838_v44, %v11834_v29  ;;  %v11808_v26 = vmax.f32 %v11552_v58, 0.0  ;;  %11480 = vmatmul.mubr.bf16.gmra.mrb[120].mxu0 %v20521_v27  ;;  %12921 = vmatprep.subr.bf16.mxu1 %v17626_v43  ;;  %v17630_v43 = vld [vmem:[%s23564_s11 + $0x170] ss:$8 sps:$4 sm:$0xff]  }
 0x9ed   : > { %v22641_v60 = vpack.c.bf16 %v11839_v34, %v11835_v55  ;;  %v11809_v63 = vmax.f32 %v11553_v7, 0.0  ;;  %v10555_v40 = vpop.f32.mrb[160].mxu1  ;;  %11489 = vmatprep.mubr.bf16.mxu0 %v20545_v35 }
 0x9ee   : > { %v22644_v53 = vpack.c.bf16 %v11808_v26, %v11804_v57  ;;  %v11586_v21 = vadd.f32 %v22466_v15, %v10555_v40  ;;  %v10557_v45 = vpop.f32.mrb[161].mxu1  ;;  %v17633_v26 = vld [vmem:[%s23564_s11 + $0x180] ss:$8 sps:$4 sm:$0xff]  }
 0x9ef   : > { %v22647_v37 = vpack.c.bf16 %v11809_v63, %v11805_v54  ;;  %v11587_v27 = vadd.f32 %v22471_v11, %v10557_v45  ;;  %v10559_v14 = vpop.f32.mrb[162].mxu1  ;;  %v11221_v28 = vpop.f32.mrb[16].mxu0  ;;  %12922 = vmatpush1.bf16.msra.mxu1 %v17624_v59 }
 0x9f0   : > { %v11590_v41 = vadd.f32 %v22466_v15, %v10559_v14  ;;  %v11556_v35 = vadd.f32 %v22522_v13, %v11221_v28  ;;  %v10561_v9 = vpop.f32.mrb[163].mxu1  ;;  %v11223_v17 = vpop.f32.mrb[17].mxu0  ;;  %12923 = vmatprep.subr.bf16.mxu1 %v17629_v51  ;;  %v11842_v23 = vmax.f32 %v11586_v21, 0.0  ;;  %v17638_v21 = vld [vmem:[%s23564_s11 + $0x194] ss:$8 sps:$4 sm:$0xff]  }
 0x9f1   : > { %v11591_v49 = vadd.f32 %v22471_v11, %v10561_v9  ;;  %v11557_v19 = vadd.f32 %v22530_v30, %v11223_v17  ;;  %v11225_v32 = vpop.f32.mrb[18].mxu0  ;;  %v11843_v62 = vmax.f32 %v11587_v27, 0.0 }
 0x9f2   : > { %v11846_v4 = vmax.f32 %v11590_v41, 0.0  ;;  %v11560_v6 = vadd.f32 %v22522_v13, %v11225_v32  ;;  %v11227_v22 = vpop.f32.mrb[19].mxu0  ;;  %12621 = vmatmul.mubr.bf16.gmra.mrb[12].mxu1 %v22517_v8  ;;  %v11812_v0 = vmax.f32 %v11556_v35, 0.0  ;;  %v17635_v8 = vld [vmem:[%s23564_s11 + $0x184] ss:$8 sps:$4 sm:$0xff]  }
 0x9f3   : > { %v11847_v38 = vmax.f32 %v11591_v49, 0.0  ;;  %v11561_v42 = vadd.f32 %v22530_v30, %v11227_v22  ;;  %12630 = vmatprep.mubr.bf16.mxu1 %v22545_v18  ;;  %12924 = vmatpush1.bf16.msra.mxu1 %v17627_v20  ;;  %v11813_v44 = vmax.f32 %v11557_v19, 0.0  ;;  %v17636_v49 = vld [vmem:[%s23564_s11 + $0x190] ss:$8 sps:$4 sm:$0xff]  }
 0x9f4   : > { %v22667_v46 = vpack.c.bf16 %v11846_v4, %v11842_v23  ;;  %v11816_v3 = vmax.f32 %v11560_v6, 0.0  ;;  %11490 = vmatmul.mubr.bf16.gmra.mrb[124].mxu0 %v20541_v24  ;;  %12925 = vmatprep.subr.bf16.mxu1 %v17632_v61 }
 0x9f5   : > { %v22673_v29 = vpack.c.bf16 %v11847_v38, %v11843_v62  ;;  %v11817_v18 = vmax.f32 %v11561_v42, 0.0  ;;  %v10565_v58 = vpop.f32.mrb[164].mxu1  ;;  %v17641_v42 = vld [vmem:[%s23564_s11 + $0x1a4] ss:$8 sps:$4 sm:$0xff]  }
 0x9f6   : > { %v22675_v47 = vpack.c.bf16 %v11816_v3, %v11812_v0  ;;  %v11594_v55 = vadd.f32 %v22466_v15, %v10565_v58  ;;  %v10567_v34 = vpop.f32.mrb[165].mxu1 }
 0x9f7   : > { %v22678_v7 = vpack.c.bf16 %v11817_v18, %v11813_v44  ;;  %v11595_v59 = vadd.f32 %v22471_v11, %v10567_v34  ;;  %v10569_v24 = vpop.f32.mrb[166].mxu1  ;;  %v11231_v57 = vpop.f32.mrb[20].mxu0  ;;  %12926 = vmatpush1.bf16.msra.mxu1 %v17630_v43  ;;  %v17639_v44 = vld [vmem:[%s23564_s11 + $0x1a0] ss:$8 sps:$4 sm:$0xff]  }
 0x9f8   : > { %v11598_v51 = vadd.f32 %v22466_v15, %v10569_v24  ;;  %v11564_v54 = vadd.f32 %v22522_v13, %v11231_v57  ;;  %v10571_v63 = vpop.f32.mrb[167].mxu1  ;;  %v11233_v40 = vpop.f32.mrb[21].mxu0  ;;  %12927 = vmatprep.subr.bf16.mxu1 %v17635_v8  ;;  %v11850_v28 = vmax.f32 %v11594_v55, 0.0 }
 0x9f9   : > { %v11599_v45 = vadd.f32 %v22471_v11, %v10571_v63  ;;  %v11565_v27 = vadd.f32 %v22530_v30, %v11233_v40  ;;  %v11235_v14 = vpop.f32.mrb[22].mxu0  ;;  %v11851_v9 = vmax.f32 %v11595_v59, 0.0 }
 0x9fa   : > { %v11854_v20 = vmax.f32 %v11598_v51, 0.0  ;;  %v11568_v41 = vadd.f32 %v22522_v13, %v11235_v14  ;;  %v11237_v35 = vpop.f32.mrb[23].mxu0  ;;  %12631 = vmatmul.mubr.bf16.gmra.mrb[16].mxu1 %v22542_v31  ;;  %v11820_v32 = vmax.f32 %v11564_v54, 0.0 }
 0x9fb   : > { %v11855_v17 = vmax.f32 %v11599_v45, 0.0  ;;  %v11569_v61 = vadd.f32 %v22530_v30, %v11237_v35  ;;  %12640 = vmatprep.mubr.bf16.mxu1 %v22577_v1  ;;  %12928 = vmatpush1.bf16.msra.mxu1 %v17633_v26  ;;  %v11821_v6 = vmax.f32 %v11565_v27, 0.0 }
 0x9fc   : > { %v22698_v19 = vpack.c.bf16 %v11854_v20, %v11850_v28  ;;  %v11824_v23 = vmax.f32 %v11568_v41, 0.0  ;;  %12929 = vmatprep.subr.bf16.mxu1 %v17638_v21 }
 0x9fd   : > { %v22700_v4 = vpack.c.bf16 %v11855_v17, %v11851_v9  ;;  %v11825_v31 = vmax.f32 %v11569_v61, 0.0  ;;  %v10575_v22 = vpop.f32.mrb[168].mxu1 }
 0x9fe   : > { %v22702_v62 = vpack.c.bf16 %v11824_v23, %v11820_v32  ;;  %v11602_v38 = vadd.f32 %v22466_v15, %v10575_v22  ;;  %v10577_v1 = vpop.f32.mrb[169].mxu1 }
 0x9ff   : > { %v22708_v43 = vpack.c.bf16 %v11825_v31, %v11821_v6  ;;  %v11603_v0 = vadd.f32 %v22471_v11, %v10577_v1  ;;  %v10579_v3 = vpop.f32.mrb[170].mxu1  ;;  %v11241_v8 = vpop.f32.mrb[24].mxu0  ;;  %12930 = vmatpush1.bf16.msra.mxu1 %v17636_v49 }
 0xa00   : > { %v11606_v18 = vadd.f32 %v22466_v15, %v10579_v3  ;;  %v11572_v58 = vadd.f32 %v22522_v13, %v11241_v8  ;;  %v10581_v55 = vpop.f32.mrb[171].mxu1  ;;  %v11243_v34 = vpop.f32.mrb[25].mxu0  ;;  %12931 = vmatprep.subr.bf16.mxu1 %v17641_v42  ;;  %v11858_v26 = vmax.f32 %v11602_v38, 0.0 }
 0xa01   : > { %v11607_v59 = vadd.f32 %v22471_v11, %v10581_v55  ;;  %v11573_v24 = vadd.f32 %v22530_v30, %v11243_v34  ;;  %v11245_v57 = vpop.f32.mrb[26].mxu0  ;;  %v11859_v40 = vmax.f32 %v11603_v0, 0.0 }
 0xa02   : > { %v11862_v51 = vmax.f32 %v11606_v18, 0.0  ;;  %v11576_v54 = vadd.f32 %v22522_v13, %v11245_v57  ;;  %v11247_v63 = vpop.f32.mrb[27].mxu0  ;;  %12641 = vmatmul.mubr.bf16.gmra.mrb[20].mxu1 %v22571_v10  ;;  %v11828_v14 = vmax.f32 %v11572_v58, 0.0 }
 0xa03   : > { %v11863_v21 = vmax.f32 %v11607_v59, 0.0  ;;  %v11577_v45 = vadd.f32 %v22530_v30, %v11247_v63  ;;  %12650 = vmatprep.mubr.bf16.mxu1 %v22609_v16  ;;  %12932 = vmatpush1.bf16.msra.mxu1 %v17639_v44  ;;  %v11829_v41 = vmax.f32 %v11573_v24, 0.0 }
 0xa04   : > { %v22722_v27 = vpack.c.bf16 %v11862_v51, %v11858_v26  ;;  %v11832_v28 = vmax.f32 %v11576_v54, 0.0 }
 0xa05   : > { %v22724_v20 = vpack.c.bf16 %v11863_v21, %v11859_v40  ;;  %v11833_v35 = vmax.f32 %v11577_v45, 0.0  ;;  %v10585_v9 = vpop.f32.mrb[172].mxu1  ;;  %v17642_v45 = vld [vmem:[%s23564_s11 + $0x1b0] ss:$8 sps:$4 sm:$0xff]  }
 0xa06   : > { %v22726_v17 = vpack.c.bf16 %v11832_v28, %v11828_v14  ;;  %v11610_v10 = vadd.f32 %v22466_v15, %v10585_v9  ;;  %v10587_v61 = vpop.f32.mrb[173].mxu1 }
 0xa07   : > { %v22729_v49 = vpack.c.bf16 %v11833_v35, %v11829_v41  ;;  %v11611_v32 = vadd.f32 %v22471_v11, %v10587_v61  ;;  %v10589_v16 = vpop.f32.mrb[174].mxu1  ;;  %v11251_v23 = vpop.f32.mrb[28].mxu0 }
 0xa08   : > { %v11614_v6 = vadd.f32 %v22466_v15, %v10589_v16  ;;  %v11580_v31 = vadd.f32 %v22522_v13, %v11251_v23  ;;  %v10591_v22 = vpop.f32.mrb[175].mxu1  ;;  %v11253_v38 = vpop.f32.mrb[29].mxu0  ;;  %v11866_v3 = vmax.f32 %v11610_v10, 0.0 }
 0xa09   : > { %v11615_v1 = vadd.f32 %v22471_v11, %v10591_v22  ;;  %v11581_v42 = vadd.f32 %v22530_v30, %v11253_v38  ;;  %v11255_v0 = vpop.f32.mrb[30].mxu0  ;;  %v11867_v58 = vmax.f32 %v11611_v32, 0.0 }
 0xa0a   : > { %v11870_v8 = vmax.f32 %v11614_v6, 0.0  ;;  %v11584_v44 = vadd.f32 %v22522_v13, %v11255_v0  ;;  %v11257_v18 = vpop.f32.mrb[31].mxu0  ;;  %12651 = vmatmul.mubr.bf16.gmra.mrb[24].mxu1 %v22603_v50  ;;  %v11836_v24 = vmax.f32 %v11580_v31, 0.0 }
 0xa0b   : > { %v11871_v55 = vmax.f32 %v11615_v1, 0.0  ;;  %v11585_v34 = vadd.f32 %v22530_v30, %v11257_v18  ;;  %12660 = vmatprep.mubr.bf16.mxu1 %v22641_v60  ;;  %v11837_v51 = vmax.f32 %v11581_v42, 0.0  ;;  %v17644_v60 = vld [vmem:[%s23564_s11 + $0x1b4] ss:$8 sps:$4 sm:$0xff]  }
 0xa0c   : > { %v22740_v59 = vpack.c.bf16 %v11870_v8, %v11866_v3  ;;  %v11840_v57 = vmax.f32 %v11584_v44, 0.0  ;;  %12933 = vmatprep.subr.bf16.mxu1 %v17644_v60 }
 0xa0d   : > { %v22742_v26 = vpack.c.bf16 %v11871_v55, %v11867_v58  ;;  %v11841_v54 = vmax.f32 %v11585_v34, 0.0  ;;  %v10595_v63 = vpop.f32.mrb[176].mxu1  ;;  %12934 = vmatpush1.bf16.msra.mxu1 %v17642_v45 }
 0xa0e   : > { %v22744_v40 = vpack.c.bf16 %v11840_v57, %v11836_v24  ;;  %v11618_v21 = vadd.f32 %v22466_v15, %v10595_v63  ;;  %v10597_v50 = vpop.f32.mrb[177].mxu1 }
 0xa0f   : > { %v22753_v14 = vpack.c.bf16 %v11841_v54, %v11837_v51  ;;  %v11619_v28 = vadd.f32 %v22471_v11, %v10597_v50  ;;  %v10599_v41 = vpop.f32.mrb[178].mxu1  ;;  %v11261_v35 = vpop.f32.mrb[32].mxu0 }
 0xa10   : > { %v11622_v9 = vadd.f32 %v22466_v15, %v10599_v41  ;;  %v11588_v10 = vadd.f32 %v22522_v13, %v11261_v35  ;;  %v10601_v61 = vpop.f32.mrb[179].mxu1  ;;  %v11263_v32 = vpop.f32.mrb[33].mxu0  ;;  %v11874_v31 = vmax.f32 %v11618_v21, 0.0 }
 0xa11   : > { %v11623_v16 = vadd.f32 %v22471_v11, %v10601_v61  ;;  %v11589_v23 = vadd.f32 %v22530_v30, %v11263_v32  ;;  %v11265_v6 = vpop.f32.mrb[34].mxu0  ;;  %v11875_v42 = vmax.f32 %v11619_v28, 0.0 }
 0xa12   : > { %v11878_v22 = vmax.f32 %v11622_v9, 0.0  ;;  %v11592_v38 = vadd.f32 %v22522_v13, %v11265_v6  ;;  %v11267_v1 = vpop.f32.mrb[35].mxu0  ;;  %12661 = vmatmul.mubr.bf16.gmra.mrb[28].mxu1 %v22635_v2  ;;  %v11844_v44 = vmax.f32 %v11588_v10, 0.0 }
 0xa13   : > { %v11879_v0 = vmax.f32 %v11623_v16, 0.0  ;;  %v11593_v3 = vadd.f32 %v22530_v30, %v11267_v1  ;;  %12670 = vmatprep.mubr.bf16.mxu1 %v22673_v29  ;;  %v11845_v55 = vmax.f32 %v11589_v23, 0.0 }
 0xa14   : > { %v22764_v8 = vpack.c.bf16 %v11878_v22, %v11874_v31  ;;  %v11848_v18 = vmax.f32 %v11592_v38, 0.0 }
 0xa15   : > { %v22766_v58 = vpack.c.bf16 %v11879_v0, %v11875_v42  ;;  %v11849_v34 = vmax.f32 %v11593_v3, 0.0  ;;  %v10605_v24 = vpop.f32.mrb[180].mxu1 }
 0xa16   : > { %v22768_v57 = vpack.c.bf16 %v11848_v18, %v11844_v44  ;;  %v11626_v51 = vadd.f32 %v22466_v15, %v10605_v24  ;;  %v10607_v2 = vpop.f32.mrb[181].mxu1 }
 0xa17   : > { %v22771_v54 = vpack.c.bf16 %v11849_v34, %v11845_v55  ;;  %v11627_v63 = vadd.f32 %v22471_v11, %v10607_v2  ;;  %v10609_v21 = vpop.f32.mrb[182].mxu1  ;;  %v11271_v29 = vpop.f32.mrb[36].mxu0  ;;  %v17645_v34 = vld [vmem:[%s23564_s11 + $0x1c0] ss:$8 sps:$4 sm:$0xff]  }
 0xa18   : > { %v11630_v50 = vadd.f32 %v22466_v15, %v10609_v21  ;;  %v11596_v45 = vadd.f32 %v22522_v13, %v11271_v29  ;;  %v10611_v60 = vpop.f32.mrb[183].mxu1  ;;  %v11273_v28 = vpop.f32.mrb[37].mxu0  ;;  %v11882_v10 = vmax.f32 %v11626_v51, 0.0 }
 0xa19   : > { %v11631_v41 = vadd.f32 %v22471_v11, %v10611_v60  ;;  %v11597_v35 = vadd.f32 %v22530_v30, %v11273_v28  ;;  %v11275_v9 = vpop.f32.mrb[38].mxu0  ;;  %v11883_v23 = vmax.f32 %v11627_v63, 0.0 }
 0xa1a   : > { %v11886_v61 = vmax.f32 %v11630_v50, 0.0  ;;  %v11600_v32 = vadd.f32 %v22522_v13, %v11275_v9  ;;  %v11277_v16 = vpop.f32.mrb[39].mxu0  ;;  %12671 = vmatmul.mubr.bf16.gmra.mrb[32].mxu1 %v22667_v46  ;;  %v11852_v38 = vmax.f32 %v11596_v45, 0.0 }
 0xa1b   : > { %v11887_v6 = vmax.f32 %v11631_v41, 0.0  ;;  %v11601_v31 = vadd.f32 %v22530_v30, %v11277_v16  ;;  %12680 = vmatprep.mubr.bf16.mxu1 %v22700_v4  ;;  %v11853_v0 = vmax.f32 %v11597_v35, 0.0  ;;  %v17647_v4 = vld [vmem:[%s23564_s11 + $0x1c4] ss:$8 sps:$4 sm:$0xff]  }
 0xa1c   : > { %v22782_v22 = vpack.c.bf16 %v11886_v61, %v11882_v10  ;;  %v11856_v1 = vmax.f32 %v11600_v32, 0.0  ;;  %12935 = vmatprep.subr.bf16.mxu1 %v17647_v4 }
 0xa1d   : > { %v22784_v42 = vpack.c.bf16 %v11887_v6, %v11883_v23  ;;  %v11857_v3 = vmax.f32 %v11601_v31, 0.0  ;;  %v10615_v44 = vpop.f32.mrb[184].mxu1  ;;  %12936 = vmatpush1.bf16.msra.mxu1 %v17645_v34 }
 0xa1e   : > { %v22786_v18 = vpack.c.bf16 %v11856_v1, %v11852_v38  ;;  %v11634_v55 = vadd.f32 %v22466_v15, %v10615_v44  ;;  %v10617_v46 = vpop.f32.mrb[185].mxu1 }
 0xa1f   : > { %v22795_v24 = vpack.c.bf16 %v11857_v3, %v11853_v0  ;;  %v11635_v51 = vadd.f32 %v22471_v11, %v10617_v46  ;;  %v10619_v2 = vpop.f32.mrb[186].mxu1  ;;  %v11281_v63 = vpop.f32.mrb[40].mxu0 }
 0xa20   : > { %v11638_v21 = vadd.f32 %v22466_v15, %v10619_v2  ;;  %v11604_v29 = vadd.f32 %v22522_v13, %v11281_v63  ;;  %v10621_v50 = vpop.f32.mrb[187].mxu1  ;;  %v11283_v45 = vpop.f32.mrb[41].mxu0  ;;  %v11890_v35 = vmax.f32 %v11634_v55, 0.0 }
 0xa21   : > { %v11639_v60 = vadd.f32 %v22471_v11, %v10621_v50  ;;  %v11605_v28 = vadd.f32 %v22530_v30, %v11283_v45  ;;  %v11285_v41 = vpop.f32.mrb[42].mxu0  ;;  %v11891_v32 = vmax.f32 %v11635_v51, 0.0 }
 0xa22   : > { %v11894_v9 = vmax.f32 %v11638_v21, 0.0  ;;  %v11608_v10 = vadd.f32 %v22522_v13, %v11285_v41  ;;  %v11287_v61 = vpop.f32.mrb[43].mxu0  ;;  %12681 = vmatmul.mubr.bf16.gmra.mrb[36].mxu1 %v22698_v19  ;;  %v11860_v31 = vmax.f32 %v11604_v29, 0.0 }
 0xa23   : > { %v11895_v16 = vmax.f32 %v11639_v60, 0.0  ;;  %v11609_v23 = vadd.f32 %v22530_v30, %v11287_v61  ;;  %12690 = vmatprep.mubr.bf16.mxu1 %v22724_v20  ;;  %v11861_v0 = vmax.f32 %v11605_v28, 0.0 }
 0xa24   : > { %v22806_v6 = vpack.c.bf16 %v11894_v9, %v11890_v35  ;;  %v11864_v38 = vmax.f32 %v11608_v10, 0.0 }
 0xa25   : > { %v22808_v1 = vpack.c.bf16 %v11895_v16, %v11891_v32  ;;  %v11865_v3 = vmax.f32 %v11609_v23, 0.0  ;;  %v10625_v44 = vpop.f32.mrb[188].mxu1 }
 0xa26   : > { %v22810_v55 = vpack.c.bf16 %v11864_v38, %v11860_v31  ;;  %v11642_v46 = vadd.f32 %v22466_v15, %v10625_v44  ;;  %v10627_v19 = vpop.f32.mrb[189].mxu1 }
 0xa27   : > { %v22813_v34 = vpack.c.bf16 %v11865_v3, %v11861_v0  ;;  %v11643_v4 = vadd.f32 %v22471_v11, %v10627_v19  ;;  %v10629_v51 = vpop.f32.mrb[190].mxu1  ;;  %v11291_v20 = vpop.f32.mrb[44].mxu0 }
 0xa28   : > { %v11646_v2 = vadd.f32 %v22466_v15, %v10629_v51  ;;  %v11612_v63 = vadd.f32 %v22522_v13, %v11291_v20  ;;  %v10631_v21 = vpop.f32.mrb[191].mxu1  ;;  %v11293_v29 = vpop.f32.mrb[45].mxu0  ;;  %v11898_v28 = vmax.f32 %v11642_v46, 0.0 }
 0xa29   : > { %v11647_v50 = vadd.f32 %v22471_v11, %v10631_v21  ;;  %v11613_v45 = vadd.f32 %v22530_v30, %v11293_v29  ;;  %v11295_v60 = vpop.f32.mrb[46].mxu0  ;;  %v11899_v10 = vmax.f32 %v11643_v4, 0.0  ;;  %v17648_v4 = vld [vmem:[%s23564_s11 + $0x1d0] ss:$8 sps:$4 sm:$0xff]  }
 0xa2a   : > { %v11902_v41 = vmax.f32 %v11646_v2, 0.0  ;;  %v11616_v35 = vadd.f32 %v22522_v13, %v11295_v60  ;;  %v11297_v9 = vpop.f32.mrb[47].mxu0  ;;  %12691 = vmatmul.mubr.bf16.gmra.mrb[40].mxu1 %v22722_v27  ;;  %v11868_v23 = vmax.f32 %v11612_v63, 0.0 }
 0xa2b   : > { %v11903_v61 = vmax.f32 %v11647_v50, 0.0  ;;  %v11617_v32 = vadd.f32 %v22530_v30, %v11297_v9  ;;  %12700 = vmatprep.mubr.bf16.mxu1 %v22742_v26  ;;  %v11869_v0 = vmax.f32 %v11613_v45, 0.0  ;;  %v17650_v26 = vld [vmem:[%s23564_s11 + $0x1d4] ss:$8 sps:$4 sm:$0xff]  }
 0xa2c   : > { %v22824_v16 = vpack.c.bf16 %v11902_v41, %v11898_v28  ;;  %v11872_v31 = vmax.f32 %v11616_v35, 0.0  ;;  %12937 = vmatprep.subr.bf16.mxu1 %v17650_v26 }
 0xa2d   : > { %v22826_v38 = vpack.c.bf16 %v11903_v61, %v11899_v10  ;;  %v11873_v3 = vmax.f32 %v11617_v32, 0.0  ;;  %v10635_v44 = vpop.f32.mrb[192].mxu1  ;;  %12938 = vmatpush1.bf16.msra.mxu1 %v17648_v4 }
 0xa2e   : > { %v22828_v46 = vpack.c.bf16 %v11872_v31, %v11868_v23  ;;  %v11650_v19 = vadd.f32 %v22466_v15, %v10635_v44  ;;  %v10637_v27 = vpop.f32.mrb[193].mxu1 }
 0xa2f   : > { %v22837_v51 = vpack.c.bf16 %v11873_v3, %v11869_v0  ;;  %v11651_v20 = vadd.f32 %v22471_v11, %v10637_v27  ;;  %v10639_v2 = vpop.f32.mrb[194].mxu1  ;;  %v11301_v63 = vpop.f32.mrb[48].mxu0 }
 0xa30   : > { %v11654_v21 = vadd.f32 %v22466_v15, %v10639_v2  ;;  %v11620_v29 = vadd.f32 %v22522_v13, %v11301_v63  ;;  %v10641_v50 = vpop.f32.mrb[195].mxu1  ;;  %v11303_v45 = vpop.f32.mrb[49].mxu0  ;;  %v11906_v35 = vmax.f32 %v11650_v19, 0.0 }
 0xa31   : > { %v11655_v60 = vadd.f32 %v22471_v11, %v10641_v50  ;;  %v11621_v28 = vadd.f32 %v22530_v30, %v11303_v45  ;;  %v11305_v41 = vpop.f32.mrb[50].mxu0  ;;  %v11907_v32 = vmax.f32 %v11651_v20, 0.0 }
 0xa32   : > { %v11910_v9 = vmax.f32 %v11654_v21, 0.0  ;;  %v11624_v10 = vadd.f32 %v22522_v13, %v11305_v41  ;;  %v11307_v61 = vpop.f32.mrb[51].mxu0  ;;  %12701 = vmatmul.mubr.bf16.gmra.mrb[44].mxu1 %v22740_v59  ;;  %v11876_v3 = vmax.f32 %v11620_v29, 0.0 }
 0xa33   : > { %v11911_v23 = vmax.f32 %v11655_v60, 0.0  ;;  %v11625_v31 = vadd.f32 %v22530_v30, %v11307_v61  ;;  %12710 = vmatprep.mubr.bf16.mxu1 %v22766_v58  ;;  %v11877_v4 = vmax.f32 %v11621_v28, 0.0 }
 0xa34   : > { %v22848_v0 = vpack.c.bf16 %v11910_v9, %v11906_v35  ;;  %v11880_v44 = vmax.f32 %v11624_v10, 0.0 }
 0xa35   : > { %v22850_v27 = vpack.c.bf16 %v11911_v23, %v11907_v32  ;;  %v11881_v19 = vmax.f32 %v11625_v31, 0.0  ;;  %v10645_v26 = vpop.f32.mrb[196].mxu1 }
 0xa36   : > { %v22852_v2 = vpack.c.bf16 %v11880_v44, %v11876_v3  ;;  %v11658_v63 = vadd.f32 %v22466_v15, %v10645_v26  ;;  %v10647_v59 = vpop.f32.mrb[197].mxu1 }
 0xa37   : > { %v22855_v20 = vpack.c.bf16 %v11881_v19, %v11877_v4  ;;  %v11659_v21 = vadd.f32 %v22471_v11, %v10647_v59  ;;  %v10649_v50 = vpop.f32.mrb[198].mxu1  ;;  %v11311_v58 = vpop.f32.mrb[52].mxu0  ;;  %v17651_v4 = vld [vmem:[%s23566_s13] sm:$0xff]  }
 0xa38   : > { %v11662_v45 = vadd.f32 %v22466_v15, %v10649_v50  ;;  %v11628_v29 = vadd.f32 %v22522_v13, %v11311_v58  ;;  %v10651_v60 = vpop.f32.mrb[199].mxu1  ;;  %v11313_v41 = vpop.f32.mrb[53].mxu0  ;;  %v11914_v10 = vmax.f32 %v11658_v63, 0.0  ;;  %13592 = vmatpush1.bf16.msra.mxu0 %v17651_v4 }
 0xa39   : > { %v11663_v28 = vadd.f32 %v22471_v11, %v10651_v60  ;;  %v11629_v35 = vadd.f32 %v22530_v30, %v11313_v41  ;;  %v11315_v9 = vpop.f32.mrb[54].mxu0  ;;  %v11915_v31 = vmax.f32 %v11659_v21, 0.0  ;;  %13593 = vmatprep.subr.bf16.mxu0 %v23796_v25 }
 0xa3a   : > { %v11918_v61 = vmax.f32 %v11662_v45, 0.0  ;;  %v11632_v32 = vadd.f32 %v22522_v13, %v11315_v9  ;;  %v11317_v23 = vpop.f32.mrb[55].mxu0  ;;  %12711 = vmatmul.mubr.bf16.gmra.mrb[48].mxu1 %v22764_v8  ;;  %v11884_v26 = vmax.f32 %v11628_v29, 0.0  ;;  %v17654_v29 = vld [vmem:[%s23564_s11 + $0x1e4] ss:$8 sps:$4 sm:$0xff]  }
 0xa3b   : > { %v11919_v3 = vmax.f32 %v11663_v28, 0.0  ;;  %v11633_v44 = vadd.f32 %v22530_v30, %v11317_v23  ;;  %12720 = vmatprep.mubr.bf16.mxu1 %v22784_v42  ;;  %v11885_v50 = vmax.f32 %v11629_v35, 0.0  ;;  %v17652_v42 = vld [vmem:[%s23564_s11 + $0x1e0] ss:$8 sps:$4 sm:$0xff]   ;;  %12939 = vmatprep.subr.bf16.mxu1 %v17654_v29 }
 0xa3c   : > { %v22869_v19 = vpack.c.bf16 %v11918_v61, %v11914_v10  ;;  %v11888_v63 = vmax.f32 %v11632_v32, 0.0  ;;  %12940 = vmatpush1.bf16.msra.mxu1 %v17652_v42 }
 0xa3d   : > { %v22871_v59 = vpack.c.bf16 %v11919_v3, %v11915_v31  ;;  %v11889_v58 = vmax.f32 %v11633_v44, 0.0  ;;  %v10655_v45 = vpop.f32.mrb[200].mxu1 }
 0xa3e   : > { %v22873_v8 = vpack.c.bf16 %v11888_v63, %v11884_v26  ;;  %v11666_v21 = vadd.f32 %v22466_v15, %v10655_v45  ;;  %v10657_v60 = vpop.f32.mrb[201].mxu1 }
 0xa3f   : > { %v22883_v41 = vpack.c.bf16 %v11889_v58, %v11885_v50  ;;  %v11667_v28 = vadd.f32 %v22471_v11, %v10657_v60  ;;  %v10659_v35 = vpop.f32.mrb[202].mxu1  ;;  %v11321_v9 = vpop.f32.mrb[56].mxu0 }
 0xa40   : > { %v11670_v10 = vadd.f32 %v22466_v15, %v10659_v35  ;;  %v11636_v61 = vadd.f32 %v22522_v13, %v11321_v9  ;;  %v10661_v32 = vpop.f32.mrb[203].mxu1  ;;  %v11323_v23 = vpop.f32.mrb[57].mxu0  ;;  %v11922_v4 = vmax.f32 %v11666_v21, 0.0 }
 0xa41   : > { %v11671_v31 = vadd.f32 %v22471_v11, %v10661_v32  ;;  %v11637_v3 = vadd.f32 %v22530_v30, %v11323_v23  ;;  %v11325_v44 = vpop.f32.mrb[58].mxu0  ;;  %v11923_v58 = vmax.f32 %v11667_v28, 0.0 }
 0xa42   : > { %v11926_v26 = vmax.f32 %v11670_v10, 0.0  ;;  %v11640_v63 = vadd.f32 %v22522_v13, %v11325_v44  ;;  %v11327_v50 = vpop.f32.mrb[59].mxu0  ;;  %12721 = vmatmul.mubr.bf16.gmra.mrb[52].mxu1 %v22782_v22  ;;  %v11892_v35 = vmax.f32 %v11636_v61, 0.0 }
 0xa43   : > { %v11927_v45 = vmax.f32 %v11671_v31, 0.0  ;;  %v11641_v60 = vadd.f32 %v22530_v30, %v11327_v50  ;;  %12730 = vmatprep.mubr.bf16.mxu1 %v22808_v1  ;;  %v11893_v42 = vmax.f32 %v11637_v3, 0.0 }
 0xa44   : > { %v22894_v29 = vpack.c.bf16 %v11926_v26, %v11922_v4  ;;  %v11896_v9 = vmax.f32 %v11640_v63, 0.0 }
 0xa45   : > { %v22896_v32 = vpack.c.bf16 %v11927_v45, %v11923_v58  ;;  %v11897_v21 = vmax.f32 %v11641_v60, 0.0  ;;  %v10665_v10 = vpop.f32.mrb[204].mxu1 }
 0xa46   : > { %v22898_v23 = vpack.c.bf16 %v11896_v9, %v11892_v35  ;;  %v11674_v44 = vadd.f32 %v22466_v15, %v10665_v10  ;;  %v10667_v22 = vpop.f32.mrb[205].mxu1 }
 0xa47   : > { %v22901_v28 = vpack.c.bf16 %v11897_v21, %v11893_v42  ;;  %v11675_v31 = vadd.f32 %v22471_v11, %v10667_v22  ;;  %v10669_v50 = vpop.f32.mrb[206].mxu1  ;;  %v11331_v1 = vpop.f32.mrb[60].mxu0 }
 0xa48   : > { %v11678_v4 = vadd.f32 %v22466_v15, %v10669_v50  ;;  %v11644_v61 = vadd.f32 %v22522_v13, %v11331_v1  ;;  %v10671_v26 = vpop.f32.mrb[207].mxu1  ;;  %v11333_v63 = vpop.f32.mrb[61].mxu0  ;;  %v11930_v60 = vmax.f32 %v11674_v44, 0.0  ;;  %v17655_v50 = vld [vmem:[%s23566_s13 + $0x8] sm:$0xff]  }
 0xa49   : > { %v11679_v3 = vadd.f32 %v22471_v11, %v10671_v26  ;;  %v11645_v58 = vadd.f32 %v22530_v30, %v11333_v63  ;;  %v11335_v45 = vpop.f32.mrb[62].mxu0  ;;  %v11931_v21 = vmax.f32 %v11675_v31, 0.0  ;;  %13594 = vmatpush1.bf16.msra.mxu0 %v17655_v50 }
 0xa4a   : > { %v11934_v35 = vmax.f32 %v11678_v4, 0.0  ;;  %v11648_v9 = vadd.f32 %v22522_v13, %v11335_v45  ;;  %v11337_v42 = vpop.f32.mrb[63].mxu0  ;;  %12731 = vmatmul.mubr.bf16.gmra.mrb[56].mxu1 %v22806_v6  ;;  %v11900_v26 = vmax.f32 %v11644_v61, 0.0  ;;  %v17658_v61 = vld [vmem:[%s23564_s11 + $0x1f4] ss:$8 sps:$4 sm:$0xff]   ;;  %13595 = vmatprep.subr.bf16.mxu0 %v23796_v25 }
 0xa4b   : > { %v11935_v10 = vmax.f32 %v11679_v3, 0.0  ;;  %v11649_v22 = vadd.f32 %v22530_v30, %v11337_v42  ;;  %12740 = vmatprep.mubr.bf16.mxu1 %v22826_v38  ;;  %v11901_v63 = vmax.f32 %v11645_v58, 0.0  ;;  %v17656_v38 = vld [vmem:[%s23564_s11 + $0x1f0] ss:$8 sps:$4 sm:$0xff]   ;;  %12941 = vmatprep.subr.bf16.mxu1 %v17658_v61 }
 0xa4c   : > { %v22915_v1 = vpack.c.bf16 %v11934_v35, %v11930_v60  ;;  %v11904_v44 = vmax.f32 %v11648_v9, 0.0  ;;  %12942 = vmatpush1.bf16.msra.mxu1 %v17656_v38  ;;  %v17659_v61 = vld [vmem:[%s23566_s13 + $0x10] sm:$0xff]  }
 0xa4d   : > { %v22917_v4 = vpack.c.bf16 %v11935_v10, %v11931_v21  ;;  %v11905_v45 = vmax.f32 %v11649_v22, 0.0  ;;  %v10675_v48 = vpop.f32.mrb[208].mxu1  ;;  %13596 = vmatpush1.bf16.msra.mxu0 %v17659_v61 }
 0xa4e   : > { %v22919_v6 = vpack.c.bf16 %v11904_v44, %v11900_v26  ;;  %v11682_v31 = vadd.f32 %v22466_v15, %v10675_v48  ;;  %v10677_v3 = vpop.f32.mrb[209].mxu1  ;;  %13597 = vmatprep.subr.bf16.mxu0 %v23796_v25 }
 0xa4f   : > { %v22929_v60 = vpack.c.bf16 %v11905_v45, %v11901_v63  ;;  %v11683_v58 = vadd.f32 %v22471_v11, %v10677_v3  ;;  %v10679_v35 = vpop.f32.mrb[210].mxu1  ;;  %v11341_v9 = vpop.f32.mrb[64].mxu0 }
 0xa50   : > { %23874 = vst [vmem:[#allocation7_spill] sm:$0xff] %v22919_v6  ;;  %v11686_v42 = vadd.f32 %v22466_v15, %v10679_v35  ;;  %v11652_v48 = vadd.f32 %v22522_v13, %v11341_v9  ;;  %v10681_v21 = vpop.f32.mrb[211].mxu1  ;;  %v11343_v10 = vpop.f32.mrb[65].mxu0  ;;  %v11938_v44 = vmax.f32 %v11682_v31, 0.0 }
 0xa51   : > { %23875 = vst [vmem:[#allocation6_spill] sm:$0xff] %v22929_v60  ;;  %v11687_v22 = vadd.f32 %v22471_v11, %v10681_v21  ;;  %v11653_v50 = vadd.f32 %v22530_v30, %v11343_v10  ;;  %v11345_v26 = vpop.f32.mrb[66].mxu0  ;;  %v11939_v33 = vmax.f32 %v11683_v58, 0.0 }
 0xa52   : > { %v11942_v63 = vmax.f32 %v11686_v42, 0.0  ;;  %v11656_v45 = vadd.f32 %v22522_v13, %v11345_v26  ;;  %v11347_v3 = vpop.f32.mrb[67].mxu0  ;;  %12741 = vmatmul.mubr.bf16.gmra.mrb[60].mxu1 %v22824_v16  ;;  %v11908_v38 = vmax.f32 %v11652_v48, 0.0 }
 0xa53   : > { %v11943_v35 = vmax.f32 %v11687_v22, 0.0  ;;  %v11657_v9 = vadd.f32 %v22530_v30, %v11347_v3  ;;  %12750 = vmatprep.mubr.bf16.mxu1 %v22850_v27  ;;  %v11909_v10 = vmax.f32 %v11653_v50, 0.0 }
 0xa54   : > { %v22943_v21 = vpack.c.bf16 %v11942_v63, %v11938_v44  ;;  %v11912_v31 = vmax.f32 %v11656_v45, 0.0 }
 0xa55   : > { %v22945_v42 = vpack.c.bf16 %v11943_v35, %v11939_v33  ;;  %v11913_v26 = vmax.f32 %v11657_v9, 0.0  ;;  %v10685_v6 = vpop.f32.mrb[212].mxu1 }
 0xa56   : > { %v22947_v16 = vpack.c.bf16 %v11912_v31, %v11908_v38  ;;  %v11690_v58 = vadd.f32 %v22466_v15, %v10685_v6  ;;  %v10687_v22 = vpop.f32.mrb[213].mxu1 }
 0xa57   : > { %v22951_v27 = vpack.c.bf16 %v11913_v26, %v11909_v10  ;;  %v11691_v44 = vadd.f32 %v22471_v11, %v10687_v22  ;;  %v10689_v63 = vpop.f32.mrb[214].mxu1  ;;  %v11351_v48 = vpop.f32.mrb[68].mxu0 }
 0xa58   : > { %23876 = vst [vmem:[#allocation9_spill] sm:$0xff] %v22947_v16  ;;  %v11694_v33 = vadd.f32 %v22466_v15, %v10689_v63  ;;  %v11660_v50 = vadd.f32 %v22522_v13, %v11351_v48  ;;  %v10691_v45 = vpop.f32.mrb[215].mxu1  ;;  %v11353_v3 = vpop.f32.mrb[69].mxu0  ;;  %v11946_v61 = vmax.f32 %v11690_v58, 0.0 }
 0xa59   : > { %23877 = vst [vmem:[#allocation8_spill] sm:$0xff] %v22951_v27  ;;  %v11695_v35 = vadd.f32 %v22471_v11, %v10691_v45  ;;  %v11661_v9 = vadd.f32 %v22530_v30, %v11353_v3  ;;  %v11355_v6 = vpop.f32.mrb[70].mxu0  ;;  %v11947_v26 = vmax.f32 %v11691_v44, 0.0 }
 0xa5a   : > { %v11950_v38 = vmax.f32 %v11694_v33, 0.0  ;;  %v11664_v31 = vadd.f32 %v22522_v13, %v11355_v6  ;;  %v11357_v10 = vpop.f32.mrb[71].mxu0  ;;  %12751 = vmatmul.mubr.bf16.gmra.mrb[64].mxu1 %v22848_v0  ;;  %v11916_v16 = vmax.f32 %v11660_v50, 0.0 }
 0xa5b   : > { %v11951_v22 = vmax.f32 %v11695_v35, 0.0  ;;  %v11665_v63 = vadd.f32 %v22530_v30, %v11357_v10  ;;  %12760 = vmatprep.mubr.bf16.mxu1 %v22871_v59  ;;  %v11917_v3 = vmax.f32 %v11661_v9, 0.0 }
 0xa5c   : > { %v22962_v48 = vpack.c.bf16 %v11950_v38, %v11946_v61  ;;  %v11920_v45 = vmax.f32 %v11664_v31, 0.0 }
 0xa5d   : > { %v22964_v27 = vpack.c.bf16 %v11951_v22, %v11947_v26  ;;  %v11921_v58 = vmax.f32 %v11665_v63, 0.0  ;;  %v10695_v33 = vpop.f32.mrb[216].mxu1 }
 0xa5e   : > { %v22966_v60 = vpack.c.bf16 %v11920_v45, %v11916_v16  ;;  %v11698_v6 = vadd.f32 %v22466_v15, %v10695_v33  ;;  %v10697_v0 = vpop.f32.mrb[217].mxu1 }
 0xa5f   : > { %v22969_v44 = vpack.c.bf16 %v11921_v58, %v11917_v3  ;;  %v11699_v35 = vadd.f32 %v22471_v11, %v10697_v0  ;;  %v10699_v10 = vpop.f32.mrb[218].mxu1  ;;  %v11361_v59 = vpop.f32.mrb[72].mxu0 }
 0xa60   : > { %23878 = vst [vmem:[#allocation11_spill] sm:$0xff] %v22966_v60  ;;  %v11702_v61 = vadd.f32 %v22466_v15, %v10699_v10  ;;  %v11668_v50 = vadd.f32 %v22522_v13, %v11361_v59  ;;  %v10701_v38 = vpop.f32.mrb[219].mxu1  ;;  %v11363_v31 = vpop.f32.mrb[73].mxu0  ;;  %v11954_v22 = vmax.f32 %v11698_v6, 0.0  ;;  %v17660_v10 = vld [vmem:[%s23566_s13 + $0x18] sm:$0xff]  }
 0xa61   : > { %23879 = vst [vmem:[#allocation10_spill] sm:$0xff] %v22969_v44  ;;  %v11703_v9 = vadd.f32 %v22471_v11, %v10701_v38  ;;  %v11669_v16 = vadd.f32 %v22530_v30, %v11363_v31  ;;  %v11365_v26 = vpop.f32.mrb[74].mxu0  ;;  %v11955_v58 = vmax.f32 %v11699_v35, 0.0  ;;  %13598 = vmatpush1.bf16.msra.mxu0 %v17660_v10 }
 0xa62   : > { %v11958_v63 = vmax.f32 %v11702_v61, 0.0  ;;  %v11672_v45 = vadd.f32 %v22522_v13, %v11365_v26  ;;  %v11367_v3 = vpop.f32.mrb[75].mxu0  ;;  %12761 = vmatmul.mubr.bf16.gmra.mrb[68].mxu1 %v22869_v19  ;;  %v11924_v38 = vmax.f32 %v11668_v50, 0.0  ;;  %13599 = vmatprep.subr.bf16.mxu0 %v23796_v25 }
 0xa63   : > { %v11959_v33 = vmax.f32 %v11703_v9, 0.0  ;;  %v11673_v0 = vadd.f32 %v22530_v30, %v11367_v3  ;;  %12770 = vmatprep.mubr.bf16.mxu1 %v22896_v32  ;;  %v11925_v31 = vmax.f32 %v11669_v16, 0.0 }
 0xa64   : > { %v22983_v59 = vpack.c.bf16 %v11958_v63, %v11954_v22  ;;  %v11928_v6 = vmax.f32 %v11672_v45, 0.0 }
 0xa65   : > { %v22985_v61 = vpack.c.bf16 %v11959_v33, %v11955_v58  ;;  %v11929_v26 = vmax.f32 %v11673_v0, 0.0  ;;  %v10705_v60 = vpop.f32.mrb[220].mxu1 }
 0xa66   : > { %v22987_v19 = vpack.c.bf16 %v11928_v6, %v11924_v38  ;;  %v11706_v35 = vadd.f32 %v22466_v15, %v10705_v60  ;;  %v10707_v9 = vpop.f32.mrb[221].mxu1 }
 0xa67   : > { %v22991_v32 = vpack.c.bf16 %v11929_v26, %v11925_v31  ;;  %v11707_v22 = vadd.f32 %v22471_v11, %v10707_v9  ;;  %v10709_v63 = vpop.f32.mrb[222].mxu1  ;;  %v11371_v50 = vpop.f32.mrb[76].mxu0 }
 0xa68   : > { %23880 = vst [vmem:[#allocation13_spill] sm:$0xff] %v22987_v19  ;;  %v11710_v45 = vadd.f32 %v22466_v15, %v10709_v63  ;;  %v11676_v16 = vadd.f32 %v22522_v13, %v11371_v50  ;;  %v10711_v3 = vpop.f32.mrb[223].mxu1  ;;  %v11373_v58 = vpop.f32.mrb[77].mxu0  ;;  %v11962_v10 = vmax.f32 %v11706_v35, 0.0 }
 0xa69   : > { %23881 = vst [vmem:[#allocation12_spill] sm:$0xff] %v22991_v32  ;;  %v11711_v33 = vadd.f32 %v22471_v11, %v10711_v3  ;;  %v11677_v0 = vadd.f32 %v22530_v30, %v11373_v58  ;;  %v11375_v60 = vpop.f32.mrb[78].mxu0  ;;  %v11963_v26 = vmax.f32 %v11707_v22, 0.0 }
 0xa6a   : > { %v11966_v38 = vmax.f32 %v11710_v45, 0.0  ;;  %v11680_v6 = vadd.f32 %v22522_v13, %v11375_v60  ;;  %v11377_v31 = vpop.f32.mrb[79].mxu0  ;;  %12771 = vmatmul.mubr.bf16.gmra.mrb[72].mxu1 %v22894_v29  ;;  %v11932_v19 = vmax.f32 %v11676_v16, 0.0 }
 0xa6b   : > { %v11967_v9 = vmax.f32 %v11711_v33, 0.0  ;;  %v11681_v63 = vadd.f32 %v22530_v30, %v11377_v31  ;;  %12780 = vmatprep.mubr.bf16.mxu1 %v22917_v4  ;;  %v11933_v58 = vmax.f32 %v11677_v0, 0.0 }
 0xa6c   : > { %v23002_v50 = vpack.c.bf16 %v11966_v38, %v11962_v10  ;;  %v11936_v3 = vmax.f32 %v11680_v6, 0.0 }
 0xa6d   : > { %v23004_v32 = vpack.c.bf16 %v11967_v9, %v11963_v26  ;;  %v11937_v35 = vmax.f32 %v11681_v63, 0.0  ;;  %v10715_v45 = vpop.f32.mrb[224].mxu1 }
 0xa6e   : > { %v23006_v44 = vpack.c.bf16 %v11936_v3, %v11932_v19  ;;  %v11714_v60 = vadd.f32 %v22466_v15, %v10715_v45  ;;  %v10717_v29 = vpop.f32.mrb[225].mxu1 }
 0xa6f   : > { %v23009_v22 = vpack.c.bf16 %v11937_v35, %v11933_v58  ;;  %v11715_v33 = vadd.f32 %v22471_v11, %v10717_v29  ;;  %v10719_v31 = vpop.f32.mrb[226].mxu1  ;;  %v11381_v4 = vpop.f32.mrb[80].mxu0 }
 0xa70   : > { %23882 = vst [vmem:[#allocation16_spill] sm:$0xff] %v23006_v44  ;;  %v11718_v10 = vadd.f32 %v22466_v15, %v10719_v31  ;;  %v11684_v16 = vadd.f32 %v22522_v13, %v11381_v4  ;;  %v10721_v38 = vpop.f32.mrb[227].mxu1  ;;  %v11383_v6 = vpop.f32.mrb[81].mxu0  ;;  %v11970_v9 = vmax.f32 %v11714_v60, 0.0  ;;  %v17661_v31 = vld [vmem:[%s23566_s13 + $0x20] sm:$0xff]  }
 0xa71   : > { %23883 = vst [vmem:[#allocation15_spill] sm:$0xff] %v23009_v22  ;;  %v11719_v0 = vadd.f32 %v22471_v11, %v10721_v38  ;;  %v11685_v19 = vadd.f32 %v22530_v30, %v11383_v6  ;;  %v11385_v26 = vpop.f32.mrb[82].mxu0  ;;  %v11971_v35 = vmax.f32 %v11715_v33, 0.0  ;;  %13600 = vmatpush1.bf16.msra.mxu0 %v17661_v31 }
 0xa72   : > { %v11974_v63 = vmax.f32 %v11718_v10, 0.0  ;;  %v11688_v3 = vadd.f32 %v22522_v13, %v11385_v26  ;;  %v11387_v58 = vpop.f32.mrb[83].mxu0  ;;  %12781 = vmatmul.mubr.bf16.gmra.mrb[76].mxu1 %v22915_v1  ;;  %v11940_v38 = vmax.f32 %v11684_v16, 0.0  ;;  %13601 = vmatprep.subr.bf16.mxu0 %v23796_v25 }
 0xa73   : > { %v11975_v45 = vmax.f32 %v11719_v0, 0.0  ;;  %v11689_v29 = vadd.f32 %v22530_v30, %v11387_v58  ;;  %12790 = vmatprep.mubr.bf16.mxu1 %v22945_v42  ;;  %v11941_v6 = vmax.f32 %v11685_v19, 0.0 }
 0xa74   : > { %v23023_v4 = vpack.c.bf16 %v11974_v63, %v11970_v9  ;;  %v11944_v60 = vmax.f32 %v11688_v3, 0.0 }
 0xa75   : > { %v23025_v10 = vpack.c.bf16 %v11975_v45, %v11971_v35  ;;  %v11945_v26 = vmax.f32 %v11689_v29, 0.0  ;;  %v10725_v44 = vpop.f32.mrb[228].mxu1 }
 0xa76   : > { %v23027_v1 = vpack.c.bf16 %v11944_v60, %v11940_v38  ;;  %v11722_v33 = vadd.f32 %v22466_v15, %v10725_v44  ;;  %v10727_v0 = vpop.f32.mrb[229].mxu1 }
 0xa77   : > { %v23031_v42 = vpack.c.bf16 %v11945_v26, %v11941_v6  ;;  %v11723_v9 = vadd.f32 %v22471_v11, %v10727_v0  ;;  %v10729_v63 = vpop.f32.mrb[230].mxu1  ;;  %v11391_v16 = vpop.f32.mrb[84].mxu0 }
 0xa78   : > { %23884 = vst [vmem:[#allocation19_spill] sm:$0xff] %v23027_v1  ;;  %v11726_v3 = vadd.f32 %v22466_v15, %v10729_v63  ;;  %v11692_v19 = vadd.f32 %v22522_v13, %v11391_v16  ;;  %v10731_v58 = vpop.f32.mrb[231].mxu1  ;;  %v11393_v35 = vpop.f32.mrb[85].mxu0  ;;  %v11978_v31 = vmax.f32 %v11722_v33, 0.0 }
 0xa79   : > { %23885 = vst [vmem:[#allocation18_spill] sm:$0xff] %v23031_v42  ;;  %v11727_v45 = vadd.f32 %v22471_v11, %v10731_v58  ;;  %v11693_v29 = vadd.f32 %v22530_v30, %v11393_v35  ;;  %v11395_v44 = vpop.f32.mrb[86].mxu0  ;;  %v11979_v26 = vmax.f32 %v11723_v9, 0.0 }
 0xa7a   : > { %v11982_v38 = vmax.f32 %v11726_v3, 0.0  ;;  %v11696_v60 = vadd.f32 %v22522_v13, %v11395_v44  ;;  %v11397_v6 = vpop.f32.mrb[87].mxu0  ;;  %12791 = vmatmul.mubr.bf16.gmra.mrb[80].mxu1 %v22943_v21  ;;  %v11948_v1 = vmax.f32 %v11692_v19, 0.0 }
 0xa7b   : > { %v11983_v0 = vmax.f32 %v11727_v45, 0.0  ;;  %v11697_v63 = vadd.f32 %v22530_v30, %v11397_v6  ;;  %12800 = vmatprep.mubr.bf16.mxu1 %v22964_v27  ;;  %v11949_v35 = vmax.f32 %v11693_v29, 0.0 }
 0xa7c   : > { %v23042_v16 = vpack.c.bf16 %v11982_v38, %v11978_v31  ;;  %v11952_v58 = vmax.f32 %v11696_v60, 0.0 }
 0xa7d   : > { %v23044_v42 = vpack.c.bf16 %v11983_v0, %v11979_v26  ;;  %v11953_v33 = vmax.f32 %v11697_v63, 0.0  ;;  %v10735_v3 = vpop.f32.mrb[232].mxu1 }
 0xa7e   : > { %v23046_v22 = vpack.c.bf16 %v11952_v58, %v11948_v1  ;;  %v11730_v44 = vadd.f32 %v22466_v15, %v10735_v3  ;;  %v10737_v21 = vpop.f32.mrb[233].mxu1 }
 0xa7f   : > { %v23049_v9 = vpack.c.bf16 %v11953_v33, %v11949_v35  ;;  %v11731_v45 = vadd.f32 %v22471_v11, %v10737_v21  ;;  %v10739_v6 = vpop.f32.mrb[234].mxu1  ;;  %v11401_v27 = vpop.f32.mrb[88].mxu0 }
 0xa80   : > { %23886 = vst [vmem:[#allocation23_spill] sm:$0xff] %v23046_v22  ;;  %v11734_v31 = vadd.f32 %v22466_v15, %v10739_v6  ;;  %v11700_v19 = vadd.f32 %v22522_v13, %v11401_v27  ;;  %v10741_v38 = vpop.f32.mrb[235].mxu1  ;;  %v11403_v60 = vpop.f32.mrb[89].mxu0  ;;  %v11986_v0 = vmax.f32 %v11730_v44, 0.0  ;;  %v17662_v6 = vld [vmem:[%s23566_s13 + $0x28] sm:$0xff]  }
 0xa81   : > { %23887 = vst [vmem:[#allocation22_spill] sm:$0xff] %v23049_v9  ;;  %v11735_v29 = vadd.f32 %v22471_v11, %v10741_v38  ;;  %v11701_v1 = vadd.f32 %v22530_v30, %v11403_v60  ;;  %v11405_v26 = vpop.f32.mrb[90].mxu0  ;;  %v11987_v33 = vmax.f32 %v11731_v45, 0.0  ;;  %13602 = vmatpush1.bf16.msra.mxu0 %v17662_v6 }
 0xa82   : > { %v11990_v63 = vmax.f32 %v11734_v31, 0.0  ;;  %v11704_v58 = vadd.f32 %v22522_v13, %v11405_v26  ;;  %v11407_v35 = vpop.f32.mrb[91].mxu0  ;;  %12801 = vmatmul.mubr.bf16.gmra.mrb[84].mxu1 %v22962_v48  ;;  %v11956_v38 = vmax.f32 %v11700_v19, 0.0  ;;  %13603 = vmatprep.subr.bf16.mxu0 %v23796_v25 }
 0xa83   : > { %v11991_v3 = vmax.f32 %v11735_v29, 0.0  ;;  %v11705_v21 = vadd.f32 %v22530_v30, %v11407_v35  ;;  %12810 = vmatprep.mubr.bf16.mxu1 %v22985_v61  ;;  %v11957_v60 = vmax.f32 %v11701_v1, 0.0 }
 0xa84   : > { %v23063_v27 = vpack.c.bf16 %v11990_v63, %v11986_v0  ;;  %v11960_v44 = vmax.f32 %v11704_v58, 0.0 }
 0xa85   : > { %v23065_v31 = vpack.c.bf16 %v11991_v3, %v11987_v33  ;;  %v11961_v26 = vmax.f32 %v11705_v21, 0.0  ;;  %v10745_v22 = vpop.f32.mrb[236].mxu1 }
 0xa86   : > { %v23067_v48 = vpack.c.bf16 %v11960_v44, %v11956_v38  ;;  %v11738_v45 = vadd.f32 %v22466_v15, %v10745_v22  ;;  %v10747_v29 = vpop.f32.mrb[237].mxu1 }
 0xa87   : > { %v23071_v61 = vpack.c.bf16 %v11961_v26, %v11957_v60  ;;  %v11739_v0 = vadd.f32 %v22471_v11, %v10747_v29  ;;  %v10749_v63 = vpop.f32.mrb[238].mxu1  ;;  %v11411_v19 = vpop.f32.mrb[92].mxu0 }
 0xa88   : > { %23888 = vst [vmem:[#allocation14_spill] sm:$0xff] %v23067_v48  ;;  %v11742_v58 = vadd.f32 %v22466_v15, %v10749_v63  ;;  %v11708_v1 = vadd.f32 %v22522_v13, %v11411_v19  ;;  %v10751_v35 = vpop.f32.mrb[239].mxu1  ;;  %v11413_v33 = vpop.f32.mrb[93].mxu0  ;;  %v11994_v6 = vmax.f32 %v11738_v45, 0.0 }
 0xa89   : > { %23889 = vst [vmem:[#allocation24_spill] sm:$0xff] %v23071_v61  ;;  %v11743_v3 = vadd.f32 %v22471_v11, %v10751_v35  ;;  %v11709_v21 = vadd.f32 %v22530_v30, %v11413_v33  ;;  %v11415_v22 = vpop.f32.mrb[94].mxu0  ;;  %v11995_v26 = vmax.f32 %v11739_v0, 0.0 }
 0xa8a   : > { %v11998_v38 = vmax.f32 %v11742_v58, 0.0  ;;  %v11712_v44 = vadd.f32 %v22522_v13, %v11415_v22  ;;  %v11417_v60 = vpop.f32.mrb[95].mxu0  ;;  %12811 = vmatmul.mubr.bf16.gmra.mrb[88].mxu1 %v22983_v59  ;;  %v11964_v48 = vmax.f32 %v11708_v1, 0.0 }
 0xa8b   : > { %v11999_v29 = vmax.f32 %v11743_v3, 0.0  ;;  %v11713_v63 = vadd.f32 %v22530_v30, %v11417_v60  ;;  %12820 = vmatprep.mubr.bf16.mxu1 %v23004_v32  ;;  %v11965_v33 = vmax.f32 %v11709_v21, 0.0 }
 0xa8c   : > { %v23082_v19 = vpack.c.bf16 %v11998_v38, %v11994_v6  ;;  %v11968_v35 = vmax.f32 %v11712_v44, 0.0 }
 0xa8d   : > { %v23084_v61 = vpack.c.bf16 %v11999_v29, %v11995_v26  ;;  %v11969_v45 = vmax.f32 %v11713_v63, 0.0  ;;  %v10755_v58 = vpop.f32.mrb[240].mxu1 }
 0xa8e   : > { %v23086_v9 = vpack.c.bf16 %v11968_v35, %v11964_v48  ;;  %v11746_v22 = vadd.f32 %v22466_v15, %v10755_v58  ;;  %v10757_v59 = vpop.f32.mrb[241].mxu1 }
 0xa8f   : > { %v23089_v0 = vpack.c.bf16 %v11969_v45, %v11965_v33  ;;  %v11747_v3 = vadd.f32 %v22471_v11, %v10757_v59  ;;  %v10759_v60 = vpop.f32.mrb[242].mxu1  ;;  %v11421_v32 = vpop.f32.mrb[96].mxu0 }
 0xa90   : > { %23890 = vst [vmem:[#allocation20_spill] sm:$0xff] %v23086_v9  ;;  %v11750_v6 = vadd.f32 %v22466_v15, %v10759_v60  ;;  %v11716_v1 = vadd.f32 %v22522_v13, %v11421_v32  ;;  %v10761_v38 = vpop.f32.mrb[243].mxu1  ;;  %v11423_v44 = vpop.f32.mrb[97].mxu0  ;;  %v12002_v29 = vmax.f32 %v11746_v22, 0.0  ;;  %v17663_v60 = vld [vmem:[%s23566_s13 + $0x30] sm:$0xff]  }
 0xa91   : > { %23891 = vst [vmem:[#allocation36_spill] sm:$0xff] %v23089_v0  ;;  %v11751_v21 = vadd.f32 %v22471_v11, %v10761_v38  ;;  %v11717_v48 = vadd.f32 %v22530_v30, %v11423_v44  ;;  %v11425_v26 = vpop.f32.mrb[98].mxu0  ;;  %v12003_v45 = vmax.f32 %v11747_v3, 0.0  ;;  %13604 = vmatpush1.bf16.msra.mxu0 %v17663_v60 }
 0xa92   : > { %v12006_v63 = vmax.f32 %v11750_v6, 0.0  ;;  %v11720_v35 = vadd.f32 %v22522_v13, %v11425_v26  ;;  %v11427_v33 = vpop.f32.mrb[99].mxu0  ;;  %12821 = vmatmul.mubr.bf16.gmra.mrb[92].mxu1 %v23002_v50  ;;  %v11972_v38 = vmax.f32 %v11716_v1, 0.0  ;;  %13605 = vmatprep.subr.bf16.mxu0 %v23796_v25 }
 0xa93   : > { %v12007_v58 = vmax.f32 %v11751_v21, 0.0  ;;  %v11721_v59 = vadd.f32 %v22530_v30, %v11427_v33  ;;  %12830 = vmatprep.mubr.bf16.mxu1 %v23025_v10  ;;  %v11973_v44 = vmax.f32 %v11717_v48, 0.0 }
 0xa94   : > { %v23103_v32 = vpack.c.bf16 %v12006_v63, %v12002_v29  ;;  %v11976_v22 = vmax.f32 %v11720_v35, 0.0 }
 0xa95   : > { %v23105_v6 = vpack.c.bf16 %v12007_v58, %v12003_v45  ;;  %v11977_v26 = vmax.f32 %v11721_v59, 0.0  ;;  %v10765_v9 = vpop.f32.mrb[244].mxu1 }
 0xa96   : > { %v23107_v50 = vpack.c.bf16 %v11976_v22, %v11972_v38  ;;  %v11754_v3 = vadd.f32 %v22466_v15, %v10765_v9  ;;  %v10767_v21 = vpop.f32.mrb[245].mxu1 }
 0xa97   : > { %v23111_v10 = vpack.c.bf16 %v11977_v26, %v11973_v44  ;;  %v11755_v29 = vadd.f32 %v22471_v11, %v10767_v21  ;;  %v10769_v63 = vpop.f32.mrb[246].mxu1  ;;  %v11431_v1 = vpop.f32.mrb[100].mxu0 }
 0xa98   : > { %23892 = vst [vmem:[#allocation35_spill] sm:$0xff] %v23107_v50  ;;  %v11758_v35 = vadd.f32 %v22466_v15, %v10769_v63  ;;  %v11724_v48 = vadd.f32 %v22522_v13, %v11431_v1  ;;  %v10771_v33 = vpop.f32.mrb[247].mxu1  ;;  %v11433_v45 = vpop.f32.mrb[101].mxu0  ;;  %v12010_v60 = vmax.f32 %v11754_v3, 0.0 }
 0xa99   : > { %23893 = vst [vmem:[#allocation42_spill] sm:$0xff] %v23111_v10  ;;  %v11759_v58 = vadd.f32 %v22471_v11, %v10771_v33  ;;  %v11725_v59 = vadd.f32 %v22530_v30, %v11433_v45  ;;  %v11435_v9 = vpop.f32.mrb[102].mxu0  ;;  %v12011_v26 = vmax.f32 %v11755_v29, 0.0 }
 0xa9a   : > { %v12014_v38 = vmax.f32 %v11758_v35, 0.0  ;;  %v11728_v22 = vadd.f32 %v22522_v13, %v11435_v9  ;;  %v11437_v44 = vpop.f32.mrb[103].mxu0  ;;  %12831 = vmatmul.mubr.bf16.gmra.mrb[96].mxu1 %v23023_v4  ;;  %v11980_v50 = vmax.f32 %v11724_v48, 0.0 }
 0xa9b   : > { %v12015_v21 = vmax.f32 %v11759_v58, 0.0  ;;  %v11729_v63 = vadd.f32 %v22530_v30, %v11437_v44  ;;  %12840 = vmatprep.mubr.bf16.mxu1 %v23044_v42  ;;  %v11981_v45 = vmax.f32 %v11725_v59, 0.0 }
 0xa9c   : > { %v23122_v1 = vpack.c.bf16 %v12014_v38, %v12010_v60  ;;  %v11984_v33 = vmax.f32 %v11728_v22, 0.0 }
 0xa9d   : > { %v23124_v10 = vpack.c.bf16 %v12015_v21, %v12011_v26  ;;  %v11985_v3 = vmax.f32 %v11729_v63, 0.0  ;;  %v10775_v35 = vpop.f32.mrb[248].mxu1 }
 0xa9e   : > { %v23126_v0 = vpack.c.bf16 %v11984_v33, %v11980_v50  ;;  %v11762_v9 = vadd.f32 %v22466_v15, %v10775_v35  ;;  %v10777_v4 = vpop.f32.mrb[249].mxu1 }
 0xa9f   : > { %v23129_v29 = vpack.c.bf16 %v11985_v3, %v11981_v45  ;;  %v11763_v58 = vadd.f32 %v22471_v11, %v10777_v4  ;;  %v10779_v44 = vpop.f32.mrb[250].mxu1  ;;  %v11441_v42 = vpop.f32.mrb[104].mxu0 }
 0xaa0   : > { %23894 = vst [vmem:[#allocation41_spill] sm:$0xff] %v23126_v0  ;;  %v11766_v60 = vadd.f32 %v22466_v15, %v10779_v44  ;;  %v11732_v48 = vadd.f32 %v22522_v13, %v11441_v42  ;;  %v10781_v38 = vpop.f32.mrb[251].mxu1  ;;  %v11443_v22 = vpop.f32.mrb[105].mxu0  ;;  %v12018_v21 = vmax.f32 %v11762_v9, 0.0  ;;  %v17664_v44 = vld [vmem:[%s23566_s13 + $0x38] sm:$0xff]  }
 0xaa1   : > { %v11767_v59 = vadd.f32 %v22471_v11, %v10781_v38  ;;  %v11733_v50 = vadd.f32 %v22530_v30, %v11443_v22  ;;  %v11445_v26 = vpop.f32.mrb[106].mxu0  ;;  %v12019_v3 = vmax.f32 %v11763_v58, 0.0  ;;  %13606 = vmatpush1.bf16.msra.mxu0 %v17664_v44 }
 0xaa2   : > { %v12022_v63 = vmax.f32 %v11766_v60, 0.0  ;;  %v11736_v33 = vadd.f32 %v22522_v13, %v11445_v26  ;;  %v11447_v45 = vpop.f32.mrb[107].mxu0  ;;  %12841 = vmatmul.mubr.bf16.gmra.mrb[100].mxu1 %v23042_v16  ;;  %v11988_v38 = vmax.f32 %v11732_v48, 0.0  ;;  %13607 = vmatprep.subr.bf16.mxu0 %v23796_v25 }
 0xaa3   : > { %v12023_v35 = vmax.f32 %v11767_v59, 0.0  ;;  %v11737_v4 = vadd.f32 %v22530_v30, %v11447_v45  ;;  %12850 = vmatprep.mubr.bf16.mxu1 %v23065_v31  ;;  %v11989_v22 = vmax.f32 %v11733_v50, 0.0 }
 0xaa4   : > { %v23143_v42 = vpack.c.bf16 %v12022_v63, %v12018_v21  ;;  %v11992_v9 = vmax.f32 %v11736_v33, 0.0 }
 0xaa5   : > { %v23145_v60 = vpack.c.bf16 %v12023_v35, %v12019_v3  ;;  %v11993_v26 = vmax.f32 %v11737_v4, 0.0  ;;  %v10785_v0 = vpop.f32.mrb[252].mxu1 }
 0xaa6   : > { %v23147_v16 = vpack.c.bf16 %v11992_v9, %v11988_v38  ;;  %v11770_v58 = vadd.f32 %v22466_v15, %v10785_v0  ;;  %v10787_v59 = vpop.f32.mrb[253].mxu1 }
 0xaa7   : > { %v23151_v31 = vpack.c.bf16 %v11993_v26, %v11989_v22  ;;  %v11771_v21 = vadd.f32 %v22471_v11, %v10787_v59  ;;  %v10789_v63 = vpop.f32.mrb[254].mxu1  ;;  %v11451_v48 = vpop.f32.mrb[108].mxu0 }
 0xaa8   : > { %23895 = vst [vmem:[#allocation50_spill] sm:$0xff] %v23147_v16  ;;  %v11774_v33 = vadd.f32 %v22466_v15, %v10789_v63  ;;  %v11740_v50 = vadd.f32 %v22522_v13, %v11451_v48  ;;  %v10791_v45 = vpop.f32.mrb[255].mxu1  ;;  %v11453_v3 = vpop.f32.mrb[109].mxu0  ;;  %v12026_v44 = vmax.f32 %v11770_v58, 0.0 }
 0xaa9   : > { %v11775_v35 = vadd.f32 %v22471_v11, %v10791_v45  ;;  %v11741_v4 = vadd.f32 %v22530_v30, %v11453_v3  ;;  %v11455_v0 = vpop.f32.mrb[110].mxu0  ;;  %v12027_v26 = vmax.f32 %v11771_v21, 0.0 }
 0xaaa   : > { %v12030_v38 = vmax.f32 %v11774_v33, 0.0  ;;  %v11744_v9 = vadd.f32 %v22522_v13, %v11455_v0  ;;  %v11457_v22 = vpop.f32.mrb[111].mxu0  ;;  %12851 = vmatmul.mubr.bf16.gmra.mrb[104].mxu1 %v23063_v27  ;;  %v11996_v48 = vmax.f32 %v11740_v50, 0.0 }
 0xaab   : > { %v12031_v59 = vmax.f32 %v11775_v35, 0.0  ;;  %v11745_v15 = vadd.f32 %v22530_v30, %v11457_v22  ;;  %12860 = vmatprep.mubr.bf16.mxu1 %v23084_v61  ;;  %v11997_v3 = vmax.f32 %v11741_v4, 0.0  ;;  %v17665_v4 = vld [vmem:[%s23566_s13 + $0x40] sm:$0xff]  }
 0xaac   : > { %v23162_v63 = vpack.c.bf16 %v12030_v38, %v12026_v44  ;;  %v12000_v11 = vmax.f32 %v11744_v9, 0.0  ;;  %13608 = vmatpush1.bf16.msra.mxu0 %v17665_v4 }
 0xaad   : > { %v23164_v45 = vpack.c.bf16 %v12031_v59, %v12027_v26  ;;  %v12001_v58 = vmax.f32 %v11745_v15, 0.0  ;;  %13609 = vmatprep.subr.bf16.mxu0 %v23796_v25 }
 0xaae   : > { %v23166_v33 = vpack.c.bf16 %v12000_v11, %v11996_v48 }
 0xaaf   : > { %v23168_v0 = vpack.c.bf16 %v12001_v58, %v11997_v3  ;;  %v11461_v16 = vpop.f32.mrb[112].mxu0 }
 0xab0   : > { %v11748_v27 = vadd.f32 %v22522_v13, %v11461_v16  ;;  %v11463_v21 = vpop.f32.mrb[113].mxu0 }
 0xab1   : > { %v11749_v35 = vadd.f32 %v22530_v30, %v11463_v21  ;;  %v11465_v22 = vpop.f32.mrb[114].mxu0 }
 0xab2   : > { %v11752_v61 = vadd.f32 %v22522_v13, %v11465_v22  ;;  %v11467_v44 = vpop.f32.mrb[115].mxu0  ;;  %12861 = vmatmul.mubr.bf16.gmra.mrb[108].mxu1 %v23082_v19  ;;  %v12004_v38 = vmax.f32 %v11748_v27, 0.0 }
 0xab3   : > { %v11753_v50 = vadd.f32 %v22530_v30, %v11467_v44  ;;  %12870 = vmatprep.mubr.bf16.mxu1 %v23105_v6  ;;  %v12005_v16 = vmax.f32 %v11749_v35, 0.0 }
 0xab4   : > { %v12008_v9 = vmax.f32 %v11752_v61, 0.0 }
 0xab5   : > { %v12009_v26 = vmax.f32 %v11753_v50, 0.0 }
 0xab6   : > { %v23179_v59 = vpack.c.bf16 %v12008_v9, %v12004_v38 }
 0xab7   : > { %v23182_v15 = vpack.c.bf16 %v12009_v26, %v12005_v16  ;;  %v11471_v19 = vpop.f32.mrb[116].mxu0 }
 0xab8   : > { %v11756_v48 = vadd.f32 %v22522_v13, %v11471_v19  ;;  %v11473_v11 = vpop.f32.mrb[117].mxu0 }
 0xab9   : > { %v11757_v6 = vadd.f32 %v22530_v30, %v11473_v11  ;;  %v11475_v3 = vpop.f32.mrb[118].mxu0 }
 0xaba   : > { %v11760_v58 = vadd.f32 %v22522_v13, %v11475_v3  ;;  %v11477_v27 = vpop.f32.mrb[119].mxu0  ;;  %12871 = vmatmul.mubr.bf16.gmra.mrb[112].mxu1 %v23103_v32  ;;  %v12012_v35 = vmax.f32 %v11756_v48, 0.0  ;;  %v17666_v48 = vld [vmem:[%s23566_s13 + $0x48] sm:$0xff]  }
 0xabb   : > { %v11761_v21 = vadd.f32 %v22530_v30, %v11477_v27  ;;  %12880 = vmatprep.mubr.bf16.mxu1 %v23124_v10  ;;  %v12013_v61 = vmax.f32 %v11757_v6, 0.0  ;;  %13610 = vmatpush1.bf16.msra.mxu0 %v17666_v48 }
 0xabc   : > { %v12016_v22 = vmax.f32 %v11760_v58, 0.0  ;;  %13611 = vmatprep.subr.bf16.mxu0 %v23796_v25 }
 0xabd   : > { %v12017_v44 = vmax.f32 %v11761_v21, 0.0 }
 0xabe   : > { %v23190_v50 = vpack.c.bf16 %v12016_v22, %v12012_v35 }
 0xabf   : > { %v23192_v4 = vpack.c.bf16 %v12017_v44, %v12013_v61  ;;  %v11481_v38 = vpop.f32.mrb[120].mxu0 }
 0xac0   : > { %v11764_v9 = vadd.f32 %v22522_v13, %v11481_v38  ;;  %v11483_v16 = vpop.f32.mrb[121].mxu0 }
 0xac1   : > { %v11765_v26 = vadd.f32 %v22530_v30, %v11483_v16  ;;  %v11485_v19 = vpop.f32.mrb[122].mxu0 }
 0xac2   : > { %v11768_v32 = vadd.f32 %v22522_v13, %v11485_v19  ;;  %v11487_v11 = vpop.f32.mrb[123].mxu0  ;;  %12881 = vmatmul.mubr.bf16.gmra.mrb[116].mxu1 %v23122_v1  ;;  %v12020_v6 = vmax.f32 %v11764_v9, 0.0 }
 0xac3   : > { %v11769_v10 = vadd.f32 %v22530_v30, %v11487_v11  ;;  %12890 = vmatprep.mubr.bf16.mxu1 %v23145_v60  ;;  %v12021_v58 = vmax.f32 %v11765_v26, 0.0 }
 0xac4   : > { %v12024_v3 = vmax.f32 %v11768_v32, 0.0 }
 0xac5   : > { %v12025_v27 = vmax.f32 %v11769_v10, 0.0 }
 0xac6   : > { %v23203_v21 = vpack.c.bf16 %v12024_v3, %v12020_v6 }
 0xac7   : > { %v23206_v35 = vpack.c.bf16 %v12025_v27, %v12021_v58  ;;  %v11491_v1 = vpop.f32.mrb[124].mxu0 }
 0xac8   : > { %v11772_v22 = vadd.f32 %v22522_v13, %v11491_v1  ;;  %v11493_v61 = vpop.f32.mrb[125].mxu0 }
 0xac9   : > { %v11773_v60 = vadd.f32 %v22530_v30, %v11493_v61  ;;  %v11495_v44 = vpop.f32.mrb[126].mxu0 }
 0xaca   : > { %v11776_v38 = vadd.f32 %v22522_v13, %v11495_v44  ;;  %v11497_v9 = vpop.f32.mrb[127].mxu0  ;;  %12891 = vmatmul.mubr.bf16.gmra.mrb[120].mxu1 %v23143_v42  ;;  %v12028_v26 = vmax.f32 %v11772_v22, 0.0  ;;  %v17667_v13 = vld [vmem:[%s23566_s13 + $0x50] sm:$0xff]  }
 0xacb   : > { %v11777_v16 = vadd.f32 %v22530_v30, %v11497_v9  ;;  %12900 = vmatprep.mubr.bf16.mxu1 %v23164_v45  ;;  %v12029_v32 = vmax.f32 %v11773_v60, 0.0  ;;  %13612 = vmatpush1.bf16.msra.mxu0 %v17667_v13  ;;  %v17668_v30 = vld [vmem:[%s23566_s13 + $0x58] sm:$0xff]  }
 0xacc   : > { %v12032_v19 = vmax.f32 %v11776_v38, 0.0  ;;  %13613 = vmatprep.subr.bf16.mxu0 %v23796_v25 }
 0xacd   : > { %v12033_v11 = vmax.f32 %v11777_v16, 0.0 }
 0xace   : > { %v23214_v10 = vpack.c.bf16 %v12032_v19, %v12028_v26 }
 0xacf   : > { %v23216_v48 = vpack.c.bf16 %v12033_v11, %v12029_v32  ;;  %13614 = vmatpush1.bf16.msra.mxu0 %v17668_v30 }
 0xad0   : > { %13615 = vmatprep.subr.bf16.mxu0 %v23796_v25 }
 0xad2   : > { %12901 = vmatmul.mubr.bf16.gmra.mrb[124].mxu1 %v23162_v63 }
 0xad3   : > { %12943 = vmatprep.mubr.bf16.mxu1 %v22551_v36  ;;  %v17670_v36 = vld [vmem:[%s23566_s13 + $0x68] sm:$0xff]  }
 0xada   : > { %12944 = vmatmul.mubr.bf16.vlgmr.msra.gmra.mrb[0].mxu1 %v22548_v12  ;;  %v17669_v12 = vld [vmem:[%s23566_s13 + $0x60] sm:$0xff]  }
 0xadb   : > { %12953 = vmatprep.mubr.bf16.mxu1 %v22583_v5  ;;  %13616 = vmatpush1.bf16.msra.mxu0 %v17669_v12  ;;  %v17672_v5 = vld [vmem:[%s23566_s13 + $0x78] sm:$0xff]  }
 0xadc   : > { %13617 = vmatprep.subr.bf16.mxu0 %v23796_v25 }
 0xadf   : > { %13618 = vmatpush1.bf16.msra.mxu0 %v17670_v36 }
 0xae0   : > { %13619 = vmatprep.subr.bf16.mxu0 %v23796_v25 }
 0xae2   : > { %12954 = vmatmul.mubr.bf16.gmra.mrb[4].mxu1 %v22580_v56  ;;  %v17671_v56 = vld [vmem:[%s23566_s13 + $0x70] sm:$0xff]  }
 0xae3   : > { %12963 = vmatprep.mubr.bf16.mxu1 %v22615_v52  ;;  %13620 = vmatpush1.bf16.msra.mxu0 %v17671_v56  ;;  %v23898_v52 = vld [vmem:[#allocation8_spill] sm:$0xff] }
 0xae4   : > { %13621 = vmatprep.subr.bf16.mxu0 %v23796_v25  ;;  %v23896_v25 = vld [vmem:[#allocation6_spill] sm:$0xff] }
 0xae7   : > { %13622 = vmatpush1.bf16.msra.mxu0 %v17672_v5 }
 0xaea   : > { %12964 = vmatmul.mubr.bf16.gmra.mrb[8].mxu1 %v22612_v39  ;;  %v23897_v39 = vld [vmem:[#allocation7_spill] sm:$0xff] }
 0xaeb   : > { %12973 = vmatprep.mubr.bf16.mxu1 %v22647_v37  ;;  %v23900_v37 = vld [vmem:[#allocation10_spill] sm:$0xff] }
 0xaf2   : > { %12974 = vmatmul.mubr.bf16.gmra.mrb[12].mxu1 %v22644_v53  ;;  %v23899_v53 = vld [vmem:[#allocation9_spill] sm:$0xff] }
 0xaf3   : > { %12983 = vmatprep.mubr.bf16.mxu1 %v22678_v7  ;;  %v23902_v7 = vld [vmem:[#allocation12_spill] sm:$0xff] }
 0xafa   : > { %12984 = vmatmul.mubr.bf16.gmra.mrb[16].mxu1 %v22675_v47  ;;  %v23901_v47 = vld [vmem:[#allocation11_spill] sm:$0xff] }
 0xafb   : > { %12993 = vmatprep.mubr.bf16.mxu1 %v22708_v43  ;;  %v23904_v43 = vld [vmem:[#allocation15_spill] sm:$0xff] }
 0xb02   : > { %12994 = vmatmul.mubr.bf16.gmra.mrb[20].mxu1 %v22702_v62  ;;  %v23903_v62 = vld [vmem:[#allocation13_spill] sm:$0xff] }
 0xb03   : > { %13003 = vmatprep.mubr.bf16.mxu1 %v22729_v49  ;;  %v23906_v49 = vld [vmem:[#allocation18_spill] sm:$0xff] }
 0xb0a   : > { %13004 = vmatmul.mubr.bf16.gmra.mrb[24].mxu1 %v22726_v17  ;;  %v23905_v17 = vld [vmem:[#allocation16_spill] sm:$0xff] }
 0xb0b   : > { %13013 = vmatprep.mubr.bf16.mxu1 %v22753_v14  ;;  %v23908_v14 = vld [vmem:[#allocation22_spill] sm:$0xff] }
 0xb12   : > { %13014 = vmatmul.mubr.bf16.gmra.mrb[28].mxu1 %v22744_v40  ;;  %v23907_v40 = vld [vmem:[#allocation19_spill] sm:$0xff] }
 0xb13   : > { %13023 = vmatprep.mubr.bf16.mxu1 %v22771_v54  ;;  %v23910_v54 = vld [vmem:[#allocation24_spill] sm:$0xff] }
 0xb1a   : > { %13024 = vmatmul.mubr.bf16.gmra.mrb[32].mxu1 %v22768_v57  ;;  %v23909_v57 = vld [vmem:[#allocation23_spill] sm:$0xff] }
 0xb1b   : > { %13033 = vmatprep.mubr.bf16.mxu1 %v22795_v24  ;;  %v23912_v24 = vld [vmem:[#allocation36_spill] sm:$0xff] }
 0xb22   : > { %13034 = vmatmul.mubr.bf16.gmra.mrb[36].mxu1 %v22786_v18  ;;  %v23911_v18 = vld [vmem:[#allocation14_spill] sm:$0xff] }
 0xb23   : > { %13043 = vmatprep.mubr.bf16.mxu1 %v22813_v34  ;;  %v23914_v34 = vld [vmem:[#allocation42_spill] sm:$0xff] }
 0xb2a   : > { %13044 = vmatmul.mubr.bf16.gmra.mrb[40].mxu1 %v22810_v55  ;;  %v23913_v55 = vld [vmem:[#allocation20_spill] sm:$0xff] }
 0xb2b   : > { %13053 = vmatprep.mubr.bf16.mxu1 %v22837_v51  ;;  %v23916_v51 = vld [vmem:[#allocation41_spill] sm:$0xff] }
 0xb32   : > { %13054 = vmatmul.mubr.bf16.gmra.mrb[44].mxu1 %v22828_v46  ;;  %v23915_v46 = vld [vmem:[#allocation35_spill] sm:$0xff] }
 0xb33   : > { %13063 = vmatprep.mubr.bf16.mxu1 %v22855_v20  ;;  %v23917_v20 = vld [vmem:[#allocation50_spill] sm:$0xff] }
 0xb3a   : > { %13064 = vmatmul.mubr.bf16.gmra.mrb[48].mxu1 %v22852_v2  ;;  %v12226_v2 = vld [vmem:[%s23565_s12] sm:$0x3] }
 0xb3b   : > { %13073 = vmatprep.mubr.bf16.mxu1 %v22883_v41 }
 0xb42   : > { %13074 = vmatmul.mubr.bf16.gmra.mrb[52].mxu1 %v22873_v8  ;;  %v23918_v8 = vld [vmem:[#allocation5_spill] sm:$0xff] }
 0xb43   : > { %13083 = vmatprep.mubr.bf16.mxu1 %v22901_v28  ;;  %v23300_v41 = vrot.slane %v12226_v2, %v23918_v8 }
 0xb4a   : > { %13084 = vmatmul.mubr.bf16.gmra.mrb[56].mxu1 %v22898_v23  ;;  %v23919_v23 = vld [vmem:[#allocation3_spill] sm:$0xff] }
 0xb4b   : > { %13093 = vmatprep.mubr.bf16.mxu1 %v23896_v25  ;;  %v23304_v28 = vrot.slane %v12226_v2, %v23919_v23 }
 0xb52   : > { %13094 = vmatmul.mubr.bf16.gmra.mrb[60].mxu1 %v23897_v39 }
 0xb53   : > { %13103 = vmatprep.mubr.bf16.mxu1 %v23898_v52 }
 0xb5a   : > { %13104 = vmatmul.mubr.bf16.gmra.mrb[64].mxu1 %v23899_v53 }
 0xb5b   : > { %13113 = vmatprep.mubr.bf16.mxu1 %v23900_v37 }
 0xb62   : > { %13114 = vmatmul.mubr.bf16.gmra.mrb[68].mxu1 %v23901_v47 }
 0xb63   : > { %13123 = vmatprep.mubr.bf16.mxu1 %v23902_v7 }
 0xb6a   : > { %13124 = vmatmul.mubr.bf16.gmra.mrb[72].mxu1 %v23903_v62 }
 0xb6b   : > { %13133 = vmatprep.mubr.bf16.mxu1 %v23904_v43 }
 0xb72   : > { %13134 = vmatmul.mubr.bf16.gmra.mrb[76].mxu1 %v23905_v17 }
 0xb73   : > { %13143 = vmatprep.mubr.bf16.mxu1 %v23906_v49 }
 0xb7a   : > { %13144 = vmatmul.mubr.bf16.gmra.mrb[80].mxu1 %v23907_v40 }
 0xb7b   : > { %13153 = vmatprep.mubr.bf16.mxu1 %v23908_v14 }
 0xb82   : > { %13154 = vmatmul.mubr.bf16.gmra.mrb[84].mxu1 %v23909_v57 }
 0xb83   : > { %13163 = vmatprep.mubr.bf16.mxu1 %v23910_v54 }
 0xb8a   : > { %13164 = vmatmul.mubr.bf16.gmra.mrb[88].mxu1 %v23911_v18 }
 0xb8b   : > { %13173 = vmatprep.mubr.bf16.mxu1 %v23912_v24 }
 0xb92   : > { %13174 = vmatmul.mubr.bf16.gmra.mrb[92].mxu1 %v23913_v55 }
 0xb93   : > { %13183 = vmatprep.mubr.bf16.mxu1 %v23914_v34 }
 0xb9a   : > { %13184 = vmatmul.mubr.bf16.gmra.mrb[96].mxu1 %v23915_v46 }
 0xb9b   : > { %13193 = vmatprep.mubr.bf16.mxu1 %v23129_v29 }
 0xba2   : > { %13194 = vmatmul.mubr.bf16.gmra.mrb[100].mxu1 %v23916_v51 }
 0xba3   : > { %13203 = vmatprep.mubr.bf16.mxu1 %v23151_v31 }
 0xbaa   : > { %13204 = vmatmul.mubr.bf16.gmra.mrb[104].mxu1 %v23917_v20 }
 0xbab   : > { %13213 = vmatprep.mubr.bf16.mxu1 %v23168_v0 }
 0xbad   : > { %v12945_v42 = vpop.f32.mrb[0].mxu1 }
 0xbae   : > { %v15234_v29 = vadd.f32 %v12945_v42, %v23300_v41  ;;  %v12947_v63 = vpop.f32.mrb[1].mxu1 }
 0xbaf   : > { %v15235_v31 = vadd.f32 %v12947_v63, %v23304_v28  ;;  %v12949_v45 = vpop.f32.mrb[2].mxu1 }
 0xbb0   : > { %v15236_v6 = vadd.f32 %v12949_v45, %v23300_v41  ;;  %v12951_v3 = vpop.f32.mrb[3].mxu1  ;;  %v13264_v27 = vmax.f32 %v15234_v29, 0.0 }
 0xbb1   : > { %v15237_v58 = vadd.f32 %v12951_v3, %v23304_v28  ;;  %v13265_v0 = vmax.f32 %v15235_v31, 0.0 }
 0xbb2   : > { %v13266_v1 = vmax.f32 %v15236_v6, 0.0  ;;  %13214 = vmatmul.mubr.bf16.gmra.mrb[108].mxu1 %v23166_v33 }
 0xbb3   : > { %v13267_v22 = vmax.f32 %v15237_v58, 0.0  ;;  %13223 = vmatprep.mubr.bf16.mxu1 %v23182_v15 }
 0xbb4   : > { %v13392_v61 = vpack.c.bf16 %v13266_v1, %v13264_v27 }
 0xbb5   : > { %v13393_v60 = vpack.c.bf16 %v13267_v22, %v13265_v0  ;;  %v12955_v44 = vpop.f32.mrb[4].mxu1 }
 0xbb6   : > { %v15238_v38 = vadd.f32 %v12955_v44, %v23300_v41  ;;  %v12957_v9 = vpop.f32.mrb[5].mxu1 }
 0xbb7   : > { %v15239_v16 = vadd.f32 %v12957_v9, %v23304_v28  ;;  %v12959_v26 = vpop.f32.mrb[6].mxu1  ;;  %13623 = vmatprep.mubr.bf16.mxu0 %v13393_v60 }
 0xbb8   : > { %v15240_v19 = vadd.f32 %v12959_v26, %v23300_v41  ;;  %v12961_v32 = vpop.f32.mrb[7].mxu1  ;;  %13624 = vmatmul.mubr.bf16.vlgmr.msra.gmra.mrb[128].mxu0 %v13392_v61  ;;  %v13268_v11 = vmax.f32 %v15238_v38, 0.0 }
 0xbb9   : > { %v15241_v33 = vadd.f32 %v12961_v32, %v23304_v28  ;;  %v13269_v15 = vmax.f32 %v15239_v16, 0.0 }
 0xbba   : > { %v13270_v13 = vmax.f32 %v15240_v19, 0.0  ;;  %13224 = vmatmul.mubr.bf16.gmra.mrb[112].mxu1 %v23179_v59 }
 0xbbb   : > { %v13271_v30 = vmax.f32 %v15241_v33, 0.0  ;;  %13233 = vmatprep.mubr.bf16.mxu1 %v23192_v4 }
 0xbbc   : > { %v13394_v12 = vpack.c.bf16 %v13270_v13, %v13268_v11 }
 0xbbd   : > { %v13395_v36 = vpack.c.bf16 %v13271_v30, %v13269_v15  ;;  %v12965_v56 = vpop.f32.mrb[8].mxu1 }
 0xbbe   : > { %v15242_v5 = vadd.f32 %v12965_v56, %v23300_v41  ;;  %v12967_v25 = vpop.f32.mrb[9].mxu1 }
 0xbbf   : > { %v15243_v39 = vadd.f32 %v12967_v25, %v23304_v28  ;;  %v12969_v52 = vpop.f32.mrb[10].mxu1  ;;  %13631 = vmatprep.mubr.bf16.mxu0 %v13395_v36 }
 0xbc0   : > { %v15244_v53 = vadd.f32 %v12969_v52, %v23300_v41  ;;  %v12971_v37 = vpop.f32.mrb[11].mxu1  ;;  %13632 = vmatmul.mubr.bf16.gmra.mrb[132].mxu0 %v13394_v12  ;;  %v13272_v47 = vmax.f32 %v15242_v5, 0.0 }
 0xbc1   : > { %v15245_v59 = vadd.f32 %v12971_v37, %v23304_v28  ;;  %v13273_v4 = vmax.f32 %v15243_v39, 0.0 }
 0xbc2   : > { %v13274_v7 = vmax.f32 %v15244_v53, 0.0  ;;  %13234 = vmatmul.mubr.bf16.gmra.mrb[116].mxu1 %v23190_v50 }
 0xbc3   : > { %v13275_v62 = vmax.f32 %v15245_v59, 0.0  ;;  %13243 = vmatprep.mubr.bf16.mxu1 %v23206_v35 }
 0xbc4   : > { %v13396_v43 = vpack.c.bf16 %v13274_v7, %v13272_v47 }
 0xbc5   : > { %v13397_v17 = vpack.c.bf16 %v13275_v62, %v13273_v4  ;;  %v12975_v49 = vpop.f32.mrb[12].mxu1 }
 0xbc6   : > { %v15246_v40 = vadd.f32 %v12975_v49, %v23300_v41  ;;  %v12977_v14 = vpop.f32.mrb[13].mxu1 }
 0xbc7   : > { %v15247_v57 = vadd.f32 %v12977_v14, %v23304_v28  ;;  %v12979_v54 = vpop.f32.mrb[14].mxu1  ;;  %13639 = vmatprep.mubr.bf16.mxu0 %v13397_v17 }
 0xbc8   : > { %v15248_v18 = vadd.f32 %v12979_v54, %v23300_v41  ;;  %v12981_v24 = vpop.f32.mrb[15].mxu1  ;;  %13640 = vmatmul.mubr.bf16.gmra.mrb[136].mxu0 %v13396_v43  ;;  %v13276_v55 = vmax.f32 %v15246_v40, 0.0 }
 0xbc9   : > { %v15249_v50 = vadd.f32 %v12981_v24, %v23304_v28  ;;  %v13277_v35 = vmax.f32 %v15247_v57, 0.0 }
 0xbca   : > { %v13278_v34 = vmax.f32 %v15248_v18, 0.0  ;;  %13244 = vmatmul.mubr.bf16.gmra.mrb[120].mxu1 %v23203_v21 }
 0xbcb   : > { %v13279_v46 = vmax.f32 %v15249_v50, 0.0  ;;  %13253 = vmatprep.mubr.bf16.mxu1 %v23216_v48 }
 0xbcc   : > { %v13398_v51 = vpack.c.bf16 %v13278_v34, %v13276_v55 }
 0xbcd   : > { %v13399_v2 = vpack.c.bf16 %v13279_v46, %v13277_v35  ;;  %v12985_v20 = vpop.f32.mrb[16].mxu1 }
 0xbce   : > { %v15250_v8 = vadd.f32 %v12985_v20, %v23300_v41  ;;  %v12987_v23 = vpop.f32.mrb[17].mxu1 }
 0xbcf   : > { %v15251_v42 = vadd.f32 %v12987_v23, %v23304_v28  ;;  %v12989_v29 = vpop.f32.mrb[18].mxu1  ;;  %13647 = vmatprep.mubr.bf16.mxu0 %v13399_v2 }
 0xbd0   : > { %v15252_v63 = vadd.f32 %v12989_v29, %v23300_v41  ;;  %v12991_v31 = vpop.f32.mrb[19].mxu1  ;;  %13648 = vmatmul.mubr.bf16.gmra.mrb[140].mxu0 %v13398_v51  ;;  %v13280_v45 = vmax.f32 %v15250_v8, 0.0 }
 0xbd1   : > { %v15253_v21 = vadd.f32 %v12991_v31, %v23304_v28  ;;  %v13281_v48 = vmax.f32 %v15251_v42, 0.0 }
 0xbd2   : > { %v13282_v6 = vmax.f32 %v15252_v63, 0.0  ;;  %13254 = vmatmul.mubr.bf16.gmra.mrb[124].mxu1 %v23214_v10 }
 0xbd3   : > { %v13283_v3 = vmax.f32 %v15253_v21, 0.0 }
 0xbd4   : > { %v13400_v58 = vpack.c.bf16 %v13282_v6, %v13280_v45 }
 0xbd5   : > { %v13401_v27 = vpack.c.bf16 %v13283_v3, %v13281_v48  ;;  %v12995_v1 = vpop.f32.mrb[20].mxu1 }
 0xbd6   : > { %v15254_v0 = vadd.f32 %v12995_v1, %v23300_v41  ;;  %v12997_v22 = vpop.f32.mrb[21].mxu1 }
 0xbd7   : > { %v15255_v61 = vadd.f32 %v12997_v22, %v23304_v28  ;;  %v12999_v60 = vpop.f32.mrb[22].mxu1  ;;  %13655 = vmatprep.mubr.bf16.mxu0 %v13401_v27 }
 0xbd8   : > { %v15256_v44 = vadd.f32 %v12999_v60, %v23300_v41  ;;  %v13001_v38 = vpop.f32.mrb[23].mxu1  ;;  %13656 = vmatmul.mubr.bf16.gmra.mrb[144].mxu0 %v13400_v58  ;;  %v13284_v16 = vmax.f32 %v15254_v0, 0.0 }
 0xbd9   : > { %v15257_v9 = vadd.f32 %v13001_v38, %v23304_v28  ;;  %v13285_v26 = vmax.f32 %v15255_v61, 0.0 }
 0xbda   : > { %v13286_v10 = vmax.f32 %v15256_v44, 0.0 }
 0xbdb   : > { %v13287_v19 = vmax.f32 %v15257_v9, 0.0 }
 0xbdc   : > { %v13402_v32 = vpack.c.bf16 %v13286_v10, %v13284_v16 }
 0xbdd   : > { %v13403_v33 = vpack.c.bf16 %v13287_v19, %v13285_v26  ;;  %v13005_v11 = vpop.f32.mrb[24].mxu1 }
 0xbde   : > { %v15258_v13 = vadd.f32 %v13005_v11, %v23300_v41  ;;  %v13007_v15 = vpop.f32.mrb[25].mxu1 }
 0xbdf   : > { %v15259_v30 = vadd.f32 %v13007_v15, %v23304_v28  ;;  %v13009_v12 = vpop.f32.mrb[26].mxu1  ;;  %13663 = vmatprep.mubr.bf16.mxu0 %v13403_v33 }
 0xbe0   : > { %v15260_v36 = vadd.f32 %v13009_v12, %v23300_v41  ;;  %v13011_v56 = vpop.f32.mrb[27].mxu1  ;;  %13664 = vmatmul.mubr.bf16.gmra.mrb[148].mxu0 %v13402_v32  ;;  %v13288_v25 = vmax.f32 %v15258_v13, 0.0 }
 0xbe1   : > { %v15261_v5 = vadd.f32 %v13011_v56, %v23304_v28  ;;  %v13289_v52 = vmax.f32 %v15259_v30, 0.0 }
 0xbe2   : > { %v13290_v39 = vmax.f32 %v15260_v36, 0.0 }
 0xbe3   : > { %v13291_v53 = vmax.f32 %v15261_v5, 0.0 }
 0xbe4   : > { %v13404_v37 = vpack.c.bf16 %v13290_v39, %v13288_v25 }
 0xbe5   : > { %v13405_v59 = vpack.c.bf16 %v13291_v53, %v13289_v52  ;;  %v13015_v47 = vpop.f32.mrb[28].mxu1 }
 0xbe6   : > { %v15262_v7 = vadd.f32 %v13015_v47, %v23300_v41  ;;  %v13017_v4 = vpop.f32.mrb[29].mxu1 }
 0xbe7   : > { %v15263_v62 = vadd.f32 %v13017_v4, %v23304_v28  ;;  %v13019_v43 = vpop.f32.mrb[30].mxu1  ;;  %13671 = vmatprep.mubr.bf16.mxu0 %v13405_v59 }
 0xbe8   : > { %v15264_v17 = vadd.f32 %v13019_v43, %v23300_v41  ;;  %v13021_v49 = vpop.f32.mrb[31].mxu1  ;;  %13672 = vmatmul.mubr.bf16.gmra.mrb[152].mxu0 %v13404_v37  ;;  %v13292_v14 = vmax.f32 %v15262_v7, 0.0 }
 0xbe9   : > { %v15265_v40 = vadd.f32 %v13021_v49, %v23304_v28  ;;  %v13293_v54 = vmax.f32 %v15263_v62, 0.0 }
 0xbea   : > { %v13294_v57 = vmax.f32 %v15264_v17, 0.0 }
 0xbeb   : > { %v13295_v18 = vmax.f32 %v15265_v40, 0.0 }
 0xbec   : > { %v13406_v24 = vpack.c.bf16 %v13294_v57, %v13292_v14 }
 0xbed   : > { %v13407_v50 = vpack.c.bf16 %v13295_v18, %v13293_v54  ;;  %v13025_v55 = vpop.f32.mrb[32].mxu1 }
 0xbee   : > { %v15266_v34 = vadd.f32 %v13025_v55, %v23300_v41  ;;  %v13027_v35 = vpop.f32.mrb[33].mxu1 }
 0xbef   : > { %v15267_v46 = vadd.f32 %v13027_v35, %v23304_v28  ;;  %v13029_v51 = vpop.f32.mrb[34].mxu1  ;;  %13679 = vmatprep.mubr.bf16.mxu0 %v13407_v50 }
 0xbf0   : > { %v15268_v2 = vadd.f32 %v13029_v51, %v23300_v41  ;;  %v13031_v20 = vpop.f32.mrb[35].mxu1  ;;  %13680 = vmatmul.mubr.bf16.gmra.mrb[156].mxu0 %v13406_v24  ;;  %v13296_v23 = vmax.f32 %v15266_v34, 0.0 }
 0xbf1   : > { %v15269_v8 = vadd.f32 %v13031_v20, %v23304_v28  ;;  %v13297_v29 = vmax.f32 %v15267_v46, 0.0 }
 0xbf2   : > { %v13298_v42 = vmax.f32 %v15268_v2, 0.0 }
 0xbf3   : > { %v13299_v63 = vmax.f32 %v15269_v8, 0.0 }
 0xbf4   : > { %v13408_v31 = vpack.c.bf16 %v13298_v42, %v13296_v23 }
 0xbf5   : > { %v13409_v21 = vpack.c.bf16 %v13299_v63, %v13297_v29  ;;  %v13035_v45 = vpop.f32.mrb[36].mxu1 }
 0xbf6   : > { %v15270_v6 = vadd.f32 %v13035_v45, %v23300_v41  ;;  %v13037_v48 = vpop.f32.mrb[37].mxu1 }
 0xbf7   : > { %v15271_v3 = vadd.f32 %v13037_v48, %v23304_v28  ;;  %v13039_v58 = vpop.f32.mrb[38].mxu1  ;;  %13687 = vmatprep.mubr.bf16.mxu0 %v13409_v21 }
 0xbf8   : > { %v15272_v27 = vadd.f32 %v13039_v58, %v23300_v41  ;;  %v13041_v1 = vpop.f32.mrb[39].mxu1  ;;  %13688 = vmatmul.mubr.bf16.gmra.mrb[160].mxu0 %v13408_v31  ;;  %v13300_v22 = vmax.f32 %v15270_v6, 0.0 }
 0xbf9   : > { %v15273_v0 = vadd.f32 %v13041_v1, %v23304_v28  ;;  %v13301_v60 = vmax.f32 %v15271_v3, 0.0 }
 0xbfa   : > { %v13302_v61 = vmax.f32 %v15272_v27, 0.0 }
 0xbfb   : > { %v13303_v44 = vmax.f32 %v15273_v0, 0.0 }
 0xbfc   : > { %v13410_v38 = vpack.c.bf16 %v13302_v61, %v13300_v22 }
 0xbfd   : > { %v13411_v9 = vpack.c.bf16 %v13303_v44, %v13301_v60  ;;  %v13045_v16 = vpop.f32.mrb[40].mxu1 }
 0xbfe   : > { %v15274_v10 = vadd.f32 %v13045_v16, %v23300_v41  ;;  %v13047_v26 = vpop.f32.mrb[41].mxu1 }
 0xbff   : > { %v15275_v19 = vadd.f32 %v13047_v26, %v23304_v28  ;;  %v13049_v32 = vpop.f32.mrb[42].mxu1  ;;  %13695 = vmatprep.mubr.bf16.mxu0 %v13411_v9 }
 0xc00   : > { %v15276_v33 = vadd.f32 %v13049_v32, %v23300_v41  ;;  %v13051_v11 = vpop.f32.mrb[43].mxu1  ;;  %13696 = vmatmul.mubr.bf16.gmra.mrb[164].mxu0 %v13410_v38  ;;  %v13304_v15 = vmax.f32 %v15274_v10, 0.0 }
 0xc01   : > { %v15277_v13 = vadd.f32 %v13051_v11, %v23304_v28  ;;  %v13305_v12 = vmax.f32 %v15275_v19, 0.0 }
 0xc02   : > { %v13306_v30 = vmax.f32 %v15276_v33, 0.0 }
 0xc03   : > { %v13307_v36 = vmax.f32 %v15277_v13, 0.0 }
 0xc04   : > { %v13412_v56 = vpack.c.bf16 %v13306_v30, %v13304_v15 }
 0xc05   : > { %v13413_v5 = vpack.c.bf16 %v13307_v36, %v13305_v12  ;;  %v13055_v25 = vpop.f32.mrb[44].mxu1 }
 0xc06   : > { %v15278_v39 = vadd.f32 %v13055_v25, %v23300_v41  ;;  %v13057_v52 = vpop.f32.mrb[45].mxu1 }
 0xc07   : > { %v15279_v53 = vadd.f32 %v13057_v52, %v23304_v28  ;;  %v13059_v37 = vpop.f32.mrb[46].mxu1  ;;  %13703 = vmatprep.mubr.bf16.mxu0 %v13413_v5 }
 0xc08   : > { %v15280_v59 = vadd.f32 %v13059_v37, %v23300_v41  ;;  %v13061_v47 = vpop.f32.mrb[47].mxu1  ;;  %13704 = vmatmul.mubr.bf16.gmra.mrb[168].mxu0 %v13412_v56  ;;  %v13308_v4 = vmax.f32 %v15278_v39, 0.0 }
 0xc09   : > { %v15281_v7 = vadd.f32 %v13061_v47, %v23304_v28  ;;  %v13309_v43 = vmax.f32 %v15279_v53, 0.0 }
 0xc0a   : > { %v13310_v62 = vmax.f32 %v15280_v59, 0.0 }
 0xc0b   : > { %v13311_v17 = vmax.f32 %v15281_v7, 0.0 }
 0xc0c   : > { %v13414_v49 = vpack.c.bf16 %v13310_v62, %v13308_v4 }
 0xc0d   : > { %v13415_v40 = vpack.c.bf16 %v13311_v17, %v13309_v43  ;;  %v13065_v14 = vpop.f32.mrb[48].mxu1 }
 0xc0e   : > { %v15282_v57 = vadd.f32 %v13065_v14, %v23300_v41  ;;  %v13067_v54 = vpop.f32.mrb[49].mxu1 }
 0xc0f   : > { %v15283_v18 = vadd.f32 %v13067_v54, %v23304_v28  ;;  %v13069_v24 = vpop.f32.mrb[50].mxu1  ;;  %13711 = vmatprep.mubr.bf16.mxu0 %v13415_v40 }
 0xc10   : > { %v15284_v50 = vadd.f32 %v13069_v24, %v23300_v41  ;;  %v13071_v55 = vpop.f32.mrb[51].mxu1  ;;  %13712 = vmatmul.mubr.bf16.gmra.mrb[172].mxu0 %v13414_v49  ;;  %v13312_v35 = vmax.f32 %v15282_v57, 0.0 }
 0xc11   : > { %v15285_v34 = vadd.f32 %v13071_v55, %v23304_v28  ;;  %v13313_v51 = vmax.f32 %v15283_v18, 0.0 }
 0xc12   : > { %v13314_v46 = vmax.f32 %v15284_v50, 0.0 }
 0xc13   : > { %v13315_v2 = vmax.f32 %v15285_v34, 0.0 }
 0xc14   : > { %v13416_v20 = vpack.c.bf16 %v13314_v46, %v13312_v35 }
 0xc15   : > { %v13417_v8 = vpack.c.bf16 %v13315_v2, %v13313_v51  ;;  %v13075_v23 = vpop.f32.mrb[52].mxu1 }
 0xc16   : > { %v15286_v42 = vadd.f32 %v13075_v23, %v23300_v41  ;;  %v13077_v29 = vpop.f32.mrb[53].mxu1 }
 0xc17   : > { %v15287_v63 = vadd.f32 %v13077_v29, %v23304_v28  ;;  %v13079_v31 = vpop.f32.mrb[54].mxu1  ;;  %13719 = vmatprep.mubr.bf16.mxu0 %v13417_v8 }
 0xc18   : > { %v15288_v21 = vadd.f32 %v13079_v31, %v23300_v41  ;;  %v13081_v45 = vpop.f32.mrb[55].mxu1  ;;  %13720 = vmatmul.mubr.bf16.gmra.mrb[176].mxu0 %v13416_v20  ;;  %v13316_v48 = vmax.f32 %v15286_v42, 0.0 }
 0xc19   : > { %v15289_v6 = vadd.f32 %v13081_v45, %v23304_v28  ;;  %v13317_v58 = vmax.f32 %v15287_v63, 0.0 }
 0xc1a   : > { %v13318_v3 = vmax.f32 %v15288_v21, 0.0 }
 0xc1b   : > { %v13319_v27 = vmax.f32 %v15289_v6, 0.0 }
 0xc1c   : > { %v13418_v1 = vpack.c.bf16 %v13318_v3, %v13316_v48 }
 0xc1d   : > { %v13419_v0 = vpack.c.bf16 %v13319_v27, %v13317_v58  ;;  %v13085_v22 = vpop.f32.mrb[56].mxu1 }
 0xc1e   : > { %v15290_v61 = vadd.f32 %v13085_v22, %v23300_v41  ;;  %v13087_v60 = vpop.f32.mrb[57].mxu1 }
 0xc1f   : > { %v15291_v44 = vadd.f32 %v13087_v60, %v23304_v28  ;;  %v13089_v38 = vpop.f32.mrb[58].mxu1  ;;  %13727 = vmatprep.mubr.bf16.mxu0 %v13419_v0 }
 0xc20   : > { %v15292_v9 = vadd.f32 %v13089_v38, %v23300_v41  ;;  %v13091_v16 = vpop.f32.mrb[59].mxu1  ;;  %13728 = vmatmul.mubr.bf16.gmra.mrb[180].mxu0 %v13418_v1  ;;  %v13320_v26 = vmax.f32 %v15290_v61, 0.0 }
 0xc21   : > { %v15293_v10 = vadd.f32 %v13091_v16, %v23304_v28  ;;  %v13321_v32 = vmax.f32 %v15291_v44, 0.0 }
 0xc22   : > { %v13322_v19 = vmax.f32 %v15292_v9, 0.0 }
 0xc23   : > { %v13323_v33 = vmax.f32 %v15293_v10, 0.0 }
 0xc24   : > { %v13420_v11 = vpack.c.bf16 %v13322_v19, %v13320_v26 }
 0xc25   : > { %v13421_v13 = vpack.c.bf16 %v13323_v33, %v13321_v32  ;;  %v13095_v15 = vpop.f32.mrb[60].mxu1 }
 0xc26   : > { %v15294_v30 = vadd.f32 %v13095_v15, %v23300_v41  ;;  %v13097_v12 = vpop.f32.mrb[61].mxu1 }
 0xc27   : > { %v15295_v36 = vadd.f32 %v13097_v12, %v23304_v28  ;;  %v13099_v56 = vpop.f32.mrb[62].mxu1  ;;  %13735 = vmatprep.mubr.bf16.mxu0 %v13421_v13 }
 0xc28   : > { %v15296_v5 = vadd.f32 %v13099_v56, %v23300_v41  ;;  %v13101_v25 = vpop.f32.mrb[63].mxu1  ;;  %13736 = vmatmul.mubr.bf16.gmra.mrb[184].mxu0 %v13420_v11  ;;  %v13324_v52 = vmax.f32 %v15294_v30, 0.0 }
 0xc29   : > { %v15297_v39 = vadd.f32 %v13101_v25, %v23304_v28  ;;  %v13325_v37 = vmax.f32 %v15295_v36, 0.0 }
 0xc2a   : > { %v13326_v53 = vmax.f32 %v15296_v5, 0.0 }
 0xc2b   : > { %v13327_v59 = vmax.f32 %v15297_v39, 0.0 }
 0xc2c   : > { %v13422_v47 = vpack.c.bf16 %v13326_v53, %v13324_v52 }
 0xc2d   : > { %v13423_v7 = vpack.c.bf16 %v13327_v59, %v13325_v37  ;;  %v13105_v4 = vpop.f32.mrb[64].mxu1 }
 0xc2e   : > { %v15298_v62 = vadd.f32 %v13105_v4, %v23300_v41  ;;  %v13107_v43 = vpop.f32.mrb[65].mxu1 }
 0xc2f   : > { %v15299_v17 = vadd.f32 %v13107_v43, %v23304_v28  ;;  %v13109_v49 = vpop.f32.mrb[66].mxu1  ;;  %13743 = vmatprep.mubr.bf16.mxu0 %v13423_v7 }
 0xc30   : > { %v15300_v40 = vadd.f32 %v13109_v49, %v23300_v41  ;;  %v13111_v14 = vpop.f32.mrb[67].mxu1  ;;  %13744 = vmatmul.mubr.bf16.gmra.mrb[188].mxu0 %v13422_v47  ;;  %v13328_v54 = vmax.f32 %v15298_v62, 0.0 }
 0xc31   : > { %v15301_v57 = vadd.f32 %v13111_v14, %v23304_v28  ;;  %v13329_v24 = vmax.f32 %v15299_v17, 0.0 }
 0xc32   : > { %v13330_v18 = vmax.f32 %v15300_v40, 0.0 }
 0xc33   : > { %v13331_v50 = vmax.f32 %v15301_v57, 0.0 }
 0xc34   : > { %v13424_v55 = vpack.c.bf16 %v13330_v18, %v13328_v54 }
 0xc35   : > { %v13425_v34 = vpack.c.bf16 %v13331_v50, %v13329_v24  ;;  %v13115_v35 = vpop.f32.mrb[68].mxu1 }
 0xc36   : > { %v15302_v46 = vadd.f32 %v13115_v35, %v23300_v41  ;;  %v13117_v51 = vpop.f32.mrb[69].mxu1 }
 0xc37   : > { %v15303_v2 = vadd.f32 %v13117_v51, %v23304_v28  ;;  %v13119_v20 = vpop.f32.mrb[70].mxu1  ;;  %13751 = vmatprep.mubr.bf16.mxu0 %v13425_v34 }
 0xc38   : > { %v15304_v8 = vadd.f32 %v13119_v20, %v23300_v41  ;;  %v13121_v23 = vpop.f32.mrb[71].mxu1  ;;  %13752 = vmatmul.mubr.bf16.gmra.mrb[192].mxu0 %v13424_v55  ;;  %v13332_v29 = vmax.f32 %v15302_v46, 0.0 }
 0xc39   : > { %v15305_v42 = vadd.f32 %v13121_v23, %v23304_v28  ;;  %v13333_v31 = vmax.f32 %v15303_v2, 0.0 }
 0xc3a   : > { %v13334_v63 = vmax.f32 %v15304_v8, 0.0 }
 0xc3b   : > { %v13335_v21 = vmax.f32 %v15305_v42, 0.0 }
 0xc3c   : > { %v13426_v45 = vpack.c.bf16 %v13334_v63, %v13332_v29 }
 0xc3d   : > { %v13427_v6 = vpack.c.bf16 %v13335_v21, %v13333_v31  ;;  %v13125_v48 = vpop.f32.mrb[72].mxu1 }
 0xc3e   : > { %v15306_v3 = vadd.f32 %v13125_v48, %v23300_v41  ;;  %v13127_v58 = vpop.f32.mrb[73].mxu1 }
 0xc3f   : > { %v15307_v27 = vadd.f32 %v13127_v58, %v23304_v28  ;;  %v13129_v1 = vpop.f32.mrb[74].mxu1  ;;  %13759 = vmatprep.mubr.bf16.mxu0 %v13427_v6 }
 0xc40   : > { %v15308_v0 = vadd.f32 %v13129_v1, %v23300_v41  ;;  %v13131_v22 = vpop.f32.mrb[75].mxu1  ;;  %13760 = vmatmul.mubr.bf16.gmra.mrb[196].mxu0 %v13426_v45  ;;  %v13336_v60 = vmax.f32 %v15306_v3, 0.0 }
 0xc41   : > { %v15309_v61 = vadd.f32 %v13131_v22, %v23304_v28  ;;  %v13337_v38 = vmax.f32 %v15307_v27, 0.0 }
 0xc42   : > { %v13338_v44 = vmax.f32 %v15308_v0, 0.0 }
 0xc43   : > { %v13339_v9 = vmax.f32 %v15309_v61, 0.0 }
 0xc44   : > { %v13428_v16 = vpack.c.bf16 %v13338_v44, %v13336_v60 }
 0xc45   : > { %v13429_v10 = vpack.c.bf16 %v13339_v9, %v13337_v38  ;;  %v13135_v26 = vpop.f32.mrb[76].mxu1 }
 0xc46   : > { %v15310_v19 = vadd.f32 %v13135_v26, %v23300_v41  ;;  %v13137_v32 = vpop.f32.mrb[77].mxu1 }
 0xc47   : > { %v15311_v33 = vadd.f32 %v13137_v32, %v23304_v28  ;;  %v13139_v11 = vpop.f32.mrb[78].mxu1  ;;  %13767 = vmatprep.mubr.bf16.mxu0 %v13429_v10 }
 0xc48   : > { %v15312_v13 = vadd.f32 %v13139_v11, %v23300_v41  ;;  %v13141_v15 = vpop.f32.mrb[79].mxu1  ;;  %13768 = vmatmul.mubr.bf16.gmra.mrb[200].mxu0 %v13428_v16  ;;  %v13340_v12 = vmax.f32 %v15310_v19, 0.0 }
 0xc49   : > { %v15313_v30 = vadd.f32 %v13141_v15, %v23304_v28  ;;  %v13341_v56 = vmax.f32 %v15311_v33, 0.0 }
 0xc4a   : > { %v13342_v36 = vmax.f32 %v15312_v13, 0.0 }
 0xc4b   : > { %v13343_v5 = vmax.f32 %v15313_v30, 0.0 }
 0xc4c   : > { %v13430_v25 = vpack.c.bf16 %v13342_v36, %v13340_v12 }
 0xc4d   : > { %v13431_v39 = vpack.c.bf16 %v13343_v5, %v13341_v56  ;;  %v13145_v52 = vpop.f32.mrb[80].mxu1 }
 0xc4e   : > { %v15314_v53 = vadd.f32 %v13145_v52, %v23300_v41  ;;  %v13147_v37 = vpop.f32.mrb[81].mxu1 }
 0xc4f   : > { %v15315_v59 = vadd.f32 %v13147_v37, %v23304_v28  ;;  %v13149_v47 = vpop.f32.mrb[82].mxu1  ;;  %13775 = vmatprep.mubr.bf16.mxu0 %v13431_v39 }
 0xc50   : > { %v15316_v7 = vadd.f32 %v13149_v47, %v23300_v41  ;;  %v13151_v4 = vpop.f32.mrb[83].mxu1  ;;  %13776 = vmatmul.mubr.bf16.gmra.mrb[204].mxu0 %v13430_v25  ;;  %v13344_v43 = vmax.f32 %v15314_v53, 0.0 }
 0xc51   : > { %v15317_v62 = vadd.f32 %v13151_v4, %v23304_v28  ;;  %v13345_v49 = vmax.f32 %v15315_v59, 0.0 }
 0xc52   : > { %v13346_v17 = vmax.f32 %v15316_v7, 0.0 }
 0xc53   : > { %v13347_v40 = vmax.f32 %v15317_v62, 0.0 }
 0xc54   : > { %v13432_v14 = vpack.c.bf16 %v13346_v17, %v13344_v43 }
 0xc55   : > { %v13433_v57 = vpack.c.bf16 %v13347_v40, %v13345_v49  ;;  %v13155_v54 = vpop.f32.mrb[84].mxu1 }
 0xc56   : > { %v15318_v18 = vadd.f32 %v13155_v54, %v23300_v41  ;;  %v13157_v24 = vpop.f32.mrb[85].mxu1 }
 0xc57   : > { %v15319_v50 = vadd.f32 %v13157_v24, %v23304_v28  ;;  %v13159_v55 = vpop.f32.mrb[86].mxu1  ;;  %13783 = vmatprep.mubr.bf16.mxu0 %v13433_v57 }
 0xc58   : > { %v15320_v34 = vadd.f32 %v13159_v55, %v23300_v41  ;;  %v13161_v35 = vpop.f32.mrb[87].mxu1  ;;  %13784 = vmatmul.mubr.bf16.gmra.mrb[208].mxu0 %v13432_v14  ;;  %v13348_v51 = vmax.f32 %v15318_v18, 0.0 }
 0xc59   : > { %v15321_v46 = vadd.f32 %v13161_v35, %v23304_v28  ;;  %v13349_v20 = vmax.f32 %v15319_v50, 0.0 }
 0xc5a   : > { %v13350_v2 = vmax.f32 %v15320_v34, 0.0 }
 0xc5b   : > { %v13351_v8 = vmax.f32 %v15321_v46, 0.0 }
 0xc5c   : > { %v13434_v23 = vpack.c.bf16 %v13350_v2, %v13348_v51 }
 0xc5d   : > { %v13435_v42 = vpack.c.bf16 %v13351_v8, %v13349_v20  ;;  %v13165_v29 = vpop.f32.mrb[88].mxu1 }
 0xc5e   : > { %v15322_v63 = vadd.f32 %v13165_v29, %v23300_v41  ;;  %v13167_v31 = vpop.f32.mrb[89].mxu1 }
 0xc5f   : > { %v15323_v21 = vadd.f32 %v13167_v31, %v23304_v28  ;;  %v13169_v45 = vpop.f32.mrb[90].mxu1  ;;  %13791 = vmatprep.mubr.bf16.mxu0 %v13435_v42 }
 0xc60   : > { %v15324_v6 = vadd.f32 %v13169_v45, %v23300_v41  ;;  %v13171_v48 = vpop.f32.mrb[91].mxu1  ;;  %13792 = vmatmul.mubr.bf16.gmra.mrb[212].mxu0 %v13434_v23  ;;  %v13352_v58 = vmax.f32 %v15322_v63, 0.0 }
 0xc61   : > { %v15325_v3 = vadd.f32 %v13171_v48, %v23304_v28  ;;  %v13353_v1 = vmax.f32 %v15323_v21, 0.0 }
 0xc62   : > { %v13354_v27 = vmax.f32 %v15324_v6, 0.0 }
 0xc63   : > { %v13355_v0 = vmax.f32 %v15325_v3, 0.0 }
 0xc64   : > { %v13436_v22 = vpack.c.bf16 %v13354_v27, %v13352_v58 }
 0xc65   : > { %v13437_v61 = vpack.c.bf16 %v13355_v0, %v13353_v1  ;;  %v13175_v60 = vpop.f32.mrb[92].mxu1 }
 0xc66   : > { %v15326_v44 = vadd.f32 %v13175_v60, %v23300_v41  ;;  %v13177_v38 = vpop.f32.mrb[93].mxu1 }
 0xc67   : > { %v15327_v9 = vadd.f32 %v13177_v38, %v23304_v28  ;;  %v13179_v16 = vpop.f32.mrb[94].mxu1  ;;  %13799 = vmatprep.mubr.bf16.mxu0 %v13437_v61 }
 0xc68   : > { %v15328_v10 = vadd.f32 %v13179_v16, %v23300_v41  ;;  %v13181_v26 = vpop.f32.mrb[95].mxu1  ;;  %13800 = vmatmul.mubr.bf16.gmra.mrb[216].mxu0 %v13436_v22  ;;  %v13356_v32 = vmax.f32 %v15326_v44, 0.0 }
 0xc69   : > { %v15329_v19 = vadd.f32 %v13181_v26, %v23304_v28  ;;  %v13357_v11 = vmax.f32 %v15327_v9, 0.0  ;;  %v23430_v26 = vld [vmem:[%s23567_s14] ss:$0 sm:$0xff] }
 0xc6a   : > { %v13358_v33 = vmax.f32 %v15328_v10, 0.0 }
 0xc6b   : > { %v13359_v13 = vmax.f32 %v15329_v19, 0.0 }
 0xc6c   : > { %v13438_v15 = vpack.c.bf16 %v13358_v33, %v13356_v32 }
 0xc6d   : > { %v13439_v30 = vpack.c.bf16 %v13359_v13, %v13357_v11  ;;  %v13185_v12 = vpop.f32.mrb[96].mxu1 }
 0xc6e   : > { %v15330_v36 = vadd.f32 %v13185_v12, %v23300_v41  ;;  %v13187_v56 = vpop.f32.mrb[97].mxu1 }
 0xc6f   : > { %v15331_v5 = vadd.f32 %v13187_v56, %v23304_v28  ;;  %v13189_v25 = vpop.f32.mrb[98].mxu1  ;;  %13807 = vmatprep.mubr.bf16.mxu0 %v13439_v30 }
 0xc70   : > { %v15332_v39 = vadd.f32 %v13189_v25, %v23300_v41  ;;  %v13191_v52 = vpop.f32.mrb[99].mxu1  ;;  %13808 = vmatmul.mubr.bf16.gmra.mrb[220].mxu0 %v13438_v15  ;;  %v13360_v37 = vmax.f32 %v15330_v36, 0.0 }
 0xc71   : > { %v15333_v53 = vadd.f32 %v13191_v52, %v23304_v28  ;;  %v13361_v47 = vmax.f32 %v15331_v5, 0.0 }
 0xc72   : > { %v13362_v59 = vmax.f32 %v15332_v39, 0.0 }
 0xc73   : > { %v13363_v7 = vmax.f32 %v15333_v53, 0.0 }
 0xc74   : > { %v13440_v4 = vpack.c.bf16 %v13362_v59, %v13360_v37 }
 0xc75   : > { %v13441_v62 = vpack.c.bf16 %v13363_v7, %v13361_v47  ;;  %v13195_v43 = vpop.f32.mrb[100].mxu1 }
 0xc76   : > { %v15334_v17 = vadd.f32 %v13195_v43, %v23300_v41  ;;  %v13197_v49 = vpop.f32.mrb[101].mxu1 }
 0xc77   : > { %v15335_v40 = vadd.f32 %v13197_v49, %v23304_v28  ;;  %v13199_v14 = vpop.f32.mrb[102].mxu1  ;;  %13815 = vmatprep.mubr.bf16.mxu0 %v13441_v62 }
 0xc78   : > { %v15336_v57 = vadd.f32 %v13199_v14, %v23300_v41  ;;  %v13201_v54 = vpop.f32.mrb[103].mxu1  ;;  %13816 = vmatmul.mubr.bf16.gmra.mrb[224].mxu0 %v13440_v4  ;;  %v13364_v24 = vmax.f32 %v15334_v17, 0.0 }
 0xc79   : > { %v15337_v18 = vadd.f32 %v13201_v54, %v23304_v28  ;;  %v13365_v55 = vmax.f32 %v15335_v40, 0.0 }
 0xc7a   : > { %v13366_v50 = vmax.f32 %v15336_v57, 0.0 }
 0xc7b   : > { %v13367_v34 = vmax.f32 %v15337_v18, 0.0 }
 0xc7c   : > { %v13442_v35 = vpack.c.bf16 %v13366_v50, %v13364_v24 }
 0xc7d   : > { %v13443_v46 = vpack.c.bf16 %v13367_v34, %v13365_v55  ;;  %v13205_v51 = vpop.f32.mrb[104].mxu1 }
 0xc7e   : > { %v15338_v2 = vadd.f32 %v13205_v51, %v23300_v41  ;;  %v13207_v20 = vpop.f32.mrb[105].mxu1 }
 0xc7f   : > { %v15339_v8 = vadd.f32 %v13207_v20, %v23304_v28  ;;  %v13209_v23 = vpop.f32.mrb[106].mxu1  ;;  %13823 = vmatprep.mubr.bf16.mxu0 %v13443_v46 }
 0xc80   : > { %v15340_v42 = vadd.f32 %v13209_v23, %v23300_v41  ;;  %v13211_v29 = vpop.f32.mrb[107].mxu1  ;;  %13824 = vmatmul.mubr.bf16.gmra.mrb[228].mxu0 %v13442_v35  ;;  %v13368_v31 = vmax.f32 %v15338_v2, 0.0 }
 0xc81   : > { %v15341_v63 = vadd.f32 %v13211_v29, %v23304_v28  ;;  %v13369_v45 = vmax.f32 %v15339_v8, 0.0 }
 0xc82   : > { %v13370_v21 = vmax.f32 %v15340_v42, 0.0 }
 0xc83   : > { %v13371_v6 = vmax.f32 %v15341_v63, 0.0 }
 0xc84   : > { %v13444_v48 = vpack.c.bf16 %v13370_v21, %v13368_v31 }
 0xc85   : > { %v13445_v3 = vpack.c.bf16 %v13371_v6, %v13369_v45  ;;  %v13215_v58 = vpop.f32.mrb[108].mxu1 }
 0xc86   : > { %v15342_v27 = vadd.f32 %v13215_v58, %v23300_v41  ;;  %v13217_v1 = vpop.f32.mrb[109].mxu1 }
 0xc87   : > { %v15343_v0 = vadd.f32 %v13217_v1, %v23304_v28  ;;  %v13219_v22 = vpop.f32.mrb[110].mxu1  ;;  %13831 = vmatprep.mubr.bf16.mxu0 %v13445_v3 }
 0xc88   : > { %v15344_v61 = vadd.f32 %v13219_v22, %v23300_v41  ;;  %v13221_v60 = vpop.f32.mrb[111].mxu1  ;;  %13832 = vmatmul.mubr.bf16.gmra.mrb[232].mxu0 %v13444_v48  ;;  %v13372_v38 = vmax.f32 %v15342_v27, 0.0 }
 0xc89   : > { %v15345_v44 = vadd.f32 %v13221_v60, %v23304_v28  ;;  %v13373_v16 = vmax.f32 %v15343_v0, 0.0 }
 0xc8a   : > { %v13374_v9 = vmax.f32 %v15344_v61, 0.0 }
 0xc8b   : > { %v13375_v10 = vmax.f32 %v15345_v44, 0.0  ;;  %v13625_v19 = vpop.f32.mrb[128].mxu0 }
 0xc8c   : > { %v13446_v32 = vpack.c.bf16 %v13374_v9, %v13372_v38  ;;  %v13627_v33 = vpop.f32.mrb[129].mxu0  ;;  %v13626_v30 = vadd.f32 %v23430_v26, %v13625_v19 }
 0xc8d   : > { %v13447_v11 = vpack.c.bf16 %v13375_v10, %v13373_v16  ;;  %v13225_v13 = vpop.f32.mrb[112].mxu1  ;;  %v13628_v15 = vpop.f32.mrb[130].mxu0 }
 0xc8e   : > { %v15346_v12 = vadd.f32 %v13225_v13, %v23300_v41  ;;  %v13629_v36 = vadd.f32 %v23430_v26, %v13628_v15  ;;  %v13227_v56 = vpop.f32.mrb[113].mxu1  ;;  %v13630_v5 = vpop.f32.mrb[131].mxu0 }
 0xc8f   : > { %v15347_v25 = vadd.f32 %v13227_v56, %v23304_v28  ;;  %v13229_v39 = vpop.f32.mrb[114].mxu1  ;;  %13839 = vmatprep.mubr.bf16.mxu0 %v13447_v11 }
 0xc90   : > { %v15046_v52 = vpack.c.bf16 %v13629_v36, %v13626_v30  ;;  %v15348_v53 = vadd.f32 %v13229_v39, %v23300_v41  ;;  %v13231_v37 = vpop.f32.mrb[115].mxu1  ;;  %13840 = vmatmul.mubr.bf16.gmra.mrb[236].mxu0 %v13446_v32  ;;  %v13376_v47 = vmax.f32 %v15346_v12, 0.0 }
 0xc91   : > { %v15349_v59 = vadd.f32 %v13231_v37, %v23304_v28  ;;  %v13377_v4 = vmax.f32 %v15347_v25, 0.0 }
 0xc92   : > { %15047 = vst [vmem:[%s23439_s30] sm:$0xff] %v15046_v52   ;;  %v13378_v7 = vmax.f32 %v15348_v53, 0.0 }
 0xc93   : > { %v13379_v62 = vmax.f32 %v15349_v59, 0.0  ;;  %v13633_v43 = vpop.f32.mrb[132].mxu0 }
 0xc94   : > { %v13448_v17 = vpack.c.bf16 %v13378_v7, %v13376_v47  ;;  %v13635_v49 = vpop.f32.mrb[133].mxu0  ;;  %v13634_v54 = vadd.f32 %v23430_v26, %v13633_v43 }
 0xc95   : > { %v13449_v40 = vpack.c.bf16 %v13379_v62, %v13377_v4  ;;  %v13235_v14 = vpop.f32.mrb[116].mxu1  ;;  %v13636_v57 = vpop.f32.mrb[134].mxu0 }
 0xc96   : > { %v15350_v18 = vadd.f32 %v13235_v14, %v23300_v41  ;;  %v13637_v24 = vadd.f32 %v23430_v26, %v13636_v57  ;;  %v13237_v50 = vpop.f32.mrb[117].mxu1  ;;  %v13638_v55 = vpop.f32.mrb[135].mxu0 }
 0xc97   : > { %v15351_v34 = vadd.f32 %v13237_v50, %v23304_v28  ;;  %v13239_v35 = vpop.f32.mrb[118].mxu1  ;;  %13847 = vmatprep.mubr.bf16.mxu0 %v13449_v40 }
 0xc98   : > { %v15051_v46 = vpack.c.bf16 %v13637_v24, %v13634_v54  ;;  %v15352_v51 = vadd.f32 %v13239_v35, %v23300_v41  ;;  %v13241_v2 = vpop.f32.mrb[119].mxu1  ;;  %13848 = vmatmul.mubr.bf16.gmra.mrb[240].mxu0 %v13448_v17  ;;  %v13380_v8 = vmax.f32 %v15350_v18, 0.0 }
 0xc99   : > { %v15353_v20 = vadd.f32 %v13241_v2, %v23304_v28  ;;  %v13381_v42 = vmax.f32 %v15351_v34, 0.0 }
 0xc9a   : > { %15203 = vst [vmem:[%s23439_s30 + $0x8] sm:$0xff] %v15051_v46   ;;  %v13382_v23 = vmax.f32 %v15352_v51, 0.0 }
 0xc9b   : > { %v13383_v29 = vmax.f32 %v15353_v20, 0.0  ;;  %v13641_v63 = vpop.f32.mrb[136].mxu0 }
 0xc9c   : > { %v13450_v31 = vpack.c.bf16 %v13382_v23, %v13380_v8  ;;  %v13643_v21 = vpop.f32.mrb[137].mxu0  ;;  %v13642_v3 = vadd.f32 %v23430_v26, %v13641_v63 }
 0xc9d   : > { %v13451_v45 = vpack.c.bf16 %v13383_v29, %v13381_v42  ;;  %v13245_v6 = vpop.f32.mrb[120].mxu1  ;;  %v13644_v48 = vpop.f32.mrb[138].mxu0 }
 0xc9e   : > { %v15354_v58 = vadd.f32 %v13245_v6, %v23300_v41  ;;  %v13645_v27 = vadd.f32 %v23430_v26, %v13644_v48  ;;  %v13247_v1 = vpop.f32.mrb[121].mxu1  ;;  %v13646_v0 = vpop.f32.mrb[139].mxu0 }
 0xc9f   : > { %v15355_v22 = vadd.f32 %v13247_v1, %v23304_v28  ;;  %v13249_v61 = vpop.f32.mrb[122].mxu1  ;;  %13855 = vmatprep.mubr.bf16.mxu0 %v13451_v45 }
 0xca0   : > { %v15056_v60 = vpack.c.bf16 %v13645_v27, %v13642_v3  ;;  %v15356_v44 = vadd.f32 %v13249_v61, %v23300_v41  ;;  %v13251_v38 = vpop.f32.mrb[123].mxu1  ;;  %13856 = vmatmul.mubr.bf16.gmra.mrb[244].mxu0 %v13450_v31  ;;  %v13384_v16 = vmax.f32 %v15354_v58, 0.0 }
 0xca1   : > { %v15357_v9 = vadd.f32 %v13251_v38, %v23304_v28  ;;  %v13385_v19 = vmax.f32 %v15355_v22, 0.0 }
 0xca2   : > { %15204 = vst [vmem:[%s23439_s30 + $0x10] sm:$0xff] %v15056_v60   ;;  %v13386_v10 = vmax.f32 %v15356_v44, 0.0 }
 0xca3   : > { %v13387_v32 = vmax.f32 %v15357_v9, 0.0  ;;  %v13649_v33 = vpop.f32.mrb[140].mxu0 }
 0xca4   : > { %v13452_v11 = vpack.c.bf16 %v13386_v10, %v13384_v16  ;;  %v13651_v13 = vpop.f32.mrb[141].mxu0  ;;  %v13650_v36 = vadd.f32 %v23430_v26, %v13649_v33 }
 0xca5   : > { %v13453_v15 = vpack.c.bf16 %v13387_v32, %v13385_v19  ;;  %v13255_v30 = vpop.f32.mrb[124].mxu1  ;;  %v13652_v12 = vpop.f32.mrb[142].mxu0 }
 0xca6   : > { %v15358_v56 = vadd.f32 %v13255_v30, %v23300_v41  ;;  %v13653_v5 = vadd.f32 %v23430_v26, %v13652_v12  ;;  %v13257_v25 = vpop.f32.mrb[125].mxu1  ;;  %v13654_v39 = vpop.f32.mrb[143].mxu0 }
 0xca7   : > { %v15359_v52 = vadd.f32 %v13257_v25, %v23304_v28  ;;  %v13259_v53 = vpop.f32.mrb[126].mxu1  ;;  %13863 = vmatprep.mubr.bf16.mxu0 %v13453_v15 }
 0xca8   : > { %v15061_v37 = vpack.c.bf16 %v13653_v5, %v13650_v36  ;;  %v15360_v59 = vadd.f32 %v13259_v53, %v23300_v41  ;;  %v13261_v47 = vpop.f32.mrb[127].mxu1  ;;  %13864 = vmatmul.mubr.bf16.gmra.mrb[248].mxu0 %v13452_v11  ;;  %v13388_v4 = vmax.f32 %v15358_v56, 0.0 }
 0xca9   : > { %v15361_v7 = vadd.f32 %v13261_v47, %v23304_v28  ;;  %v13389_v43 = vmax.f32 %v15359_v52, 0.0 }
 0xcaa   : > { %15205 = vst [vmem:[%s23439_s30 + $0x18] sm:$0xff] %v15061_v37   ;;  %v13390_v62 = vmax.f32 %v15360_v59, 0.0 }
 0xcab   : > { %v13391_v17 = vmax.f32 %v15361_v7, 0.0  ;;  %v13657_v49 = vpop.f32.mrb[144].mxu0 }
 0xcac   : > { %v13454_v40 = vpack.c.bf16 %v13390_v62, %v13388_v4  ;;  %v13659_v14 = vpop.f32.mrb[145].mxu0  ;;  %v13658_v18 = vadd.f32 %v23430_v26, %v13657_v49 }
 0xcad   : > { %v13455_v57 = vpack.c.bf16 %v13391_v17, %v13389_v43  ;;  %v13660_v54 = vpop.f32.mrb[146].mxu0 }
 0xcae   : > { %v13661_v41 = vadd.f32 %v23430_v26, %v13660_v54  ;;  %v13662_v24 = vpop.f32.mrb[147].mxu0 }
 0xcaf   : > { %13871 = vmatprep.mubr.bf16.mxu0 %v13455_v57 }
 0xcb0   : > { %v15066_v50 = vpack.c.bf16 %v13661_v41, %v13658_v18  ;;  %13872 = vmatmul.mubr.bf16.gmra.mrb[252].mxu0 %v13454_v40 }
 0xcb2   : > { %15206 = vst [vmem:[%s23439_s30 + $0x20] sm:$0xff] %v15066_v50  }
 0xcb3   : > { %v13665_v28 = vpop.f32.mrb[148].mxu0 }
 0xcb4   : > { %v13667_v55 = vpop.f32.mrb[149].mxu0  ;;  %v13666_v35 = vadd.f32 %v23430_v26, %v13665_v28 }
 0xcb5   : > { %v13668_v34 = vpop.f32.mrb[150].mxu0 }
 0xcb6   : > { %v13669_v46 = vadd.f32 %v23430_v26, %v13668_v34  ;;  %v13670_v51 = vpop.f32.mrb[151].mxu0 }
 0xcb8   : > { %v15071_v2 = vpack.c.bf16 %v13669_v46, %v13666_v35 }
 0xcba   : > { %15207 = vst [vmem:[%s23439_s30 + $0x28] sm:$0xff] %v15071_v2  }
 0xcbb   : > { %v13673_v20 = vpop.f32.mrb[152].mxu0 }
 0xcbc   : > { %v13675_v8 = vpop.f32.mrb[153].mxu0  ;;  %v13674_v42 = vadd.f32 %v23430_v26, %v13673_v20 }
 0xcbd   : > { %v13676_v23 = vpop.f32.mrb[154].mxu0 }
 0xcbe   : > { %v13677_v29 = vadd.f32 %v23430_v26, %v13676_v23  ;;  %v13678_v63 = vpop.f32.mrb[155].mxu0 }
 0xcc0   : > { %v15076_v31 = vpack.c.bf16 %v13677_v29, %v13674_v42 }
 0xcc2   : > { %15208 = vst [vmem:[%s23439_s30 + $0x30] sm:$0xff] %v15076_v31  }
 0xcc3   : > { %v13681_v21 = vpop.f32.mrb[156].mxu0 }
 0xcc4   : > { %v13683_v45 = vpop.f32.mrb[157].mxu0  ;;  %v13682_v48 = vadd.f32 %v23430_v26, %v13681_v21 }
 0xcc5   : > { %v13684_v6 = vpop.f32.mrb[158].mxu0 }
 0xcc6   : > { %v13685_v3 = vadd.f32 %v23430_v26, %v13684_v6  ;;  %v13686_v58 = vpop.f32.mrb[159].mxu0 }
 0xcc8   : > { %v15081_v27 = vpack.c.bf16 %v13685_v3, %v13682_v48 }
 0xcca   : > { %15209 = vst [vmem:[%s23439_s30 + $0x38] sm:$0xff] %v15081_v27  }
 0xccb   : > { %v13689_v1 = vpop.f32.mrb[160].mxu0 }
 0xccc   : > { %v13691_v0 = vpop.f32.mrb[161].mxu0  ;;  %v13690_v61 = vadd.f32 %v23430_v26, %v13689_v1 }
 0xccd   : > { %v13692_v22 = vpop.f32.mrb[162].mxu0 }
 0xcce   : > { %v13693_v60 = vadd.f32 %v23430_v26, %v13692_v22  ;;  %v13694_v44 = vpop.f32.mrb[163].mxu0 }
 0xcd0   : > { %v15086_v38 = vpack.c.bf16 %v13693_v60, %v13690_v61 }
 0xcd2   : > { %15210 = vst [vmem:[%s23439_s30 + $0x40] sm:$0xff] %v15086_v38  }
 0xcd3   : > { %v13697_v9 = vpop.f32.mrb[164].mxu0 }
 0xcd4   : > { %v13699_v16 = vpop.f32.mrb[165].mxu0  ;;  %v13698_v19 = vadd.f32 %v23430_v26, %v13697_v9 }
 0xcd5   : > { %v13700_v10 = vpop.f32.mrb[166].mxu0 }
 0xcd6   : > { %v13701_v32 = vadd.f32 %v23430_v26, %v13700_v10  ;;  %v13702_v33 = vpop.f32.mrb[167].mxu0 }
 0xcd8   : > { %v15091_v11 = vpack.c.bf16 %v13701_v32, %v13698_v19 }
 0xcda   : > { %15211 = vst [vmem:[%s23439_s30 + $0x48] sm:$0xff] %v15091_v11  }
 0xcdb   : > { %v13705_v13 = vpop.f32.mrb[168].mxu0 }
 0xcdc   : > { %v13707_v15 = vpop.f32.mrb[169].mxu0  ;;  %v13706_v12 = vadd.f32 %v23430_v26, %v13705_v13 }
 0xcdd   : > { %v13708_v30 = vpop.f32.mrb[170].mxu0 }
 0xcde   : > { %v13709_v36 = vadd.f32 %v23430_v26, %v13708_v30  ;;  %v13710_v56 = vpop.f32.mrb[171].mxu0 }
 0xce0   : > { %v15096_v5 = vpack.c.bf16 %v13709_v36, %v13706_v12 }
 0xce2   : > { %15212 = vst [vmem:[%s23439_s30 + $0x50] sm:$0xff] %v15096_v5  }
 0xce3   : > { %v13713_v25 = vpop.f32.mrb[172].mxu0 }
 0xce4   : > { %v13715_v39 = vpop.f32.mrb[173].mxu0  ;;  %v13714_v53 = vadd.f32 %v23430_v26, %v13713_v25 }
 0xce5   : > { %v13716_v52 = vpop.f32.mrb[174].mxu0 }
 0xce6   : > { %v13717_v37 = vadd.f32 %v23430_v26, %v13716_v52  ;;  %v13718_v59 = vpop.f32.mrb[175].mxu0 }
 0xce8   : > { %v15101_v47 = vpack.c.bf16 %v13717_v37, %v13714_v53 }
 0xcea   : > { %15213 = vst [vmem:[%s23439_s30 + $0x58] sm:$0xff] %v15101_v47  }
 0xceb   : > { %v13721_v7 = vpop.f32.mrb[176].mxu0 }
 0xcec   : > { %v13723_v4 = vpop.f32.mrb[177].mxu0  ;;  %v13722_v43 = vadd.f32 %v23430_v26, %v13721_v7 }
 0xced   : > { %v13724_v62 = vpop.f32.mrb[178].mxu0 }
 0xcee   : > { %v13725_v17 = vadd.f32 %v23430_v26, %v13724_v62  ;;  %v13726_v49 = vpop.f32.mrb[179].mxu0 }
 0xcf0   : > { %v15106_v40 = vpack.c.bf16 %v13725_v17, %v13722_v43 }
 0xcf2   : > { %15214 = vst [vmem:[%s23439_s30 + $0x60] sm:$0xff] %v15106_v40  }
 0xcf3   : > { %v13729_v14 = vpop.f32.mrb[180].mxu0 }
 0xcf4   : > { %v13731_v57 = vpop.f32.mrb[181].mxu0  ;;  %v13730_v18 = vadd.f32 %v23430_v26, %v13729_v14 }
 0xcf5   : > { %v13732_v54 = vpop.f32.mrb[182].mxu0 }
 0xcf6   : > { %v13733_v41 = vadd.f32 %v23430_v26, %v13732_v54  ;;  %v13734_v24 = vpop.f32.mrb[183].mxu0 }
 0xcf8   : > { %v15111_v50 = vpack.c.bf16 %v13733_v41, %v13730_v18 }
 0xcfa   : > { %15215 = vst [vmem:[%s23439_s30 + $0x68] sm:$0xff] %v15111_v50  }
 0xcfb   : > { %v13737_v28 = vpop.f32.mrb[184].mxu0 }
 0xcfc   : > { %v13739_v55 = vpop.f32.mrb[185].mxu0  ;;  %v13738_v35 = vadd.f32 %v23430_v26, %v13737_v28 }
 0xcfd   : > { %v13740_v34 = vpop.f32.mrb[186].mxu0 }
 0xcfe   : > { %v13741_v46 = vadd.f32 %v23430_v26, %v13740_v34  ;;  %v13742_v51 = vpop.f32.mrb[187].mxu0 }
 0xd00   : > { %v15116_v2 = vpack.c.bf16 %v13741_v46, %v13738_v35 }
 0xd02   : > { %15216 = vst [vmem:[%s23439_s30 + $0x70] sm:$0xff] %v15116_v2  }
 0xd03   : > { %v13745_v20 = vpop.f32.mrb[188].mxu0 }
 0xd04   : > { %v13747_v8 = vpop.f32.mrb[189].mxu0  ;;  %v13746_v42 = vadd.f32 %v23430_v26, %v13745_v20 }
 0xd05   : > { %v13748_v23 = vpop.f32.mrb[190].mxu0 }
 0xd06   : > { %v13749_v29 = vadd.f32 %v23430_v26, %v13748_v23  ;;  %v13750_v63 = vpop.f32.mrb[191].mxu0 }
 0xd08   : > { %v15121_v31 = vpack.c.bf16 %v13749_v29, %v13746_v42 }
 0xd0a   : > { %15217 = vst [vmem:[%s23439_s30 + $0x78] sm:$0xff] %v15121_v31  }
 0xd0b   : > { %v13753_v21 = vpop.f32.mrb[192].mxu0 }
 0xd0c   : > { %v13755_v45 = vpop.f32.mrb[193].mxu0  ;;  %v13754_v48 = vadd.f32 %v23430_v26, %v13753_v21 }
 0xd0d   : > { %v13756_v6 = vpop.f32.mrb[194].mxu0 }
 0xd0e   : > { %v13757_v3 = vadd.f32 %v23430_v26, %v13756_v6  ;;  %v13758_v58 = vpop.f32.mrb[195].mxu0 }
 0xd10   : > { %v15126_v27 = vpack.c.bf16 %v13757_v3, %v13754_v48 }
 0xd12   : > { %15218 = vst [vmem:[%s23439_s30 + $0x80] sm:$0xff] %v15126_v27  }
 0xd13   : > { %v13761_v1 = vpop.f32.mrb[196].mxu0 }
 0xd14   : > { %v13763_v0 = vpop.f32.mrb[197].mxu0  ;;  %v13762_v61 = vadd.f32 %v23430_v26, %v13761_v1 }
 0xd15   : > { %v13764_v22 = vpop.f32.mrb[198].mxu0 }
 0xd16   : > { %v13765_v60 = vadd.f32 %v23430_v26, %v13764_v22  ;;  %v13766_v44 = vpop.f32.mrb[199].mxu0 }
 0xd18   : > { %v15131_v38 = vpack.c.bf16 %v13765_v60, %v13762_v61 }
 0xd1a   : > { %15219 = vst [vmem:[%s23439_s30 + $0x88] sm:$0xff] %v15131_v38  }
 0xd1b   : > { %v13769_v9 = vpop.f32.mrb[200].mxu0 }
 0xd1c   : > { %v13771_v16 = vpop.f32.mrb[201].mxu0  ;;  %v13770_v19 = vadd.f32 %v23430_v26, %v13769_v9 }
 0xd1d   : > { %v13772_v10 = vpop.f32.mrb[202].mxu0 }
 0xd1e   : > { %v13773_v32 = vadd.f32 %v23430_v26, %v13772_v10  ;;  %v13774_v33 = vpop.f32.mrb[203].mxu0 }
 0xd20   : > { %v15136_v11 = vpack.c.bf16 %v13773_v32, %v13770_v19 }
 0xd22   : > { %15220 = vst [vmem:[%s23439_s30 + $0x90] sm:$0xff] %v15136_v11  }
 0xd23   : > { %v13777_v13 = vpop.f32.mrb[204].mxu0 }
 0xd24   : > { %v13779_v15 = vpop.f32.mrb[205].mxu0  ;;  %v13778_v12 = vadd.f32 %v23430_v26, %v13777_v13 }
 0xd25   : > { %v13780_v30 = vpop.f32.mrb[206].mxu0 }
 0xd26   : > { %v13781_v36 = vadd.f32 %v23430_v26, %v13780_v30  ;;  %v13782_v56 = vpop.f32.mrb[207].mxu0 }
 0xd28   : > { %v15141_v5 = vpack.c.bf16 %v13781_v36, %v13778_v12 }
 0xd2a   : > { %15221 = vst [vmem:[%s23439_s30 + $0x98] sm:$0xff] %v15141_v5  }
 0xd2b   : > { %v13785_v25 = vpop.f32.mrb[208].mxu0 }
 0xd2c   : > { %v13787_v39 = vpop.f32.mrb[209].mxu0  ;;  %v13786_v53 = vadd.f32 %v23430_v26, %v13785_v25 }
 0xd2d   : > { %v13788_v52 = vpop.f32.mrb[210].mxu0 }
 0xd2e   : > { %v13789_v37 = vadd.f32 %v23430_v26, %v13788_v52  ;;  %v13790_v59 = vpop.f32.mrb[211].mxu0 }
 0xd30   : > { %v15146_v47 = vpack.c.bf16 %v13789_v37, %v13786_v53 }
 0xd32   : > { %15222 = vst [vmem:[%s23439_s30 + $0xa0] sm:$0xff] %v15146_v47  }
 0xd33   : > { %v13793_v7 = vpop.f32.mrb[212].mxu0 }
 0xd34   : > { %v13795_v4 = vpop.f32.mrb[213].mxu0  ;;  %v13794_v43 = vadd.f32 %v23430_v26, %v13793_v7 }
 0xd35   : > { %v13796_v62 = vpop.f32.mrb[214].mxu0 }
 0xd36   : > { %v13797_v17 = vadd.f32 %v23430_v26, %v13796_v62  ;;  %v13798_v49 = vpop.f32.mrb[215].mxu0 }
 0xd38   : > { %v15151_v40 = vpack.c.bf16 %v13797_v17, %v13794_v43 }
 0xd3a   : > { %15223 = vst [vmem:[%s23439_s30 + $0xa8] sm:$0xff] %v15151_v40  }
 0xd3b   : > { %v13801_v14 = vpop.f32.mrb[216].mxu0 }
 0xd3c   : > { %v13803_v57 = vpop.f32.mrb[217].mxu0  ;;  %v13802_v18 = vadd.f32 %v23430_v26, %v13801_v14 }
 0xd3d   : > { %v13804_v54 = vpop.f32.mrb[218].mxu0 }
 0xd3e   : > { %v13805_v41 = vadd.f32 %v23430_v26, %v13804_v54  ;;  %v13806_v24 = vpop.f32.mrb[219].mxu0 }
 0xd40   : > { %v15156_v50 = vpack.c.bf16 %v13805_v41, %v13802_v18 }
 0xd42   : > { %15224 = vst [vmem:[%s23439_s30 + $0xb0] sm:$0xff] %v15156_v50  }
 0xd43   : > { %v13809_v28 = vpop.f32.mrb[220].mxu0 }
 0xd44   : > { %v13811_v55 = vpop.f32.mrb[221].mxu0  ;;  %v13810_v35 = vadd.f32 %v23430_v26, %v13809_v28 }
 0xd45   : > { %v13812_v34 = vpop.f32.mrb[222].mxu0 }
 0xd46   : > { %v13813_v46 = vadd.f32 %v23430_v26, %v13812_v34  ;;  %v13814_v51 = vpop.f32.mrb[223].mxu0 }
 0xd48   : > { %v15161_v2 = vpack.c.bf16 %v13813_v46, %v13810_v35 }
 0xd4a   : > { %15225 = vst [vmem:[%s23439_s30 + $0xb8] sm:$0xff] %v15161_v2  }
 0xd4b   : > { %v13817_v20 = vpop.f32.mrb[224].mxu0 }
 0xd4c   : > { %v13819_v8 = vpop.f32.mrb[225].mxu0  ;;  %v13818_v42 = vadd.f32 %v23430_v26, %v13817_v20 }
 0xd4d   : > { %v13820_v23 = vpop.f32.mrb[226].mxu0 }
 0xd4e   : > { %v13821_v29 = vadd.f32 %v23430_v26, %v13820_v23  ;;  %v13822_v63 = vpop.f32.mrb[227].mxu0 }
 0xd50   : > { %v15166_v31 = vpack.c.bf16 %v13821_v29, %v13818_v42 }
 0xd52   : > { %15226 = vst [vmem:[%s23439_s30 + $0xc0] sm:$0xff] %v15166_v31  }
 0xd53   : > { %v13825_v21 = vpop.f32.mrb[228].mxu0 }
 0xd54   : > { %v13827_v45 = vpop.f32.mrb[229].mxu0  ;;  %v13826_v48 = vadd.f32 %v23430_v26, %v13825_v21 }
 0xd55   : > { %v13828_v6 = vpop.f32.mrb[230].mxu0 }
 0xd56   : > { %v13829_v3 = vadd.f32 %v23430_v26, %v13828_v6  ;;  %v13830_v58 = vpop.f32.mrb[231].mxu0 }
 0xd58   : > { %v15171_v27 = vpack.c.bf16 %v13829_v3, %v13826_v48 }
 0xd5a   : > { %15227 = vst [vmem:[%s23439_s30 + $0xc8] sm:$0xff] %v15171_v27  }
 0xd5b   : > { %v13833_v1 = vpop.f32.mrb[232].mxu0 }
 0xd5c   : > { %v13835_v0 = vpop.f32.mrb[233].mxu0  ;;  %v13834_v61 = vadd.f32 %v23430_v26, %v13833_v1 }
 0xd5d   : > { %v13836_v22 = vpop.f32.mrb[234].mxu0 }
 0xd5e   : > { %v13837_v60 = vadd.f32 %v23430_v26, %v13836_v22  ;;  %v13838_v44 = vpop.f32.mrb[235].mxu0 }
 0xd60   : > { %v15176_v38 = vpack.c.bf16 %v13837_v60, %v13834_v61 }
 0xd62   : > { %15228 = vst [vmem:[%s23439_s30 + $0xd0] sm:$0xff] %v15176_v38  }
 0xd63   : > { %v13841_v9 = vpop.f32.mrb[236].mxu0 }
 0xd64   : > { %v13843_v16 = vpop.f32.mrb[237].mxu0  ;;  %v13842_v19 = vadd.f32 %v23430_v26, %v13841_v9 }
 0xd65   : > { %v13844_v10 = vpop.f32.mrb[238].mxu0 }
 0xd66   : > { %v13845_v32 = vadd.f32 %v23430_v26, %v13844_v10  ;;  %v13846_v33 = vpop.f32.mrb[239].mxu0 }
 0xd68   : > { %v15181_v11 = vpack.c.bf16 %v13845_v32, %v13842_v19 }
 0xd6a   : > { %15229 = vst [vmem:[%s23439_s30 + $0xd8] sm:$0xff] %v15181_v11  }
 0xd6b   : > { %v13849_v13 = vpop.f32.mrb[240].mxu0 }
 0xd6c   : > { %v13851_v15 = vpop.f32.mrb[241].mxu0  ;;  %v13850_v12 = vadd.f32 %v23430_v26, %v13849_v13 }
 0xd6d   : > { %v13852_v30 = vpop.f32.mrb[242].mxu0 }
 0xd6e   : > { %v13853_v36 = vadd.f32 %v23430_v26, %v13852_v30  ;;  %v13854_v56 = vpop.f32.mrb[243].mxu0 }
 0xd70   : > { %v15186_v5 = vpack.c.bf16 %v13853_v36, %v13850_v12 }
 0xd72   : > { %15230 = vst [vmem:[%s23439_s30 + $0xe0] sm:$0xff] %v15186_v5  }
 0xd73   : > { %v13857_v25 = vpop.f32.mrb[244].mxu0 }
 0xd74   : > { %v13859_v39 = vpop.f32.mrb[245].mxu0  ;;  %v13858_v53 = vadd.f32 %v23430_v26, %v13857_v25 }
 0xd75   : > { %v13860_v52 = vpop.f32.mrb[246].mxu0 }
 0xd76   : > { %v13861_v37 = vadd.f32 %v23430_v26, %v13860_v52  ;;  %v13862_v59 = vpop.f32.mrb[247].mxu0 }
 0xd78   : > { %v15191_v47 = vpack.c.bf16 %v13861_v37, %v13858_v53 }
 0xd7a   : > { %15231 = vst [vmem:[%s23439_s30 + $0xe8] sm:$0xff] %v15191_v47  }
 0xd7b   : > { %v13865_v7 = vpop.f32.mrb[248].mxu0 }
 0xd7c   : > { %v13867_v4 = vpop.f32.mrb[249].mxu0  ;;  %v13866_v43 = vadd.f32 %v23430_v26, %v13865_v7 }
 0xd7d   : > { %v13868_v62 = vpop.f32.mrb[250].mxu0 }
 0xd7e   : > { %v13869_v17 = vadd.f32 %v23430_v26, %v13868_v62  ;;  %v13870_v49 = vpop.f32.mrb[251].mxu0 }
 0xd80   : > { %v15196_v40 = vpack.c.bf16 %v13869_v17, %v13866_v43 }
 0xd82   : > { %15232 = vst [vmem:[%s23439_s30 + $0xf0] sm:$0xff] %v15196_v40  }
 0xd83   : > { %v13873_v14 = vpop.f32.mrb[252].mxu0 }
 0xd84   : > { %v13875_v57 = vpop.f32.mrb[253].mxu0  ;;  %v13874_v18 = vadd.f32 %v23430_v26, %v13873_v14 }
 0xd85   : > { %v13876_v54 = vpop.f32.mrb[254].mxu0 }
 0xd86   : > { %v13877_v41 = vadd.f32 %v23430_v26, %v13876_v54  ;;  %v13878_v24 = vpop.f32.mrb[255].mxu0 }
 0xd88   : > { %v15201_v50 = vpack.c.bf16 %v13877_v41, %v13874_v18 }
 0xd8a   : > { %15233 = vst [vmem:[%s23439_s30 + $0xf8] sm:$0xff] %v15201_v50  }
 0xd8b PF: > { %s25_s18 = sadd.s32 1, %s17693_s18  }
 0xd8c   : > { %p22_p4 = scmp.ge.s32.totalorder %s25_s18, 6  }
 0xd8e   :  { %24 = sbr.rel (!%p22_p4) target bundleno = 1 (0x1), region = 113 }

</bundles_post_ra>
